<compile_context>
chip_gen: v5e
topology: v5e:2x2
jax: 0.10.0
libtpu: 0.0.40
codegen_flags: <defaults>
</compile_context>

<pallas_src>
import functools
import numpy as np

import jax
import jax.numpy as jnp
from jax.experimental import pallas as pl
from jax.experimental.pallas import tpu as pltpu

# ----------------------------- model config (small, synthetic) ----------------------------
HIDDEN = 32            # encoder_hidden == decoder_hidden
N_HEAD = 2
D_K = HIDDEN // N_HEAD
CONV_FILTER = 64       # FFT block conv filter size
FFT_KERNEL = (3, 1)    # FFT block conv kernel sizes
N_ENC_LAYERS = 2
N_DEC_LAYERS = 2
VP_FILTER = 32         # variance predictor filter size
VP_KERNEL = 3
N_BINS = 16            # pitch / energy quantization bins
N_MEL = 16             # n_mel_channels
POSTNET_DIM = 32
POSTNET_KERNEL = 5
POSTNET_LAYERS = 5
VOCAB = 40
MAX_SEQ_LEN = 64
LN_EPS = 1e-5
BN_EPS = 1e-5
NEG_INF = -1e9
APPROX_RECIP = True                 # exact-reciprocal fallback available for parity tests
VMEM_LIMIT = 32 * 1024 * 1024       # explicit scoped-VMEM limit (safe on v5e/v6e/v7x)

# --------------------------------- in-kernel helper math -----------------------------------

def _ln(x, g, b, eps=LN_EPS):
    """LayerNorm over last dim (f32).  x: [T, C], g/b: [1, C]."""
    mu = jnp.mean(x, axis=-1, keepdims=True)
    var = jnp.mean(jnp.square(x - mu), axis=-1, keepdims=True)
    return (x - mu) * jax.lax.rsqrt(var + eps) * g + b


def _mm(a, w):
    """MXU matmul: bf16 operands, f32 accumulation."""
    return jnp.dot(a.astype(jnp.bfloat16), w.astype(jnp.bfloat16),
                   preferred_element_type=jnp.float32)


def _conv1d_same(x, w, b, K):
    """'same' 1-D conv over time using pltpu.roll taps + boundary masks.
    x: [T, Cin] f32, w: [K, Cin, Cout] bf16, b: [1, Cout] f32."""
    T = x.shape[0]
    pad = (K - 1) // 2
    row = jax.lax.broadcasted_iota(jnp.int32, (T, 1), 0)
    acc = None
    for k in range(K):
        off = k - pad                                 # tap_k[t] = x[t + off]
        if off == 0:
            tap = x
        else:
            tap = pltpu.roll(x, shift=(-off) % T, axis=0)    # XLU sublane rotate
            if off > 0:
                tap = jnp.where(row < (T - off), tap, 0.0)   # zero wrapped tail
            else:
                tap = jnp.where(row >= (-off), tap, 0.0)     # zero wrapped head
        part = _mm(tap, w[k])
        acc = part if acc is None else acc + part
    return acc + b


# ------------------------------------ FFT block body ---------------------------------------

def _fft_layer(x, mask, keep, wqkv, bqkv, wfc, bfc, g1, c1, w1, b1, w2, b2, g2, c2,
               *, T, H, n_head, d_k, conv_k):
    scale = 1.0 / float(np.sqrt(d_k))

    # ---------------- multi-head self attention (fused QKV, heads batched) ----------------
    residual = x
    qkv = _mm(x, wqkv) + bqkv                                    # [T, 3H] f32

    def split_heads(z):                                          # [T, H] -> [n_head, T, d_k]
        return jnp.stack([z[:, h * d_k:(h + 1) * d_k] for h in range(n_head)],
                         axis=0).astype(jnp.bfloat16)

    qh = split_heads(qkv[:, :H])
    kh = split_heads(qkv[:, H:2 * H])
    vh = split_heads(qkv[:, 2 * H:])
    s = jnp.einsum("nqd,nkd->nqk", qh, kh,
                   preferred_element_type=jnp.float32) * scale   # [n_head, T, T] f32
    s = jnp.where(mask[None, :, :] > 0.5, NEG_INF, s)            # mask padded keys
    s = s - jnp.max(s, axis=-1, keepdims=True)
    e = jnp.exp(s)
    denom = jnp.sum(e, axis=-1, keepdims=True)
    inv = pl.reciprocal(denom, approx=True) if APPROX_RECIP else 1.0 / denom
    p = (e * inv).astype(jnp.bfloat16)
    o = jnp.einsum("nqk,nkd->nqd", p, vh,
                   preferred_element_type=jnp.float32)           # [n_head, T, d_k]
    attn = jnp.concatenate([o[h] for h in range(n_head)], axis=-1)   # [T, H]
    attn = _mm(attn, wfc) + bfc
    x = _ln(attn + residual, g1, c1) * keep

    # ---------------- position-wise FFN: conv(k)+relu -> 1x1 conv (linear) -----------------
    residual = x
    hdn = jnp.maximum(_conv1d_same(x, w1, b1, conv_k), 0.0)
    ffn = _mm(hdn, w2) + b2
    x = _ln(ffn + residual, g2, c2) * keep
    return x


def _run_fft_stack(x, mask, keep, wqkv_r, bqkv_r, wfc_r, bfc_r, g1_r, c1_r,
                   w1_r, b1_r, w2_r, b2_r, g2_r, c2_r,
                   *, n_layers, T, H, n_head, d_k, conv_k):
    for l in range(n_layers):
        x = _fft_layer(x, mask, keep,
                       wqkv_r[l], bqkv_r[l], wfc_r[l], bfc_r[l], g1_r[l], c1_r[l],
                       w1_r[l], b1_r[l], w2_r[l], b2_r[l], g2_r[l], c2_r[l],
                       T=T, H=H, n_head=n_head, d_k=d_k, conv_k=conv_k)
    return x


# -------------------------------------- kernels --------------------------------------------

def _encoder_kernel(x_ref, mask_ref, keep_ref, pos_ref,
                    wqkv_r, bqkv_r, wfc_r, bfc_r, g1_r, c1_r,
                    w1_r, b1_r, w2_r, b2_r, g2_r, c2_r,
                    o_ref, *, T, H, n_head, d_k, n_layers, conv_k):
    x = x_ref[0] + pos_ref[...]                      # [T, H]; pos-enc add in-kernel
    x = _run_fft_stack(x, mask_ref[0], keep_ref[0],
                       wqkv_r, bqkv_r, wfc_r, bfc_r, g1_r, c1_r,
                       w1_r, b1_r, w2_r, b2_r, g2_r, c2_r,
                       n_layers=n_layers, T=T, H=H, n_head=n_head, d_k=d_k,
                       conv_k=conv_k)
    o_ref[0] = x


def _va_kernel(x_ref, keep_ref, pemb_ref, eemb_ref,
               w1_r, b1_r, g1_r, c1_r, w2_r, b2_r, g2_r, c2_r, wo_r, bo_r,
               pred_ref, xo_ref, *, T, H, K):
    """Fused variance adaptor: duration + pitch + energy predictors (stacked weights,
    index 0/1/2) plus in-kernel pitch/energy embedding adds."""
    x = x_ref[0]                                     # [T, H]
    keep = keep_ref[0]                               # [T, 1]

    def vp(i, inp):
        h = jnp.maximum(_conv1d_same(inp, w1_r[i], b1_r[i], K), 0.0)
        h = _ln(h, g1_r[i], c1_r[i])
        h = jnp.maximum(_conv1d_same(h, w2_r[i], b2_r[i], K), 0.0)
        h = _ln(h, g2_r[i], c2_r[i])
        return (_mm(h, wo_r[i]) + bo_r[i]) * keep    # [T, 1]

    log_d = vp(0, x)
    pitch = vp(1, x)
    x2 = x + pemb_ref[0]                             # teacher-forced pitch-emb add (unmasked)
    energy = vp(2, x2)
    xo_ref[0] = x2 + eemb_ref[0]                     # + energy embedding
    pred_ref[0] = jnp.concatenate([log_d, pitch, energy], axis=-1)   # packed [T, 3]


def _decoder_kernel(x_ref, mask_ref, keep_ref, pos_ref,
                    wqkv_r, bqkv_r, wfc_r, bfc_r, g1_r, c1_r,
                    w1_r, b1_r, w2_r, b2_r, g2_r, c2_r,
                    wm_r, bm_r,
                    pw0, pb0, pw1, pb1, pw2, pb2, pw3, pb3, pw4, pb4,
                    o_ref, *, T, H, n_head, d_k, n_layers, conv_k, pn_k):
    x = x_ref[0] + pos_ref[...]
    x = _run_fft_stack(x, mask_ref[0], keep_ref[0],
                       wqkv_r, bqkv_r, wfc_r, bfc_r, g1_r, c1_r,
                       w1_r, b1_r, w2_r, b2_r, g2_r, c2_r,
                       n_layers=n_layers, T=T, H=H, n_head=n_head, d_k=d_k,
                       conv_k=conv_k)
    # mel_linear + 5-layer PostNet (BatchNorm folded at prep time) + residual
    mel = _mm(x, wm_r[...]) + bm_r[...]                            # [T, N_MEL]
    y = mel
    pws = (pw0, pw1, pw2, pw3, pw4)
    pbs = (pb0, pb1, pb2, pb3, pb4)
    for i in range(len(pws)):
        y = _conv1d_same(y, pws[i][...], pbs[i][...], pn_k)
        if i < len(pws) - 1:
            y = jnp.tanh(y)
    o_ref[0] = jnp.concatenate([mel, y + mel], axis=-1)            # packed [T, 2*N_MEL]


# ---------------------------------- pallas_call wrappers ------------------------------------

_FFT_KEYS = ("w_qkv", "b_qkv", "w_fc", "b_fc", "ln1_g", "ln1_b",
             "w1", "b1", "w2", "b2", "ln2_g", "ln2_b")


def _const_spec(a):
    """Whole-array block, constant index -> weight stays VMEM-resident across grid steps."""
    return pl.BlockSpec(a.shape, lambda b, _n=a.ndim: (0,) * _n)


def _compiler_params():
    return pltpu.CompilerParams(dimension_semantics=("parallel",),
                                vmem_limit_bytes=VMEM_LIMIT)


def encoder_forward(params, texts, src_mask_f):
    B, T = texts.shape
    H = HIDDEN
    x = params["word_emb"][texts]                       # embedding gather (JAX glue)
    mask3 = src_mask_f.reshape(B, 1, T)
    keep = (1.0 - src_mask_f).reshape(B, T, 1)
    pos = params["enc_pos"][:T]
    ws = [params["encoder"][k] for k in _FFT_KEYS]
    in_specs = ([pl.BlockSpec((1, T, H), lambda b: (b, 0, 0)),
                 pl.BlockSpec((1, 1, T), lambda b: (b, 0, 0)),
                 pl.BlockSpec((1, T, 1), lambda b: (b, 0, 0)),
                 pl.BlockSpec((T, H), lambda b: (0, 0))]
                + [_const_spec(w) for w in ws])
    return pl.pallas_call(
        functools.partial(_encoder_kernel, T=T, H=H, n_head=N_HEAD, d_k=D_K,
                          n_layers=N_ENC_LAYERS, conv_k=FFT_KERNEL[0]),
        grid_spec=pltpu.PrefetchScalarGridSpec(
            num_scalar_prefetch=0, grid=(B,), in_specs=in_specs,
            out_specs=pl.BlockSpec((1, T, H), lambda b: (b, 0, 0))),
        out_shape=jax.ShapeDtypeStruct((B, T, H), jnp.float32),
        compiler_params=_compiler_params(),
    )(x, mask3, keep, pos, *ws)


def variance_adaptor_stage(params, x, src_mask_f, p_targets, e_targets):
    va = params["va"]
    B, T, H = x.shape
    keep = (1.0 - src_mask_f).reshape(B, T, 1)
    # bucketize + embedding-table gathers stay as JAX glue; the adds happen in-kernel.
    p_idx = jnp.searchsorted(va["pitch_bins"], p_targets, side="left")
    e_idx = jnp.searchsorted(va["energy_bins"], e_targets, side="left")
    pemb = va["pitch_emb"][p_idx]
    eemb = va["energy_emb"][e_idx]
    ws = [va[k] for k in ("w1", "b1", "ln1_g", "ln1_b", "w2", "b2",
                          "ln2_g", "ln2_b", "w_out", "b_out")]
    in_specs = ([pl.BlockSpec((1, T, H), lambda b: (b, 0, 0)),
                 pl.BlockSpec((1, T, 1), lambda b: (b, 0, 0)),
                 pl.BlockSpec((1, T, H), lambda b: (b, 0, 0)),
                 pl.BlockSpec((1, T, H), lambda b: (b, 0, 0))]
                + [_const_spec(w) for w in ws])
    preds, x_out = pl.pallas_call(
        functools.partial(_va_kernel, T=T, H=H, K=VP_KERNEL),
        grid_spec=pltpu.PrefetchScalarGridSpec(
            num_scalar_prefetch=0, grid=(B,), in_specs=in_specs,
            out_specs=(pl.BlockSpec((1, T, 3), lambda b: (b, 0, 0)),
                       pl.BlockSpec((1, T, H), lambda b: (b, 0, 0)))),
        out_shape=(jax.ShapeDtypeStruct((B, T, 3), jnp.float32),
                   jax.ShapeDtypeStruct((B, T, H), jnp.float32)),
        compiler_params=_compiler_params(),
    )(x, keep, pemb, eemb, *ws)
    return preds[..., 0], preds[..., 1], preds[..., 2], x_out


def decoder_mel_postnet(params, x, mel_mask_f):
    B, T, H = x.shape
    mask3 = mel_mask_f.reshape(B, 1, T)
    keep = (1.0 - mel_mask_f).reshape(B, T, 1)
    pos = params["dec_pos"][:T]
    ws = [params["decoder"][k] for k in _FFT_KEYS]
    ws += [params["mel_linear"]["w"], params["mel_linear"]["b"]]
    for lyr in params["postnet"]:
        ws += [lyr["w"], lyr["b"]]
    in_specs = ([pl.BlockSpec((1, T, H), lambda b: (b, 0, 0)),
                 pl.BlockSpec((1, 1, T), lambda b: (b, 0, 0)),
                 pl.BlockSpec((1, T, 1), lambda b: (b, 0, 0)),
                 pl.BlockSpec((T, H), lambda b: (0, 0))]
                + [_const_spec(w) for w in ws])
    out = pl.pallas_call(
        functools.partial(_decoder_kernel, T=T, H=H, n_head=N_HEAD, d_k=D_K,
                          n_layers=N_DEC_LAYERS, conv_k=FFT_KERNEL[0],
                          pn_k=POSTNET_KERNEL),
        grid_spec=pltpu.PrefetchScalarGridSpec(
            num_scalar_prefetch=0, grid=(B,), in_specs=in_specs,
            out_specs=pl.BlockSpec((1, T, 2 * N_MEL), lambda b: (b, 0, 0))),
        out_shape=jax.ShapeDtypeStruct((B, T, 2 * N_MEL), jnp.float32),
        compiler_params=_compiler_params(),
    )(x, mask3, keep, pos, *ws)
    return out[..., :N_MEL], out[..., N_MEL:]


# --------------------------------------- JAX glue -------------------------------------------

def sinusoid_table(n_position, d_hid):
    pos = np.arange(n_position, dtype=np.float64)[:, None]
    i = np.arange(d_hid, dtype=np.float64)[None, :]
    angle = pos / np.power(10000.0, 2.0 * (i // 2) / d_hid)
    table = np.zeros((n_position, d_hid), dtype=np.float64)
    table[:, 0::2] = np.sin(angle[:, 0::2])
    table[:, 1::2] = np.cos(angle[:, 1::2])
    return jnp.asarray(table, dtype=jnp.float32)


def get_mask_from_lengths(lengths, max_len):
    ids = jnp.arange(max_len, dtype=jnp.int32)[None, :]
    return ids >= lengths[:, None]           # True = padded


def length_regulate(x, durations, max_len):
    """Expand x [B,T,H] by integer durations [B,T] to [B,max_len,H]; pad with zeros."""
    B, T, _ = x.shape
    cum = jnp.cumsum(durations, axis=1)                               # [B, T]
    mel_lens = cum[:, -1].astype(jnp.int32)
    t_ids = jnp.arange(max_len, dtype=jnp.int32)
    idx = jnp.sum((cum[:, None, :] <= t_ids[None, :, None]).astype(jnp.int32), axis=-1)
    idx = jnp.minimum(idx, T - 1)
    out = jnp.take_along_axis(x, idx[..., None], axis=1)              # gather (glue)
    valid = (t_ids[None, :] < mel_lens[:, None]).astype(x.dtype)
    return out * valid[..., None], mel_lens


# ------------------------------------ full forward pass ------------------------------------

@functools.partial(jax.jit, static_argnames=("max_src_len", "max_mel_len"))
def fastspeech2_forward(params, texts, src_lens, max_src_len,
                        mel_lens, max_mel_len, p_targets, e_targets, d_targets):
    # speaker_encoder_type = 'none' (single speaker) -> no speaker branch
    # TODO(synk): inference path without d_targets (dynamic mel length) not implemented.
    src_masks = get_mask_from_lengths(src_lens, max_src_len)          # bool, True = pad
    mel_masks = get_mask_from_lengths(mel_lens, max_mel_len)
    src_mask_f = src_masks.astype(jnp.float32)
    mel_mask_f = mel_masks.astype(jnp.float32)

    # ---- encoder: embedding gather (glue) + fused FFT-stack kernel (pos-enc in-kernel) ----
    x = encoder_forward(params, texts, src_mask_f)
    speaker_predict = None

    # ---- fused variance adaptor kernel (dur/pitch/energy VP + embedding adds) ----
    log_d_pred, p_pred, e_pred, x = variance_adaptor_stage(
        params, x, src_mask_f, p_targets, e_targets)
    x, mel_lens_out = length_regulate(x, d_targets, max_mel_len)
    d_rounded = d_targets

    # ---- decoder FFT stack + mel_linear + postnet fused into one kernel ----
    mel, postnet_mel = decoder_mel_postnet(params, x, mel_mask_f)

    return (mel, postnet_mel, p_pred, e_pred, log_d_pred, d_rounded,
            src_masks, mel_masks, src_lens, mel_lens_out, speaker_predict)


# ----------------------------------- parameter initialization ------------------------------

def init_params(key):
    keys = iter(jax.random.split(key, 256))

    def nrm(shape, scale=0.1):
        return jax.random.normal(next(keys), shape, jnp.float32) * scale

    def fft_layer():
        return {
            "attn": {
                "w_q": nrm((HIDDEN, N_HEAD * D_K)), "b_q": nrm((N_HEAD * D_K,)),
                "w_k": nrm((HIDDEN, N_HEAD * D_K)), "b_k": nrm((N_HEAD * D_K,)),
                "w_v": nrm((HIDDEN, N_HEAD * D_K)), "b_v": nrm((N_HEAD * D_K,)),
                "w_fc": nrm((N_HEAD * D_K, HIDDEN)), "b_fc": nrm((HIDDEN,)),
                "ln_g": jnp.ones((HIDDEN,), jnp.float32),
                "ln_b": jnp.zeros((HIDDEN,), jnp.float32),
            },
            "ffn": {
                "w1": nrm((FFT_KERNEL[0], HIDDEN, CONV_FILTER)), "b1": nrm((CONV_FILTER,)),
                "w2": nrm((FFT_KERNEL[1], CONV_FILTER, HIDDEN)), "b2": nrm((HIDDEN,)),
                "ln_g": jnp.ones((HIDDEN,), jnp.float32),
                "ln_b": jnp.zeros((HIDDEN,), jnp.float32),
            },
        }

    def vp():
        return {
            "w1": nrm((VP_KERNEL, HIDDEN, VP_FILTER)), "b1": nrm((VP_FILTER,)),
            "ln1_g": jnp.ones((VP_FILTER,), jnp.float32),
            "ln1_b": jnp.zeros((VP_FILTER,), jnp.float32),
            "w2": nrm((VP_KERNEL, VP_FILTER, VP_FILTER)), "b2": nrm((VP_FILTER,)),
            "ln2_g": jnp.ones((VP_FILTER,), jnp.float32),
            "ln2_b": jnp.zeros((VP_FILTER,), jnp.float32),
            "w_out": nrm((VP_FILTER, 1)), "b_out": nrm((1,)),
        }

    word_emb = nrm((VOCAB, HIDDEN)).at[0].set(0.0)   # padding_idx = 0

    def postnet_layer(cin, cout):
        return {
            "w": nrm((POSTNET_KERNEL, cin, cout)), "b": nrm((cout,)),
            "bn_gamma": jnp.ones((cout,), jnp.float32) + nrm((cout,), 0.05),
            "bn_beta": nrm((cout,), 0.05),
            "bn_mean": jnp.zeros((cout,), jnp.float32),
            "bn_var": jnp.ones((cout,), jnp.float32),
        }

    postnet_convs = ([postnet_layer(N_MEL, POSTNET_DIM)]
                     + [postnet_layer(POSTNET_DIM, POSTNET_DIM)
                        for _ in range(POSTNET_LAYERS - 2)]
                     + [postnet_layer(POSTNET_DIM, N_MEL)])

    return {
        "encoder": {
            "word_emb": word_emb,
            "pos_enc": sinusoid_table(MAX_SEQ_LEN + 1, HIDDEN),
            "layers": [fft_layer() for _ in range(N_ENC_LAYERS)],
        },
        "decoder": {
            "pos_enc": sinusoid_table(MAX_SEQ_LEN + 1, HIDDEN),
            "layers": [fft_layer() for _ in range(N_DEC_LAYERS)],
        },
        "variance_adaptor": {
            "duration": vp(), "pitch": vp(), "energy": vp(),
            "pitch_bins": jnp.linspace(-2.0, 2.0, N_BINS - 1, dtype=jnp.float32),
            "energy_bins": jnp.linspace(-2.0, 2.0, N_BINS - 1, dtype=jnp.float32),
            "pitch_emb": nrm((N_BINS, HIDDEN)),
            "energy_emb": nrm((N_BINS, HIDDEN)),
        },
        "mel_linear": {"w": nrm((HIDDEN, N_MEL)), "b": nrm((N_MEL,))},
        "postnet": {"convs": postnet_convs},
    }


def prepare_params(raw):
    """Host-side one-time weight folding/stacking:
       - fused QKV projection, per-layer FFT weights stacked to [L, ...]
       - 1x1 FFN conv squeezed to a plain linear
       - 3 variance predictors stacked to [3, ...]
       - eval-mode BatchNorm folded into PostNet conv weights
       - matmul/conv weights stored bf16 (MXU native), biases/LN params kept f32."""
    bf16 = jnp.bfloat16

    def prep_fft_stack(layers):
        def stk(fn, dtype=None):
            a = jnp.stack([fn(lp) for lp in layers], axis=0)
            return a.astype(dtype) if dtype is not None else a
        return {
            "w_qkv": stk(lambda lp: jnp.concatenate(
                [lp["attn"]["w_q"], lp["attn"]["w_k"], lp["attn"]["w_v"]], axis=1), bf16),
            "b_qkv": stk(lambda lp: jnp.concatenate(
                [lp["attn"]["b_q"], lp["attn"]["b_k"], lp["attn"]["b_v"]]).reshape(1, -1)),
            "w_fc": stk(lambda lp: lp["attn"]["w_fc"], bf16),
            "b_fc": stk(lambda lp: lp["attn"]["b_fc"].reshape(1, -1)),
            "ln1_g": stk(lambda lp: lp["attn"]["ln_g"].reshape(1, -1)),
            "ln1_b": stk(lambda lp: lp["attn"]["ln_b"].reshape(1, -1)),
            "w1": stk(lambda lp: lp["ffn"]["w1"], bf16),                  # [L,K,H,F]
            "b1": stk(lambda lp: lp["ffn"]["b1"].reshape(1, -1)),
            "w2": stk(lambda lp: lp["ffn"]["w2"][0], bf16),               # [L,F,H] (k=1 conv)
            "b2": stk(lambda lp: lp["ffn"]["b2"].reshape(1, -1)),
            "ln2_g": stk(lambda lp: lp["ffn"]["ln_g"].reshape(1, -1)),
            "ln2_b": stk(lambda lp: lp["ffn"]["ln_b"].reshape(1, -1)),
        }

    def prep_va(va):
        vps = [va["duration"], va["pitch"], va["energy"]]
        def stk(fn, dtype=None):
            a = jnp.stack([fn(v) for v in vps], axis=0)
            return a.astype(dtype) if dtype is not None else a
        return {
            "w1": stk(lambda v: v["w1"], bf16),                           # [3,K,H,F]
            "b1": stk(lambda v: v["b1"].reshape(1, -1)),
            "ln1_g": stk(lambda v: v["ln1_g"].reshape(1, -1)),
            "ln1_b": stk(lambda v: v["ln1_b"].reshape(1, -1)),
            "w2": stk(lambda v: v["w2"], bf16),                           # [3,K,F,F]
            "b2": stk(lambda v: v["b2"].reshape(1, -1)),
            "ln2_g": stk(lambda v: v["ln2_g"].reshape(1, -1)),
            "ln2_b": stk(lambda v: v["ln2_b"].reshape(1, -1)),
            "w_out": stk(lambda v: v["w_out"], bf16),                     # [3,F,1]
            "b_out": stk(lambda v: v["b_out"].reshape(1, 1)),             # [3,1,1]
            "pitch_bins": va["pitch_bins"], "energy_bins": va["energy_bins"],
            "pitch_emb": va["pitch_emb"], "energy_emb": va["energy_emb"],
        }

    def prep_postnet(layer):
        # fold eval-mode BatchNorm (running stats) into the conv weight/bias ONCE
        scale = layer["bn_gamma"] / jnp.sqrt(layer["bn_var"] + BN_EPS)
        w = layer["w"] * scale[None, None, :]
        b = (layer["b"] - layer["bn_mean"]) * scale + layer["bn_beta"]
        return {"w": w.astype(bf16), "b": b.reshape(1, -1)}

    va = raw["variance_adaptor"]
    return {
        "word_emb": raw["encoder"]["word_emb"],
        "enc_pos": raw["encoder"]["pos_enc"],
        "dec_pos": raw["decoder"]["pos_enc"],
        "encoder": prep_fft_stack(raw["encoder"]["layers"]),
        "decoder": prep_fft_stack(raw["decoder"]["layers"]),
        "va": prep_va(va),
        "mel_linear": {"w": raw["mel_linear"]["w"].astype(bf16),
                       "b": raw["mel_linear"]["b"].reshape(1, -1)},
        "postnet": [prep_postnet(l) for l in raw["postnet"]["convs"]],
    }


# -------------------------------------------- main -----------------------------------------

if __name__ == "__main__":
    key = jax.random.PRNGKey(0)
    pkey, dkey = jax.random.split(key)
    params = prepare_params(init_params(pkey))

    B = 2
    MAX_SRC = 8
    MAX_MEL = 16
    src_lens = jnp.array([8, 6], dtype=jnp.int32)

    k1, k2, k3 = jax.random.split(dkey, 3)
    texts = jax.random.randint(k1, (B, MAX_SRC), 1, VOCAB, dtype=jnp.int32)
    pad = jnp.arange(MAX_SRC)[None, :] >= src_lens[:, None]
    texts = jnp.where(pad, 0, texts)                                  # padding token = 0

    d_targets = jnp.array([[2, 2, 2, 2, 2, 2, 2, 2],
                           [2, 2, 2, 2, 2, 2, 0, 0]], dtype=jnp.int32)
    mel_lens = jnp.sum(d_targets, axis=1).astype(jnp.int32)           # [16, 12]
    p_targets = jax.random.normal(k2, (B, MAX_SRC), jnp.float32)
    e_targets = jax.random.normal(k3, (B, MAX_SRC), jnp.float32)

    outs = fastspeech2_forward(params, texts, src_lens, max_src_len=MAX_SRC,
                               mel_lens=mel_lens, max_mel_len=MAX_MEL,
                               p_targets=p_targets, e_targets=e_targets,
                               d_targets=d_targets)
    outs = jax.block_until_ready(outs)

    mel_out, postnet_out = outs[0], outs[1]
    assert mel_out.shape == (B, MAX_MEL, N_MEL)
    assert postnet_out.shape == (B, MAX_MEL, N_MEL)
    assert outs[2].shape == (B, MAX_SRC)     # pitch predictions
    assert outs[4].shape == (B, MAX_SRC)     # log duration predictions
    assert bool(jnp.all(jnp.isfinite(postnet_out)))
    assert bool(jnp.all(jnp.isfinite(outs[2])))
    print("KERNEL_OK")
</pallas_src>

<mosaic_0001>
module attributes {stable_mosaic.version = 11 : i64} {
  func.func @_encoder_kernel(%arg0: i32, %arg1: memref<1x8x32xf32, #tpu.memory_space<vmem>>, %arg2: memref<1x1x8xf32, #tpu.memory_space<vmem>>, %arg3: memref<1x8x1xf32, #tpu.memory_space<vmem>>, %arg4: memref<8x32xf32, #tpu.memory_space<vmem>>, %arg5: memref<2x32x96xbf16, #tpu.memory_space<vmem>>, %arg6: memref<2x1x96xf32, #tpu.memory_space<vmem>>, %arg7: memref<2x32x32xbf16, #tpu.memory_space<vmem>>, %arg8: memref<2x1x32xf32, #tpu.memory_space<vmem>>, %arg9: memref<2x1x32xf32, #tpu.memory_space<vmem>>, %arg10: memref<2x1x32xf32, #tpu.memory_space<vmem>>, %arg11: memref<2x3x32x64xbf16, #tpu.memory_space<vmem>>, %arg12: memref<2x1x64xf32, #tpu.memory_space<vmem>>, %arg13: memref<2x64x32xbf16, #tpu.memory_space<vmem>>, %arg14: memref<2x1x32xf32, #tpu.memory_space<vmem>>, %arg15: memref<2x1x32xf32, #tpu.memory_space<vmem>>, %arg16: memref<2x1x32xf32, #tpu.memory_space<vmem>>, %arg17: memref<1x8x32xf32, #tpu.memory_space<vmem>>) attributes {dimension_semantics = [#tpu.dimension_semantics<parallel>], iteration_bounds = array<i64: 2>, scalar_prefetch = 0 : i64, scratch_operands = 0 : i64, tpu.core_type = #tpu.core_type<tc>, window_params = [{transform_indices = @transform_0, window_bounds = array<i64: 1, 8, 32>}, {transform_indices = @transform_1, window_bounds = array<i64: 1, 1, 8>}, {transform_indices = @transform_2, window_bounds = array<i64: 1, 8, 1>}, {pipeline_mode = #tpu.pipeline_mode<synchronous>, transform_indices = @transform_3, window_bounds = array<i64: 8, 32>}, {pipeline_mode = #tpu.pipeline_mode<synchronous>, transform_indices = @transform_4, window_bounds = array<i64: 2, 32, 96>}, {pipeline_mode = #tpu.pipeline_mode<synchronous>, transform_indices = @transform_5, window_bounds = array<i64: 2, 1, 96>}, {pipeline_mode = #tpu.pipeline_mode<synchronous>, transform_indices = @transform_6, window_bounds = array<i64: 2, 32, 32>}, {pipeline_mode = #tpu.pipeline_mode<synchronous>, transform_indices = @transform_7, window_bounds = array<i64: 2, 1, 32>}, {pipeline_mode = #tpu.pipeline_mode<synchronous>, transform_indices = @transform_8, window_bounds = array<i64: 2, 1, 32>}, {pipeline_mode = #tpu.pipeline_mode<synchronous>, transform_indices = @transform_9, window_bounds = array<i64: 2, 1, 32>}, {pipeline_mode = #tpu.pipeline_mode<synchronous>, transform_indices = @transform_10, window_bounds = array<i64: 2, 3, 32, 64>}, {pipeline_mode = #tpu.pipeline_mode<synchronous>, transform_indices = @transform_11, window_bounds = array<i64: 2, 1, 64>}, {pipeline_mode = #tpu.pipeline_mode<synchronous>, transform_indices = @transform_12, window_bounds = array<i64: 2, 64, 32>}, {pipeline_mode = #tpu.pipeline_mode<synchronous>, transform_indices = @transform_13, window_bounds = array<i64: 2, 1, 32>}, {pipeline_mode = #tpu.pipeline_mode<synchronous>, transform_indices = @transform_14, window_bounds = array<i64: 2, 1, 32>}, {pipeline_mode = #tpu.pipeline_mode<synchronous>, transform_indices = @transform_15, window_bounds = array<i64: 2, 1, 32>}, {transform_indices = @transform_16, window_bounds = array<i64: 1, 8, 32>}]} {
    %c0 = arith.constant 0 : index
    %c0_0 = arith.constant 0 : index
    %c0_1 = arith.constant 0 : index
    %0 = vector.load %arg1[%c0, %c0_0, %c0_1] : memref<1x8x32xf32, #tpu.memory_space<vmem>>, vector<1x8x32xf32>
    %1 = vector.shape_cast %0 : vector<1x8x32xf32> to vector<8x32xf32>
    %c0_2 = arith.constant 0 : index
    %c0_3 = arith.constant 0 : index
    %2 = vector.load %arg4[%c0_2, %c0_3] : memref<8x32xf32, #tpu.memory_space<vmem>>, vector<8x32xf32>
    %3 = arith.addf %1, %2 : vector<8x32xf32>
    %c0_4 = arith.constant 0 : index
    %c0_5 = arith.constant 0 : index
    %c0_6 = arith.constant 0 : index
    %4 = vector.load %arg2[%c0_4, %c0_5, %c0_6] : memref<1x1x8xf32, #tpu.memory_space<vmem>>, vector<1x1x8xf32>
    %5 = vector.shape_cast %4 : vector<1x1x8xf32> to vector<1x8xf32>
    %c0_7 = arith.constant 0 : index
    %c0_8 = arith.constant 0 : index
    %c0_9 = arith.constant 0 : index
    %6 = vector.load %arg3[%c0_7, %c0_8, %c0_9] : memref<1x8x1xf32, #tpu.memory_space<vmem>>, vector<1x8x1xf32>
    %7 = vector.shape_cast %6 : vector<1x8x1xf32> to vector<8x1xf32>
    %c0_10 = arith.constant 0 : index
    %c0_11 = arith.constant 0 : index
    %c0_12 = arith.constant 0 : index
    %8 = vector.load %arg5[%c0_10, %c0_11, %c0_12] : memref<2x32x96xbf16, #tpu.memory_space<vmem>>, vector<1x32x96xbf16>
    %9 = vector.shape_cast %8 : vector<1x32x96xbf16> to vector<32x96xbf16>
    %c0_13 = arith.constant 0 : index
    %c0_14 = arith.constant 0 : index
    %c0_15 = arith.constant 0 : index
    %10 = vector.load %arg6[%c0_13, %c0_14, %c0_15] : memref<2x1x96xf32, #tpu.memory_space<vmem>>, vector<1x1x96xf32>
    %11 = vector.shape_cast %10 : vector<1x1x96xf32> to vector<1x96xf32>
    %c0_16 = arith.constant 0 : index
    %c0_17 = arith.constant 0 : index
    %c0_18 = arith.constant 0 : index
    %12 = vector.load %arg7[%c0_16, %c0_17, %c0_18] : memref<2x32x32xbf16, #tpu.memory_space<vmem>>, vector<1x32x32xbf16>
    %13 = vector.shape_cast %12 : vector<1x32x32xbf16> to vector<32x32xbf16>
    %c0_19 = arith.constant 0 : index
    %c0_20 = arith.constant 0 : index
    %c0_21 = arith.constant 0 : index
    %14 = vector.load %arg8[%c0_19, %c0_20, %c0_21] : memref<2x1x32xf32, #tpu.memory_space<vmem>>, vector<1x1x32xf32>
    %15 = vector.shape_cast %14 : vector<1x1x32xf32> to vector<1x32xf32>
    %c0_22 = arith.constant 0 : index
    %c0_23 = arith.constant 0 : index
    %c0_24 = arith.constant 0 : index
    %16 = vector.load %arg9[%c0_22, %c0_23, %c0_24] : memref<2x1x32xf32, #tpu.memory_space<vmem>>, vector<1x1x32xf32>
    %17 = vector.shape_cast %16 : vector<1x1x32xf32> to vector<1x32xf32>
    %c0_25 = arith.constant 0 : index
    %c0_26 = arith.constant 0 : index
    %c0_27 = arith.constant 0 : index
    %18 = vector.load %arg10[%c0_25, %c0_26, %c0_27] : memref<2x1x32xf32, #tpu.memory_space<vmem>>, vector<1x1x32xf32>
    %19 = vector.shape_cast %18 : vector<1x1x32xf32> to vector<1x32xf32>
    %c0_28 = arith.constant 0 : index
    %c0_29 = arith.constant 0 : index
    %c0_30 = arith.constant 0 : index
    %c0_31 = arith.constant 0 : index
    %20 = vector.load %arg11[%c0_28, %c0_29, %c0_30, %c0_31] : memref<2x3x32x64xbf16, #tpu.memory_space<vmem>>, vector<1x3x32x64xbf16>
    %21 = vector.shape_cast %20 : vector<1x3x32x64xbf16> to vector<3x32x64xbf16>
    %c0_32 = arith.constant 0 : index
    %c0_33 = arith.constant 0 : index
    %c0_34 = arith.constant 0 : index
    %22 = vector.load %arg12[%c0_32, %c0_33, %c0_34] : memref<2x1x64xf32, #tpu.memory_space<vmem>>, vector<1x1x64xf32>
    %23 = vector.shape_cast %22 : vector<1x1x64xf32> to vector<1x64xf32>
    %c0_35 = arith.constant 0 : index
    %c0_36 = arith.constant 0 : index
    %c0_37 = arith.constant 0 : index
    %24 = vector.load %arg13[%c0_35, %c0_36, %c0_37] : memref<2x64x32xbf16, #tpu.memory_space<vmem>>, vector<1x64x32xbf16>
    %25 = vector.shape_cast %24 : vector<1x64x32xbf16> to vector<64x32xbf16>
    %c0_38 = arith.constant 0 : index
    %c0_39 = arith.constant 0 : index
    %c0_40 = arith.constant 0 : index
    %26 = vector.load %arg14[%c0_38, %c0_39, %c0_40] : memref<2x1x32xf32, #tpu.memory_space<vmem>>, vector<1x1x32xf32>
    %27 = vector.shape_cast %26 : vector<1x1x32xf32> to vector<1x32xf32>
    %c0_41 = arith.constant 0 : index
    %c0_42 = arith.constant 0 : index
    %c0_43 = arith.constant 0 : index
    %28 = vector.load %arg15[%c0_41, %c0_42, %c0_43] : memref<2x1x32xf32, #tpu.memory_space<vmem>>, vector<1x1x32xf32>
    %29 = vector.shape_cast %28 : vector<1x1x32xf32> to vector<1x32xf32>
    %c0_44 = arith.constant 0 : index
    %c0_45 = arith.constant 0 : index
    %c0_46 = arith.constant 0 : index
    %30 = vector.load %arg16[%c0_44, %c0_45, %c0_46] : memref<2x1x32xf32, #tpu.memory_space<vmem>>, vector<1x1x32xf32>
    %31 = vector.shape_cast %30 : vector<1x1x32xf32> to vector<1x32xf32>
    %32 = arith.truncf %3 : vector<8x32xf32> to vector<8x32xbf16>
    %cst = arith.constant dense<0.000000e+00> : vector<8x96xf32>
    %33 = tpu.matmul %32, %9, %cst {dimension_numbers = #tpu.dot_dimension_numbers<[1], [0], [0], [1], [0, 0, 1, 1], [], []>} : vector<8x32xbf16>, vector<32x96xbf16>, vector<8x96xf32> -> vector<8x96xf32>
    %34 = vector.broadcast %11 : vector<1x96xf32> to vector<8x96xf32>
    %35 = arith.addf %33, %34 : vector<8x96xf32>
    %36 = vector.extract_strided_slice %35 {offsets = [0, 0], sizes = [8, 32], strides = [1, 1]} : vector<8x96xf32> to vector<8x32xf32>
    %37 = vector.extract_strided_slice %36 {offsets = [0, 0], sizes = [8, 16], strides = [1, 1]} : vector<8x32xf32> to vector<8x16xf32>
    %38 = vector.extract_strided_slice %36 {offsets = [0, 16], sizes = [8, 16], strides = [1, 1]} : vector<8x32xf32> to vector<8x16xf32>
    %39 = vector.shape_cast %37 : vector<8x16xf32> to vector<1x8x16xf32>
    %40 = vector.shape_cast %38 : vector<8x16xf32> to vector<1x8x16xf32>
    %41 = tpu.concatenate %39, %40 in 0 : vector<1x8x16xf32>, vector<1x8x16xf32> -> vector<2x8x16xf32>
    %42 = arith.truncf %41 : vector<2x8x16xf32> to vector<2x8x16xbf16>
    %43 = vector.extract_strided_slice %35 {offsets = [0, 32], sizes = [8, 32], strides = [1, 1]} : vector<8x96xf32> to vector<8x32xf32>
    %44 = vector.extract_strided_slice %43 {offsets = [0, 0], sizes = [8, 16], strides = [1, 1]} : vector<8x32xf32> to vector<8x16xf32>
    %45 = vector.extract_strided_slice %43 {offsets = [0, 16], sizes = [8, 16], strides = [1, 1]} : vector<8x32xf32> to vector<8x16xf32>
    %46 = vector.shape_cast %44 : vector<8x16xf32> to vector<1x8x16xf32>
    %47 = vector.shape_cast %45 : vector<8x16xf32> to vector<1x8x16xf32>
    %48 = tpu.concatenate %46, %47 in 0 : vector<1x8x16xf32>, vector<1x8x16xf32> -> vector<2x8x16xf32>
    %49 = arith.truncf %48 : vector<2x8x16xf32> to vector<2x8x16xbf16>
    %50 = vector.extract_strided_slice %35 {offsets = [0, 64], sizes = [8, 32], strides = [1, 1]} : vector<8x96xf32> to vector<8x32xf32>
    %51 = vector.extract_strided_slice %50 {offsets = [0, 0], sizes = [8, 16], strides = [1, 1]} : vector<8x32xf32> to vector<8x16xf32>
    %52 = vector.extract_strided_slice %50 {offsets = [0, 16], sizes = [8, 16], strides = [1, 1]} : vector<8x32xf32> to vector<8x16xf32>
    %53 = vector.shape_cast %51 : vector<8x16xf32> to vector<1x8x16xf32>
    %54 = vector.shape_cast %52 : vector<8x16xf32> to vector<1x8x16xf32>
    %55 = tpu.concatenate %53, %54 in 0 : vector<1x8x16xf32>, vector<1x8x16xf32> -> vector<2x8x16xf32>
    %56 = arith.truncf %55 : vector<2x8x16xf32> to vector<2x8x16xbf16>
    "tpu.trace_start"() <{level = 10 : i32, message = "nqd,nkd->nqk"}> : () -> ()
    %cst_47 = arith.constant dense<0.000000e+00> : vector<2x8x8xf32>
    %57 = tpu.matmul %42, %49, %cst_47 {dimension_numbers = #tpu.dot_dimension_numbers<[2], [2], [1], [1], [0, 0, 0, 1, 1, 1], [0], [0]>} : vector<2x8x16xbf16>, vector<2x8x16xbf16>, vector<2x8x8xf32> -> vector<2x8x8xf32>
    "tpu.trace_stop"() : () -> ()
    %cst_48 = arith.constant 2.500000e-01 : f32
    %58 = vector.broadcast %cst_48 : f32 to vector<2x8x8xf32>
    %59 = arith.mulf %57, %58 : vector<2x8x8xf32>
    %60 = vector.shape_cast %5 : vector<1x8xf32> to vector<1x1x8xf32>
    %cst_49 = arith.constant 5.000000e-01 : f32
    %61 = vector.broadcast %cst_49 : f32 to vector<1x1x8xf32>
    %62 = arith.cmpf ogt, %60, %61 : vector<1x1x8xf32>
    %cst_50 = arith.constant -1.000000e+09 : f32
    %63 = vector.shape_cast %62 : vector<1x1x8xi1> to vector<1x1x8xi1>
    %64 = vector.broadcast %63 : vector<1x1x8xi1> to vector<2x8x8xi1>
    %65 = vector.broadcast %cst_50 : f32 to vector<2x8x8xf32>
    %66 = arith.select %64, %65, %59 : vector<2x8x8xi1>, vector<2x8x8xf32>
    %cst_51 = arith.constant dense<0xFF800000> : vector<2x8xf32>
    %67 = vector.multi_reduction <maximumf>, %66, %cst_51 [2] : vector<2x8x8xf32> to vector<2x8xf32>
    %68 = vector.shape_cast %67 : vector<2x8xf32> to vector<2x8x1xf32>
    %69 = vector.broadcast %68 : vector<2x8x1xf32> to vector<2x8x8xf32>
    %70 = arith.subf %66, %69 : vector<2x8x8xf32>
    %71 = math.exp %70 : vector<2x8x8xf32>
    %cst_52 = arith.constant dense<0.000000e+00> : vector<2x8xf32>
    %72 = vector.multi_reduction <add>, %71, %cst_52 [2] : vector<2x8x8xf32> to vector<2x8xf32>
    %73 = vector.shape_cast %72 : vector<2x8xf32> to vector<2x8x1xf32>
    %74 = tpu.reciprocal %73 {approx = true} : vector<2x8x1xf32> -> vector<2x8x1xf32>
    %75 = vector.broadcast %74 : vector<2x8x1xf32> to vector<2x8x8xf32>
    %76 = arith.mulf %71, %75 : vector<2x8x8xf32>
    %77 = arith.truncf %76 : vector<2x8x8xf32> to vector<2x8x8xbf16>
    "tpu.trace_start"() <{level = 10 : i32, message = "nqk,nkd->nqd"}> : () -> ()
    %cst_53 = arith.constant dense<0.000000e+00> : vector<2x8x16xf32>
    %78 = tpu.matmul %77, %56, %cst_53 {dimension_numbers = #tpu.dot_dimension_numbers<[2], [1], [1], [2], [0, 0, 0, 1, 1, 2], [0], [0]>} : vector<2x8x8xbf16>, vector<2x8x16xbf16>, vector<2x8x16xf32> -> vector<2x8x16xf32>
    "tpu.trace_stop"() : () -> ()
    %79 = vector.extract_strided_slice %78 {offsets = [0, 0, 0], sizes = [1, 8, 16], strides = [1, 1, 1]} : vector<2x8x16xf32> to vector<1x8x16xf32>
    %80 = vector.shape_cast %79 : vector<1x8x16xf32> to vector<8x16xf32>
    %81 = vector.extract_strided_slice %78 {offsets = [1, 0, 0], sizes = [1, 8, 16], strides = [1, 1, 1]} : vector<2x8x16xf32> to vector<1x8x16xf32>
    %82 = vector.shape_cast %81 : vector<1x8x16xf32> to vector<8x16xf32>
    %83 = tpu.concatenate %80, %82 in 1 : vector<8x16xf32>, vector<8x16xf32> -> vector<8x32xf32>
    %84 = arith.truncf %83 : vector<8x32xf32> to vector<8x32xbf16>
    %cst_54 = arith.constant dense<0.000000e+00> : vector<8x32xf32>
    %85 = tpu.matmul %84, %13, %cst_54 {dimension_numbers = #tpu.dot_dimension_numbers<[1], [0], [0], [1], [0, 0, 1, 1], [], []>} : vector<8x32xbf16>, vector<32x32xbf16>, vector<8x32xf32> -> vector<8x32xf32>
    %86 = vector.broadcast %15 : vector<1x32xf32> to vector<8x32xf32>
    %87 = arith.addf %85, %86 : vector<8x32xf32>
    %88 = arith.addf %87, %3 : vector<8x32xf32>
    %cst_55 = arith.constant dense<0.000000e+00> : vector<8xf32>
    %89 = vector.multi_reduction <add>, %88, %cst_55 [1] : vector<8x32xf32> to vector<8xf32>
    %90 = vector.shape_cast %89 : vector<8xf32> to vector<8x1xf32>
    %cst_56 = arith.constant 3.200000e+01 : f32
    %91 = vector.broadcast %cst_56 : f32 to vector<8x1xf32>
    %92 = arith.divf %90, %91 : vector<8x1xf32>
    %93 = vector.broadcast %92 : vector<8x1xf32> to vector<8x32xf32>
    %94 = arith.subf %88, %93 : vector<8x32xf32>
    %95 = arith.mulf %94, %94 : vector<8x32xf32>
    %cst_57 = arith.constant dense<0.000000e+00> : vector<8xf32>
    %96 = vector.multi_reduction <add>, %95, %cst_57 [1] : vector<8x32xf32> to vector<8xf32>
    %97 = vector.shape_cast %96 : vector<8xf32> to vector<8x1xf32>
    %cst_58 = arith.constant 3.200000e+01 : f32
    %98 = vector.broadcast %cst_58 : f32 to vector<8x1xf32>
    %99 = arith.divf %97, %98 : vector<8x1xf32>
    %100 = vector.broadcast %92 : vector<8x1xf32> to vector<8x32xf32>
    %101 = arith.subf %88, %100 : vector<8x32xf32>
    %cst_59 = arith.constant 9.99999974E-6 : f32
    %102 = vector.broadcast %cst_59 : f32 to vector<8x1xf32>
    %103 = arith.addf %99, %102 : vector<8x1xf32>
    %104 = math.rsqrt %103 : vector<8x1xf32>
    %105 = vector.broadcast %104 : vector<8x1xf32> to vector<8x32xf32>
    %106 = arith.mulf %101, %105 : vector<8x32xf32>
    %107 = vector.broadcast %17 : vector<1x32xf32> to vector<8x32xf32>
    %108 = arith.mulf %106, %107 : vector<8x32xf32>
    %109 = vector.broadcast %19 : vector<1x32xf32> to vector<8x32xf32>
    %110 = arith.addf %108, %109 : vector<8x32xf32>
    %111 = vector.broadcast %7 : vector<8x1xf32> to vector<8x32xf32>
    %112 = arith.mulf %110, %111 : vector<8x32xf32>
    %113 = tpu.iota {dimensions = array<i32: 0>} : vector<8x1xi32>
    %c1_i32 = arith.constant 1 : i32
    %114 = tpu.dynamic_rotate %112 by %c1_i32 dim 0 : vector<8x32xf32>, i32 -> vector<8x32xf32>
    %c1_i32_60 = arith.constant 1 : i32
    %115 = vector.broadcast %c1_i32_60 : i32 to vector<8x1xi32>
    %116 = arith.cmpi sge, %113, %115 : vector<8x1xi32>
    %cst_61 = arith.constant 0.000000e+00 : f32
    %117 = vector.shape_cast %116 : vector<8x1xi1> to vector<8x1xi1>
    %118 = vector.broadcast %117 : vector<8x1xi1> to vector<8x32xi1>
    %119 = vector.broadcast %cst_61 : f32 to vector<8x32xf32>
    %120 = arith.select %118, %114, %119 : vector<8x32xi1>, vector<8x32xf32>
    %121 = vector.extract_strided_slice %21 {offsets = [0, 0, 0], sizes = [1, 32, 64], strides = [1, 1, 1]} : vector<3x32x64xbf16> to vector<1x32x64xbf16>
    %122 = vector.shape_cast %121 : vector<1x32x64xbf16> to vector<32x64xbf16>
    %123 = arith.truncf %120 : vector<8x32xf32> to vector<8x32xbf16>
    %cst_62 = arith.constant dense<0.000000e+00> : vector<8x64xf32>
    %124 = tpu.matmul %123, %122, %cst_62 {dimension_numbers = #tpu.dot_dimension_numbers<[1], [0], [0], [1], [0, 0, 1, 1], [], []>} : vector<8x32xbf16>, vector<32x64xbf16>, vector<8x64xf32> -> vector<8x64xf32>
    %125 = vector.extract_strided_slice %21 {offsets = [1, 0, 0], sizes = [1, 32, 64], strides = [1, 1, 1]} : vector<3x32x64xbf16> to vector<1x32x64xbf16>
    %126 = vector.shape_cast %125 : vector<1x32x64xbf16> to vector<32x64xbf16>
    %127 = arith.truncf %112 : vector<8x32xf32> to vector<8x32xbf16>
    %cst_63 = arith.constant dense<0.000000e+00> : vector<8x64xf32>
    %128 = tpu.matmul %127, %126, %cst_63 {dimension_numbers = #tpu.dot_dimension_numbers<[1], [0], [0], [1], [0, 0, 1, 1], [], []>} : vector<8x32xbf16>, vector<32x64xbf16>, vector<8x64xf32> -> vector<8x64xf32>
    %129 = arith.addf %124, %128 : vector<8x64xf32>
    %c7_i32 = arith.constant 7 : i32
    %130 = tpu.dynamic_rotate %112 by %c7_i32 dim 0 : vector<8x32xf32>, i32 -> vector<8x32xf32>
    %c7_i32_64 = arith.constant 7 : i32
    %131 = vector.broadcast %c7_i32_64 : i32 to vector<8x1xi32>
    %132 = arith.cmpi slt, %113, %131 : vector<8x1xi32>
    %cst_65 = arith.constant 0.000000e+00 : f32
    %133 = vector.shape_cast %132 : vector<8x1xi1> to vector<8x1xi1>
    %134 = vector.broadcast %133 : vector<8x1xi1> to vector<8x32xi1>
    %135 = vector.broadcast %cst_65 : f32 to vector<8x32xf32>
    %136 = arith.select %134, %130, %135 : vector<8x32xi1>, vector<8x32xf32>
    %137 = vector.extract_strided_slice %21 {offsets = [2, 0, 0], sizes = [1, 32, 64], strides = [1, 1, 1]} : vector<3x32x64xbf16> to vector<1x32x64xbf16>
    %138 = vector.shape_cast %137 : vector<1x32x64xbf16> to vector<32x64xbf16>
    %139 = arith.truncf %136 : vector<8x32xf32> to vector<8x32xbf16>
    %cst_66 = arith.constant dense<0.000000e+00> : vector<8x64xf32>
    %140 = tpu.matmul %139, %138, %cst_66 {dimension_numbers = #tpu.dot_dimension_numbers<[1], [0], [0], [1], [0, 0, 1, 1], [], []>} : vector<8x32xbf16>, vector<32x64xbf16>, vector<8x64xf32> -> vector<8x64xf32>
    %141 = arith.addf %129, %140 : vector<8x64xf32>
    %142 = vector.broadcast %23 : vector<1x64xf32> to vector<8x64xf32>
    %143 = arith.addf %141, %142 : vector<8x64xf32>
    %cst_67 = arith.constant 0.000000e+00 : f32
    %144 = vector.broadcast %cst_67 : f32 to vector<8x64xf32>
    %145 = arith.maximumf %143, %144 : vector<8x64xf32>
    %146 = arith.truncf %145 : vector<8x64xf32> to vector<8x64xbf16>
    %cst_68 = arith.constant dense<0.000000e+00> : vector<8x32xf32>
    %147 = tpu.matmul %146, %25, %cst_68 {dimension_numbers = #tpu.dot_dimension_numbers<[1], [0], [0], [1], [0, 0, 1, 1], [], []>} : vector<8x64xbf16>, vector<64x32xbf16>, vector<8x32xf32> -> vector<8x32xf32>
    %148 = vector.broadcast %27 : vector<1x32xf32> to vector<8x32xf32>
    %149 = arith.addf %147, %148 : vector<8x32xf32>
    %150 = arith.addf %149, %112 : vector<8x32xf32>
    %cst_69 = arith.constant dense<0.000000e+00> : vector<8xf32>
    %151 = vector.multi_reduction <add>, %150, %cst_69 [1] : vector<8x32xf32> to vector<8xf32>
    %152 = vector.shape_cast %151 : vector<8xf32> to vector<8x1xf32>
    %cst_70 = arith.constant 3.200000e+01 : f32
    %153 = vector.broadcast %cst_70 : f32 to vector<8x1xf32>
    %154 = arith.divf %152, %153 : vector<8x1xf32>
    %155 = vector.broadcast %154 : vector<8x1xf32> to vector<8x32xf32>
    %156 = arith.subf %150, %155 : vector<8x32xf32>
    %157 = arith.mulf %156, %156 : vector<8x32xf32>
    %cst_71 = arith.constant dense<0.000000e+00> : vector<8xf32>
    %158 = vector.multi_reduction <add>, %157, %cst_71 [1] : vector<8x32xf32> to vector<8xf32>
    %159 = vector.shape_cast %158 : vector<8xf32> to vector<8x1xf32>
    %cst_72 = arith.constant 3.200000e+01 : f32
    %160 = vector.broadcast %cst_72 : f32 to vector<8x1xf32>
    %161 = arith.divf %159, %160 : vector<8x1xf32>
    %162 = vector.broadcast %154 : vector<8x1xf32> to vector<8x32xf32>
    %163 = arith.subf %150, %162 : vector<8x32xf32>
    %cst_73 = arith.constant 9.99999974E-6 : f32
    %164 = vector.broadcast %cst_73 : f32 to vector<8x1xf32>
    %165 = arith.addf %161, %164 : vector<8x1xf32>
    %166 = math.rsqrt %165 : vector<8x1xf32>
    %167 = vector.broadcast %166 : vector<8x1xf32> to vector<8x32xf32>
    %168 = arith.mulf %163, %167 : vector<8x32xf32>
    %169 = vector.broadcast %29 : vector<1x32xf32> to vector<8x32xf32>
    %170 = arith.mulf %168, %169 : vector<8x32xf32>
    %171 = vector.broadcast %31 : vector<1x32xf32> to vector<8x32xf32>
    %172 = arith.addf %170, %171 : vector<8x32xf32>
    %173 = vector.broadcast %7 : vector<8x1xf32> to vector<8x32xf32>
    %174 = arith.mulf %172, %173 : vector<8x32xf32>
    %c1 = arith.constant 1 : index
    %c0_74 = arith.constant 0 : index
    %c0_75 = arith.constant 0 : index
    %175 = vector.load %arg5[%c1, %c0_74, %c0_75] : memref<2x32x96xbf16, #tpu.memory_space<vmem>>, vector<1x32x96xbf16>
    %176 = vector.shape_cast %175 : vector<1x32x96xbf16> to vector<32x96xbf16>
    %c1_76 = arith.constant 1 : index
    %c0_77 = arith.constant 0 : index
    %c0_78 = arith.constant 0 : index
    %177 = vector.load %arg6[%c1_76, %c0_77, %c0_78] : memref<2x1x96xf32, #tpu.memory_space<vmem>>, vector<1x1x96xf32>
    %178 = vector.shape_cast %177 : vector<1x1x96xf32> to vector<1x96xf32>
    %c1_79 = arith.constant 1 : index
    %c0_80 = arith.constant 0 : index
    %c0_81 = arith.constant 0 : index
    %179 = vector.load %arg7[%c1_79, %c0_80, %c0_81] : memref<2x32x32xbf16, #tpu.memory_space<vmem>>, vector<1x32x32xbf16>
    %180 = vector.shape_cast %179 : vector<1x32x32xbf16> to vector<32x32xbf16>
    %c1_82 = arith.constant 1 : index
    %c0_83 = arith.constant 0 : index
    %c0_84 = arith.constant 0 : index
    %181 = vector.load %arg8[%c1_82, %c0_83, %c0_84] : memref<2x1x32xf32, #tpu.memory_space<vmem>>, vector<1x1x32xf32>
    %182 = vector.shape_cast %181 : vector<1x1x32xf32> to vector<1x32xf32>
    %c1_85 = arith.constant 1 : index
    %c0_86 = arith.constant 0 : index
    %c0_87 = arith.constant 0 : index
    %183 = vector.load %arg9[%c1_85, %c0_86, %c0_87] : memref<2x1x32xf32, #tpu.memory_space<vmem>>, vector<1x1x32xf32>
    %184 = vector.shape_cast %183 : vector<1x1x32xf32> to vector<1x32xf32>
    %c1_88 = arith.constant 1 : index
    %c0_89 = arith.constant 0 : index
    %c0_90 = arith.constant 0 : index
    %185 = vector.load %arg10[%c1_88, %c0_89, %c0_90] : memref<2x1x32xf32, #tpu.memory_space<vmem>>, vector<1x1x32xf32>
    %186 = vector.shape_cast %185 : vector<1x1x32xf32> to vector<1x32xf32>
    %c1_91 = arith.constant 1 : index
    %c0_92 = arith.constant 0 : index
    %c0_93 = arith.constant 0 : index
    %c0_94 = arith.constant 0 : index
    %187 = vector.load %arg11[%c1_91, %c0_92, %c0_93, %c0_94] : memref<2x3x32x64xbf16, #tpu.memory_space<vmem>>, vector<1x3x32x64xbf16>
    %188 = vector.shape_cast %187 : vector<1x3x32x64xbf16> to vector<3x32x64xbf16>
    %c1_95 = arith.constant 1 : index
    %c0_96 = arith.constant 0 : index
    %c0_97 = arith.constant 0 : index
    %189 = vector.load %arg12[%c1_95, %c0_96, %c0_97] : memref<2x1x64xf32, #tpu.memory_space<vmem>>, vector<1x1x64xf32>
    %190 = vector.shape_cast %189 : vector<1x1x64xf32> to vector<1x64xf32>
    %c1_98 = arith.constant 1 : index
    %c0_99 = arith.constant 0 : index
    %c0_100 = arith.constant 0 : index
    %191 = vector.load %arg13[%c1_98, %c0_99, %c0_100] : memref<2x64x32xbf16, #tpu.memory_space<vmem>>, vector<1x64x32xbf16>
    %192 = vector.shape_cast %191 : vector<1x64x32xbf16> to vector<64x32xbf16>
    %c1_101 = arith.constant 1 : index
    %c0_102 = arith.constant 0 : index
    %c0_103 = arith.constant 0 : index
    %193 = vector.load %arg14[%c1_101, %c0_102, %c0_103] : memref<2x1x32xf32, #tpu.memory_space<vmem>>, vector<1x1x32xf32>
    %194 = vector.shape_cast %193 : vector<1x1x32xf32> to vector<1x32xf32>
    %c1_104 = arith.constant 1 : index
    %c0_105 = arith.constant 0 : index
    %c0_106 = arith.constant 0 : index
    %195 = vector.load %arg15[%c1_104, %c0_105, %c0_106] : memref<2x1x32xf32, #tpu.memory_space<vmem>>, vector<1x1x32xf32>
    %196 = vector.shape_cast %195 : vector<1x1x32xf32> to vector<1x32xf32>
    %c1_107 = arith.constant 1 : index
    %c0_108 = arith.constant 0 : index
    %c0_109 = arith.constant 0 : index
    %197 = vector.load %arg16[%c1_107, %c0_108, %c0_109] : memref<2x1x32xf32, #tpu.memory_space<vmem>>, vector<1x1x32xf32>
    %198 = vector.shape_cast %197 : vector<1x1x32xf32> to vector<1x32xf32>
    %199 = arith.truncf %174 : vector<8x32xf32> to vector<8x32xbf16>
    %cst_110 = arith.constant dense<0.000000e+00> : vector<8x96xf32>
    %200 = tpu.matmul %199, %176, %cst_110 {dimension_numbers = #tpu.dot_dimension_numbers<[1], [0], [0], [1], [0, 0, 1, 1], [], []>} : vector<8x32xbf16>, vector<32x96xbf16>, vector<8x96xf32> -> vector<8x96xf32>
    %201 = vector.broadcast %178 : vector<1x96xf32> to vector<8x96xf32>
    %202 = arith.addf %200, %201 : vector<8x96xf32>
    %203 = vector.extract_strided_slice %202 {offsets = [0, 0], sizes = [8, 32], strides = [1, 1]} : vector<8x96xf32> to vector<8x32xf32>
    %204 = vector.extract_strided_slice %203 {offsets = [0, 0], sizes = [8, 16], strides = [1, 1]} : vector<8x32xf32> to vector<8x16xf32>
    %205 = vector.extract_strided_slice %203 {offsets = [0, 16], sizes = [8, 16], strides = [1, 1]} : vector<8x32xf32> to vector<8x16xf32>
    %206 = vector.shape_cast %204 : vector<8x16xf32> to vector<1x8x16xf32>
    %207 = vector.shape_cast %205 : vector<8x16xf32> to vector<1x8x16xf32>
    %208 = tpu.concatenate %206, %207 in 0 : vector<1x8x16xf32>, vector<1x8x16xf32> -> vector<2x8x16xf32>
    %209 = arith.truncf %208 : vector<2x8x16xf32> to vector<2x8x16xbf16>
    %210 = vector.extract_strided_slice %202 {offsets = [0, 32], sizes = [8, 32], strides = [1, 1]} : vector<8x96xf32> to vector<8x32xf32>
    %211 = vector.extract_strided_slice %210 {offsets = [0, 0], sizes = [8, 16], strides = [1, 1]} : vector<8x32xf32> to vector<8x16xf32>
    %212 = vector.extract_strided_slice %210 {offsets = [0, 16], sizes = [8, 16], strides = [1, 1]} : vector<8x32xf32> to vector<8x16xf32>
    %213 = vector.shape_cast %211 : vector<8x16xf32> to vector<1x8x16xf32>
    %214 = vector.shape_cast %212 : vector<8x16xf32> to vector<1x8x16xf32>
    %215 = tpu.concatenate %213, %214 in 0 : vector<1x8x16xf32>, vector<1x8x16xf32> -> vector<2x8x16xf32>
    %216 = arith.truncf %215 : vector<2x8x16xf32> to vector<2x8x16xbf16>
    %217 = vector.extract_strided_slice %202 {offsets = [0, 64], sizes = [8, 32], strides = [1, 1]} : vector<8x96xf32> to vector<8x32xf32>
    %218 = vector.extract_strided_slice %217 {offsets = [0, 0], sizes = [8, 16], strides = [1, 1]} : vector<8x32xf32> to vector<8x16xf32>
    %219 = vector.extract_strided_slice %217 {offsets = [0, 16], sizes = [8, 16], strides = [1, 1]} : vector<8x32xf32> to vector<8x16xf32>
    %220 = vector.shape_cast %218 : vector<8x16xf32> to vector<1x8x16xf32>
    %221 = vector.shape_cast %219 : vector<8x16xf32> to vector<1x8x16xf32>
    %222 = tpu.concatenate %220, %221 in 0 : vector<1x8x16xf32>, vector<1x8x16xf32> -> vector<2x8x16xf32>
    %223 = arith.truncf %222 : vector<2x8x16xf32> to vector<2x8x16xbf16>
    "tpu.trace_start"() <{level = 10 : i32, message = "nqd,nkd->nqk"}> : () -> ()
    %cst_111 = arith.constant dense<0.000000e+00> : vector<2x8x8xf32>
    %224 = tpu.matmul %209, %216, %cst_111 {dimension_numbers = #tpu.dot_dimension_numbers<[2], [2], [1], [1], [0, 0, 0, 1, 1, 1], [0], [0]>} : vector<2x8x16xbf16>, vector<2x8x16xbf16>, vector<2x8x8xf32> -> vector<2x8x8xf32>
    "tpu.trace_stop"() : () -> ()
    %cst_112 = arith.constant 2.500000e-01 : f32
    %225 = vector.broadcast %cst_112 : f32 to vector<2x8x8xf32>
    %226 = arith.mulf %224, %225 : vector<2x8x8xf32>
    %227 = vector.shape_cast %5 : vector<1x8xf32> to vector<1x1x8xf32>
    %cst_113 = arith.constant 5.000000e-01 : f32
    %228 = vector.broadcast %cst_113 : f32 to vector<1x1x8xf32>
    %229 = arith.cmpf ogt, %227, %228 : vector<1x1x8xf32>
    %cst_114 = arith.constant -1.000000e+09 : f32
    %230 = vector.shape_cast %229 : vector<1x1x8xi1> to vector<1x1x8xi1>
    %231 = vector.broadcast %230 : vector<1x1x8xi1> to vector<2x8x8xi1>
    %232 = vector.broadcast %cst_114 : f32 to vector<2x8x8xf32>
    %233 = arith.select %231, %232, %226 : vector<2x8x8xi1>, vector<2x8x8xf32>
    %cst_115 = arith.constant dense<0xFF800000> : vector<2x8xf32>
    %234 = vector.multi_reduction <maximumf>, %233, %cst_115 [2] : vector<2x8x8xf32> to vector<2x8xf32>
    %235 = vector.shape_cast %234 : vector<2x8xf32> to vector<2x8x1xf32>
    %236 = vector.broadcast %235 : vector<2x8x1xf32> to vector<2x8x8xf32>
    %237 = arith.subf %233, %236 : vector<2x8x8xf32>
    %238 = math.exp %237 : vector<2x8x8xf32>
    %cst_116 = arith.constant dense<0.000000e+00> : vector<2x8xf32>
    %239 = vector.multi_reduction <add>, %238, %cst_116 [2] : vector<2x8x8xf32> to vector<2x8xf32>
    %240 = vector.shape_cast %239 : vector<2x8xf32> to vector<2x8x1xf32>
    %241 = tpu.reciprocal %240 {approx = true} : vector<2x8x1xf32> -> vector<2x8x1xf32>
    %242 = vector.broadcast %241 : vector<2x8x1xf32> to vector<2x8x8xf32>
    %243 = arith.mulf %238, %242 : vector<2x8x8xf32>
    %244 = arith.truncf %243 : vector<2x8x8xf32> to vector<2x8x8xbf16>
    "tpu.trace_start"() <{level = 10 : i32, message = "nqk,nkd->nqd"}> : () -> ()
    %cst_117 = arith.constant dense<0.000000e+00> : vector<2x8x16xf32>
    %245 = tpu.matmul %244, %223, %cst_117 {dimension_numbers = #tpu.dot_dimension_numbers<[2], [1], [1], [2], [0, 0, 0, 1, 1, 2], [0], [0]>} : vector<2x8x8xbf16>, vector<2x8x16xbf16>, vector<2x8x16xf32> -> vector<2x8x16xf32>
    "tpu.trace_stop"() : () -> ()
    %246 = vector.extract_strided_slice %245 {offsets = [0, 0, 0], sizes = [1, 8, 16], strides = [1, 1, 1]} : vector<2x8x16xf32> to vector<1x8x16xf32>
    %247 = vector.shape_cast %246 : vector<1x8x16xf32> to vector<8x16xf32>
    %248 = vector.extract_strided_slice %245 {offsets = [1, 0, 0], sizes = [1, 8, 16], strides = [1, 1, 1]} : vector<2x8x16xf32> to vector<1x8x16xf32>
    %249 = vector.shape_cast %248 : vector<1x8x16xf32> to vector<8x16xf32>
    %250 = tpu.concatenate %247, %249 in 1 : vector<8x16xf32>, vector<8x16xf32> -> vector<8x32xf32>
    %251 = arith.truncf %250 : vector<8x32xf32> to vector<8x32xbf16>
    %cst_118 = arith.constant dense<0.000000e+00> : vector<8x32xf32>
    %252 = tpu.matmul %251, %180, %cst_118 {dimension_numbers = #tpu.dot_dimension_numbers<[1], [0], [0], [1], [0, 0, 1, 1], [], []>} : vector<8x32xbf16>, vector<32x32xbf16>, vector<8x32xf32> -> vector<8x32xf32>
    %253 = vector.broadcast %182 : vector<1x32xf32> to vector<8x32xf32>
    %254 = arith.addf %252, %253 : vector<8x32xf32>
    %255 = arith.addf %254, %174 : vector<8x32xf32>
    %cst_119 = arith.constant dense<0.000000e+00> : vector<8xf32>
    %256 = vector.multi_reduction <add>, %255, %cst_119 [1] : vector<8x32xf32> to vector<8xf32>
    %257 = vector.shape_cast %256 : vector<8xf32> to vector<8x1xf32>
    %cst_120 = arith.constant 3.200000e+01 : f32
    %258 = vector.broadcast %cst_120 : f32 to vector<8x1xf32>
    %259 = arith.divf %257, %258 : vector<8x1xf32>
    %260 = vector.broadcast %259 : vector<8x1xf32> to vector<8x32xf32>
    %261 = arith.subf %255, %260 : vector<8x32xf32>
    %262 = arith.mulf %261, %261 : vector<8x32xf32>
    %cst_121 = arith.constant dense<0.000000e+00> : vector<8xf32>
    %263 = vector.multi_reduction <add>, %262, %cst_121 [1] : vector<8x32xf32> to vector<8xf32>
    %264 = vector.shape_cast %263 : vector<8xf32> to vector<8x1xf32>
    %cst_122 = arith.constant 3.200000e+01 : f32
    %265 = vector.broadcast %cst_122 : f32 to vector<8x1xf32>
    %266 = arith.divf %264, %265 : vector<8x1xf32>
    %267 = vector.broadcast %259 : vector<8x1xf32> to vector<8x32xf32>
    %268 = arith.subf %255, %267 : vector<8x32xf32>
    %cst_123 = arith.constant 9.99999974E-6 : f32
    %269 = vector.broadcast %cst_123 : f32 to vector<8x1xf32>
    %270 = arith.addf %266, %269 : vector<8x1xf32>
    %271 = math.rsqrt %270 : vector<8x1xf32>
    %272 = vector.broadcast %271 : vector<8x1xf32> to vector<8x32xf32>
    %273 = arith.mulf %268, %272 : vector<8x32xf32>
    %274 = vector.broadcast %184 : vector<1x32xf32> to vector<8x32xf32>
    %275 = arith.mulf %273, %274 : vector<8x32xf32>
    %276 = vector.broadcast %186 : vector<1x32xf32> to vector<8x32xf32>
    %277 = arith.addf %275, %276 : vector<8x32xf32>
    %278 = vector.broadcast %7 : vector<8x1xf32> to vector<8x32xf32>
    %279 = arith.mulf %277, %278 : vector<8x32xf32>
    %280 = tpu.iota {dimensions = array<i32: 0>} : vector<8x1xi32>
    %c1_i32_124 = arith.constant 1 : i32
    %281 = tpu.dynamic_rotate %279 by %c1_i32_124 dim 0 : vector<8x32xf32>, i32 -> vector<8x32xf32>
    %c1_i32_125 = arith.constant 1 : i32
    %282 = vector.broadcast %c1_i32_125 : i32 to vector<8x1xi32>
    %283 = arith.cmpi sge, %280, %282 : vector<8x1xi32>
    %cst_126 = arith.constant 0.000000e+00 : f32
    %284 = vector.shape_cast %283 : vector<8x1xi1> to vector<8x1xi1>
    %285 = vector.broadcast %284 : vector<8x1xi1> to vector<8x32xi1>
    %286 = vector.broadcast %cst_126 : f32 to vector<8x32xf32>
    %287 = arith.select %285, %281, %286 : vector<8x32xi1>, vector<8x32xf32>
    %288 = vector.extract_strided_slice %188 {offsets = [0, 0, 0], sizes = [1, 32, 64], strides = [1, 1, 1]} : vector<3x32x64xbf16> to vector<1x32x64xbf16>
    %289 = vector.shape_cast %288 : vector<1x32x64xbf16> to vector<32x64xbf16>
    %290 = arith.truncf %287 : vector<8x32xf32> to vector<8x32xbf16>
    %cst_127 = arith.constant dense<0.000000e+00> : vector<8x64xf32>
    %291 = tpu.matmul %290, %289, %cst_127 {dimension_numbers = #tpu.dot_dimension_numbers<[1], [0], [0], [1], [0, 0, 1, 1], [], []>} : vector<8x32xbf16>, vector<32x64xbf16>, vector<8x64xf32> -> vector<8x64xf32>
    %292 = vector.extract_strided_slice %188 {offsets = [1, 0, 0], sizes = [1, 32, 64], strides = [1, 1, 1]} : vector<3x32x64xbf16> to vector<1x32x64xbf16>
    %293 = vector.shape_cast %292 : vector<1x32x64xbf16> to vector<32x64xbf16>
    %294 = arith.truncf %279 : vector<8x32xf32> to vector<8x32xbf16>
    %cst_128 = arith.constant dense<0.000000e+00> : vector<8x64xf32>
    %295 = tpu.matmul %294, %293, %cst_128 {dimension_numbers = #tpu.dot_dimension_numbers<[1], [0], [0], [1], [0, 0, 1, 1], [], []>} : vector<8x32xbf16>, vector<32x64xbf16>, vector<8x64xf32> -> vector<8x64xf32>
    %296 = arith.addf %291, %295 : vector<8x64xf32>
    %c7_i32_129 = arith.constant 7 : i32
    %297 = tpu.dynamic_rotate %279 by %c7_i32_129 dim 0 : vector<8x32xf32>, i32 -> vector<8x32xf32>
    %c7_i32_130 = arith.constant 7 : i32
    %298 = vector.broadcast %c7_i32_130 : i32 to vector<8x1xi32>
    %299 = arith.cmpi slt, %280, %298 : vector<8x1xi32>
    %cst_131 = arith.constant 0.000000e+00 : f32
    %300 = vector.shape_cast %299 : vector<8x1xi1> to vector<8x1xi1>
    %301 = vector.broadcast %300 : vector<8x1xi1> to vector<8x32xi1>
    %302 = vector.broadcast %cst_131 : f32 to vector<8x32xf32>
    %303 = arith.select %301, %297, %302 : vector<8x32xi1>, vector<8x32xf32>
    %304 = vector.extract_strided_slice %188 {offsets = [2, 0, 0], sizes = [1, 32, 64], strides = [1, 1, 1]} : vector<3x32x64xbf16> to vector<1x32x64xbf16>
    %305 = vector.shape_cast %304 : vector<1x32x64xbf16> to vector<32x64xbf16>
    %306 = arith.truncf %303 : vector<8x32xf32> to vector<8x32xbf16>
    %cst_132 = arith.constant dense<0.000000e+00> : vector<8x64xf32>
    %307 = tpu.matmul %306, %305, %cst_132 {dimension_numbers = #tpu.dot_dimension_numbers<[1], [0], [0], [1], [0, 0, 1, 1], [], []>} : vector<8x32xbf16>, vector<32x64xbf16>, vector<8x64xf32> -> vector<8x64xf32>
    %308 = arith.addf %296, %307 : vector<8x64xf32>
    %309 = vector.broadcast %190 : vector<1x64xf32> to vector<8x64xf32>
    %310 = arith.addf %308, %309 : vector<8x64xf32>
    %cst_133 = arith.constant 0.000000e+00 : f32
    %311 = vector.broadcast %cst_133 : f32 to vector<8x64xf32>
    %312 = arith.maximumf %310, %311 : vector<8x64xf32>
    %313 = arith.truncf %312 : vector<8x64xf32> to vector<8x64xbf16>
    %cst_134 = arith.constant dense<0.000000e+00> : vector<8x32xf32>
    %314 = tpu.matmul %313, %192, %cst_134 {dimension_numbers = #tpu.dot_dimension_numbers<[1], [0], [0], [1], [0, 0, 1, 1], [], []>} : vector<8x64xbf16>, vector<64x32xbf16>, vector<8x32xf32> -> vector<8x32xf32>
    %315 = vector.broadcast %194 : vector<1x32xf32> to vector<8x32xf32>
    %316 = arith.addf %314, %315 : vector<8x32xf32>
    %317 = arith.addf %316, %279 : vector<8x32xf32>
    %cst_135 = arith.constant dense<0.000000e+00> : vector<8xf32>
    %318 = vector.multi_reduction <add>, %317, %cst_135 [1] : vector<8x32xf32> to vector<8xf32>
    %319 = vector.shape_cast %318 : vector<8xf32> to vector<8x1xf32>
    %cst_136 = arith.constant 3.200000e+01 : f32
    %320 = vector.broadcast %cst_136 : f32 to vector<8x1xf32>
    %321 = arith.divf %319, %320 : vector<8x1xf32>
    %322 = vector.broadcast %321 : vector<8x1xf32> to vector<8x32xf32>
    %323 = arith.subf %317, %322 : vector<8x32xf32>
    %324 = arith.mulf %323, %323 : vector<8x32xf32>
    %cst_137 = arith.constant dense<0.000000e+00> : vector<8xf32>
    %325 = vector.multi_reduction <add>, %324, %cst_137 [1] : vector<8x32xf32> to vector<8xf32>
    %326 = vector.shape_cast %325 : vector<8xf32> to vector<8x1xf32>
    %cst_138 = arith.constant 3.200000e+01 : f32
    %327 = vector.broadcast %cst_138 : f32 to vector<8x1xf32>
    %328 = arith.divf %326, %327 : vector<8x1xf32>
    %329 = vector.broadcast %321 : vector<8x1xf32> to vector<8x32xf32>
    %330 = arith.subf %317, %329 : vector<8x32xf32>
    %cst_139 = arith.constant 9.99999974E-6 : f32
    %331 = vector.broadcast %cst_139 : f32 to vector<8x1xf32>
    %332 = arith.addf %328, %331 : vector<8x1xf32>
    %333 = math.rsqrt %332 : vector<8x1xf32>
    %334 = vector.broadcast %333 : vector<8x1xf32> to vector<8x32xf32>
    %335 = arith.mulf %330, %334 : vector<8x32xf32>
    %336 = vector.broadcast %196 : vector<1x32xf32> to vector<8x32xf32>
    %337 = arith.mulf %335, %336 : vector<8x32xf32>
    %338 = vector.broadcast %198 : vector<1x32xf32> to vector<8x32xf32>
    %339 = arith.addf %337, %338 : vector<8x32xf32>
    %340 = vector.broadcast %7 : vector<8x1xf32> to vector<8x32xf32>
    %341 = arith.mulf %339, %340 : vector<8x32xf32>
    %c0_140 = arith.constant 0 : index
    %c0_141 = arith.constant 0 : index
    %c0_142 = arith.constant 0 : index
    %342 = vector.load %arg17[%c0_140, %c0_141, %c0_142] : memref<1x8x32xf32, #tpu.memory_space<vmem>>, vector<1x8x32xf32>
    %343 = vector.shape_cast %342 : vector<1x8x32xf32> to vector<8x32xf32>
    %344 = vector.shape_cast %341 : vector<8x32xf32> to vector<1x8x32xf32>
    tpu.vector_store %arg17[%c0_140, %c0_141, %c0_142], %344 {strides = array<i32>} : memref<1x8x32xf32, #tpu.memory_space<vmem>>, vector<1x8x32xf32>,
    return
  }
  func.func @transform_0(%arg0: i32) -> (i32, i32, i32) {
    %c0_i32 = arith.constant 0 : i32
    %c0_i32_0 = arith.constant 0 : i32
    %c0_i32_1 = arith.constant 0 : i32
    return %arg0, %c0_i32, %c0_i32_0 : i32, i32, i32
  }
  func.func @transform_1(%arg0: i32) -> (i32, i32, i32) {
    %c0_i32 = arith.constant 0 : i32
    %c0_i32_0 = arith.constant 0 : i32
    %c0_i32_1 = arith.constant 0 : i32
    return %arg0, %c0_i32, %c0_i32_0 : i32, i32, i32
  }
  func.func @transform_2(%arg0: i32) -> (i32, i32, i32) {
    %c0_i32 = arith.constant 0 : i32
    %c0_i32_0 = arith.constant 0 : i32
    %c0_i32_1 = arith.constant 0 : i32
    return %arg0, %c0_i32, %c0_i32_0 : i32, i32, i32
  }
  func.func @transform_3(%arg0: i32) -> (i32, i32) {
    %c0_i32 = arith.constant 0 : i32
    %c0_i32_0 = arith.constant 0 : i32
    %c0_i32_1 = arith.constant 0 : i32
    return %c0_i32, %c0_i32_0 : i32, i32
  }
  func.func @transform_4(%arg0: i32) -> (i32, i32, i32) {
    %c0_i32 = arith.constant 0 : i32
    %c0_i32_0 = arith.constant 0 : i32
    %c0_i32_1 = arith.constant 0 : i32
    %c0_i32_2 = arith.constant 0 : i32
    return %c0_i32, %c0_i32_0, %c0_i32_1 : i32, i32, i32
  }
  func.func @transform_5(%arg0: i32) -> (i32, i32, i32) {
    %c0_i32 = arith.constant 0 : i32
    %c0_i32_0 = arith.constant 0 : i32
    %c0_i32_1 = arith.constant 0 : i32
    %c0_i32_2 = arith.constant 0 : i32
    return %c0_i32, %c0_i32_0, %c0_i32_1 : i32, i32, i32
  }
  func.func @transform_6(%arg0: i32) -> (i32, i32, i32) {
    %c0_i32 = arith.constant 0 : i32
    %c0_i32_0 = arith.constant 0 : i32
    %c0_i32_1 = arith.constant 0 : i32
    %c0_i32_2 = arith.constant 0 : i32
    return %c0_i32, %c0_i32_0, %c0_i32_1 : i32, i32, i32
  }
  func.func @transform_7(%arg0: i32) -> (i32, i32, i32) {
    %c0_i32 = arith.constant 0 : i32
    %c0_i32_0 = arith.constant 0 : i32
    %c0_i32_1 = arith.constant 0 : i32
    %c0_i32_2 = arith.constant 0 : i32
    return %c0_i32, %c0_i32_0, %c0_i32_1 : i32, i32, i32
  }
  func.func @transform_8(%arg0: i32) -> (i32, i32, i32) {
    %c0_i32 = arith.constant 0 : i32
    %c0_i32_0 = arith.constant 0 : i32
    %c0_i32_1 = arith.constant 0 : i32
    %c0_i32_2 = arith.constant 0 : i32
    return %c0_i32, %c0_i32_0, %c0_i32_1 : i32, i32, i32
  }
  func.func @transform_9(%arg0: i32) -> (i32, i32, i32) {
    %c0_i32 = arith.constant 0 : i32
    %c0_i32_0 = arith.constant 0 : i32
    %c0_i32_1 = arith.constant 0 : i32
    %c0_i32_2 = arith.constant 0 : i32
    return %c0_i32, %c0_i32_0, %c0_i32_1 : i32, i32, i32
  }
  func.func @transform_10(%arg0: i32) -> (i32, i32, i32, i32) {
    %c0_i32 = arith.constant 0 : i32
    %c0_i32_0 = arith.constant 0 : i32
    %c0_i32_1 = arith.constant 0 : i32
    %c0_i32_2 = arith.constant 0 : i32
    %c0_i32_3 = arith.constant 0 : i32
    return %c0_i32, %c0_i32_0, %c0_i32_1, %c0_i32_2 : i32, i32, i32, i32
  }
  func.func @transform_11(%arg0: i32) -> (i32, i32, i32) {
    %c0_i32 = arith.constant 0 : i32
    %c0_i32_0 = arith.constant 0 : i32
    %c0_i32_1 = arith.constant 0 : i32
    %c0_i32_2 = arith.constant 0 : i32
    return %c0_i32, %c0_i32_0, %c0_i32_1 : i32, i32, i32
  }
  func.func @transform_12(%arg0: i32) -> (i32, i32, i32) {
    %c0_i32 = arith.constant 0 : i32
    %c0_i32_0 = arith.constant 0 : i32
    %c0_i32_1 = arith.constant 0 : i32
    %c0_i32_2 = arith.constant 0 : i32
    return %c0_i32, %c0_i32_0, %c0_i32_1 : i32, i32, i32
  }
  func.func @transform_13(%arg0: i32) -> (i32, i32, i32) {
    %c0_i32 = arith.constant 0 : i32
    %c0_i32_0 = arith.constant 0 : i32
    %c0_i32_1 = arith.constant 0 : i32
    %c0_i32_2 = arith.constant 0 : i32
    return %c0_i32, %c0_i32_0, %c0_i32_1 : i32, i32, i32
  }
  func.func @transform_14(%arg0: i32) -> (i32, i32, i32) {
    %c0_i32 = arith.constant 0 : i32
    %c0_i32_0 = arith.constant 0 : i32
    %c0_i32_1 = arith.constant 0 : i32
    %c0_i32_2 = arith.constant 0 : i32
    return %c0_i32, %c0_i32_0, %c0_i32_1 : i32, i32, i32
  }
  func.func @transform_15(%arg0: i32) -> (i32, i32, i32) {
    %c0_i32 = arith.constant 0 : i32
    %c0_i32_0 = arith.constant 0 : i32
    %c0_i32_1 = arith.constant 0 : i32
    %c0_i32_2 = arith.constant 0 : i32
    return %c0_i32, %c0_i32_0, %c0_i32_1 : i32, i32, i32
  }
  func.func @transform_16(%arg0: i32) -> (i32, i32, i32) {
    %c0_i32 = arith.constant 0 : i32
    %c0_i32_0 = arith.constant 0 : i32
    %c0_i32_1 = arith.constant 0 : i32
    return %arg0, %c0_i32, %c0_i32_0 : i32, i32, i32
  }
}

module attributes {stable_mosaic.version = 11 : i64} {
  func.func @_va_kernel(%arg0: i32, %arg1: memref<1x8x32xf32, #tpu.memory_space<vmem>>, %arg2: memref<1x8x1xf32, #tpu.memory_space<vmem>>, %arg3: memref<1x8x32xf32, #tpu.memory_space<vmem>>, %arg4: memref<1x8x32xf32, #tpu.memory_space<vmem>>, %arg5: memref<3x3x32x32xbf16, #tpu.memory_space<vmem>>, %arg6: memref<3x1x32xf32, #tpu.memory_space<vmem>>, %arg7: memref<3x1x32xf32, #tpu.memory_space<vmem>>, %arg8: memref<3x1x32xf32, #tpu.memory_space<vmem>>, %arg9: memref<3x3x32x32xbf16, #tpu.memory_space<vmem>>, %arg10: memref<3x1x32xf32, #tpu.memory_space<vmem>>, %arg11: memref<3x1x32xf32, #tpu.memory_space<vmem>>, %arg12: memref<3x1x32xf32, #tpu.memory_space<vmem>>, %arg13: memref<3x32x1xbf16, #tpu.memory_space<vmem>>, %arg14: memref<3x1x1xf32, #tpu.memory_space<vmem>>, %arg15: memref<1x8x3xf32, #tpu.memory_space<vmem>>, %arg16: memref<1x8x32xf32, #tpu.memory_space<vmem>>) attributes {dimension_semantics = [#tpu.dimension_semantics<parallel>], iteration_bounds = array<i64: 2>, scalar_prefetch = 0 : i64, scratch_operands = 0 : i64, tpu.core_type = #tpu.core_type<tc>, window_params = [{transform_indices = @transform_0, window_bounds = array<i64: 1, 8, 32>}, {transform_indices = @transform_1, window_bounds = array<i64: 1, 8, 1>}, {transform_indices = @transform_2, window_bounds = array<i64: 1, 8, 32>}, {transform_indices = @transform_3, window_bounds = array<i64: 1, 8, 32>}, {pipeline_mode = #tpu.pipeline_mode<synchronous>, transform_indices = @transform_4, window_bounds = array<i64: 3, 3, 32, 32>}, {pipeline_mode = #tpu.pipeline_mode<synchronous>, transform_indices = @transform_5, window_bounds = array<i64: 3, 1, 32>}, {pipeline_mode = #tpu.pipeline_mode<synchronous>, transform_indices = @transform_6, window_bounds = array<i64: 3, 1, 32>}, {pipeline_mode = #tpu.pipeline_mode<synchronous>, transform_indices = @transform_7, window_bounds = array<i64: 3, 1, 32>}, {pipeline_mode = #tpu.pipeline_mode<synchronous>, transform_indices = @transform_8, window_bounds = array<i64: 3, 3, 32, 32>}, {pipeline_mode = #tpu.pipeline_mode<synchronous>, transform_indices = @transform_9, window_bounds = array<i64: 3, 1, 32>}, {pipeline_mode = #tpu.pipeline_mode<synchronous>, transform_indices = @transform_10, window_bounds = array<i64: 3, 1, 32>}, {pipeline_mode = #tpu.pipeline_mode<synchronous>, transform_indices = @transform_11, window_bounds = array<i64: 3, 1, 32>}, {pipeline_mode = #tpu.pipeline_mode<synchronous>, transform_indices = @transform_12, window_bounds = array<i64: 3, 32, 1>}, {pipeline_mode = #tpu.pipeline_mode<synchronous>, transform_indices = @transform_13, window_bounds = array<i64: 3, 1, 1>}, {transform_indices = @transform_14, window_bounds = array<i64: 1, 8, 3>}, {transform_indices = @transform_15, window_bounds = array<i64: 1, 8, 32>}]} {
    %c0 = arith.constant 0 : index
    %c0_0 = arith.constant 0 : index
    %c0_1 = arith.constant 0 : index
    %0 = vector.load %arg1[%c0, %c0_0, %c0_1] : memref<1x8x32xf32, #tpu.memory_space<vmem>>, vector<1x8x32xf32>
    %1 = vector.shape_cast %0 : vector<1x8x32xf32> to vector<8x32xf32>
    %c0_2 = arith.constant 0 : index
    %c0_3 = arith.constant 0 : index
    %c0_4 = arith.constant 0 : index
    %2 = vector.load %arg2[%c0_2, %c0_3, %c0_4] : memref<1x8x1xf32, #tpu.memory_space<vmem>>, vector<1x8x1xf32>
    %3 = vector.shape_cast %2 : vector<1x8x1xf32> to vector<8x1xf32>
    %c0_5 = arith.constant 0 : index
    %c0_6 = arith.constant 0 : index
    %c0_7 = arith.constant 0 : index
    %c0_8 = arith.constant 0 : index
    %4 = vector.load %arg5[%c0_5, %c0_6, %c0_7, %c0_8] : memref<3x3x32x32xbf16, #tpu.memory_space<vmem>>, vector<1x3x32x32xbf16>
    %5 = vector.shape_cast %4 : vector<1x3x32x32xbf16> to vector<3x32x32xbf16>
    %c0_9 = arith.constant 0 : index
    %c0_10 = arith.constant 0 : index
    %c0_11 = arith.constant 0 : index
    %6 = vector.load %arg6[%c0_9, %c0_10, %c0_11] : memref<3x1x32xf32, #tpu.memory_space<vmem>>, vector<1x1x32xf32>
    %7 = vector.shape_cast %6 : vector<1x1x32xf32> to vector<1x32xf32>
    %8 = tpu.iota {dimensions = array<i32: 0>} : vector<8x1xi32>
    %c1_i32 = arith.constant 1 : i32
    %9 = tpu.dynamic_rotate %1 by %c1_i32 dim 0 : vector<8x32xf32>, i32 -> vector<8x32xf32>
    %c1_i32_12 = arith.constant 1 : i32
    %10 = vector.broadcast %c1_i32_12 : i32 to vector<8x1xi32>
    %11 = arith.cmpi sge, %8, %10 : vector<8x1xi32>
    %cst = arith.constant 0.000000e+00 : f32
    %12 = vector.shape_cast %11 : vector<8x1xi1> to vector<8x1xi1>
    %13 = vector.broadcast %12 : vector<8x1xi1> to vector<8x32xi1>
    %14 = vector.broadcast %cst : f32 to vector<8x32xf32>
    %15 = arith.select %13, %9, %14 : vector<8x32xi1>, vector<8x32xf32>
    %16 = vector.extract_strided_slice %5 {offsets = [0, 0, 0], sizes = [1, 32, 32], strides = [1, 1, 1]} : vector<3x32x32xbf16> to vector<1x32x32xbf16>
    %17 = vector.shape_cast %16 : vector<1x32x32xbf16> to vector<32x32xbf16>
    %18 = arith.truncf %15 : vector<8x32xf32> to vector<8x32xbf16>
    %cst_13 = arith.constant dense<0.000000e+00> : vector<8x32xf32>
    %19 = tpu.matmul %18, %17, %cst_13 {dimension_numbers = #tpu.dot_dimension_numbers<[1], [0], [0], [1], [0, 0, 1, 1], [], []>} : vector<8x32xbf16>, vector<32x32xbf16>, vector<8x32xf32> -> vector<8x32xf32>
    %20 = vector.extract_strided_slice %5 {offsets = [1, 0, 0], sizes = [1, 32, 32], strides = [1, 1, 1]} : vector<3x32x32xbf16> to vector<1x32x32xbf16>
    %21 = vector.shape_cast %20 : vector<1x32x32xbf16> to vector<32x32xbf16>
    %22 = arith.truncf %1 : vector<8x32xf32> to vector<8x32xbf16>
    %cst_14 = arith.constant dense<0.000000e+00> : vector<8x32xf32>
    %23 = tpu.matmul %22, %21, %cst_14 {dimension_numbers = #tpu.dot_dimension_numbers<[1], [0], [0], [1], [0, 0, 1, 1], [], []>} : vector<8x32xbf16>, vector<32x32xbf16>, vector<8x32xf32> -> vector<8x32xf32>
    %24 = arith.addf %19, %23 : vector<8x32xf32>
    %c7_i32 = arith.constant 7 : i32
    %25 = tpu.dynamic_rotate %1 by %c7_i32 dim 0 : vector<8x32xf32>, i32 -> vector<8x32xf32>
    %c7_i32_15 = arith.constant 7 : i32
    %26 = vector.broadcast %c7_i32_15 : i32 to vector<8x1xi32>
    %27 = arith.cmpi slt, %8, %26 : vector<8x1xi32>
    %cst_16 = arith.constant 0.000000e+00 : f32
    %28 = vector.shape_cast %27 : vector<8x1xi1> to vector<8x1xi1>
    %29 = vector.broadcast %28 : vector<8x1xi1> to vector<8x32xi1>
    %30 = vector.broadcast %cst_16 : f32 to vector<8x32xf32>
    %31 = arith.select %29, %25, %30 : vector<8x32xi1>, vector<8x32xf32>
    %32 = vector.extract_strided_slice %5 {offsets = [2, 0, 0], sizes = [1, 32, 32], strides = [1, 1, 1]} : vector<3x32x32xbf16> to vector<1x32x32xbf16>
    %33 = vector.shape_cast %32 : vector<1x32x32xbf16> to vector<32x32xbf16>
    %34 = arith.truncf %31 : vector<8x32xf32> to vector<8x32xbf16>
    %cst_17 = arith.constant dense<0.000000e+00> : vector<8x32xf32>
    %35 = tpu.matmul %34, %33, %cst_17 {dimension_numbers = #tpu.dot_dimension_numbers<[1], [0], [0], [1], [0, 0, 1, 1], [], []>} : vector<8x32xbf16>, vector<32x32xbf16>, vector<8x32xf32> -> vector<8x32xf32>
    %36 = arith.addf %24, %35 : vector<8x32xf32>
    %37 = vector.broadcast %7 : vector<1x32xf32> to vector<8x32xf32>
    %38 = arith.addf %36, %37 : vector<8x32xf32>
    %cst_18 = arith.constant 0.000000e+00 : f32
    %39 = vector.broadcast %cst_18 : f32 to vector<8x32xf32>
    %40 = arith.maximumf %38, %39 : vector<8x32xf32>
    %c0_19 = arith.constant 0 : index
    %c0_20 = arith.constant 0 : index
    %c0_21 = arith.constant 0 : index
    %41 = vector.load %arg7[%c0_19, %c0_20, %c0_21] : memref<3x1x32xf32, #tpu.memory_space<vmem>>, vector<1x1x32xf32>
    %42 = vector.shape_cast %41 : vector<1x1x32xf32> to vector<1x32xf32>
    %c0_22 = arith.constant 0 : index
    %c0_23 = arith.constant 0 : index
    %c0_24 = arith.constant 0 : index
    %43 = vector.load %arg8[%c0_22, %c0_23, %c0_24] : memref<3x1x32xf32, #tpu.memory_space<vmem>>, vector<1x1x32xf32>
    %44 = vector.shape_cast %43 : vector<1x1x32xf32> to vector<1x32xf32>
    %cst_25 = arith.constant dense<0.000000e+00> : vector<8xf32>
    %45 = vector.multi_reduction <add>, %40, %cst_25 [1] : vector<8x32xf32> to vector<8xf32>
    %46 = vector.shape_cast %45 : vector<8xf32> to vector<8x1xf32>
    %cst_26 = arith.constant 3.200000e+01 : f32
    %47 = vector.broadcast %cst_26 : f32 to vector<8x1xf32>
    %48 = arith.divf %46, %47 : vector<8x1xf32>
    %49 = vector.broadcast %48 : vector<8x1xf32> to vector<8x32xf32>
    %50 = arith.subf %40, %49 : vector<8x32xf32>
    %51 = arith.mulf %50, %50 : vector<8x32xf32>
    %cst_27 = arith.constant dense<0.000000e+00> : vector<8xf32>
    %52 = vector.multi_reduction <add>, %51, %cst_27 [1] : vector<8x32xf32> to vector<8xf32>
    %53 = vector.shape_cast %52 : vector<8xf32> to vector<8x1xf32>
    %cst_28 = arith.constant 3.200000e+01 : f32
    %54 = vector.broadcast %cst_28 : f32 to vector<8x1xf32>
    %55 = arith.divf %53, %54 : vector<8x1xf32>
    %56 = vector.broadcast %48 : vector<8x1xf32> to vector<8x32xf32>
    %57 = arith.subf %40, %56 : vector<8x32xf32>
    %cst_29 = arith.constant 9.99999974E-6 : f32
    %58 = vector.broadcast %cst_29 : f32 to vector<8x1xf32>
    %59 = arith.addf %55, %58 : vector<8x1xf32>
    %60 = math.rsqrt %59 : vector<8x1xf32>
    %61 = vector.broadcast %60 : vector<8x1xf32> to vector<8x32xf32>
    %62 = arith.mulf %57, %61 : vector<8x32xf32>
    %63 = vector.broadcast %42 : vector<1x32xf32> to vector<8x32xf32>
    %64 = arith.mulf %62, %63 : vector<8x32xf32>
    %65 = vector.broadcast %44 : vector<1x32xf32> to vector<8x32xf32>
    %66 = arith.addf %64, %65 : vector<8x32xf32>
    %c0_30 = arith.constant 0 : index
    %c0_31 = arith.constant 0 : index
    %c0_32 = arith.constant 0 : index
    %c0_33 = arith.constant 0 : index
    %67 = vector.load %arg9[%c0_30, %c0_31, %c0_32, %c0_33] : memref<3x3x32x32xbf16, #tpu.memory_space<vmem>>, vector<1x3x32x32xbf16>
    %68 = vector.shape_cast %67 : vector<1x3x32x32xbf16> to vector<3x32x32xbf16>
    %c0_34 = arith.constant 0 : index
    %c0_35 = arith.constant 0 : index
    %c0_36 = arith.constant 0 : index
    %69 = vector.load %arg10[%c0_34, %c0_35, %c0_36] : memref<3x1x32xf32, #tpu.memory_space<vmem>>, vector<1x1x32xf32>
    %70 = vector.shape_cast %69 : vector<1x1x32xf32> to vector<1x32xf32>
    %71 = tpu.iota {dimensions = array<i32: 0>} : vector<8x1xi32>
    %c1_i32_37 = arith.constant 1 : i32
    %72 = tpu.dynamic_rotate %66 by %c1_i32_37 dim 0 : vector<8x32xf32>, i32 -> vector<8x32xf32>
    %c1_i32_38 = arith.constant 1 : i32
    %73 = vector.broadcast %c1_i32_38 : i32 to vector<8x1xi32>
    %74 = arith.cmpi sge, %71, %73 : vector<8x1xi32>
    %cst_39 = arith.constant 0.000000e+00 : f32
    %75 = vector.shape_cast %74 : vector<8x1xi1> to vector<8x1xi1>
    %76 = vector.broadcast %75 : vector<8x1xi1> to vector<8x32xi1>
    %77 = vector.broadcast %cst_39 : f32 to vector<8x32xf32>
    %78 = arith.select %76, %72, %77 : vector<8x32xi1>, vector<8x32xf32>
    %79 = vector.extract_strided_slice %68 {offsets = [0, 0, 0], sizes = [1, 32, 32], strides = [1, 1, 1]} : vector<3x32x32xbf16> to vector<1x32x32xbf16>
    %80 = vector.shape_cast %79 : vector<1x32x32xbf16> to vector<32x32xbf16>
    %81 = arith.truncf %78 : vector<8x32xf32> to vector<8x32xbf16>
    %cst_40 = arith.constant dense<0.000000e+00> : vector<8x32xf32>
    %82 = tpu.matmul %81, %80, %cst_40 {dimension_numbers = #tpu.dot_dimension_numbers<[1], [0], [0], [1], [0, 0, 1, 1], [], []>} : vector<8x32xbf16>, vector<32x32xbf16>, vector<8x32xf32> -> vector<8x32xf32>
    %83 = vector.extract_strided_slice %68 {offsets = [1, 0, 0], sizes = [1, 32, 32], strides = [1, 1, 1]} : vector<3x32x32xbf16> to vector<1x32x32xbf16>
    %84 = vector.shape_cast %83 : vector<1x32x32xbf16> to vector<32x32xbf16>
    %85 = arith.truncf %66 : vector<8x32xf32> to vector<8x32xbf16>
    %cst_41 = arith.constant dense<0.000000e+00> : vector<8x32xf32>
    %86 = tpu.matmul %85, %84, %cst_41 {dimension_numbers = #tpu.dot_dimension_numbers<[1], [0], [0], [1], [0, 0, 1, 1], [], []>} : vector<8x32xbf16>, vector<32x32xbf16>, vector<8x32xf32> -> vector<8x32xf32>
    %87 = arith.addf %82, %86 : vector<8x32xf32>
    %c7_i32_42 = arith.constant 7 : i32
    %88 = tpu.dynamic_rotate %66 by %c7_i32_42 dim 0 : vector<8x32xf32>, i32 -> vector<8x32xf32>
    %c7_i32_43 = arith.constant 7 : i32
    %89 = vector.broadcast %c7_i32_43 : i32 to vector<8x1xi32>
    %90 = arith.cmpi slt, %71, %89 : vector<8x1xi32>
    %cst_44 = arith.constant 0.000000e+00 : f32
    %91 = vector.shape_cast %90 : vector<8x1xi1> to vector<8x1xi1>
    %92 = vector.broadcast %91 : vector<8x1xi1> to vector<8x32xi1>
    %93 = vector.broadcast %cst_44 : f32 to vector<8x32xf32>
    %94 = arith.select %92, %88, %93 : vector<8x32xi1>, vector<8x32xf32>
    %95 = vector.extract_strided_slice %68 {offsets = [2, 0, 0], sizes = [1, 32, 32], strides = [1, 1, 1]} : vector<3x32x32xbf16> to vector<1x32x32xbf16>
    %96 = vector.shape_cast %95 : vector<1x32x32xbf16> to vector<32x32xbf16>
    %97 = arith.truncf %94 : vector<8x32xf32> to vector<8x32xbf16>
    %cst_45 = arith.constant dense<0.000000e+00> : vector<8x32xf32>
    %98 = tpu.matmul %97, %96, %cst_45 {dimension_numbers = #tpu.dot_dimension_numbers<[1], [0], [0], [1], [0, 0, 1, 1], [], []>} : vector<8x32xbf16>, vector<32x32xbf16>, vector<8x32xf32> -> vector<8x32xf32>
    %99 = arith.addf %87, %98 : vector<8x32xf32>
    %100 = vector.broadcast %70 : vector<1x32xf32> to vector<8x32xf32>
    %101 = arith.addf %99, %100 : vector<8x32xf32>
    %cst_46 = arith.constant 0.000000e+00 : f32
    %102 = vector.broadcast %cst_46 : f32 to vector<8x32xf32>
    %103 = arith.maximumf %101, %102 : vector<8x32xf32>
    %c0_47 = arith.constant 0 : index
    %c0_48 = arith.constant 0 : index
    %c0_49 = arith.constant 0 : index
    %104 = vector.load %arg11[%c0_47, %c0_48, %c0_49] : memref<3x1x32xf32, #tpu.memory_space<vmem>>, vector<1x1x32xf32>
    %105 = vector.shape_cast %104 : vector<1x1x32xf32> to vector<1x32xf32>
    %c0_50 = arith.constant 0 : index
    %c0_51 = arith.constant 0 : index
    %c0_52 = arith.constant 0 : index
    %106 = vector.load %arg12[%c0_50, %c0_51, %c0_52] : memref<3x1x32xf32, #tpu.memory_space<vmem>>, vector<1x1x32xf32>
    %107 = vector.shape_cast %106 : vector<1x1x32xf32> to vector<1x32xf32>
    %cst_53 = arith.constant dense<0.000000e+00> : vector<8xf32>
    %108 = vector.multi_reduction <add>, %103, %cst_53 [1] : vector<8x32xf32> to vector<8xf32>
    %109 = vector.shape_cast %108 : vector<8xf32> to vector<8x1xf32>
    %cst_54 = arith.constant 3.200000e+01 : f32
    %110 = vector.broadcast %cst_54 : f32 to vector<8x1xf32>
    %111 = arith.divf %109, %110 : vector<8x1xf32>
    %112 = vector.broadcast %111 : vector<8x1xf32> to vector<8x32xf32>
    %113 = arith.subf %103, %112 : vector<8x32xf32>
    %114 = arith.mulf %113, %113 : vector<8x32xf32>
    %cst_55 = arith.constant dense<0.000000e+00> : vector<8xf32>
    %115 = vector.multi_reduction <add>, %114, %cst_55 [1] : vector<8x32xf32> to vector<8xf32>
    %116 = vector.shape_cast %115 : vector<8xf32> to vector<8x1xf32>
    %cst_56 = arith.constant 3.200000e+01 : f32
    %117 = vector.broadcast %cst_56 : f32 to vector<8x1xf32>
    %118 = arith.divf %116, %117 : vector<8x1xf32>
    %119 = vector.broadcast %111 : vector<8x1xf32> to vector<8x32xf32>
    %120 = arith.subf %103, %119 : vector<8x32xf32>
    %cst_57 = arith.constant 9.99999974E-6 : f32
    %121 = vector.broadcast %cst_57 : f32 to vector<8x1xf32>
    %122 = arith.addf %118, %121 : vector<8x1xf32>
    %123 = math.rsqrt %122 : vector<8x1xf32>
    %124 = vector.broadcast %123 : vector<8x1xf32> to vector<8x32xf32>
    %125 = arith.mulf %120, %124 : vector<8x32xf32>
    %126 = vector.broadcast %105 : vector<1x32xf32> to vector<8x32xf32>
    %127 = arith.mulf %125, %126 : vector<8x32xf32>
    %128 = vector.broadcast %107 : vector<1x32xf32> to vector<8x32xf32>
    %129 = arith.addf %127, %128 : vector<8x32xf32>
    %c0_58 = arith.constant 0 : index
    %c0_59 = arith.constant 0 : index
    %c0_60 = arith.constant 0 : index
    %130 = vector.load %arg13[%c0_58, %c0_59, %c0_60] : memref<3x32x1xbf16, #tpu.memory_space<vmem>>, vector<1x32x1xbf16>
    %131 = vector.shape_cast %130 : vector<1x32x1xbf16> to vector<32x1xbf16>
    %132 = arith.truncf %129 : vector<8x32xf32> to vector<8x32xbf16>
    %cst_61 = arith.constant dense<0.000000e+00> : vector<8x1xf32>
    %133 = tpu.matmul %132, %131, %cst_61 {dimension_numbers = #tpu.dot_dimension_numbers<[1], [0], [0], [1], [0, 0, 1, 1], [], []>} : vector<8x32xbf16>, vector<32x1xbf16>, vector<8x1xf32> -> vector<8x1xf32>
    %c0_62 = arith.constant 0 : index
    %c0_63 = arith.constant 0 : index
    %c0_64 = arith.constant 0 : index
    %134 = vector.load %arg14[%c0_62, %c0_63, %c0_64] : memref<3x1x1xf32, #tpu.memory_space<vmem>>, vector<1x1x1xf32>
    %135 = vector.shape_cast %134 : vector<1x1x1xf32> to vector<1x1xf32>
    %136 = vector.broadcast %135 : vector<1x1xf32> to vector<8x1xf32>
    %137 = arith.addf %133, %136 : vector<8x1xf32>
    %138 = arith.mulf %137, %3 : vector<8x1xf32>
    %c1 = arith.constant 1 : index
    %c0_65 = arith.constant 0 : index
    %c0_66 = arith.constant 0 : index
    %c0_67 = arith.constant 0 : index
    %139 = vector.load %arg5[%c1, %c0_65, %c0_66, %c0_67] : memref<3x3x32x32xbf16, #tpu.memory_space<vmem>>, vector<1x3x32x32xbf16>
    %140 = vector.shape_cast %139 : vector<1x3x32x32xbf16> to vector<3x32x32xbf16>
    %c1_68 = arith.constant 1 : index
    %c0_69 = arith.constant 0 : index
    %c0_70 = arith.constant 0 : index
    %141 = vector.load %arg6[%c1_68, %c0_69, %c0_70] : memref<3x1x32xf32, #tpu.memory_space<vmem>>, vector<1x1x32xf32>
    %142 = vector.shape_cast %141 : vector<1x1x32xf32> to vector<1x32xf32>
    %143 = tpu.iota {dimensions = array<i32: 0>} : vector<8x1xi32>
    %c1_i32_71 = arith.constant 1 : i32
    %144 = tpu.dynamic_rotate %1 by %c1_i32_71 dim 0 : vector<8x32xf32>, i32 -> vector<8x32xf32>
    %c1_i32_72 = arith.constant 1 : i32
    %145 = vector.broadcast %c1_i32_72 : i32 to vector<8x1xi32>
    %146 = arith.cmpi sge, %143, %145 : vector<8x1xi32>
    %cst_73 = arith.constant 0.000000e+00 : f32
    %147 = vector.shape_cast %146 : vector<8x1xi1> to vector<8x1xi1>
    %148 = vector.broadcast %147 : vector<8x1xi1> to vector<8x32xi1>
    %149 = vector.broadcast %cst_73 : f32 to vector<8x32xf32>
    %150 = arith.select %148, %144, %149 : vector<8x32xi1>, vector<8x32xf32>
    %151 = vector.extract_strided_slice %140 {offsets = [0, 0, 0], sizes = [1, 32, 32], strides = [1, 1, 1]} : vector<3x32x32xbf16> to vector<1x32x32xbf16>
    %152 = vector.shape_cast %151 : vector<1x32x32xbf16> to vector<32x32xbf16>
    %153 = arith.truncf %150 : vector<8x32xf32> to vector<8x32xbf16>
    %cst_74 = arith.constant dense<0.000000e+00> : vector<8x32xf32>
    %154 = tpu.matmul %153, %152, %cst_74 {dimension_numbers = #tpu.dot_dimension_numbers<[1], [0], [0], [1], [0, 0, 1, 1], [], []>} : vector<8x32xbf16>, vector<32x32xbf16>, vector<8x32xf32> -> vector<8x32xf32>
    %155 = vector.extract_strided_slice %140 {offsets = [1, 0, 0], sizes = [1, 32, 32], strides = [1, 1, 1]} : vector<3x32x32xbf16> to vector<1x32x32xbf16>
    %156 = vector.shape_cast %155 : vector<1x32x32xbf16> to vector<32x32xbf16>
    %157 = arith.truncf %1 : vector<8x32xf32> to vector<8x32xbf16>
    %cst_75 = arith.constant dense<0.000000e+00> : vector<8x32xf32>
    %158 = tpu.matmul %157, %156, %cst_75 {dimension_numbers = #tpu.dot_dimension_numbers<[1], [0], [0], [1], [0, 0, 1, 1], [], []>} : vector<8x32xbf16>, vector<32x32xbf16>, vector<8x32xf32> -> vector<8x32xf32>
    %159 = arith.addf %154, %158 : vector<8x32xf32>
    %c7_i32_76 = arith.constant 7 : i32
    %160 = tpu.dynamic_rotate %1 by %c7_i32_76 dim 0 : vector<8x32xf32>, i32 -> vector<8x32xf32>
    %c7_i32_77 = arith.constant 7 : i32
    %161 = vector.broadcast %c7_i32_77 : i32 to vector<8x1xi32>
    %162 = arith.cmpi slt, %143, %161 : vector<8x1xi32>
    %cst_78 = arith.constant 0.000000e+00 : f32
    %163 = vector.shape_cast %162 : vector<8x1xi1> to vector<8x1xi1>
    %164 = vector.broadcast %163 : vector<8x1xi1> to vector<8x32xi1>
    %165 = vector.broadcast %cst_78 : f32 to vector<8x32xf32>
    %166 = arith.select %164, %160, %165 : vector<8x32xi1>, vector<8x32xf32>
    %167 = vector.extract_strided_slice %140 {offsets = [2, 0, 0], sizes = [1, 32, 32], strides = [1, 1, 1]} : vector<3x32x32xbf16> to vector<1x32x32xbf16>
    %168 = vector.shape_cast %167 : vector<1x32x32xbf16> to vector<32x32xbf16>
    %169 = arith.truncf %166 : vector<8x32xf32> to vector<8x32xbf16>
    %cst_79 = arith.constant dense<0.000000e+00> : vector<8x32xf32>
    %170 = tpu.matmul %169, %168, %cst_79 {dimension_numbers = #tpu.dot_dimension_numbers<[1], [0], [0], [1], [0, 0, 1, 1], [], []>} : vector<8x32xbf16>, vector<32x32xbf16>, vector<8x32xf32> -> vector<8x32xf32>
    %171 = arith.addf %159, %170 : vector<8x32xf32>
    %172 = vector.broadcast %142 : vector<1x32xf32> to vector<8x32xf32>
    %173 = arith.addf %171, %172 : vector<8x32xf32>
    %cst_80 = arith.constant 0.000000e+00 : f32
    %174 = vector.broadcast %cst_80 : f32 to vector<8x32xf32>
    %175 = arith.maximumf %173, %174 : vector<8x32xf32>
    %c1_81 = arith.constant 1 : index
    %c0_82 = arith.constant 0 : index
    %c0_83 = arith.constant 0 : index
    %176 = vector.load %arg7[%c1_81, %c0_82, %c0_83] : memref<3x1x32xf32, #tpu.memory_space<vmem>>, vector<1x1x32xf32>
    %177 = vector.shape_cast %176 : vector<1x1x32xf32> to vector<1x32xf32>
    %c1_84 = arith.constant 1 : index
    %c0_85 = arith.constant 0 : index
    %c0_86 = arith.constant 0 : index
    %178 = vector.load %arg8[%c1_84, %c0_85, %c0_86] : memref<3x1x32xf32, #tpu.memory_space<vmem>>, vector<1x1x32xf32>
    %179 = vector.shape_cast %178 : vector<1x1x32xf32> to vector<1x32xf32>
    %cst_87 = arith.constant dense<0.000000e+00> : vector<8xf32>
    %180 = vector.multi_reduction <add>, %175, %cst_87 [1] : vector<8x32xf32> to vector<8xf32>
    %181 = vector.shape_cast %180 : vector<8xf32> to vector<8x1xf32>
    %cst_88 = arith.constant 3.200000e+01 : f32
    %182 = vector.broadcast %cst_88 : f32 to vector<8x1xf32>
    %183 = arith.divf %181, %182 : vector<8x1xf32>
    %184 = vector.broadcast %183 : vector<8x1xf32> to vector<8x32xf32>
    %185 = arith.subf %175, %184 : vector<8x32xf32>
    %186 = arith.mulf %185, %185 : vector<8x32xf32>
    %cst_89 = arith.constant dense<0.000000e+00> : vector<8xf32>
    %187 = vector.multi_reduction <add>, %186, %cst_89 [1] : vector<8x32xf32> to vector<8xf32>
    %188 = vector.shape_cast %187 : vector<8xf32> to vector<8x1xf32>
    %cst_90 = arith.constant 3.200000e+01 : f32
    %189 = vector.broadcast %cst_90 : f32 to vector<8x1xf32>
    %190 = arith.divf %188, %189 : vector<8x1xf32>
    %191 = vector.broadcast %183 : vector<8x1xf32> to vector<8x32xf32>
    %192 = arith.subf %175, %191 : vector<8x32xf32>
    %cst_91 = arith.constant 9.99999974E-6 : f32
    %193 = vector.broadcast %cst_91 : f32 to vector<8x1xf32>
    %194 = arith.addf %190, %193 : vector<8x1xf32>
    %195 = math.rsqrt %194 : vector<8x1xf32>
    %196 = vector.broadcast %195 : vector<8x1xf32> to vector<8x32xf32>
    %197 = arith.mulf %192, %196 : vector<8x32xf32>
    %198 = vector.broadcast %177 : vector<1x32xf32> to vector<8x32xf32>
    %199 = arith.mulf %197, %198 : vector<8x32xf32>
    %200 = vector.broadcast %179 : vector<1x32xf32> to vector<8x32xf32>
    %201 = arith.addf %199, %200 : vector<8x32xf32>
    %c1_92 = arith.constant 1 : index
    %c0_93 = arith.constant 0 : index
    %c0_94 = arith.constant 0 : index
    %c0_95 = arith.constant 0 : index
    %202 = vector.load %arg9[%c1_92, %c0_93, %c0_94, %c0_95] : memref<3x3x32x32xbf16, #tpu.memory_space<vmem>>, vector<1x3x32x32xbf16>
    %203 = vector.shape_cast %202 : vector<1x3x32x32xbf16> to vector<3x32x32xbf16>
    %c1_96 = arith.constant 1 : index
    %c0_97 = arith.constant 0 : index
    %c0_98 = arith.constant 0 : index
    %204 = vector.load %arg10[%c1_96, %c0_97, %c0_98] : memref<3x1x32xf32, #tpu.memory_space<vmem>>, vector<1x1x32xf32>
    %205 = vector.shape_cast %204 : vector<1x1x32xf32> to vector<1x32xf32>
    %206 = tpu.iota {dimensions = array<i32: 0>} : vector<8x1xi32>
    %c1_i32_99 = arith.constant 1 : i32
    %207 = tpu.dynamic_rotate %201 by %c1_i32_99 dim 0 : vector<8x32xf32>, i32 -> vector<8x32xf32>
    %c1_i32_100 = arith.constant 1 : i32
    %208 = vector.broadcast %c1_i32_100 : i32 to vector<8x1xi32>
    %209 = arith.cmpi sge, %206, %208 : vector<8x1xi32>
    %cst_101 = arith.constant 0.000000e+00 : f32
    %210 = vector.shape_cast %209 : vector<8x1xi1> to vector<8x1xi1>
    %211 = vector.broadcast %210 : vector<8x1xi1> to vector<8x32xi1>
    %212 = vector.broadcast %cst_101 : f32 to vector<8x32xf32>
    %213 = arith.select %211, %207, %212 : vector<8x32xi1>, vector<8x32xf32>
    %214 = vector.extract_strided_slice %203 {offsets = [0, 0, 0], sizes = [1, 32, 32], strides = [1, 1, 1]} : vector<3x32x32xbf16> to vector<1x32x32xbf16>
    %215 = vector.shape_cast %214 : vector<1x32x32xbf16> to vector<32x32xbf16>
    %216 = arith.truncf %213 : vector<8x32xf32> to vector<8x32xbf16>
    %cst_102 = arith.constant dense<0.000000e+00> : vector<8x32xf32>
    %217 = tpu.matmul %216, %215, %cst_102 {dimension_numbers = #tpu.dot_dimension_numbers<[1], [0], [0], [1], [0, 0, 1, 1], [], []>} : vector<8x32xbf16>, vector<32x32xbf16>, vector<8x32xf32> -> vector<8x32xf32>
    %218 = vector.extract_strided_slice %203 {offsets = [1, 0, 0], sizes = [1, 32, 32], strides = [1, 1, 1]} : vector<3x32x32xbf16> to vector<1x32x32xbf16>
    %219 = vector.shape_cast %218 : vector<1x32x32xbf16> to vector<32x32xbf16>
    %220 = arith.truncf %201 : vector<8x32xf32> to vector<8x32xbf16>
    %cst_103 = arith.constant dense<0.000000e+00> : vector<8x32xf32>
    %221 = tpu.matmul %220, %219, %cst_103 {dimension_numbers = #tpu.dot_dimension_numbers<[1], [0], [0], [1], [0, 0, 1, 1], [], []>} : vector<8x32xbf16>, vector<32x32xbf16>, vector<8x32xf32> -> vector<8x32xf32>
    %222 = arith.addf %217, %221 : vector<8x32xf32>
    %c7_i32_104 = arith.constant 7 : i32
    %223 = tpu.dynamic_rotate %201 by %c7_i32_104 dim 0 : vector<8x32xf32>, i32 -> vector<8x32xf32>
    %c7_i32_105 = arith.constant 7 : i32
    %224 = vector.broadcast %c7_i32_105 : i32 to vector<8x1xi32>
    %225 = arith.cmpi slt, %206, %224 : vector<8x1xi32>
    %cst_106 = arith.constant 0.000000e+00 : f32
    %226 = vector.shape_cast %225 : vector<8x1xi1> to vector<8x1xi1>
    %227 = vector.broadcast %226 : vector<8x1xi1> to vector<8x32xi1>
    %228 = vector.broadcast %cst_106 : f32 to vector<8x32xf32>
    %229 = arith.select %227, %223, %228 : vector<8x32xi1>, vector<8x32xf32>
    %230 = vector.extract_strided_slice %203 {offsets = [2, 0, 0], sizes = [1, 32, 32], strides = [1, 1, 1]} : vector<3x32x32xbf16> to vector<1x32x32xbf16>
    %231 = vector.shape_cast %230 : vector<1x32x32xbf16> to vector<32x32xbf16>
    %232 = arith.truncf %229 : vector<8x32xf32> to vector<8x32xbf16>
    %cst_107 = arith.constant dense<0.000000e+00> : vector<8x32xf32>
    %233 = tpu.matmul %232, %231, %cst_107 {dimension_numbers = #tpu.dot_dimension_numbers<[1], [0], [0], [1], [0, 0, 1, 1], [], []>} : vector<8x32xbf16>, vector<32x32xbf16>, vector<8x32xf32> -> vector<8x32xf32>
    %234 = arith.addf %222, %233 : vector<8x32xf32>
    %235 = vector.broadcast %205 : vector<1x32xf32> to vector<8x32xf32>
    %236 = arith.addf %234, %235 : vector<8x32xf32>
    %cst_108 = arith.constant 0.000000e+00 : f32
    %237 = vector.broadcast %cst_108 : f32 to vector<8x32xf32>
    %238 = arith.maximumf %236, %237 : vector<8x32xf32>
    %c1_109 = arith.constant 1 : index
    %c0_110 = arith.constant 0 : index
    %c0_111 = arith.constant 0 : index
    %239 = vector.load %arg11[%c1_109, %c0_110, %c0_111] : memref<3x1x32xf32, #tpu.memory_space<vmem>>, vector<1x1x32xf32>
    %240 = vector.shape_cast %239 : vector<1x1x32xf32> to vector<1x32xf32>
    %c1_112 = arith.constant 1 : index
    %c0_113 = arith.constant 0 : index
    %c0_114 = arith.constant 0 : index
    %241 = vector.load %arg12[%c1_112, %c0_113, %c0_114] : memref<3x1x32xf32, #tpu.memory_space<vmem>>, vector<1x1x32xf32>
    %242 = vector.shape_cast %241 : vector<1x1x32xf32> to vector<1x32xf32>
    %cst_115 = arith.constant dense<0.000000e+00> : vector<8xf32>
    %243 = vector.multi_reduction <add>, %238, %cst_115 [1] : vector<8x32xf32> to vector<8xf32>
    %244 = vector.shape_cast %243 : vector<8xf32> to vector<8x1xf32>
    %cst_116 = arith.constant 3.200000e+01 : f32
    %245 = vector.broadcast %cst_116 : f32 to vector<8x1xf32>
    %246 = arith.divf %244, %245 : vector<8x1xf32>
    %247 = vector.broadcast %246 : vector<8x1xf32> to vector<8x32xf32>
    %248 = arith.subf %238, %247 : vector<8x32xf32>
    %249 = arith.mulf %248, %248 : vector<8x32xf32>
    %cst_117 = arith.constant dense<0.000000e+00> : vector<8xf32>
    %250 = vector.multi_reduction <add>, %249, %cst_117 [1] : vector<8x32xf32> to vector<8xf32>
    %251 = vector.shape_cast %250 : vector<8xf32> to vector<8x1xf32>
    %cst_118 = arith.constant 3.200000e+01 : f32
    %252 = vector.broadcast %cst_118 : f32 to vector<8x1xf32>
    %253 = arith.divf %251, %252 : vector<8x1xf32>
    %254 = vector.broadcast %246 : vector<8x1xf32> to vector<8x32xf32>
    %255 = arith.subf %238, %254 : vector<8x32xf32>
    %cst_119 = arith.constant 9.99999974E-6 : f32
    %256 = vector.broadcast %cst_119 : f32 to vector<8x1xf32>
    %257 = arith.addf %253, %256 : vector<8x1xf32>
    %258 = math.rsqrt %257 : vector<8x1xf32>
    %259 = vector.broadcast %258 : vector<8x1xf32> to vector<8x32xf32>
    %260 = arith.mulf %255, %259 : vector<8x32xf32>
    %261 = vector.broadcast %240 : vector<1x32xf32> to vector<8x32xf32>
    %262 = arith.mulf %260, %261 : vector<8x32xf32>
    %263 = vector.broadcast %242 : vector<1x32xf32> to vector<8x32xf32>
    %264 = arith.addf %262, %263 : vector<8x32xf32>
    %c1_120 = arith.constant 1 : index
    %c0_121 = arith.constant 0 : index
    %c0_122 = arith.constant 0 : index
    %265 = vector.load %arg13[%c1_120, %c0_121, %c0_122] : memref<3x32x1xbf16, #tpu.memory_space<vmem>>, vector<1x32x1xbf16>
    %266 = vector.shape_cast %265 : vector<1x32x1xbf16> to vector<32x1xbf16>
    %267 = arith.truncf %264 : vector<8x32xf32> to vector<8x32xbf16>
    %cst_123 = arith.constant dense<0.000000e+00> : vector<8x1xf32>
    %268 = tpu.matmul %267, %266, %cst_123 {dimension_numbers = #tpu.dot_dimension_numbers<[1], [0], [0], [1], [0, 0, 1, 1], [], []>} : vector<8x32xbf16>, vector<32x1xbf16>, vector<8x1xf32> -> vector<8x1xf32>
    %c1_124 = arith.constant 1 : index
    %c0_125 = arith.constant 0 : index
    %c0_126 = arith.constant 0 : index
    %269 = vector.load %arg14[%c1_124, %c0_125, %c0_126] : memref<3x1x1xf32, #tpu.memory_space<vmem>>, vector<1x1x1xf32>
    %270 = vector.shape_cast %269 : vector<1x1x1xf32> to vector<1x1xf32>
    %271 = vector.broadcast %270 : vector<1x1xf32> to vector<8x1xf32>
    %272 = arith.addf %268, %271 : vector<8x1xf32>
    %273 = arith.mulf %272, %3 : vector<8x1xf32>
    %c0_127 = arith.constant 0 : index
    %c0_128 = arith.constant 0 : index
    %c0_129 = arith.constant 0 : index
    %274 = vector.load %arg3[%c0_127, %c0_128, %c0_129] : memref<1x8x32xf32, #tpu.memory_space<vmem>>, vector<1x8x32xf32>
    %275 = vector.shape_cast %274 : vector<1x8x32xf32> to vector<8x32xf32>
    %276 = arith.addf %1, %275 : vector<8x32xf32>
    %c2 = arith.constant 2 : index
    %c0_130 = arith.constant 0 : index
    %c0_131 = arith.constant 0 : index
    %c0_132 = arith.constant 0 : index
    %277 = vector.load %arg5[%c2, %c0_130, %c0_131, %c0_132] : memref<3x3x32x32xbf16, #tpu.memory_space<vmem>>, vector<1x3x32x32xbf16>
    %278 = vector.shape_cast %277 : vector<1x3x32x32xbf16> to vector<3x32x32xbf16>
    %c2_133 = arith.constant 2 : index
    %c0_134 = arith.constant 0 : index
    %c0_135 = arith.constant 0 : index
    %279 = vector.load %arg6[%c2_133, %c0_134, %c0_135] : memref<3x1x32xf32, #tpu.memory_space<vmem>>, vector<1x1x32xf32>
    %280 = vector.shape_cast %279 : vector<1x1x32xf32> to vector<1x32xf32>
    %281 = tpu.iota {dimensions = array<i32: 0>} : vector<8x1xi32>
    %c1_i32_136 = arith.constant 1 : i32
    %282 = tpu.dynamic_rotate %276 by %c1_i32_136 dim 0 : vector<8x32xf32>, i32 -> vector<8x32xf32>
    %c1_i32_137 = arith.constant 1 : i32
    %283 = vector.broadcast %c1_i32_137 : i32 to vector<8x1xi32>
    %284 = arith.cmpi sge, %281, %283 : vector<8x1xi32>
    %cst_138 = arith.constant 0.000000e+00 : f32
    %285 = vector.shape_cast %284 : vector<8x1xi1> to vector<8x1xi1>
    %286 = vector.broadcast %285 : vector<8x1xi1> to vector<8x32xi1>
    %287 = vector.broadcast %cst_138 : f32 to vector<8x32xf32>
    %288 = arith.select %286, %282, %287 : vector<8x32xi1>, vector<8x32xf32>
    %289 = vector.extract_strided_slice %278 {offsets = [0, 0, 0], sizes = [1, 32, 32], strides = [1, 1, 1]} : vector<3x32x32xbf16> to vector<1x32x32xbf16>
    %290 = vector.shape_cast %289 : vector<1x32x32xbf16> to vector<32x32xbf16>
    %291 = arith.truncf %288 : vector<8x32xf32> to vector<8x32xbf16>
    %cst_139 = arith.constant dense<0.000000e+00> : vector<8x32xf32>
    %292 = tpu.matmul %291, %290, %cst_139 {dimension_numbers = #tpu.dot_dimension_numbers<[1], [0], [0], [1], [0, 0, 1, 1], [], []>} : vector<8x32xbf16>, vector<32x32xbf16>, vector<8x32xf32> -> vector<8x32xf32>
    %293 = vector.extract_strided_slice %278 {offsets = [1, 0, 0], sizes = [1, 32, 32], strides = [1, 1, 1]} : vector<3x32x32xbf16> to vector<1x32x32xbf16>
    %294 = vector.shape_cast %293 : vector<1x32x32xbf16> to vector<32x32xbf16>
    %295 = arith.truncf %276 : vector<8x32xf32> to vector<8x32xbf16>
    %cst_140 = arith.constant dense<0.000000e+00> : vector<8x32xf32>
    %296 = tpu.matmul %295, %294, %cst_140 {dimension_numbers = #tpu.dot_dimension_numbers<[1], [0], [0], [1], [0, 0, 1, 1], [], []>} : vector<8x32xbf16>, vector<32x32xbf16>, vector<8x32xf32> -> vector<8x32xf32>
    %297 = arith.addf %292, %296 : vector<8x32xf32>
    %c7_i32_141 = arith.constant 7 : i32
    %298 = tpu.dynamic_rotate %276 by %c7_i32_141 dim 0 : vector<8x32xf32>, i32 -> vector<8x32xf32>
    %c7_i32_142 = arith.constant 7 : i32
    %299 = vector.broadcast %c7_i32_142 : i32 to vector<8x1xi32>
    %300 = arith.cmpi slt, %281, %299 : vector<8x1xi32>
    %cst_143 = arith.constant 0.000000e+00 : f32
    %301 = vector.shape_cast %300 : vector<8x1xi1> to vector<8x1xi1>
    %302 = vector.broadcast %301 : vector<8x1xi1> to vector<8x32xi1>
    %303 = vector.broadcast %cst_143 : f32 to vector<8x32xf32>
    %304 = arith.select %302, %298, %303 : vector<8x32xi1>, vector<8x32xf32>
    %305 = vector.extract_strided_slice %278 {offsets = [2, 0, 0], sizes = [1, 32, 32], strides = [1, 1, 1]} : vector<3x32x32xbf16> to vector<1x32x32xbf16>
    %306 = vector.shape_cast %305 : vector<1x32x32xbf16> to vector<32x32xbf16>
    %307 = arith.truncf %304 : vector<8x32xf32> to vector<8x32xbf16>
    %cst_144 = arith.constant dense<0.000000e+00> : vector<8x32xf32>
    %308 = tpu.matmul %307, %306, %cst_144 {dimension_numbers = #tpu.dot_dimension_numbers<[1], [0], [0], [1], [0, 0, 1, 1], [], []>} : vector<8x32xbf16>, vector<32x32xbf16>, vector<8x32xf32> -> vector<8x32xf32>
    %309 = arith.addf %297, %308 : vector<8x32xf32>
    %310 = vector.broadcast %280 : vector<1x32xf32> to vector<8x32xf32>
    %311 = arith.addf %309, %310 : vector<8x32xf32>
    %cst_145 = arith.constant 0.000000e+00 : f32
    %312 = vector.broadcast %cst_145 : f32 to vector<8x32xf32>
    %313 = arith.maximumf %311, %312 : vector<8x32xf32>
    %c2_146 = arith.constant 2 : index
    %c0_147 = arith.constant 0 : index
    %c0_148 = arith.constant 0 : index
    %314 = vector.load %arg7[%c2_146, %c0_147, %c0_148] : memref<3x1x32xf32, #tpu.memory_space<vmem>>, vector<1x1x32xf32>
    %315 = vector.shape_cast %314 : vector<1x1x32xf32> to vector<1x32xf32>
    %c2_149 = arith.constant 2 : index
    %c0_150 = arith.constant 0 : index
    %c0_151 = arith.constant 0 : index
    %316 = vector.load %arg8[%c2_149, %c0_150, %c0_151] : memref<3x1x32xf32, #tpu.memory_space<vmem>>, vector<1x1x32xf32>
    %317 = vector.shape_cast %316 : vector<1x1x32xf32> to vector<1x32xf32>
    %cst_152 = arith.constant dense<0.000000e+00> : vector<8xf32>
    %318 = vector.multi_reduction <add>, %313, %cst_152 [1] : vector<8x32xf32> to vector<8xf32>
    %319 = vector.shape_cast %318 : vector<8xf32> to vector<8x1xf32>
    %cst_153 = arith.constant 3.200000e+01 : f32
    %320 = vector.broadcast %cst_153 : f32 to vector<8x1xf32>
    %321 = arith.divf %319, %320 : vector<8x1xf32>
    %322 = vector.broadcast %321 : vector<8x1xf32> to vector<8x32xf32>
    %323 = arith.subf %313, %322 : vector<8x32xf32>
    %324 = arith.mulf %323, %323 : vector<8x32xf32>
    %cst_154 = arith.constant dense<0.000000e+00> : vector<8xf32>
    %325 = vector.multi_reduction <add>, %324, %cst_154 [1] : vector<8x32xf32> to vector<8xf32>
    %326 = vector.shape_cast %325 : vector<8xf32> to vector<8x1xf32>
    %cst_155 = arith.constant 3.200000e+01 : f32
    %327 = vector.broadcast %cst_155 : f32 to vector<8x1xf32>
    %328 = arith.divf %326, %327 : vector<8x1xf32>
    %329 = vector.broadcast %321 : vector<8x1xf32> to vector<8x32xf32>
    %330 = arith.subf %313, %329 : vector<8x32xf32>
    %cst_156 = arith.constant 9.99999974E-6 : f32
    %331 = vector.broadcast %cst_156 : f32 to vector<8x1xf32>
    %332 = arith.addf %328, %331 : vector<8x1xf32>
    %333 = math.rsqrt %332 : vector<8x1xf32>
    %334 = vector.broadcast %333 : vector<8x1xf32> to vector<8x32xf32>
    %335 = arith.mulf %330, %334 : vector<8x32xf32>
    %336 = vector.broadcast %315 : vector<1x32xf32> to vector<8x32xf32>
    %337 = arith.mulf %335, %336 : vector<8x32xf32>
    %338 = vector.broadcast %317 : vector<1x32xf32> to vector<8x32xf32>
    %339 = arith.addf %337, %338 : vector<8x32xf32>
    %c2_157 = arith.constant 2 : index
    %c0_158 = arith.constant 0 : index
    %c0_159 = arith.constant 0 : index
    %c0_160 = arith.constant 0 : index
    %340 = vector.load %arg9[%c2_157, %c0_158, %c0_159, %c0_160] : memref<3x3x32x32xbf16, #tpu.memory_space<vmem>>, vector<1x3x32x32xbf16>
    %341 = vector.shape_cast %340 : vector<1x3x32x32xbf16> to vector<3x32x32xbf16>
    %c2_161 = arith.constant 2 : index
    %c0_162 = arith.constant 0 : index
    %c0_163 = arith.constant 0 : index
    %342 = vector.load %arg10[%c2_161, %c0_162, %c0_163] : memref<3x1x32xf32, #tpu.memory_space<vmem>>, vector<1x1x32xf32>
    %343 = vector.shape_cast %342 : vector<1x1x32xf32> to vector<1x32xf32>
    %344 = tpu.iota {dimensions = array<i32: 0>} : vector<8x1xi32>
    %c1_i32_164 = arith.constant 1 : i32
    %345 = tpu.dynamic_rotate %339 by %c1_i32_164 dim 0 : vector<8x32xf32>, i32 -> vector<8x32xf32>
    %c1_i32_165 = arith.constant 1 : i32
    %346 = vector.broadcast %c1_i32_165 : i32 to vector<8x1xi32>
    %347 = arith.cmpi sge, %344, %346 : vector<8x1xi32>
    %cst_166 = arith.constant 0.000000e+00 : f32
    %348 = vector.shape_cast %347 : vector<8x1xi1> to vector<8x1xi1>
    %349 = vector.broadcast %348 : vector<8x1xi1> to vector<8x32xi1>
    %350 = vector.broadcast %cst_166 : f32 to vector<8x32xf32>
    %351 = arith.select %349, %345, %350 : vector<8x32xi1>, vector<8x32xf32>
    %352 = vector.extract_strided_slice %341 {offsets = [0, 0, 0], sizes = [1, 32, 32], strides = [1, 1, 1]} : vector<3x32x32xbf16> to vector<1x32x32xbf16>
    %353 = vector.shape_cast %352 : vector<1x32x32xbf16> to vector<32x32xbf16>
    %354 = arith.truncf %351 : vector<8x32xf32> to vector<8x32xbf16>
    %cst_167 = arith.constant dense<0.000000e+00> : vector<8x32xf32>
    %355 = tpu.matmul %354, %353, %cst_167 {dimension_numbers = #tpu.dot_dimension_numbers<[1], [0], [0], [1], [0, 0, 1, 1], [], []>} : vector<8x32xbf16>, vector<32x32xbf16>, vector<8x32xf32> -> vector<8x32xf32>
    %356 = vector.extract_strided_slice %341 {offsets = [1, 0, 0], sizes = [1, 32, 32], strides = [1, 1, 1]} : vector<3x32x32xbf16> to vector<1x32x32xbf16>
    %357 = vector.shape_cast %356 : vector<1x32x32xbf16> to vector<32x32xbf16>
    %358 = arith.truncf %339 : vector<8x32xf32> to vector<8x32xbf16>
    %cst_168 = arith.constant dense<0.000000e+00> : vector<8x32xf32>
    %359 = tpu.matmul %358, %357, %cst_168 {dimension_numbers = #tpu.dot_dimension_numbers<[1], [0], [0], [1], [0, 0, 1, 1], [], []>} : vector<8x32xbf16>, vector<32x32xbf16>, vector<8x32xf32> -> vector<8x32xf32>
    %360 = arith.addf %355, %359 : vector<8x32xf32>
    %c7_i32_169 = arith.constant 7 : i32
    %361 = tpu.dynamic_rotate %339 by %c7_i32_169 dim 0 : vector<8x32xf32>, i32 -> vector<8x32xf32>
    %c7_i32_170 = arith.constant 7 : i32
    %362 = vector.broadcast %c7_i32_170 : i32 to vector<8x1xi32>
    %363 = arith.cmpi slt, %344, %362 : vector<8x1xi32>
    %cst_171 = arith.constant 0.000000e+00 : f32
    %364 = vector.shape_cast %363 : vector<8x1xi1> to vector<8x1xi1>
    %365 = vector.broadcast %364 : vector<8x1xi1> to vector<8x32xi1>
    %366 = vector.broadcast %cst_171 : f32 to vector<8x32xf32>
    %367 = arith.select %365, %361, %366 : vector<8x32xi1>, vector<8x32xf32>
    %368 = vector.extract_strided_slice %341 {offsets = [2, 0, 0], sizes = [1, 32, 32], strides = [1, 1, 1]} : vector<3x32x32xbf16> to vector<1x32x32xbf16>
    %369 = vector.shape_cast %368 : vector<1x32x32xbf16> to vector<32x32xbf16>
    %370 = arith.truncf %367 : vector<8x32xf32> to vector<8x32xbf16>
    %cst_172 = arith.constant dense<0.000000e+00> : vector<8x32xf32>
    %371 = tpu.matmul %370, %369, %cst_172 {dimension_numbers = #tpu.dot_dimension_numbers<[1], [0], [0], [1], [0, 0, 1, 1], [], []>} : vector<8x32xbf16>, vector<32x32xbf16>, vector<8x32xf32> -> vector<8x32xf32>
    %372 = arith.addf %360, %371 : vector<8x32xf32>
    %373 = vector.broadcast %343 : vector<1x32xf32> to vector<8x32xf32>
    %374 = arith.addf %372, %373 : vector<8x32xf32>
    %cst_173 = arith.constant 0.000000e+00 : f32
    %375 = vector.broadcast %cst_173 : f32 to vector<8x32xf32>
    %376 = arith.maximumf %374, %375 : vector<8x32xf32>
    %c2_174 = arith.constant 2 : index
    %c0_175 = arith.constant 0 : index
    %c0_176 = arith.constant 0 : index
    %377 = vector.load %arg11[%c2_174, %c0_175, %c0_176] : memref<3x1x32xf32, #tpu.memory_space<vmem>>, vector<1x1x32xf32>
    %378 = vector.shape_cast %377 : vector<1x1x32xf32> to vector<1x32xf32>
    %c2_177 = arith.constant 2 : index
    %c0_178 = arith.constant 0 : index
    %c0_179 = arith.constant 0 : index
    %379 = vector.load %arg12[%c2_177, %c0_178, %c0_179] : memref<3x1x32xf32, #tpu.memory_space<vmem>>, vector<1x1x32xf32>
    %380 = vector.shape_cast %379 : vector<1x1x32xf32> to vector<1x32xf32>
    %cst_180 = arith.constant dense<0.000000e+00> : vector<8xf32>
    %381 = vector.multi_reduction <add>, %376, %cst_180 [1] : vector<8x32xf32> to vector<8xf32>
    %382 = vector.shape_cast %381 : vector<8xf32> to vector<8x1xf32>
    %cst_181 = arith.constant 3.200000e+01 : f32
    %383 = vector.broadcast %cst_181 : f32 to vector<8x1xf32>
    %384 = arith.divf %382, %383 : vector<8x1xf32>
    %385 = vector.broadcast %384 : vector<8x1xf32> to vector<8x32xf32>
    %386 = arith.subf %376, %385 : vector<8x32xf32>
    %387 = arith.mulf %386, %386 : vector<8x32xf32>
    %cst_182 = arith.constant dense<0.000000e+00> : vector<8xf32>
    %388 = vector.multi_reduction <add>, %387, %cst_182 [1] : vector<8x32xf32> to vector<8xf32>
    %389 = vector.shape_cast %388 : vector<8xf32> to vector<8x1xf32>
    %cst_183 = arith.constant 3.200000e+01 : f32
    %390 = vector.broadcast %cst_183 : f32 to vector<8x1xf32>
    %391 = arith.divf %389, %390 : vector<8x1xf32>
    %392 = vector.broadcast %384 : vector<8x1xf32> to vector<8x32xf32>
    %393 = arith.subf %376, %392 : vector<8x32xf32>
    %cst_184 = arith.constant 9.99999974E-6 : f32
    %394 = vector.broadcast %cst_184 : f32 to vector<8x1xf32>
    %395 = arith.addf %391, %394 : vector<8x1xf32>
    %396 = math.rsqrt %395 : vector<8x1xf32>
    %397 = vector.broadcast %396 : vector<8x1xf32> to vector<8x32xf32>
    %398 = arith.mulf %393, %397 : vector<8x32xf32>
    %399 = vector.broadcast %378 : vector<1x32xf32> to vector<8x32xf32>
    %400 = arith.mulf %398, %399 : vector<8x32xf32>
    %401 = vector.broadcast %380 : vector<1x32xf32> to vector<8x32xf32>
    %402 = arith.addf %400, %401 : vector<8x32xf32>
    %c2_185 = arith.constant 2 : index
    %c0_186 = arith.constant 0 : index
    %c0_187 = arith.constant 0 : index
    %403 = vector.load %arg13[%c2_185, %c0_186, %c0_187] : memref<3x32x1xbf16, #tpu.memory_space<vmem>>, vector<1x32x1xbf16>
    %404 = vector.shape_cast %403 : vector<1x32x1xbf16> to vector<32x1xbf16>
    %405 = arith.truncf %402 : vector<8x32xf32> to vector<8x32xbf16>
    %cst_188 = arith.constant dense<0.000000e+00> : vector<8x1xf32>
    %406 = tpu.matmul %405, %404, %cst_188 {dimension_numbers = #tpu.dot_dimension_numbers<[1], [0], [0], [1], [0, 0, 1, 1], [], []>} : vector<8x32xbf16>, vector<32x1xbf16>, vector<8x1xf32> -> vector<8x1xf32>
    %c2_189 = arith.constant 2 : index
    %c0_190 = arith.constant 0 : index
    %c0_191 = arith.constant 0 : index
    %407 = vector.load %arg14[%c2_189, %c0_190, %c0_191] : memref<3x1x1xf32, #tpu.memory_space<vmem>>, vector<1x1x1xf32>
    %408 = vector.shape_cast %407 : vector<1x1x1xf32> to vector<1x1xf32>
    %409 = vector.broadcast %408 : vector<1x1xf32> to vector<8x1xf32>
    %410 = arith.addf %406, %409 : vector<8x1xf32>
    %411 = arith.mulf %410, %3 : vector<8x1xf32>
    %c0_192 = arith.constant 0 : index
    %c0_193 = arith.constant 0 : index
    %c0_194 = arith.constant 0 : index
    %412 = vector.load %arg4[%c0_192, %c0_193, %c0_194] : memref<1x8x32xf32, #tpu.memory_space<vmem>>, vector<1x8x32xf32>
    %413 = vector.shape_cast %412 : vector<1x8x32xf32> to vector<8x32xf32>
    %414 = arith.addf %276, %413 : vector<8x32xf32>
    %c0_195 = arith.constant 0 : index
    %c0_196 = arith.constant 0 : index
    %c0_197 = arith.constant 0 : index
    %415 = vector.load %arg16[%c0_195, %c0_196, %c0_197] : memref<1x8x32xf32, #tpu.memory_space<vmem>>, vector<1x8x32xf32>
    %416 = vector.shape_cast %415 : vector<1x8x32xf32> to vector<8x32xf32>
    %417 = vector.shape_cast %414 : vector<8x32xf32> to vector<1x8x32xf32>
    tpu.vector_store %arg16[%c0_195, %c0_196, %c0_197], %417 {strides = array<i32>} : memref<1x8x32xf32, #tpu.memory_space<vmem>>, vector<1x8x32xf32>,
    %418 = tpu.concatenate %138, %273, %411 in 1 : vector<8x1xf32>, vector<8x1xf32>, vector<8x1xf32> -> vector<8x3xf32>
    %c0_198 = arith.constant 0 : index
    %c0_199 = arith.constant 0 : index
    %c0_200 = arith.constant 0 : index
    %419 = vector.load %arg15[%c0_198, %c0_199, %c0_200] : memref<1x8x3xf32, #tpu.memory_space<vmem>>, vector<1x8x3xf32>
    %420 = vector.shape_cast %419 : vector<1x8x3xf32> to vector<8x3xf32>
    %421 = vector.shape_cast %418 : vector<8x3xf32> to vector<1x8x3xf32>
    tpu.vector_store %arg15[%c0_198, %c0_199, %c0_200], %421 {strides = array<i32>} : memref<1x8x3xf32, #tpu.memory_space<vmem>>, vector<1x8x3xf32>,
    return
  }
  func.func @transform_0(%arg0: i32) -> (i32, i32, i32) {
    %c0_i32 = arith.constant 0 : i32
    %c0_i32_0 = arith.constant 0 : i32
    %c0_i32_1 = arith.constant 0 : i32
    return %arg0, %c0_i32, %c0_i32_0 : i32, i32, i32
  }
  func.func @transform_1(%arg0: i32) -> (i32, i32, i32) {
    %c0_i32 = arith.constant 0 : i32
    %c0_i32_0 = arith.constant 0 : i32
    %c0_i32_1 = arith.constant 0 : i32
    return %arg0, %c0_i32, %c0_i32_0 : i32, i32, i32
  }
  func.func @transform_2(%arg0: i32) -> (i32, i32, i32) {
    %c0_i32 = arith.constant 0 : i32
    %c0_i32_0 = arith.constant 0 : i32
    %c0_i32_1 = arith.constant 0 : i32
    return %arg0, %c0_i32, %c0_i32_0 : i32, i32, i32
  }
  func.func @transform_3(%arg0: i32) -> (i32, i32, i32) {
    %c0_i32 = arith.constant 0 : i32
    %c0_i32_0 = arith.constant 0 : i32
    %c0_i32_1 = arith.constant 0 : i32
    return %arg0, %c0_i32, %c0_i32_0 : i32, i32, i32
  }
  func.func @transform_4(%arg0: i32) -> (i32, i32, i32, i32) {
    %c0_i32 = arith.constant 0 : i32
    %c0_i32_0 = arith.constant 0 : i32
    %c0_i32_1 = arith.constant 0 : i32
    %c0_i32_2 = arith.constant 0 : i32
    %c0_i32_3 = arith.constant 0 : i32
    return %c0_i32, %c0_i32_0, %c0_i32_1, %c0_i32_2 : i32, i32, i32, i32
  }
  func.func @transform_5(%arg0: i32) -> (i32, i32, i32) {
    %c0_i32 = arith.constant 0 : i32
    %c0_i32_0 = arith.constant 0 : i32
    %c0_i32_1 = arith.constant 0 : i32
    %c0_i32_2 = arith.constant 0 : i32
    return %c0_i32, %c0_i32_0, %c0_i32_1 : i32, i32, i32
  }
  func.func @transform_6(%arg0: i32) -> (i32, i32, i32) {
    %c0_i32 = arith.constant 0 : i32
    %c0_i32_0 = arith.constant 0 : i32
    %c0_i32_1 = arith.constant 0 : i32
    %c0_i32_2 = arith.constant 0 : i32
    return %c0_i32, %c0_i32_0, %c0_i32_1 : i32, i32, i32
  }
  func.func @transform_7(%arg0: i32) -> (i32, i32, i32) {
    %c0_i32 = arith.constant 0 : i32
    %c0_i32_0 = arith.constant 0 : i32
    %c0_i32_1 = arith.constant 0 : i32
    %c0_i32_2 = arith.constant 0 : i32
    return %c0_i32, %c0_i32_0, %c0_i32_1 : i32, i32, i32
  }
  func.func @transform_8(%arg0: i32) -> (i32, i32, i32, i32) {
    %c0_i32 = arith.constant 0 : i32
    %c0_i32_0 = arith.constant 0 : i32
    %c0_i32_1 = arith.constant 0 : i32
    %c0_i32_2 = arith.constant 0 : i32
    %c0_i32_3 = arith.constant 0 : i32
    return %c0_i32, %c0_i32_0, %c0_i32_1, %c0_i32_2 : i32, i32, i32, i32
  }
  func.func @transform_9(%arg0: i32) -> (i32, i32, i32) {
    %c0_i32 = arith.constant 0 : i32
    %c0_i32_0 = arith.constant 0 : i32
    %c0_i32_1 = arith.constant 0 : i32
    %c0_i32_2 = arith.constant 0 : i32
    return %c0_i32, %c0_i32_0, %c0_i32_1 : i32, i32, i32
  }
  func.func @transform_10(%arg0: i32) -> (i32, i32, i32) {
    %c0_i32 = arith.constant 0 : i32
    %c0_i32_0 = arith.constant 0 : i32
    %c0_i32_1 = arith.constant 0 : i32
    %c0_i32_2 = arith.constant 0 : i32
    return %c0_i32, %c0_i32_0, %c0_i32_1 : i32, i32, i32
  }
  func.func @transform_11(%arg0: i32) -> (i32, i32, i32) {
    %c0_i32 = arith.constant 0 : i32
    %c0_i32_0 = arith.constant 0 : i32
    %c0_i32_1 = arith.constant 0 : i32
    %c0_i32_2 = arith.constant 0 : i32
    return %c0_i32, %c0_i32_0, %c0_i32_1 : i32, i32, i32
  }
  func.func @transform_12(%arg0: i32) -> (i32, i32, i32) {
    %c0_i32 = arith.constant 0 : i32
    %c0_i32_0 = arith.constant 0 : i32
    %c0_i32_1 = arith.constant 0 : i32
    %c0_i32_2 = arith.constant 0 : i32
    return %c0_i32, %c0_i32_0, %c0_i32_1 : i32, i32, i32
  }
  func.func @transform_13(%arg0: i32) -> (i32, i32, i32) {
    %c0_i32 = arith.constant 0 : i32
    %c0_i32_0 = arith.constant 0 : i32
    %c0_i32_1 = arith.constant 0 : i32
    %c0_i32_2 = arith.constant 0 : i32
    return %c0_i32, %c0_i32_0, %c0_i32_1 : i32, i32, i32
  }
  func.func @transform_14(%arg0: i32) -> (i32, i32, i32) {
    %c0_i32 = arith.constant 0 : i32
    %c0_i32_0 = arith.constant 0 : i32
    %c0_i32_1 = arith.constant 0 : i32
    return %arg0, %c0_i32, %c0_i32_0 : i32, i32, i32
  }
  func.func @transform_15(%arg0: i32) -> (i32, i32, i32) {
    %c0_i32 = arith.constant 0 : i32
    %c0_i32_0 = arith.constant 0 : i32
    %c0_i32_1 = arith.constant 0 : i32
    return %arg0, %c0_i32, %c0_i32_0 : i32, i32, i32
  }
}

module attributes {stable_mosaic.version = 11 : i64} {
  func.func @_decoder_kernel(%arg0: i32, %arg1: memref<1x16x32xf32, #tpu.memory_space<vmem>>, %arg2: memref<1x1x16xf32, #tpu.memory_space<vmem>>, %arg3: memref<1x16x1xf32, #tpu.memory_space<vmem>>, %arg4: memref<16x32xf32, #tpu.memory_space<vmem>>, %arg5: memref<2x32x96xbf16, #tpu.memory_space<vmem>>, %arg6: memref<2x1x96xf32, #tpu.memory_space<vmem>>, %arg7: memref<2x32x32xbf16, #tpu.memory_space<vmem>>, %arg8: memref<2x1x32xf32, #tpu.memory_space<vmem>>, %arg9: memref<2x1x32xf32, #tpu.memory_space<vmem>>, %arg10: memref<2x1x32xf32, #tpu.memory_space<vmem>>, %arg11: memref<2x3x32x64xbf16, #tpu.memory_space<vmem>>, %arg12: memref<2x1x64xf32, #tpu.memory_space<vmem>>, %arg13: memref<2x64x32xbf16, #tpu.memory_space<vmem>>, %arg14: memref<2x1x32xf32, #tpu.memory_space<vmem>>, %arg15: memref<2x1x32xf32, #tpu.memory_space<vmem>>, %arg16: memref<2x1x32xf32, #tpu.memory_space<vmem>>, %arg17: memref<32x16xbf16, #tpu.memory_space<vmem>>, %arg18: memref<1x16xf32, #tpu.memory_space<vmem>>, %arg19: memref<5x16x32xbf16, #tpu.memory_space<vmem>>, %arg20: memref<1x32xf32, #tpu.memory_space<vmem>>, %arg21: memref<5x32x32xbf16, #tpu.memory_space<vmem>>, %arg22: memref<1x32xf32, #tpu.memory_space<vmem>>, %arg23: memref<5x32x32xbf16, #tpu.memory_space<vmem>>, %arg24: memref<1x32xf32, #tpu.memory_space<vmem>>, %arg25: memref<5x32x32xbf16, #tpu.memory_space<vmem>>, %arg26: memref<1x32xf32, #tpu.memory_space<vmem>>, %arg27: memref<5x32x16xbf16, #tpu.memory_space<vmem>>, %arg28: memref<1x16xf32, #tpu.memory_space<vmem>>, %arg29: memref<1x16x32xf32, #tpu.memory_space<vmem>>) attributes {dimension_semantics = [#tpu.dimension_semantics<parallel>], iteration_bounds = array<i64: 2>, scalar_prefetch = 0 : i64, scratch_operands = 0 : i64, tpu.core_type = #tpu.core_type<tc>, window_params = [{transform_indices = @transform_0, window_bounds = array<i64: 1, 16, 32>}, {transform_indices = @transform_1, window_bounds = array<i64: 1, 1, 16>}, {transform_indices = @transform_2, window_bounds = array<i64: 1, 16, 1>}, {pipeline_mode = #tpu.pipeline_mode<synchronous>, transform_indices = @transform_3, window_bounds = array<i64: 16, 32>}, {pipeline_mode = #tpu.pipeline_mode<synchronous>, transform_indices = @transform_4, window_bounds = array<i64: 2, 32, 96>}, {pipeline_mode = #tpu.pipeline_mode<synchronous>, transform_indices = @transform_5, window_bounds = array<i64: 2, 1, 96>}, {pipeline_mode = #tpu.pipeline_mode<synchronous>, transform_indices = @transform_6, window_bounds = array<i64: 2, 32, 32>}, {pipeline_mode = #tpu.pipeline_mode<synchronous>, transform_indices = @transform_7, window_bounds = array<i64: 2, 1, 32>}, {pipeline_mode = #tpu.pipeline_mode<synchronous>, transform_indices = @transform_8, window_bounds = array<i64: 2, 1, 32>}, {pipeline_mode = #tpu.pipeline_mode<synchronous>, transform_indices = @transform_9, window_bounds = array<i64: 2, 1, 32>}, {pipeline_mode = #tpu.pipeline_mode<synchronous>, transform_indices = @transform_10, window_bounds = array<i64: 2, 3, 32, 64>}, {pipeline_mode = #tpu.pipeline_mode<synchronous>, transform_indices = @transform_11, window_bounds = array<i64: 2, 1, 64>}, {pipeline_mode = #tpu.pipeline_mode<synchronous>, transform_indices = @transform_12, window_bounds = array<i64: 2, 64, 32>}, {pipeline_mode = #tpu.pipeline_mode<synchronous>, transform_indices = @transform_13, window_bounds = array<i64: 2, 1, 32>}, {pipeline_mode = #tpu.pipeline_mode<synchronous>, transform_indices = @transform_14, window_bounds = array<i64: 2, 1, 32>}, {pipeline_mode = #tpu.pipeline_mode<synchronous>, transform_indices = @transform_15, window_bounds = array<i64: 2, 1, 32>}, {pipeline_mode = #tpu.pipeline_mode<synchronous>, transform_indices = @transform_16, window_bounds = array<i64: 32, 16>}, {pipeline_mode = #tpu.pipeline_mode<synchronous>, transform_indices = @transform_17, window_bounds = array<i64: 1, 16>}, {pipeline_mode = #tpu.pipeline_mode<synchronous>, transform_indices = @transform_18, window_bounds = array<i64: 5, 16, 32>}, {pipeline_mode = #tpu.pipeline_mode<synchronous>, transform_indices = @transform_19, window_bounds = array<i64: 1, 32>}, {pipeline_mode = #tpu.pipeline_mode<synchronous>, transform_indices = @transform_20, window_bounds = array<i64: 5, 32, 32>}, {pipeline_mode = #tpu.pipeline_mode<synchronous>, transform_indices = @transform_21, window_bounds = array<i64: 1, 32>}, {pipeline_mode = #tpu.pipeline_mode<synchronous>, transform_indices = @transform_22, window_bounds = array<i64: 5, 32, 32>}, {pipeline_mode = #tpu.pipeline_mode<synchronous>, transform_indices = @transform_23, window_bounds = array<i64: 1, 32>}, {pipeline_mode = #tpu.pipeline_mode<synchronous>, transform_indices = @transform_24, window_bounds = array<i64: 5, 32, 32>}, {pipeline_mode = #tpu.pipeline_mode<synchronous>, transform_indices = @transform_25, window_bounds = array<i64: 1, 32>}, {pipeline_mode = #tpu.pipeline_mode<synchronous>, transform_indices = @transform_26, window_bounds = array<i64: 5, 32, 16>}, {pipeline_mode = #tpu.pipeline_mode<synchronous>, transform_indices = @transform_27, window_bounds = array<i64: 1, 16>}, {transform_indices = @transform_28, window_bounds = array<i64: 1, 16, 32>}]} {
    %c0 = arith.constant 0 : index
    %c0_0 = arith.constant 0 : index
    %c0_1 = arith.constant 0 : index
    %0 = vector.load %arg1[%c0, %c0_0, %c0_1] : memref<1x16x32xf32, #tpu.memory_space<vmem>>, vector<1x16x32xf32>
    %1 = vector.shape_cast %0 : vector<1x16x32xf32> to vector<16x32xf32>
    %c0_2 = arith.constant 0 : index
    %c0_3 = arith.constant 0 : index
    %2 = vector.load %arg4[%c0_2, %c0_3] : memref<16x32xf32, #tpu.memory_space<vmem>>, vector<16x32xf32>
    %3 = arith.addf %1, %2 : vector<16x32xf32>
    %c0_4 = arith.constant 0 : index
    %c0_5 = arith.constant 0 : index
    %c0_6 = arith.constant 0 : index
    %4 = vector.load %arg2[%c0_4, %c0_5, %c0_6] : memref<1x1x16xf32, #tpu.memory_space<vmem>>, vector<1x1x16xf32>
    %5 = vector.shape_cast %4 : vector<1x1x16xf32> to vector<1x16xf32>
    %c0_7 = arith.constant 0 : index
    %c0_8 = arith.constant 0 : index
    %c0_9 = arith.constant 0 : index
    %6 = vector.load %arg3[%c0_7, %c0_8, %c0_9] : memref<1x16x1xf32, #tpu.memory_space<vmem>>, vector<1x16x1xf32>
    %7 = vector.shape_cast %6 : vector<1x16x1xf32> to vector<16x1xf32>
    %c0_10 = arith.constant 0 : index
    %c0_11 = arith.constant 0 : index
    %c0_12 = arith.constant 0 : index
    %8 = vector.load %arg5[%c0_10, %c0_11, %c0_12] : memref<2x32x96xbf16, #tpu.memory_space<vmem>>, vector<1x32x96xbf16>
    %9 = vector.shape_cast %8 : vector<1x32x96xbf16> to vector<32x96xbf16>
    %c0_13 = arith.constant 0 : index
    %c0_14 = arith.constant 0 : index
    %c0_15 = arith.constant 0 : index
    %10 = vector.load %arg6[%c0_13, %c0_14, %c0_15] : memref<2x1x96xf32, #tpu.memory_space<vmem>>, vector<1x1x96xf32>
    %11 = vector.shape_cast %10 : vector<1x1x96xf32> to vector<1x96xf32>
    %c0_16 = arith.constant 0 : index
    %c0_17 = arith.constant 0 : index
    %c0_18 = arith.constant 0 : index
    %12 = vector.load %arg7[%c0_16, %c0_17, %c0_18] : memref<2x32x32xbf16, #tpu.memory_space<vmem>>, vector<1x32x32xbf16>
    %13 = vector.shape_cast %12 : vector<1x32x32xbf16> to vector<32x32xbf16>
    %c0_19 = arith.constant 0 : index
    %c0_20 = arith.constant 0 : index
    %c0_21 = arith.constant 0 : index
    %14 = vector.load %arg8[%c0_19, %c0_20, %c0_21] : memref<2x1x32xf32, #tpu.memory_space<vmem>>, vector<1x1x32xf32>
    %15 = vector.shape_cast %14 : vector<1x1x32xf32> to vector<1x32xf32>
    %c0_22 = arith.constant 0 : index
    %c0_23 = arith.constant 0 : index
    %c0_24 = arith.constant 0 : index
    %16 = vector.load %arg9[%c0_22, %c0_23, %c0_24] : memref<2x1x32xf32, #tpu.memory_space<vmem>>, vector<1x1x32xf32>
    %17 = vector.shape_cast %16 : vector<1x1x32xf32> to vector<1x32xf32>
    %c0_25 = arith.constant 0 : index
    %c0_26 = arith.constant 0 : index
    %c0_27 = arith.constant 0 : index
    %18 = vector.load %arg10[%c0_25, %c0_26, %c0_27] : memref<2x1x32xf32, #tpu.memory_space<vmem>>, vector<1x1x32xf32>
    %19 = vector.shape_cast %18 : vector<1x1x32xf32> to vector<1x32xf32>
    %c0_28 = arith.constant 0 : index
    %c0_29 = arith.constant 0 : index
    %c0_30 = arith.constant 0 : index
    %c0_31 = arith.constant 0 : index
    %20 = vector.load %arg11[%c0_28, %c0_29, %c0_30, %c0_31] : memref<2x3x32x64xbf16, #tpu.memory_space<vmem>>, vector<1x3x32x64xbf16>
    %21 = vector.shape_cast %20 : vector<1x3x32x64xbf16> to vector<3x32x64xbf16>
    %c0_32 = arith.constant 0 : index
    %c0_33 = arith.constant 0 : index
    %c0_34 = arith.constant 0 : index
    %22 = vector.load %arg12[%c0_32, %c0_33, %c0_34] : memref<2x1x64xf32, #tpu.memory_space<vmem>>, vector<1x1x64xf32>
    %23 = vector.shape_cast %22 : vector<1x1x64xf32> to vector<1x64xf32>
    %c0_35 = arith.constant 0 : index
    %c0_36 = arith.constant 0 : index
    %c0_37 = arith.constant 0 : index
    %24 = vector.load %arg13[%c0_35, %c0_36, %c0_37] : memref<2x64x32xbf16, #tpu.memory_space<vmem>>, vector<1x64x32xbf16>
    %25 = vector.shape_cast %24 : vector<1x64x32xbf16> to vector<64x32xbf16>
    %c0_38 = arith.constant 0 : index
    %c0_39 = arith.constant 0 : index
    %c0_40 = arith.constant 0 : index
    %26 = vector.load %arg14[%c0_38, %c0_39, %c0_40] : memref<2x1x32xf32, #tpu.memory_space<vmem>>, vector<1x1x32xf32>
    %27 = vector.shape_cast %26 : vector<1x1x32xf32> to vector<1x32xf32>
    %c0_41 = arith.constant 0 : index
    %c0_42 = arith.constant 0 : index
    %c0_43 = arith.constant 0 : index
    %28 = vector.load %arg15[%c0_41, %c0_42, %c0_43] : memref<2x1x32xf32, #tpu.memory_space<vmem>>, vector<1x1x32xf32>
    %29 = vector.shape_cast %28 : vector<1x1x32xf32> to vector<1x32xf32>
    %c0_44 = arith.constant 0 : index
    %c0_45 = arith.constant 0 : index
    %c0_46 = arith.constant 0 : index
    %30 = vector.load %arg16[%c0_44, %c0_45, %c0_46] : memref<2x1x32xf32, #tpu.memory_space<vmem>>, vector<1x1x32xf32>
    %31 = vector.shape_cast %30 : vector<1x1x32xf32> to vector<1x32xf32>
    %32 = arith.truncf %3 : vector<16x32xf32> to vector<16x32xbf16>
    %cst = arith.constant dense<0.000000e+00> : vector<16x96xf32>
    %33 = tpu.matmul %32, %9, %cst {dimension_numbers = #tpu.dot_dimension_numbers<[1], [0], [0], [1], [0, 0, 1, 1], [], []>} : vector<16x32xbf16>, vector<32x96xbf16>, vector<16x96xf32> -> vector<16x96xf32>
    %34 = vector.broadcast %11 : vector<1x96xf32> to vector<16x96xf32>
    %35 = arith.addf %33, %34 : vector<16x96xf32>
    %36 = vector.extract_strided_slice %35 {offsets = [0, 0], sizes = [16, 32], strides = [1, 1]} : vector<16x96xf32> to vector<16x32xf32>
    %37 = vector.extract_strided_slice %36 {offsets = [0, 0], sizes = [16, 16], strides = [1, 1]} : vector<16x32xf32> to vector<16x16xf32>
    %38 = vector.extract_strided_slice %36 {offsets = [0, 16], sizes = [16, 16], strides = [1, 1]} : vector<16x32xf32> to vector<16x16xf32>
    %39 = vector.shape_cast %37 : vector<16x16xf32> to vector<1x16x16xf32>
    %40 = vector.shape_cast %38 : vector<16x16xf32> to vector<1x16x16xf32>
    %41 = tpu.concatenate %39, %40 in 0 : vector<1x16x16xf32>, vector<1x16x16xf32> -> vector<2x16x16xf32>
    %42 = arith.truncf %41 : vector<2x16x16xf32> to vector<2x16x16xbf16>
    %43 = vector.extract_strided_slice %35 {offsets = [0, 32], sizes = [16, 32], strides = [1, 1]} : vector<16x96xf32> to vector<16x32xf32>
    %44 = vector.extract_strided_slice %43 {offsets = [0, 0], sizes = [16, 16], strides = [1, 1]} : vector<16x32xf32> to vector<16x16xf32>
    %45 = vector.extract_strided_slice %43 {offsets = [0, 16], sizes = [16, 16], strides = [1, 1]} : vector<16x32xf32> to vector<16x16xf32>
    %46 = vector.shape_cast %44 : vector<16x16xf32> to vector<1x16x16xf32>
    %47 = vector.shape_cast %45 : vector<16x16xf32> to vector<1x16x16xf32>
    %48 = tpu.concatenate %46, %47 in 0 : vector<1x16x16xf32>, vector<1x16x16xf32> -> vector<2x16x16xf32>
    %49 = arith.truncf %48 : vector<2x16x16xf32> to vector<2x16x16xbf16>
    %50 = vector.extract_strided_slice %35 {offsets = [0, 64], sizes = [16, 32], strides = [1, 1]} : vector<16x96xf32> to vector<16x32xf32>
    %51 = vector.extract_strided_slice %50 {offsets = [0, 0], sizes = [16, 16], strides = [1, 1]} : vector<16x32xf32> to vector<16x16xf32>
    %52 = vector.extract_strided_slice %50 {offsets = [0, 16], sizes = [16, 16], strides = [1, 1]} : vector<16x32xf32> to vector<16x16xf32>
    %53 = vector.shape_cast %51 : vector<16x16xf32> to vector<1x16x16xf32>
    %54 = vector.shape_cast %52 : vector<16x16xf32> to vector<1x16x16xf32>
    %55 = tpu.concatenate %53, %54 in 0 : vector<1x16x16xf32>, vector<1x16x16xf32> -> vector<2x16x16xf32>
    %56 = arith.truncf %55 : vector<2x16x16xf32> to vector<2x16x16xbf16>
    "tpu.trace_start"() <{level = 10 : i32, message = "nqd,nkd->nqk"}> : () -> ()
    %cst_47 = arith.constant dense<0.000000e+00> : vector<2x16x16xf32>
    %57 = tpu.matmul %42, %49, %cst_47 {dimension_numbers = #tpu.dot_dimension_numbers<[2], [2], [1], [1], [0, 0, 0, 1, 1, 1], [0], [0]>} : vector<2x16x16xbf16>, vector<2x16x16xbf16>, vector<2x16x16xf32> -> vector<2x16x16xf32>
    "tpu.trace_stop"() : () -> ()
    %cst_48 = arith.constant 2.500000e-01 : f32
    %58 = vector.broadcast %cst_48 : f32 to vector<2x16x16xf32>
    %59 = arith.mulf %57, %58 : vector<2x16x16xf32>
    %60 = vector.shape_cast %5 : vector<1x16xf32> to vector<1x1x16xf32>
    %cst_49 = arith.constant 5.000000e-01 : f32
    %61 = vector.broadcast %cst_49 : f32 to vector<1x1x16xf32>
    %62 = arith.cmpf ogt, %60, %61 : vector<1x1x16xf32>
    %cst_50 = arith.constant -1.000000e+09 : f32
    %63 = vector.shape_cast %62 : vector<1x1x16xi1> to vector<1x1x16xi1>
    %64 = vector.broadcast %63 : vector<1x1x16xi1> to vector<2x16x16xi1>
    %65 = vector.broadcast %cst_50 : f32 to vector<2x16x16xf32>
    %66 = arith.select %64, %65, %59 : vector<2x16x16xi1>, vector<2x16x16xf32>
    %cst_51 = arith.constant dense<0xFF800000> : vector<2x16xf32>
    %67 = vector.multi_reduction <maximumf>, %66, %cst_51 [2] : vector<2x16x16xf32> to vector<2x16xf32>
    %68 = vector.shape_cast %67 : vector<2x16xf32> to vector<2x16x1xf32>
    %69 = vector.broadcast %68 : vector<2x16x1xf32> to vector<2x16x16xf32>
    %70 = arith.subf %66, %69 : vector<2x16x16xf32>
    %71 = math.exp %70 : vector<2x16x16xf32>
    %cst_52 = arith.constant dense<0.000000e+00> : vector<2x16xf32>
    %72 = vector.multi_reduction <add>, %71, %cst_52 [2] : vector<2x16x16xf32> to vector<2x16xf32>
    %73 = vector.shape_cast %72 : vector<2x16xf32> to vector<2x16x1xf32>
    %74 = tpu.reciprocal %73 {approx = true} : vector<2x16x1xf32> -> vector<2x16x1xf32>
    %75 = vector.broadcast %74 : vector<2x16x1xf32> to vector<2x16x16xf32>
    %76 = arith.mulf %71, %75 : vector<2x16x16xf32>
    %77 = arith.truncf %76 : vector<2x16x16xf32> to vector<2x16x16xbf16>
    "tpu.trace_start"() <{level = 10 : i32, message = "nqk,nkd->nqd"}> : () -> ()
    %cst_53 = arith.constant dense<0.000000e+00> : vector<2x16x16xf32>
    %78 = tpu.matmul %77, %56, %cst_53 {dimension_numbers = #tpu.dot_dimension_numbers<[2], [1], [1], [2], [0, 0, 0, 1, 1, 2], [0], [0]>} : vector<2x16x16xbf16>, vector<2x16x16xbf16>, vector<2x16x16xf32> -> vector<2x16x16xf32>
    "tpu.trace_stop"() : () -> ()
    %79 = vector.extract_strided_slice %78 {offsets = [0, 0, 0], sizes = [1, 16, 16], strides = [1, 1, 1]} : vector<2x16x16xf32> to vector<1x16x16xf32>
    %80 = vector.shape_cast %79 : vector<1x16x16xf32> to vector<16x16xf32>
    %81 = vector.extract_strided_slice %78 {offsets = [1, 0, 0], sizes = [1, 16, 16], strides = [1, 1, 1]} : vector<2x16x16xf32> to vector<1x16x16xf32>
    %82 = vector.shape_cast %81 : vector<1x16x16xf32> to vector<16x16xf32>
    %83 = tpu.concatenate %80, %82 in 1 : vector<16x16xf32>, vector<16x16xf32> -> vector<16x32xf32>
    %84 = arith.truncf %83 : vector<16x32xf32> to vector<16x32xbf16>
    %cst_54 = arith.constant dense<0.000000e+00> : vector<16x32xf32>
    %85 = tpu.matmul %84, %13, %cst_54 {dimension_numbers = #tpu.dot_dimension_numbers<[1], [0], [0], [1], [0, 0, 1, 1], [], []>} : vector<16x32xbf16>, vector<32x32xbf16>, vector<16x32xf32> -> vector<16x32xf32>
    %86 = vector.broadcast %15 : vector<1x32xf32> to vector<16x32xf32>
    %87 = arith.addf %85, %86 : vector<16x32xf32>
    %88 = arith.addf %87, %3 : vector<16x32xf32>
    %cst_55 = arith.constant dense<0.000000e+00> : vector<16xf32>
    %89 = vector.multi_reduction <add>, %88, %cst_55 [1] : vector<16x32xf32> to vector<16xf32>
    %90 = vector.shape_cast %89 : vector<16xf32> to vector<16x1xf32>
    %cst_56 = arith.constant 3.200000e+01 : f32
    %91 = vector.broadcast %cst_56 : f32 to vector<16x1xf32>
    %92 = arith.divf %90, %91 : vector<16x1xf32>
    %93 = vector.broadcast %92 : vector<16x1xf32> to vector<16x32xf32>
    %94 = arith.subf %88, %93 : vector<16x32xf32>
    %95 = arith.mulf %94, %94 : vector<16x32xf32>
    %cst_57 = arith.constant dense<0.000000e+00> : vector<16xf32>
    %96 = vector.multi_reduction <add>, %95, %cst_57 [1] : vector<16x32xf32> to vector<16xf32>
    %97 = vector.shape_cast %96 : vector<16xf32> to vector<16x1xf32>
    %cst_58 = arith.constant 3.200000e+01 : f32
    %98 = vector.broadcast %cst_58 : f32 to vector<16x1xf32>
    %99 = arith.divf %97, %98 : vector<16x1xf32>
    %100 = vector.broadcast %92 : vector<16x1xf32> to vector<16x32xf32>
    %101 = arith.subf %88, %100 : vector<16x32xf32>
    %cst_59 = arith.constant 9.99999974E-6 : f32
    %102 = vector.broadcast %cst_59 : f32 to vector<16x1xf32>
    %103 = arith.addf %99, %102 : vector<16x1xf32>
    %104 = math.rsqrt %103 : vector<16x1xf32>
    %105 = vector.broadcast %104 : vector<16x1xf32> to vector<16x32xf32>
    %106 = arith.mulf %101, %105 : vector<16x32xf32>
    %107 = vector.broadcast %17 : vector<1x32xf32> to vector<16x32xf32>
    %108 = arith.mulf %106, %107 : vector<16x32xf32>
    %109 = vector.broadcast %19 : vector<1x32xf32> to vector<16x32xf32>
    %110 = arith.addf %108, %109 : vector<16x32xf32>
    %111 = vector.broadcast %7 : vector<16x1xf32> to vector<16x32xf32>
    %112 = arith.mulf %110, %111 : vector<16x32xf32>
    %113 = tpu.iota {dimensions = array<i32: 0>} : vector<16x1xi32>
    %c1_i32 = arith.constant 1 : i32
    %114 = tpu.dynamic_rotate %112 by %c1_i32 dim 0 : vector<16x32xf32>, i32 -> vector<16x32xf32>
    %c1_i32_60 = arith.constant 1 : i32
    %115 = vector.broadcast %c1_i32_60 : i32 to vector<16x1xi32>
    %116 = arith.cmpi sge, %113, %115 : vector<16x1xi32>
    %cst_61 = arith.constant 0.000000e+00 : f32
    %117 = vector.shape_cast %116 : vector<16x1xi1> to vector<16x1xi1>
    %118 = vector.broadcast %117 : vector<16x1xi1> to vector<16x32xi1>
    %119 = vector.broadcast %cst_61 : f32 to vector<16x32xf32>
    %120 = arith.select %118, %114, %119 : vector<16x32xi1>, vector<16x32xf32>
    %121 = vector.extract_strided_slice %21 {offsets = [0, 0, 0], sizes = [1, 32, 64], strides = [1, 1, 1]} : vector<3x32x64xbf16> to vector<1x32x64xbf16>
    %122 = vector.shape_cast %121 : vector<1x32x64xbf16> to vector<32x64xbf16>
    %123 = arith.truncf %120 : vector<16x32xf32> to vector<16x32xbf16>
    %cst_62 = arith.constant dense<0.000000e+00> : vector<16x64xf32>
    %124 = tpu.matmul %123, %122, %cst_62 {dimension_numbers = #tpu.dot_dimension_numbers<[1], [0], [0], [1], [0, 0, 1, 1], [], []>} : vector<16x32xbf16>, vector<32x64xbf16>, vector<16x64xf32> -> vector<16x64xf32>
    %125 = vector.extract_strided_slice %21 {offsets = [1, 0, 0], sizes = [1, 32, 64], strides = [1, 1, 1]} : vector<3x32x64xbf16> to vector<1x32x64xbf16>
    %126 = vector.shape_cast %125 : vector<1x32x64xbf16> to vector<32x64xbf16>
    %127 = arith.truncf %112 : vector<16x32xf32> to vector<16x32xbf16>
    %cst_63 = arith.constant dense<0.000000e+00> : vector<16x64xf32>
    %128 = tpu.matmul %127, %126, %cst_63 {dimension_numbers = #tpu.dot_dimension_numbers<[1], [0], [0], [1], [0, 0, 1, 1], [], []>} : vector<16x32xbf16>, vector<32x64xbf16>, vector<16x64xf32> -> vector<16x64xf32>
    %129 = arith.addf %124, %128 : vector<16x64xf32>
    %c15_i32 = arith.constant 15 : i32
    %130 = tpu.dynamic_rotate %112 by %c15_i32 dim 0 : vector<16x32xf32>, i32 -> vector<16x32xf32>
    %c15_i32_64 = arith.constant 15 : i32
    %131 = vector.broadcast %c15_i32_64 : i32 to vector<16x1xi32>
    %132 = arith.cmpi slt, %113, %131 : vector<16x1xi32>
    %cst_65 = arith.constant 0.000000e+00 : f32
    %133 = vector.shape_cast %132 : vector<16x1xi1> to vector<16x1xi1>
    %134 = vector.broadcast %133 : vector<16x1xi1> to vector<16x32xi1>
    %135 = vector.broadcast %cst_65 : f32 to vector<16x32xf32>
    %136 = arith.select %134, %130, %135 : vector<16x32xi1>, vector<16x32xf32>
    %137 = vector.extract_strided_slice %21 {offsets = [2, 0, 0], sizes = [1, 32, 64], strides = [1, 1, 1]} : vector<3x32x64xbf16> to vector<1x32x64xbf16>
    %138 = vector.shape_cast %137 : vector<1x32x64xbf16> to vector<32x64xbf16>
    %139 = arith.truncf %136 : vector<16x32xf32> to vector<16x32xbf16>
    %cst_66 = arith.constant dense<0.000000e+00> : vector<16x64xf32>
    %140 = tpu.matmul %139, %138, %cst_66 {dimension_numbers = #tpu.dot_dimension_numbers<[1], [0], [0], [1], [0, 0, 1, 1], [], []>} : vector<16x32xbf16>, vector<32x64xbf16>, vector<16x64xf32> -> vector<16x64xf32>
    %141 = arith.addf %129, %140 : vector<16x64xf32>
    %142 = vector.broadcast %23 : vector<1x64xf32> to vector<16x64xf32>
    %143 = arith.addf %141, %142 : vector<16x64xf32>
    %cst_67 = arith.constant 0.000000e+00 : f32
    %144 = vector.broadcast %cst_67 : f32 to vector<16x64xf32>
    %145 = arith.maximumf %143, %144 : vector<16x64xf32>
    %146 = arith.truncf %145 : vector<16x64xf32> to vector<16x64xbf16>
    %cst_68 = arith.constant dense<0.000000e+00> : vector<16x32xf32>
    %147 = tpu.matmul %146, %25, %cst_68 {dimension_numbers = #tpu.dot_dimension_numbers<[1], [0], [0], [1], [0, 0, 1, 1], [], []>} : vector<16x64xbf16>, vector<64x32xbf16>, vector<16x32xf32> -> vector<16x32xf32>
    %148 = vector.broadcast %27 : vector<1x32xf32> to vector<16x32xf32>
    %149 = arith.addf %147, %148 : vector<16x32xf32>
    %150 = arith.addf %149, %112 : vector<16x32xf32>
    %cst_69 = arith.constant dense<0.000000e+00> : vector<16xf32>
    %151 = vector.multi_reduction <add>, %150, %cst_69 [1] : vector<16x32xf32> to vector<16xf32>
    %152 = vector.shape_cast %151 : vector<16xf32> to vector<16x1xf32>
    %cst_70 = arith.constant 3.200000e+01 : f32
    %153 = vector.broadcast %cst_70 : f32 to vector<16x1xf32>
    %154 = arith.divf %152, %153 : vector<16x1xf32>
    %155 = vector.broadcast %154 : vector<16x1xf32> to vector<16x32xf32>
    %156 = arith.subf %150, %155 : vector<16x32xf32>
    %157 = arith.mulf %156, %156 : vector<16x32xf32>
    %cst_71 = arith.constant dense<0.000000e+00> : vector<16xf32>
    %158 = vector.multi_reduction <add>, %157, %cst_71 [1] : vector<16x32xf32> to vector<16xf32>
    %159 = vector.shape_cast %158 : vector<16xf32> to vector<16x1xf32>
    %cst_72 = arith.constant 3.200000e+01 : f32
    %160 = vector.broadcast %cst_72 : f32 to vector<16x1xf32>
    %161 = arith.divf %159, %160 : vector<16x1xf32>
    %162 = vector.broadcast %154 : vector<16x1xf32> to vector<16x32xf32>
    %163 = arith.subf %150, %162 : vector<16x32xf32>
    %cst_73 = arith.constant 9.99999974E-6 : f32
    %164 = vector.broadcast %cst_73 : f32 to vector<16x1xf32>
    %165 = arith.addf %161, %164 : vector<16x1xf32>
    %166 = math.rsqrt %165 : vector<16x1xf32>
    %167 = vector.broadcast %166 : vector<16x1xf32> to vector<16x32xf32>
    %168 = arith.mulf %163, %167 : vector<16x32xf32>
    %169 = vector.broadcast %29 : vector<1x32xf32> to vector<16x32xf32>
    %170 = arith.mulf %168, %169 : vector<16x32xf32>
    %171 = vector.broadcast %31 : vector<1x32xf32> to vector<16x32xf32>
    %172 = arith.addf %170, %171 : vector<16x32xf32>
    %173 = vector.broadcast %7 : vector<16x1xf32> to vector<16x32xf32>
    %174 = arith.mulf %172, %173 : vector<16x32xf32>
    %c1 = arith.constant 1 : index
    %c0_74 = arith.constant 0 : index
    %c0_75 = arith.constant 0 : index
    %175 = vector.load %arg5[%c1, %c0_74, %c0_75] : memref<2x32x96xbf16, #tpu.memory_space<vmem>>, vector<1x32x96xbf16>
    %176 = vector.shape_cast %175 : vector<1x32x96xbf16> to vector<32x96xbf16>
    %c1_76 = arith.constant 1 : index
    %c0_77 = arith.constant 0 : index
    %c0_78 = arith.constant 0 : index
    %177 = vector.load %arg6[%c1_76, %c0_77, %c0_78] : memref<2x1x96xf32, #tpu.memory_space<vmem>>, vector<1x1x96xf32>
    %178 = vector.shape_cast %177 : vector<1x1x96xf32> to vector<1x96xf32>
    %c1_79 = arith.constant 1 : index
    %c0_80 = arith.constant 0 : index
    %c0_81 = arith.constant 0 : index
    %179 = vector.load %arg7[%c1_79, %c0_80, %c0_81] : memref<2x32x32xbf16, #tpu.memory_space<vmem>>, vector<1x32x32xbf16>
    %180 = vector.shape_cast %179 : vector<1x32x32xbf16> to vector<32x32xbf16>
    %c1_82 = arith.constant 1 : index
    %c0_83 = arith.constant 0 : index
    %c0_84 = arith.constant 0 : index
    %181 = vector.load %arg8[%c1_82, %c0_83, %c0_84] : memref<2x1x32xf32, #tpu.memory_space<vmem>>, vector<1x1x32xf32>
    %182 = vector.shape_cast %181 : vector<1x1x32xf32> to vector<1x32xf32>
    %c1_85 = arith.constant 1 : index
    %c0_86 = arith.constant 0 : index
    %c0_87 = arith.constant 0 : index
    %183 = vector.load %arg9[%c1_85, %c0_86, %c0_87] : memref<2x1x32xf32, #tpu.memory_space<vmem>>, vector<1x1x32xf32>
    %184 = vector.shape_cast %183 : vector<1x1x32xf32> to vector<1x32xf32>
    %c1_88 = arith.constant 1 : index
    %c0_89 = arith.constant 0 : index
    %c0_90 = arith.constant 0 : index
    %185 = vector.load %arg10[%c1_88, %c0_89, %c0_90] : memref<2x1x32xf32, #tpu.memory_space<vmem>>, vector<1x1x32xf32>
    %186 = vector.shape_cast %185 : vector<1x1x32xf32> to vector<1x32xf32>
    %c1_91 = arith.constant 1 : index
    %c0_92 = arith.constant 0 : index
    %c0_93 = arith.constant 0 : index
    %c0_94 = arith.constant 0 : index
    %187 = vector.load %arg11[%c1_91, %c0_92, %c0_93, %c0_94] : memref<2x3x32x64xbf16, #tpu.memory_space<vmem>>, vector<1x3x32x64xbf16>
    %188 = vector.shape_cast %187 : vector<1x3x32x64xbf16> to vector<3x32x64xbf16>
    %c1_95 = arith.constant 1 : index
    %c0_96 = arith.constant 0 : index
    %c0_97 = arith.constant 0 : index
    %189 = vector.load %arg12[%c1_95, %c0_96, %c0_97] : memref<2x1x64xf32, #tpu.memory_space<vmem>>, vector<1x1x64xf32>
    %190 = vector.shape_cast %189 : vector<1x1x64xf32> to vector<1x64xf32>
    %c1_98 = arith.constant 1 : index
    %c0_99 = arith.constant 0 : index
    %c0_100 = arith.constant 0 : index
    %191 = vector.load %arg13[%c1_98, %c0_99, %c0_100] : memref<2x64x32xbf16, #tpu.memory_space<vmem>>, vector<1x64x32xbf16>
    %192 = vector.shape_cast %191 : vector<1x64x32xbf16> to vector<64x32xbf16>
    %c1_101 = arith.constant 1 : index
    %c0_102 = arith.constant 0 : index
    %c0_103 = arith.constant 0 : index
    %193 = vector.load %arg14[%c1_101, %c0_102, %c0_103] : memref<2x1x32xf32, #tpu.memory_space<vmem>>, vector<1x1x32xf32>
    %194 = vector.shape_cast %193 : vector<1x1x32xf32> to vector<1x32xf32>
    %c1_104 = arith.constant 1 : index
    %c0_105 = arith.constant 0 : index
    %c0_106 = arith.constant 0 : index
    %195 = vector.load %arg15[%c1_104, %c0_105, %c0_106] : memref<2x1x32xf32, #tpu.memory_space<vmem>>, vector<1x1x32xf32>
    %196 = vector.shape_cast %195 : vector<1x1x32xf32> to vector<1x32xf32>
    %c1_107 = arith.constant 1 : index
    %c0_108 = arith.constant 0 : index
    %c0_109 = arith.constant 0 : index
    %197 = vector.load %arg16[%c1_107, %c0_108, %c0_109] : memref<2x1x32xf32, #tpu.memory_space<vmem>>, vector<1x1x32xf32>
    %198 = vector.shape_cast %197 : vector<1x1x32xf32> to vector<1x32xf32>
    %199 = arith.truncf %174 : vector<16x32xf32> to vector<16x32xbf16>
    %cst_110 = arith.constant dense<0.000000e+00> : vector<16x96xf32>
    %200 = tpu.matmul %199, %176, %cst_110 {dimension_numbers = #tpu.dot_dimension_numbers<[1], [0], [0], [1], [0, 0, 1, 1], [], []>} : vector<16x32xbf16>, vector<32x96xbf16>, vector<16x96xf32> -> vector<16x96xf32>
    %201 = vector.broadcast %178 : vector<1x96xf32> to vector<16x96xf32>
    %202 = arith.addf %200, %201 : vector<16x96xf32>
    %203 = vector.extract_strided_slice %202 {offsets = [0, 0], sizes = [16, 32], strides = [1, 1]} : vector<16x96xf32> to vector<16x32xf32>
    %204 = vector.extract_strided_slice %203 {offsets = [0, 0], sizes = [16, 16], strides = [1, 1]} : vector<16x32xf32> to vector<16x16xf32>
    %205 = vector.extract_strided_slice %203 {offsets = [0, 16], sizes = [16, 16], strides = [1, 1]} : vector<16x32xf32> to vector<16x16xf32>
    %206 = vector.shape_cast %204 : vector<16x16xf32> to vector<1x16x16xf32>
    %207 = vector.shape_cast %205 : vector<16x16xf32> to vector<1x16x16xf32>
    %208 = tpu.concatenate %206, %207 in 0 : vector<1x16x16xf32>, vector<1x16x16xf32> -> vector<2x16x16xf32>
    %209 = arith.truncf %208 : vector<2x16x16xf32> to vector<2x16x16xbf16>
    %210 = vector.extract_strided_slice %202 {offsets = [0, 32], sizes = [16, 32], strides = [1, 1]} : vector<16x96xf32> to vector<16x32xf32>
    %211 = vector.extract_strided_slice %210 {offsets = [0, 0], sizes = [16, 16], strides = [1, 1]} : vector<16x32xf32> to vector<16x16xf32>
    %212 = vector.extract_strided_slice %210 {offsets = [0, 16], sizes = [16, 16], strides = [1, 1]} : vector<16x32xf32> to vector<16x16xf32>
    %213 = vector.shape_cast %211 : vector<16x16xf32> to vector<1x16x16xf32>
    %214 = vector.shape_cast %212 : vector<16x16xf32> to vector<1x16x16xf32>
    %215 = tpu.concatenate %213, %214 in 0 : vector<1x16x16xf32>, vector<1x16x16xf32> -> vector<2x16x16xf32>
    %216 = arith.truncf %215 : vector<2x16x16xf32> to vector<2x16x16xbf16>
    %217 = vector.extract_strided_slice %202 {offsets = [0, 64], sizes = [16, 32], strides = [1, 1]} : vector<16x96xf32> to vector<16x32xf32>
    %218 = vector.extract_strided_slice %217 {offsets = [0, 0], sizes = [16, 16], strides = [1, 1]} : vector<16x32xf32> to vector<16x16xf32>
    %219 = vector.extract_strided_slice %217 {offsets = [0, 16], sizes = [16, 16], strides = [1, 1]} : vector<16x32xf32> to vector<16x16xf32>
    %220 = vector.shape_cast %218 : vector<16x16xf32> to vector<1x16x16xf32>
    %221 = vector.shape_cast %219 : vector<16x16xf32> to vector<1x16x16xf32>
    %222 = tpu.concatenate %220, %221 in 0 : vector<1x16x16xf32>, vector<1x16x16xf32> -> vector<2x16x16xf32>
    %223 = arith.truncf %222 : vector<2x16x16xf32> to vector<2x16x16xbf16>
    "tpu.trace_start"() <{level = 10 : i32, message = "nqd,nkd->nqk"}> : () -> ()
    %cst_111 = arith.constant dense<0.000000e+00> : vector<2x16x16xf32>
    %224 = tpu.matmul %209, %216, %cst_111 {dimension_numbers = #tpu.dot_dimension_numbers<[2], [2], [1], [1], [0, 0, 0, 1, 1, 1], [0], [0]>} : vector<2x16x16xbf16>, vector<2x16x16xbf16>, vector<2x16x16xf32> -> vector<2x16x16xf32>
    "tpu.trace_stop"() : () -> ()
    %cst_112 = arith.constant 2.500000e-01 : f32
    %225 = vector.broadcast %cst_112 : f32 to vector<2x16x16xf32>
    %226 = arith.mulf %224, %225 : vector<2x16x16xf32>
    %227 = vector.shape_cast %5 : vector<1x16xf32> to vector<1x1x16xf32>
    %cst_113 = arith.constant 5.000000e-01 : f32
    %228 = vector.broadcast %cst_113 : f32 to vector<1x1x16xf32>
    %229 = arith.cmpf ogt, %227, %228 : vector<1x1x16xf32>
    %cst_114 = arith.constant -1.000000e+09 : f32
    %230 = vector.shape_cast %229 : vector<1x1x16xi1> to vector<1x1x16xi1>
    %231 = vector.broadcast %230 : vector<1x1x16xi1> to vector<2x16x16xi1>
    %232 = vector.broadcast %cst_114 : f32 to vector<2x16x16xf32>
    %233 = arith.select %231, %232, %226 : vector<2x16x16xi1>, vector<2x16x16xf32>
    %cst_115 = arith.constant dense<0xFF800000> : vector<2x16xf32>
    %234 = vector.multi_reduction <maximumf>, %233, %cst_115 [2] : vector<2x16x16xf32> to vector<2x16xf32>
    %235 = vector.shape_cast %234 : vector<2x16xf32> to vector<2x16x1xf32>
    %236 = vector.broadcast %235 : vector<2x16x1xf32> to vector<2x16x16xf32>
    %237 = arith.subf %233, %236 : vector<2x16x16xf32>
    %238 = math.exp %237 : vector<2x16x16xf32>
    %cst_116 = arith.constant dense<0.000000e+00> : vector<2x16xf32>
    %239 = vector.multi_reduction <add>, %238, %cst_116 [2] : vector<2x16x16xf32> to vector<2x16xf32>
    %240 = vector.shape_cast %239 : vector<2x16xf32> to vector<2x16x1xf32>
    %241 = tpu.reciprocal %240 {approx = true} : vector<2x16x1xf32> -> vector<2x16x1xf32>
    %242 = vector.broadcast %241 : vector<2x16x1xf32> to vector<2x16x16xf32>
    %243 = arith.mulf %238, %242 : vector<2x16x16xf32>
    %244 = arith.truncf %243 : vector<2x16x16xf32> to vector<2x16x16xbf16>
    "tpu.trace_start"() <{level = 10 : i32, message = "nqk,nkd->nqd"}> : () -> ()
    %cst_117 = arith.constant dense<0.000000e+00> : vector<2x16x16xf32>
    %245 = tpu.matmul %244, %223, %cst_117 {dimension_numbers = #tpu.dot_dimension_numbers<[2], [1], [1], [2], [0, 0, 0, 1, 1, 2], [0], [0]>} : vector<2x16x16xbf16>, vector<2x16x16xbf16>, vector<2x16x16xf32> -> vector<2x16x16xf32>
    "tpu.trace_stop"() : () -> ()
    %246 = vector.extract_strided_slice %245 {offsets = [0, 0, 0], sizes = [1, 16, 16], strides = [1, 1, 1]} : vector<2x16x16xf32> to vector<1x16x16xf32>
    %247 = vector.shape_cast %246 : vector<1x16x16xf32> to vector<16x16xf32>
    %248 = vector.extract_strided_slice %245 {offsets = [1, 0, 0], sizes = [1, 16, 16], strides = [1, 1, 1]} : vector<2x16x16xf32> to vector<1x16x16xf32>
    %249 = vector.shape_cast %248 : vector<1x16x16xf32> to vector<16x16xf32>
    %250 = tpu.concatenate %247, %249 in 1 : vector<16x16xf32>, vector<16x16xf32> -> vector<16x32xf32>
    %251 = arith.truncf %250 : vector<16x32xf32> to vector<16x32xbf16>
    %cst_118 = arith.constant dense<0.000000e+00> : vector<16x32xf32>
    %252 = tpu.matmul %251, %180, %cst_118 {dimension_numbers = #tpu.dot_dimension_numbers<[1], [0], [0], [1], [0, 0, 1, 1], [], []>} : vector<16x32xbf16>, vector<32x32xbf16>, vector<16x32xf32> -> vector<16x32xf32>
    %253 = vector.broadcast %182 : vector<1x32xf32> to vector<16x32xf32>
    %254 = arith.addf %252, %253 : vector<16x32xf32>
    %255 = arith.addf %254, %174 : vector<16x32xf32>
    %cst_119 = arith.constant dense<0.000000e+00> : vector<16xf32>
    %256 = vector.multi_reduction <add>, %255, %cst_119 [1] : vector<16x32xf32> to vector<16xf32>
    %257 = vector.shape_cast %256 : vector<16xf32> to vector<16x1xf32>
    %cst_120 = arith.constant 3.200000e+01 : f32
    %258 = vector.broadcast %cst_120 : f32 to vector<16x1xf32>
    %259 = arith.divf %257, %258 : vector<16x1xf32>
    %260 = vector.broadcast %259 : vector<16x1xf32> to vector<16x32xf32>
    %261 = arith.subf %255, %260 : vector<16x32xf32>
    %262 = arith.mulf %261, %261 : vector<16x32xf32>
    %cst_121 = arith.constant dense<0.000000e+00> : vector<16xf32>
    %263 = vector.multi_reduction <add>, %262, %cst_121 [1] : vector<16x32xf32> to vector<16xf32>
    %264 = vector.shape_cast %263 : vector<16xf32> to vector<16x1xf32>
    %cst_122 = arith.constant 3.200000e+01 : f32
    %265 = vector.broadcast %cst_122 : f32 to vector<16x1xf32>
    %266 = arith.divf %264, %265 : vector<16x1xf32>
    %267 = vector.broadcast %259 : vector<16x1xf32> to vector<16x32xf32>
    %268 = arith.subf %255, %267 : vector<16x32xf32>
    %cst_123 = arith.constant 9.99999974E-6 : f32
    %269 = vector.broadcast %cst_123 : f32 to vector<16x1xf32>
    %270 = arith.addf %266, %269 : vector<16x1xf32>
    %271 = math.rsqrt %270 : vector<16x1xf32>
    %272 = vector.broadcast %271 : vector<16x1xf32> to vector<16x32xf32>
    %273 = arith.mulf %268, %272 : vector<16x32xf32>
    %274 = vector.broadcast %184 : vector<1x32xf32> to vector<16x32xf32>
    %275 = arith.mulf %273, %274 : vector<16x32xf32>
    %276 = vector.broadcast %186 : vector<1x32xf32> to vector<16x32xf32>
    %277 = arith.addf %275, %276 : vector<16x32xf32>
    %278 = vector.broadcast %7 : vector<16x1xf32> to vector<16x32xf32>
    %279 = arith.mulf %277, %278 : vector<16x32xf32>
    %280 = tpu.iota {dimensions = array<i32: 0>} : vector<16x1xi32>
    %c1_i32_124 = arith.constant 1 : i32
    %281 = tpu.dynamic_rotate %279 by %c1_i32_124 dim 0 : vector<16x32xf32>, i32 -> vector<16x32xf32>
    %c1_i32_125 = arith.constant 1 : i32
    %282 = vector.broadcast %c1_i32_125 : i32 to vector<16x1xi32>
    %283 = arith.cmpi sge, %280, %282 : vector<16x1xi32>
    %cst_126 = arith.constant 0.000000e+00 : f32
    %284 = vector.shape_cast %283 : vector<16x1xi1> to vector<16x1xi1>
    %285 = vector.broadcast %284 : vector<16x1xi1> to vector<16x32xi1>
    %286 = vector.broadcast %cst_126 : f32 to vector<16x32xf32>
    %287 = arith.select %285, %281, %286 : vector<16x32xi1>, vector<16x32xf32>
    %288 = vector.extract_strided_slice %188 {offsets = [0, 0, 0], sizes = [1, 32, 64], strides = [1, 1, 1]} : vector<3x32x64xbf16> to vector<1x32x64xbf16>
    %289 = vector.shape_cast %288 : vector<1x32x64xbf16> to vector<32x64xbf16>
    %290 = arith.truncf %287 : vector<16x32xf32> to vector<16x32xbf16>
    %cst_127 = arith.constant dense<0.000000e+00> : vector<16x64xf32>
    %291 = tpu.matmul %290, %289, %cst_127 {dimension_numbers = #tpu.dot_dimension_numbers<[1], [0], [0], [1], [0, 0, 1, 1], [], []>} : vector<16x32xbf16>, vector<32x64xbf16>, vector<16x64xf32> -> vector<16x64xf32>
    %292 = vector.extract_strided_slice %188 {offsets = [1, 0, 0], sizes = [1, 32, 64], strides = [1, 1, 1]} : vector<3x32x64xbf16> to vector<1x32x64xbf16>
    %293 = vector.shape_cast %292 : vector<1x32x64xbf16> to vector<32x64xbf16>
    %294 = arith.truncf %279 : vector<16x32xf32> to vector<16x32xbf16>
    %cst_128 = arith.constant dense<0.000000e+00> : vector<16x64xf32>
    %295 = tpu.matmul %294, %293, %cst_128 {dimension_numbers = #tpu.dot_dimension_numbers<[1], [0], [0], [1], [0, 0, 1, 1], [], []>} : vector<16x32xbf16>, vector<32x64xbf16>, vector<16x64xf32> -> vector<16x64xf32>
    %296 = arith.addf %291, %295 : vector<16x64xf32>
    %c15_i32_129 = arith.constant 15 : i32
    %297 = tpu.dynamic_rotate %279 by %c15_i32_129 dim 0 : vector<16x32xf32>, i32 -> vector<16x32xf32>
    %c15_i32_130 = arith.constant 15 : i32
    %298 = vector.broadcast %c15_i32_130 : i32 to vector<16x1xi32>
    %299 = arith.cmpi slt, %280, %298 : vector<16x1xi32>
    %cst_131 = arith.constant 0.000000e+00 : f32
    %300 = vector.shape_cast %299 : vector<16x1xi1> to vector<16x1xi1>
    %301 = vector.broadcast %300 : vector<16x1xi1> to vector<16x32xi1>
    %302 = vector.broadcast %cst_131 : f32 to vector<16x32xf32>
    %303 = arith.select %301, %297, %302 : vector<16x32xi1>, vector<16x32xf32>
    %304 = vector.extract_strided_slice %188 {offsets = [2, 0, 0], sizes = [1, 32, 64], strides = [1, 1, 1]} : vector<3x32x64xbf16> to vector<1x32x64xbf16>
    %305 = vector.shape_cast %304 : vector<1x32x64xbf16> to vector<32x64xbf16>
    %306 = arith.truncf %303 : vector<16x32xf32> to vector<16x32xbf16>
    %cst_132 = arith.constant dense<0.000000e+00> : vector<16x64xf32>
    %307 = tpu.matmul %306, %305, %cst_132 {dimension_numbers = #tpu.dot_dimension_numbers<[1], [0], [0], [1], [0, 0, 1, 1], [], []>} : vector<16x32xbf16>, vector<32x64xbf16>, vector<16x64xf32> -> vector<16x64xf32>
    %308 = arith.addf %296, %307 : vector<16x64xf32>
    %309 = vector.broadcast %190 : vector<1x64xf32> to vector<16x64xf32>
    %310 = arith.addf %308, %309 : vector<16x64xf32>
    %cst_133 = arith.constant 0.000000e+00 : f32
    %311 = vector.broadcast %cst_133 : f32 to vector<16x64xf32>
    %312 = arith.maximumf %310, %311 : vector<16x64xf32>
    %313 = arith.truncf %312 : vector<16x64xf32> to vector<16x64xbf16>
    %cst_134 = arith.constant dense<0.000000e+00> : vector<16x32xf32>
    %314 = tpu.matmul %313, %192, %cst_134 {dimension_numbers = #tpu.dot_dimension_numbers<[1], [0], [0], [1], [0, 0, 1, 1], [], []>} : vector<16x64xbf16>, vector<64x32xbf16>, vector<16x32xf32> -> vector<16x32xf32>
    %315 = vector.broadcast %194 : vector<1x32xf32> to vector<16x32xf32>
    %316 = arith.addf %314, %315 : vector<16x32xf32>
    %317 = arith.addf %316, %279 : vector<16x32xf32>
    %cst_135 = arith.constant dense<0.000000e+00> : vector<16xf32>
    %318 = vector.multi_reduction <add>, %317, %cst_135 [1] : vector<16x32xf32> to vector<16xf32>
    %319 = vector.shape_cast %318 : vector<16xf32> to vector<16x1xf32>
    %cst_136 = arith.constant 3.200000e+01 : f32
    %320 = vector.broadcast %cst_136 : f32 to vector<16x1xf32>
    %321 = arith.divf %319, %320 : vector<16x1xf32>
    %322 = vector.broadcast %321 : vector<16x1xf32> to vector<16x32xf32>
    %323 = arith.subf %317, %322 : vector<16x32xf32>
    %324 = arith.mulf %323, %323 : vector<16x32xf32>
    %cst_137 = arith.constant dense<0.000000e+00> : vector<16xf32>
    %325 = vector.multi_reduction <add>, %324, %cst_137 [1] : vector<16x32xf32> to vector<16xf32>
    %326 = vector.shape_cast %325 : vector<16xf32> to vector<16x1xf32>
    %cst_138 = arith.constant 3.200000e+01 : f32
    %327 = vector.broadcast %cst_138 : f32 to vector<16x1xf32>
    %328 = arith.divf %326, %327 : vector<16x1xf32>
    %329 = vector.broadcast %321 : vector<16x1xf32> to vector<16x32xf32>
    %330 = arith.subf %317, %329 : vector<16x32xf32>
    %cst_139 = arith.constant 9.99999974E-6 : f32
    %331 = vector.broadcast %cst_139 : f32 to vector<16x1xf32>
    %332 = arith.addf %328, %331 : vector<16x1xf32>
    %333 = math.rsqrt %332 : vector<16x1xf32>
    %334 = vector.broadcast %333 : vector<16x1xf32> to vector<16x32xf32>
    %335 = arith.mulf %330, %334 : vector<16x32xf32>
    %336 = vector.broadcast %196 : vector<1x32xf32> to vector<16x32xf32>
    %337 = arith.mulf %335, %336 : vector<16x32xf32>
    %338 = vector.broadcast %198 : vector<1x32xf32> to vector<16x32xf32>
    %339 = arith.addf %337, %338 : vector<16x32xf32>
    %340 = vector.broadcast %7 : vector<16x1xf32> to vector<16x32xf32>
    %341 = arith.mulf %339, %340 : vector<16x32xf32>
    %c0_140 = arith.constant 0 : index
    %c0_141 = arith.constant 0 : index
    %342 = vector.load %arg17[%c0_140, %c0_141] : memref<32x16xbf16, #tpu.memory_space<vmem>>, vector<32x16xbf16>
    %343 = arith.truncf %341 : vector<16x32xf32> to vector<16x32xbf16>
    %cst_142 = arith.constant dense<0.000000e+00> : vector<16x16xf32>
    %344 = tpu.matmul %343, %342, %cst_142 {dimension_numbers = #tpu.dot_dimension_numbers<[1], [0], [0], [1], [0, 0, 1, 1], [], []>} : vector<16x32xbf16>, vector<32x16xbf16>, vector<16x16xf32> -> vector<16x16xf32>
    %c0_143 = arith.constant 0 : index
    %c0_144 = arith.constant 0 : index
    %345 = vector.load %arg18[%c0_143, %c0_144] : memref<1x16xf32, #tpu.memory_space<vmem>>, vector<1x16xf32>
    %346 = vector.broadcast %345 : vector<1x16xf32> to vector<16x16xf32>
    %347 = arith.addf %344, %346 : vector<16x16xf32>
    %c0_145 = arith.constant 0 : index
    %c0_146 = arith.constant 0 : index
    %c0_147 = arith.constant 0 : index
    %348 = vector.load %arg19[%c0_145, %c0_146, %c0_147] : memref<5x16x32xbf16, #tpu.memory_space<vmem>>, vector<5x16x32xbf16>
    %c0_148 = arith.constant 0 : index
    %c0_149 = arith.constant 0 : index
    %349 = vector.load %arg20[%c0_148, %c0_149] : memref<1x32xf32, #tpu.memory_space<vmem>>, vector<1x32xf32>
    %350 = tpu.iota {dimensions = array<i32: 0>} : vector<16x1xi32>
    %c2_i32 = arith.constant 2 : i32
    %351 = tpu.dynamic_rotate %347 by %c2_i32 dim 0 : vector<16x16xf32>, i32 -> vector<16x16xf32>
    %c2_i32_150 = arith.constant 2 : i32
    %352 = vector.broadcast %c2_i32_150 : i32 to vector<16x1xi32>
    %353 = arith.cmpi sge, %350, %352 : vector<16x1xi32>
    %cst_151 = arith.constant 0.000000e+00 : f32
    %354 = vector.shape_cast %353 : vector<16x1xi1> to vector<16x1xi1>
    %355 = vector.broadcast %354 : vector<16x1xi1> to vector<16x16xi1>
    %356 = vector.broadcast %cst_151 : f32 to vector<16x16xf32>
    %357 = arith.select %355, %351, %356 : vector<16x16xi1>, vector<16x16xf32>
    %358 = vector.extract_strided_slice %348 {offsets = [0, 0, 0], sizes = [1, 16, 32], strides = [1, 1, 1]} : vector<5x16x32xbf16> to vector<1x16x32xbf16>
    %359 = vector.shape_cast %358 : vector<1x16x32xbf16> to vector<16x32xbf16>
    %360 = arith.truncf %357 : vector<16x16xf32> to vector<16x16xbf16>
    %cst_152 = arith.constant dense<0.000000e+00> : vector<16x32xf32>
    %361 = tpu.matmul %360, %359, %cst_152 {dimension_numbers = #tpu.dot_dimension_numbers<[1], [0], [0], [1], [0, 0, 1, 1], [], []>} : vector<16x16xbf16>, vector<16x32xbf16>, vector<16x32xf32> -> vector<16x32xf32>
    %c1_i32_153 = arith.constant 1 : i32
    %362 = tpu.dynamic_rotate %347 by %c1_i32_153 dim 0 : vector<16x16xf32>, i32 -> vector<16x16xf32>
    %c1_i32_154 = arith.constant 1 : i32
    %363 = vector.broadcast %c1_i32_154 : i32 to vector<16x1xi32>
    %364 = arith.cmpi sge, %350, %363 : vector<16x1xi32>
    %cst_155 = arith.constant 0.000000e+00 : f32
    %365 = vector.shape_cast %364 : vector<16x1xi1> to vector<16x1xi1>
    %366 = vector.broadcast %365 : vector<16x1xi1> to vector<16x16xi1>
    %367 = vector.broadcast %cst_155 : f32 to vector<16x16xf32>
    %368 = arith.select %366, %362, %367 : vector<16x16xi1>, vector<16x16xf32>
    %369 = vector.extract_strided_slice %348 {offsets = [1, 0, 0], sizes = [1, 16, 32], strides = [1, 1, 1]} : vector<5x16x32xbf16> to vector<1x16x32xbf16>
    %370 = vector.shape_cast %369 : vector<1x16x32xbf16> to vector<16x32xbf16>
    %371 = arith.truncf %368 : vector<16x16xf32> to vector<16x16xbf16>
    %cst_156 = arith.constant dense<0.000000e+00> : vector<16x32xf32>
    %372 = tpu.matmul %371, %370, %cst_156 {dimension_numbers = #tpu.dot_dimension_numbers<[1], [0], [0], [1], [0, 0, 1, 1], [], []>} : vector<16x16xbf16>, vector<16x32xbf16>, vector<16x32xf32> -> vector<16x32xf32>
    %373 = arith.addf %361, %372 : vector<16x32xf32>
    %374 = vector.extract_strided_slice %348 {offsets = [2, 0, 0], sizes = [1, 16, 32], strides = [1, 1, 1]} : vector<5x16x32xbf16> to vector<1x16x32xbf16>
    %375 = vector.shape_cast %374 : vector<1x16x32xbf16> to vector<16x32xbf16>
    %376 = arith.truncf %347 : vector<16x16xf32> to vector<16x16xbf16>
    %cst_157 = arith.constant dense<0.000000e+00> : vector<16x32xf32>
    %377 = tpu.matmul %376, %375, %cst_157 {dimension_numbers = #tpu.dot_dimension_numbers<[1], [0], [0], [1], [0, 0, 1, 1], [], []>} : vector<16x16xbf16>, vector<16x32xbf16>, vector<16x32xf32> -> vector<16x32xf32>
    %378 = arith.addf %373, %377 : vector<16x32xf32>
    %c15_i32_158 = arith.constant 15 : i32
    %379 = tpu.dynamic_rotate %347 by %c15_i32_158 dim 0 : vector<16x16xf32>, i32 -> vector<16x16xf32>
    %c15_i32_159 = arith.constant 15 : i32
    %380 = vector.broadcast %c15_i32_159 : i32 to vector<16x1xi32>
    %381 = arith.cmpi slt, %350, %380 : vector<16x1xi32>
    %cst_160 = arith.constant 0.000000e+00 : f32
    %382 = vector.shape_cast %381 : vector<16x1xi1> to vector<16x1xi1>
    %383 = vector.broadcast %382 : vector<16x1xi1> to vector<16x16xi1>
    %384 = vector.broadcast %cst_160 : f32 to vector<16x16xf32>
    %385 = arith.select %383, %379, %384 : vector<16x16xi1>, vector<16x16xf32>
    %386 = vector.extract_strided_slice %348 {offsets = [3, 0, 0], sizes = [1, 16, 32], strides = [1, 1, 1]} : vector<5x16x32xbf16> to vector<1x16x32xbf16>
    %387 = vector.shape_cast %386 : vector<1x16x32xbf16> to vector<16x32xbf16>
    %388 = arith.truncf %385 : vector<16x16xf32> to vector<16x16xbf16>
    %cst_161 = arith.constant dense<0.000000e+00> : vector<16x32xf32>
    %389 = tpu.matmul %388, %387, %cst_161 {dimension_numbers = #tpu.dot_dimension_numbers<[1], [0], [0], [1], [0, 0, 1, 1], [], []>} : vector<16x16xbf16>, vector<16x32xbf16>, vector<16x32xf32> -> vector<16x32xf32>
    %390 = arith.addf %378, %389 : vector<16x32xf32>
    %c14_i32 = arith.constant 14 : i32
    %391 = tpu.dynamic_rotate %347 by %c14_i32 dim 0 : vector<16x16xf32>, i32 -> vector<16x16xf32>
    %c14_i32_162 = arith.constant 14 : i32
    %392 = vector.broadcast %c14_i32_162 : i32 to vector<16x1xi32>
    %393 = arith.cmpi slt, %350, %392 : vector<16x1xi32>
    %cst_163 = arith.constant 0.000000e+00 : f32
    %394 = vector.shape_cast %393 : vector<16x1xi1> to vector<16x1xi1>
    %395 = vector.broadcast %394 : vector<16x1xi1> to vector<16x16xi1>
    %396 = vector.broadcast %cst_163 : f32 to vector<16x16xf32>
    %397 = arith.select %395, %391, %396 : vector<16x16xi1>, vector<16x16xf32>
    %398 = vector.extract_strided_slice %348 {offsets = [4, 0, 0], sizes = [1, 16, 32], strides = [1, 1, 1]} : vector<5x16x32xbf16> to vector<1x16x32xbf16>
    %399 = vector.shape_cast %398 : vector<1x16x32xbf16> to vector<16x32xbf16>
    %400 = arith.truncf %397 : vector<16x16xf32> to vector<16x16xbf16>
    %cst_164 = arith.constant dense<0.000000e+00> : vector<16x32xf32>
    %401 = tpu.matmul %400, %399, %cst_164 {dimension_numbers = #tpu.dot_dimension_numbers<[1], [0], [0], [1], [0, 0, 1, 1], [], []>} : vector<16x16xbf16>, vector<16x32xbf16>, vector<16x32xf32> -> vector<16x32xf32>
    %402 = arith.addf %390, %401 : vector<16x32xf32>
    %403 = vector.broadcast %349 : vector<1x32xf32> to vector<16x32xf32>
    %404 = arith.addf %402, %403 : vector<16x32xf32>
    %405 = math.tanh %404 : vector<16x32xf32>
    %c0_165 = arith.constant 0 : index
    %c0_166 = arith.constant 0 : index
    %c0_167 = arith.constant 0 : index
    %406 = vector.load %arg21[%c0_165, %c0_166, %c0_167] : memref<5x32x32xbf16, #tpu.memory_space<vmem>>, vector<5x32x32xbf16>
    %c0_168 = arith.constant 0 : index
    %c0_169 = arith.constant 0 : index
    %407 = vector.load %arg22[%c0_168, %c0_169] : memref<1x32xf32, #tpu.memory_space<vmem>>, vector<1x32xf32>
    %408 = tpu.iota {dimensions = array<i32: 0>} : vector<16x1xi32>
    %c2_i32_170 = arith.constant 2 : i32
    %409 = tpu.dynamic_rotate %405 by %c2_i32_170 dim 0 : vector<16x32xf32>, i32 -> vector<16x32xf32>
    %c2_i32_171 = arith.constant 2 : i32
    %410 = vector.broadcast %c2_i32_171 : i32 to vector<16x1xi32>
    %411 = arith.cmpi sge, %408, %410 : vector<16x1xi32>
    %cst_172 = arith.constant 0.000000e+00 : f32
    %412 = vector.shape_cast %411 : vector<16x1xi1> to vector<16x1xi1>
    %413 = vector.broadcast %412 : vector<16x1xi1> to vector<16x32xi1>
    %414 = vector.broadcast %cst_172 : f32 to vector<16x32xf32>
    %415 = arith.select %413, %409, %414 : vector<16x32xi1>, vector<16x32xf32>
    %416 = vector.extract_strided_slice %406 {offsets = [0, 0, 0], sizes = [1, 32, 32], strides = [1, 1, 1]} : vector<5x32x32xbf16> to vector<1x32x32xbf16>
    %417 = vector.shape_cast %416 : vector<1x32x32xbf16> to vector<32x32xbf16>
    %418 = arith.truncf %415 : vector<16x32xf32> to vector<16x32xbf16>
    %cst_173 = arith.constant dense<0.000000e+00> : vector<16x32xf32>
    %419 = tpu.matmul %418, %417, %cst_173 {dimension_numbers = #tpu.dot_dimension_numbers<[1], [0], [0], [1], [0, 0, 1, 1], [], []>} : vector<16x32xbf16>, vector<32x32xbf16>, vector<16x32xf32> -> vector<16x32xf32>
    %c1_i32_174 = arith.constant 1 : i32
    %420 = tpu.dynamic_rotate %405 by %c1_i32_174 dim 0 : vector<16x32xf32>, i32 -> vector<16x32xf32>
    %c1_i32_175 = arith.constant 1 : i32
    %421 = vector.broadcast %c1_i32_175 : i32 to vector<16x1xi32>
    %422 = arith.cmpi sge, %408, %421 : vector<16x1xi32>
    %cst_176 = arith.constant 0.000000e+00 : f32
    %423 = vector.shape_cast %422 : vector<16x1xi1> to vector<16x1xi1>
    %424 = vector.broadcast %423 : vector<16x1xi1> to vector<16x32xi1>
    %425 = vector.broadcast %cst_176 : f32 to vector<16x32xf32>
    %426 = arith.select %424, %420, %425 : vector<16x32xi1>, vector<16x32xf32>
    %427 = vector.extract_strided_slice %406 {offsets = [1, 0, 0], sizes = [1, 32, 32], strides = [1, 1, 1]} : vector<5x32x32xbf16> to vector<1x32x32xbf16>
    %428 = vector.shape_cast %427 : vector<1x32x32xbf16> to vector<32x32xbf16>
    %429 = arith.truncf %426 : vector<16x32xf32> to vector<16x32xbf16>
    %cst_177 = arith.constant dense<0.000000e+00> : vector<16x32xf32>
    %430 = tpu.matmul %429, %428, %cst_177 {dimension_numbers = #tpu.dot_dimension_numbers<[1], [0], [0], [1], [0, 0, 1, 1], [], []>} : vector<16x32xbf16>, vector<32x32xbf16>, vector<16x32xf32> -> vector<16x32xf32>
    %431 = arith.addf %419, %430 : vector<16x32xf32>
    %432 = vector.extract_strided_slice %406 {offsets = [2, 0, 0], sizes = [1, 32, 32], strides = [1, 1, 1]} : vector<5x32x32xbf16> to vector<1x32x32xbf16>
    %433 = vector.shape_cast %432 : vector<1x32x32xbf16> to vector<32x32xbf16>
    %434 = arith.truncf %405 : vector<16x32xf32> to vector<16x32xbf16>
    %cst_178 = arith.constant dense<0.000000e+00> : vector<16x32xf32>
    %435 = tpu.matmul %434, %433, %cst_178 {dimension_numbers = #tpu.dot_dimension_numbers<[1], [0], [0], [1], [0, 0, 1, 1], [], []>} : vector<16x32xbf16>, vector<32x32xbf16>, vector<16x32xf32> -> vector<16x32xf32>
    %436 = arith.addf %431, %435 : vector<16x32xf32>
    %c15_i32_179 = arith.constant 15 : i32
    %437 = tpu.dynamic_rotate %405 by %c15_i32_179 dim 0 : vector<16x32xf32>, i32 -> vector<16x32xf32>
    %c15_i32_180 = arith.constant 15 : i32
    %438 = vector.broadcast %c15_i32_180 : i32 to vector<16x1xi32>
    %439 = arith.cmpi slt, %408, %438 : vector<16x1xi32>
    %cst_181 = arith.constant 0.000000e+00 : f32
    %440 = vector.shape_cast %439 : vector<16x1xi1> to vector<16x1xi1>
    %441 = vector.broadcast %440 : vector<16x1xi1> to vector<16x32xi1>
    %442 = vector.broadcast %cst_181 : f32 to vector<16x32xf32>
    %443 = arith.select %441, %437, %442 : vector<16x32xi1>, vector<16x32xf32>
    %444 = vector.extract_strided_slice %406 {offsets = [3, 0, 0], sizes = [1, 32, 32], strides = [1, 1, 1]} : vector<5x32x32xbf16> to vector<1x32x32xbf16>
    %445 = vector.shape_cast %444 : vector<1x32x32xbf16> to vector<32x32xbf16>
    %446 = arith.truncf %443 : vector<16x32xf32> to vector<16x32xbf16>
    %cst_182 = arith.constant dense<0.000000e+00> : vector<16x32xf32>
    %447 = tpu.matmul %446, %445, %cst_182 {dimension_numbers = #tpu.dot_dimension_numbers<[1], [0], [0], [1], [0, 0, 1, 1], [], []>} : vector<16x32xbf16>, vector<32x32xbf16>, vector<16x32xf32> -> vector<16x32xf32>
    %448 = arith.addf %436, %447 : vector<16x32xf32>
    %c14_i32_183 = arith.constant 14 : i32
    %449 = tpu.dynamic_rotate %405 by %c14_i32_183 dim 0 : vector<16x32xf32>, i32 -> vector<16x32xf32>
    %c14_i32_184 = arith.constant 14 : i32
    %450 = vector.broadcast %c14_i32_184 : i32 to vector<16x1xi32>
    %451 = arith.cmpi slt, %408, %450 : vector<16x1xi32>
    %cst_185 = arith.constant 0.000000e+00 : f32
    %452 = vector.shape_cast %451 : vector<16x1xi1> to vector<16x1xi1>
    %453 = vector.broadcast %452 : vector<16x1xi1> to vector<16x32xi1>
    %454 = vector.broadcast %cst_185 : f32 to vector<16x32xf32>
    %455 = arith.select %453, %449, %454 : vector<16x32xi1>, vector<16x32xf32>
    %456 = vector.extract_strided_slice %406 {offsets = [4, 0, 0], sizes = [1, 32, 32], strides = [1, 1, 1]} : vector<5x32x32xbf16> to vector<1x32x32xbf16>
    %457 = vector.shape_cast %456 : vector<1x32x32xbf16> to vector<32x32xbf16>
    %458 = arith.truncf %455 : vector<16x32xf32> to vector<16x32xbf16>
    %cst_186 = arith.constant dense<0.000000e+00> : vector<16x32xf32>
    %459 = tpu.matmul %458, %457, %cst_186 {dimension_numbers = #tpu.dot_dimension_numbers<[1], [0], [0], [1], [0, 0, 1, 1], [], []>} : vector<16x32xbf16>, vector<32x32xbf16>, vector<16x32xf32> -> vector<16x32xf32>
    %460 = arith.addf %448, %459 : vector<16x32xf32>
    %461 = vector.broadcast %407 : vector<1x32xf32> to vector<16x32xf32>
    %462 = arith.addf %460, %461 : vector<16x32xf32>
    %463 = math.tanh %462 : vector<16x32xf32>
    %c0_187 = arith.constant 0 : index
    %c0_188 = arith.constant 0 : index
    %c0_189 = arith.constant 0 : index
    %464 = vector.load %arg23[%c0_187, %c0_188, %c0_189] : memref<5x32x32xbf16, #tpu.memory_space<vmem>>, vector<5x32x32xbf16>
    %c0_190 = arith.constant 0 : index
    %c0_191 = arith.constant 0 : index
    %465 = vector.load %arg24[%c0_190, %c0_191] : memref<1x32xf32, #tpu.memory_space<vmem>>, vector<1x32xf32>
    %466 = tpu.iota {dimensions = array<i32: 0>} : vector<16x1xi32>
    %c2_i32_192 = arith.constant 2 : i32
    %467 = tpu.dynamic_rotate %463 by %c2_i32_192 dim 0 : vector<16x32xf32>, i32 -> vector<16x32xf32>
    %c2_i32_193 = arith.constant 2 : i32
    %468 = vector.broadcast %c2_i32_193 : i32 to vector<16x1xi32>
    %469 = arith.cmpi sge, %466, %468 : vector<16x1xi32>
    %cst_194 = arith.constant 0.000000e+00 : f32
    %470 = vector.shape_cast %469 : vector<16x1xi1> to vector<16x1xi1>
    %471 = vector.broadcast %470 : vector<16x1xi1> to vector<16x32xi1>
    %472 = vector.broadcast %cst_194 : f32 to vector<16x32xf32>
    %473 = arith.select %471, %467, %472 : vector<16x32xi1>, vector<16x32xf32>
    %474 = vector.extract_strided_slice %464 {offsets = [0, 0, 0], sizes = [1, 32, 32], strides = [1, 1, 1]} : vector<5x32x32xbf16> to vector<1x32x32xbf16>
    %475 = vector.shape_cast %474 : vector<1x32x32xbf16> to vector<32x32xbf16>
    %476 = arith.truncf %473 : vector<16x32xf32> to vector<16x32xbf16>
    %cst_195 = arith.constant dense<0.000000e+00> : vector<16x32xf32>
    %477 = tpu.matmul %476, %475, %cst_195 {dimension_numbers = #tpu.dot_dimension_numbers<[1], [0], [0], [1], [0, 0, 1, 1], [], []>} : vector<16x32xbf16>, vector<32x32xbf16>, vector<16x32xf32> -> vector<16x32xf32>
    %c1_i32_196 = arith.constant 1 : i32
    %478 = tpu.dynamic_rotate %463 by %c1_i32_196 dim 0 : vector<16x32xf32>, i32 -> vector<16x32xf32>
    %c1_i32_197 = arith.constant 1 : i32
    %479 = vector.broadcast %c1_i32_197 : i32 to vector<16x1xi32>
    %480 = arith.cmpi sge, %466, %479 : vector<16x1xi32>
    %cst_198 = arith.constant 0.000000e+00 : f32
    %481 = vector.shape_cast %480 : vector<16x1xi1> to vector<16x1xi1>
    %482 = vector.broadcast %481 : vector<16x1xi1> to vector<16x32xi1>
    %483 = vector.broadcast %cst_198 : f32 to vector<16x32xf32>
    %484 = arith.select %482, %478, %483 : vector<16x32xi1>, vector<16x32xf32>
    %485 = vector.extract_strided_slice %464 {offsets = [1, 0, 0], sizes = [1, 32, 32], strides = [1, 1, 1]} : vector<5x32x32xbf16> to vector<1x32x32xbf16>
    %486 = vector.shape_cast %485 : vector<1x32x32xbf16> to vector<32x32xbf16>
    %487 = arith.truncf %484 : vector<16x32xf32> to vector<16x32xbf16>
    %cst_199 = arith.constant dense<0.000000e+00> : vector<16x32xf32>
    %488 = tpu.matmul %487, %486, %cst_199 {dimension_numbers = #tpu.dot_dimension_numbers<[1], [0], [0], [1], [0, 0, 1, 1], [], []>} : vector<16x32xbf16>, vector<32x32xbf16>, vector<16x32xf32> -> vector<16x32xf32>
    %489 = arith.addf %477, %488 : vector<16x32xf32>
    %490 = vector.extract_strided_slice %464 {offsets = [2, 0, 0], sizes = [1, 32, 32], strides = [1, 1, 1]} : vector<5x32x32xbf16> to vector<1x32x32xbf16>
    %491 = vector.shape_cast %490 : vector<1x32x32xbf16> to vector<32x32xbf16>
    %492 = arith.truncf %463 : vector<16x32xf32> to vector<16x32xbf16>
    %cst_200 = arith.constant dense<0.000000e+00> : vector<16x32xf32>
    %493 = tpu.matmul %492, %491, %cst_200 {dimension_numbers = #tpu.dot_dimension_numbers<[1], [0], [0], [1], [0, 0, 1, 1], [], []>} : vector<16x32xbf16>, vector<32x32xbf16>, vector<16x32xf32> -> vector<16x32xf32>
    %494 = arith.addf %489, %493 : vector<16x32xf32>
    %c15_i32_201 = arith.constant 15 : i32
    %495 = tpu.dynamic_rotate %463 by %c15_i32_201 dim 0 : vector<16x32xf32>, i32 -> vector<16x32xf32>
    %c15_i32_202 = arith.constant 15 : i32
    %496 = vector.broadcast %c15_i32_202 : i32 to vector<16x1xi32>
    %497 = arith.cmpi slt, %466, %496 : vector<16x1xi32>
    %cst_203 = arith.constant 0.000000e+00 : f32
    %498 = vector.shape_cast %497 : vector<16x1xi1> to vector<16x1xi1>
    %499 = vector.broadcast %498 : vector<16x1xi1> to vector<16x32xi1>
    %500 = vector.broadcast %cst_203 : f32 to vector<16x32xf32>
    %501 = arith.select %499, %495, %500 : vector<16x32xi1>, vector<16x32xf32>
    %502 = vector.extract_strided_slice %464 {offsets = [3, 0, 0], sizes = [1, 32, 32], strides = [1, 1, 1]} : vector<5x32x32xbf16> to vector<1x32x32xbf16>
    %503 = vector.shape_cast %502 : vector<1x32x32xbf16> to vector<32x32xbf16>
    %504 = arith.truncf %501 : vector<16x32xf32> to vector<16x32xbf16>
    %cst_204 = arith.constant dense<0.000000e+00> : vector<16x32xf32>
    %505 = tpu.matmul %504, %503, %cst_204 {dimension_numbers = #tpu.dot_dimension_numbers<[1], [0], [0], [1], [0, 0, 1, 1], [], []>} : vector<16x32xbf16>, vector<32x32xbf16>, vector<16x32xf32> -> vector<16x32xf32>
    %506 = arith.addf %494, %505 : vector<16x32xf32>
    %c14_i32_205 = arith.constant 14 : i32
    %507 = tpu.dynamic_rotate %463 by %c14_i32_205 dim 0 : vector<16x32xf32>, i32 -> vector<16x32xf32>
    %c14_i32_206 = arith.constant 14 : i32
    %508 = vector.broadcast %c14_i32_206 : i32 to vector<16x1xi32>
    %509 = arith.cmpi slt, %466, %508 : vector<16x1xi32>
    %cst_207 = arith.constant 0.000000e+00 : f32
    %510 = vector.shape_cast %509 : vector<16x1xi1> to vector<16x1xi1>
    %511 = vector.broadcast %510 : vector<16x1xi1> to vector<16x32xi1>
    %512 = vector.broadcast %cst_207 : f32 to vector<16x32xf32>
    %513 = arith.select %511, %507, %512 : vector<16x32xi1>, vector<16x32xf32>
    %514 = vector.extract_strided_slice %464 {offsets = [4, 0, 0], sizes = [1, 32, 32], strides = [1, 1, 1]} : vector<5x32x32xbf16> to vector<1x32x32xbf16>
    %515 = vector.shape_cast %514 : vector<1x32x32xbf16> to vector<32x32xbf16>
    %516 = arith.truncf %513 : vector<16x32xf32> to vector<16x32xbf16>
    %cst_208 = arith.constant dense<0.000000e+00> : vector<16x32xf32>
    %517 = tpu.matmul %516, %515, %cst_208 {dimension_numbers = #tpu.dot_dimension_numbers<[1], [0], [0], [1], [0, 0, 1, 1], [], []>} : vector<16x32xbf16>, vector<32x32xbf16>, vector<16x32xf32> -> vector<16x32xf32>
    %518 = arith.addf %506, %517 : vector<16x32xf32>
    %519 = vector.broadcast %465 : vector<1x32xf32> to vector<16x32xf32>
    %520 = arith.addf %518, %519 : vector<16x32xf32>
    %521 = math.tanh %520 : vector<16x32xf32>
    %c0_209 = arith.constant 0 : index
    %c0_210 = arith.constant 0 : index
    %c0_211 = arith.constant 0 : index
    %522 = vector.load %arg25[%c0_209, %c0_210, %c0_211] : memref<5x32x32xbf16, #tpu.memory_space<vmem>>, vector<5x32x32xbf16>
    %c0_212 = arith.constant 0 : index
    %c0_213 = arith.constant 0 : index
    %523 = vector.load %arg26[%c0_212, %c0_213] : memref<1x32xf32, #tpu.memory_space<vmem>>, vector<1x32xf32>
    %524 = tpu.iota {dimensions = array<i32: 0>} : vector<16x1xi32>
    %c2_i32_214 = arith.constant 2 : i32
    %525 = tpu.dynamic_rotate %521 by %c2_i32_214 dim 0 : vector<16x32xf32>, i32 -> vector<16x32xf32>
    %c2_i32_215 = arith.constant 2 : i32
    %526 = vector.broadcast %c2_i32_215 : i32 to vector<16x1xi32>
    %527 = arith.cmpi sge, %524, %526 : vector<16x1xi32>
    %cst_216 = arith.constant 0.000000e+00 : f32
    %528 = vector.shape_cast %527 : vector<16x1xi1> to vector<16x1xi1>
    %529 = vector.broadcast %528 : vector<16x1xi1> to vector<16x32xi1>
    %530 = vector.broadcast %cst_216 : f32 to vector<16x32xf32>
    %531 = arith.select %529, %525, %530 : vector<16x32xi1>, vector<16x32xf32>
    %532 = vector.extract_strided_slice %522 {offsets = [0, 0, 0], sizes = [1, 32, 32], strides = [1, 1, 1]} : vector<5x32x32xbf16> to vector<1x32x32xbf16>
    %533 = vector.shape_cast %532 : vector<1x32x32xbf16> to vector<32x32xbf16>
    %534 = arith.truncf %531 : vector<16x32xf32> to vector<16x32xbf16>
    %cst_217 = arith.constant dense<0.000000e+00> : vector<16x32xf32>
    %535 = tpu.matmul %534, %533, %cst_217 {dimension_numbers = #tpu.dot_dimension_numbers<[1], [0], [0], [1], [0, 0, 1, 1], [], []>} : vector<16x32xbf16>, vector<32x32xbf16>, vector<16x32xf32> -> vector<16x32xf32>
    %c1_i32_218 = arith.constant 1 : i32
    %536 = tpu.dynamic_rotate %521 by %c1_i32_218 dim 0 : vector<16x32xf32>, i32 -> vector<16x32xf32>
    %c1_i32_219 = arith.constant 1 : i32
    %537 = vector.broadcast %c1_i32_219 : i32 to vector<16x1xi32>
    %538 = arith.cmpi sge, %524, %537 : vector<16x1xi32>
    %cst_220 = arith.constant 0.000000e+00 : f32
    %539 = vector.shape_cast %538 : vector<16x1xi1> to vector<16x1xi1>
    %540 = vector.broadcast %539 : vector<16x1xi1> to vector<16x32xi1>
    %541 = vector.broadcast %cst_220 : f32 to vector<16x32xf32>
    %542 = arith.select %540, %536, %541 : vector<16x32xi1>, vector<16x32xf32>
    %543 = vector.extract_strided_slice %522 {offsets = [1, 0, 0], sizes = [1, 32, 32], strides = [1, 1, 1]} : vector<5x32x32xbf16> to vector<1x32x32xbf16>
    %544 = vector.shape_cast %543 : vector<1x32x32xbf16> to vector<32x32xbf16>
    %545 = arith.truncf %542 : vector<16x32xf32> to vector<16x32xbf16>
    %cst_221 = arith.constant dense<0.000000e+00> : vector<16x32xf32>
    %546 = tpu.matmul %545, %544, %cst_221 {dimension_numbers = #tpu.dot_dimension_numbers<[1], [0], [0], [1], [0, 0, 1, 1], [], []>} : vector<16x32xbf16>, vector<32x32xbf16>, vector<16x32xf32> -> vector<16x32xf32>
    %547 = arith.addf %535, %546 : vector<16x32xf32>
    %548 = vector.extract_strided_slice %522 {offsets = [2, 0, 0], sizes = [1, 32, 32], strides = [1, 1, 1]} : vector<5x32x32xbf16> to vector<1x32x32xbf16>
    %549 = vector.shape_cast %548 : vector<1x32x32xbf16> to vector<32x32xbf16>
    %550 = arith.truncf %521 : vector<16x32xf32> to vector<16x32xbf16>
    %cst_222 = arith.constant dense<0.000000e+00> : vector<16x32xf32>
    %551 = tpu.matmul %550, %549, %cst_222 {dimension_numbers = #tpu.dot_dimension_numbers<[1], [0], [0], [1], [0, 0, 1, 1], [], []>} : vector<16x32xbf16>, vector<32x32xbf16>, vector<16x32xf32> -> vector<16x32xf32>
    %552 = arith.addf %547, %551 : vector<16x32xf32>
    %c15_i32_223 = arith.constant 15 : i32
    %553 = tpu.dynamic_rotate %521 by %c15_i32_223 dim 0 : vector<16x32xf32>, i32 -> vector<16x32xf32>
    %c15_i32_224 = arith.constant 15 : i32
    %554 = vector.broadcast %c15_i32_224 : i32 to vector<16x1xi32>
    %555 = arith.cmpi slt, %524, %554 : vector<16x1xi32>
    %cst_225 = arith.constant 0.000000e+00 : f32
    %556 = vector.shape_cast %555 : vector<16x1xi1> to vector<16x1xi1>
    %557 = vector.broadcast %556 : vector<16x1xi1> to vector<16x32xi1>
    %558 = vector.broadcast %cst_225 : f32 to vector<16x32xf32>
    %559 = arith.select %557, %553, %558 : vector<16x32xi1>, vector<16x32xf32>
    %560 = vector.extract_strided_slice %522 {offsets = [3, 0, 0], sizes = [1, 32, 32], strides = [1, 1, 1]} : vector<5x32x32xbf16> to vector<1x32x32xbf16>
    %561 = vector.shape_cast %560 : vector<1x32x32xbf16> to vector<32x32xbf16>
    %562 = arith.truncf %559 : vector<16x32xf32> to vector<16x32xbf16>
    %cst_226 = arith.constant dense<0.000000e+00> : vector<16x32xf32>
    %563 = tpu.matmul %562, %561, %cst_226 {dimension_numbers = #tpu.dot_dimension_numbers<[1], [0], [0], [1], [0, 0, 1, 1], [], []>} : vector<16x32xbf16>, vector<32x32xbf16>, vector<16x32xf32> -> vector<16x32xf32>
    %564 = arith.addf %552, %563 : vector<16x32xf32>
    %c14_i32_227 = arith.constant 14 : i32
    %565 = tpu.dynamic_rotate %521 by %c14_i32_227 dim 0 : vector<16x32xf32>, i32 -> vector<16x32xf32>
    %c14_i32_228 = arith.constant 14 : i32
    %566 = vector.broadcast %c14_i32_228 : i32 to vector<16x1xi32>
    %567 = arith.cmpi slt, %524, %566 : vector<16x1xi32>
    %cst_229 = arith.constant 0.000000e+00 : f32
    %568 = vector.shape_cast %567 : vector<16x1xi1> to vector<16x1xi1>
    %569 = vector.broadcast %568 : vector<16x1xi1> to vector<16x32xi1>
    %570 = vector.broadcast %cst_229 : f32 to vector<16x32xf32>
    %571 = arith.select %569, %565, %570 : vector<16x32xi1>, vector<16x32xf32>
    %572 = vector.extract_strided_slice %522 {offsets = [4, 0, 0], sizes = [1, 32, 32], strides = [1, 1, 1]} : vector<5x32x32xbf16> to vector<1x32x32xbf16>
    %573 = vector.shape_cast %572 : vector<1x32x32xbf16> to vector<32x32xbf16>
    %574 = arith.truncf %571 : vector<16x32xf32> to vector<16x32xbf16>
    %cst_230 = arith.constant dense<0.000000e+00> : vector<16x32xf32>
    %575 = tpu.matmul %574, %573, %cst_230 {dimension_numbers = #tpu.dot_dimension_numbers<[1], [0], [0], [1], [0, 0, 1, 1], [], []>} : vector<16x32xbf16>, vector<32x32xbf16>, vector<16x32xf32> -> vector<16x32xf32>
    %576 = arith.addf %564, %575 : vector<16x32xf32>
    %577 = vector.broadcast %523 : vector<1x32xf32> to vector<16x32xf32>
    %578 = arith.addf %576, %577 : vector<16x32xf32>
    %579 = math.tanh %578 : vector<16x32xf32>
    %c0_231 = arith.constant 0 : index
    %c0_232 = arith.constant 0 : index
    %c0_233 = arith.constant 0 : index
    %580 = vector.load %arg27[%c0_231, %c0_232, %c0_233] : memref<5x32x16xbf16, #tpu.memory_space<vmem>>, vector<5x32x16xbf16>
    %c0_234 = arith.constant 0 : index
    %c0_235 = arith.constant 0 : index
    %581 = vector.load %arg28[%c0_234, %c0_235] : memref<1x16xf32, #tpu.memory_space<vmem>>, vector<1x16xf32>
    %582 = tpu.iota {dimensions = array<i32: 0>} : vector<16x1xi32>
    %c2_i32_236 = arith.constant 2 : i32
    %583 = tpu.dynamic_rotate %579 by %c2_i32_236 dim 0 : vector<16x32xf32>, i32 -> vector<16x32xf32>
    %c2_i32_237 = arith.constant 2 : i32
    %584 = vector.broadcast %c2_i32_237 : i32 to vector<16x1xi32>
    %585 = arith.cmpi sge, %582, %584 : vector<16x1xi32>
    %cst_238 = arith.constant 0.000000e+00 : f32
    %586 = vector.shape_cast %585 : vector<16x1xi1> to vector<16x1xi1>
    %587 = vector.broadcast %586 : vector<16x1xi1> to vector<16x32xi1>
    %588 = vector.broadcast %cst_238 : f32 to vector<16x32xf32>
    %589 = arith.select %587, %583, %588 : vector<16x32xi1>, vector<16x32xf32>
    %590 = vector.extract_strided_slice %580 {offsets = [0, 0, 0], sizes = [1, 32, 16], strides = [1, 1, 1]} : vector<5x32x16xbf16> to vector<1x32x16xbf16>
    %591 = vector.shape_cast %590 : vector<1x32x16xbf16> to vector<32x16xbf16>
    %592 = arith.truncf %589 : vector<16x32xf32> to vector<16x32xbf16>
    %cst_239 = arith.constant dense<0.000000e+00> : vector<16x16xf32>
    %593 = tpu.matmul %592, %591, %cst_239 {dimension_numbers = #tpu.dot_dimension_numbers<[1], [0], [0], [1], [0, 0, 1, 1], [], []>} : vector<16x32xbf16>, vector<32x16xbf16>, vector<16x16xf32> -> vector<16x16xf32>
    %c1_i32_240 = arith.constant 1 : i32
    %594 = tpu.dynamic_rotate %579 by %c1_i32_240 dim 0 : vector<16x32xf32>, i32 -> vector<16x32xf32>
    %c1_i32_241 = arith.constant 1 : i32
    %595 = vector.broadcast %c1_i32_241 : i32 to vector<16x1xi32>
    %596 = arith.cmpi sge, %582, %595 : vector<16x1xi32>
    %cst_242 = arith.constant 0.000000e+00 : f32
    %597 = vector.shape_cast %596 : vector<16x1xi1> to vector<16x1xi1>
    %598 = vector.broadcast %597 : vector<16x1xi1> to vector<16x32xi1>
    %599 = vector.broadcast %cst_242 : f32 to vector<16x32xf32>
    %600 = arith.select %598, %594, %599 : vector<16x32xi1>, vector<16x32xf32>
    %601 = vector.extract_strided_slice %580 {offsets = [1, 0, 0], sizes = [1, 32, 16], strides = [1, 1, 1]} : vector<5x32x16xbf16> to vector<1x32x16xbf16>
    %602 = vector.shape_cast %601 : vector<1x32x16xbf16> to vector<32x16xbf16>
    %603 = arith.truncf %600 : vector<16x32xf32> to vector<16x32xbf16>
    %cst_243 = arith.constant dense<0.000000e+00> : vector<16x16xf32>
    %604 = tpu.matmul %603, %602, %cst_243 {dimension_numbers = #tpu.dot_dimension_numbers<[1], [0], [0], [1], [0, 0, 1, 1], [], []>} : vector<16x32xbf16>, vector<32x16xbf16>, vector<16x16xf32> -> vector<16x16xf32>
    %605 = arith.addf %593, %604 : vector<16x16xf32>
    %606 = vector.extract_strided_slice %580 {offsets = [2, 0, 0], sizes = [1, 32, 16], strides = [1, 1, 1]} : vector<5x32x16xbf16> to vector<1x32x16xbf16>
    %607 = vector.shape_cast %606 : vector<1x32x16xbf16> to vector<32x16xbf16>
    %608 = arith.truncf %579 : vector<16x32xf32> to vector<16x32xbf16>
    %cst_244 = arith.constant dense<0.000000e+00> : vector<16x16xf32>
    %609 = tpu.matmul %608, %607, %cst_244 {dimension_numbers = #tpu.dot_dimension_numbers<[1], [0], [0], [1], [0, 0, 1, 1], [], []>} : vector<16x32xbf16>, vector<32x16xbf16>, vector<16x16xf32> -> vector<16x16xf32>
    %610 = arith.addf %605, %609 : vector<16x16xf32>
    %c15_i32_245 = arith.constant 15 : i32
    %611 = tpu.dynamic_rotate %579 by %c15_i32_245 dim 0 : vector<16x32xf32>, i32 -> vector<16x32xf32>
    %c15_i32_246 = arith.constant 15 : i32
    %612 = vector.broadcast %c15_i32_246 : i32 to vector<16x1xi32>
    %613 = arith.cmpi slt, %582, %612 : vector<16x1xi32>
    %cst_247 = arith.constant 0.000000e+00 : f32
    %614 = vector.shape_cast %613 : vector<16x1xi1> to vector<16x1xi1>
    %615 = vector.broadcast %614 : vector<16x1xi1> to vector<16x32xi1>
    %616 = vector.broadcast %cst_247 : f32 to vector<16x32xf32>
    %617 = arith.select %615, %611, %616 : vector<16x32xi1>, vector<16x32xf32>
    %618 = vector.extract_strided_slice %580 {offsets = [3, 0, 0], sizes = [1, 32, 16], strides = [1, 1, 1]} : vector<5x32x16xbf16> to vector<1x32x16xbf16>
    %619 = vector.shape_cast %618 : vector<1x32x16xbf16> to vector<32x16xbf16>
    %620 = arith.truncf %617 : vector<16x32xf32> to vector<16x32xbf16>
    %cst_248 = arith.constant dense<0.000000e+00> : vector<16x16xf32>
    %621 = tpu.matmul %620, %619, %cst_248 {dimension_numbers = #tpu.dot_dimension_numbers<[1], [0], [0], [1], [0, 0, 1, 1], [], []>} : vector<16x32xbf16>, vector<32x16xbf16>, vector<16x16xf32> -> vector<16x16xf32>
    %622 = arith.addf %610, %621 : vector<16x16xf32>
    %c14_i32_249 = arith.constant 14 : i32
    %623 = tpu.dynamic_rotate %579 by %c14_i32_249 dim 0 : vector<16x32xf32>, i32 -> vector<16x32xf32>
    %c14_i32_250 = arith.constant 14 : i32
    %624 = vector.broadcast %c14_i32_250 : i32 to vector<16x1xi32>
    %625 = arith.cmpi slt, %582, %624 : vector<16x1xi32>
    %cst_251 = arith.constant 0.000000e+00 : f32
    %626 = vector.shape_cast %625 : vector<16x1xi1> to vector<16x1xi1>
    %627 = vector.broadcast %626 : vector<16x1xi1> to vector<16x32xi1>
    %628 = vector.broadcast %cst_251 : f32 to vector<16x32xf32>
    %629 = arith.select %627, %623, %628 : vector<16x32xi1>, vector<16x32xf32>
    %630 = vector.extract_strided_slice %580 {offsets = [4, 0, 0], sizes = [1, 32, 16], strides = [1, 1, 1]} : vector<5x32x16xbf16> to vector<1x32x16xbf16>
    %631 = vector.shape_cast %630 : vector<1x32x16xbf16> to vector<32x16xbf16>
    %632 = arith.truncf %629 : vector<16x32xf32> to vector<16x32xbf16>
    %cst_252 = arith.constant dense<0.000000e+00> : vector<16x16xf32>
    %633 = tpu.matmul %632, %631, %cst_252 {dimension_numbers = #tpu.dot_dimension_numbers<[1], [0], [0], [1], [0, 0, 1, 1], [], []>} : vector<16x32xbf16>, vector<32x16xbf16>, vector<16x16xf32> -> vector<16x16xf32>
    %634 = arith.addf %622, %633 : vector<16x16xf32>
    %635 = vector.broadcast %581 : vector<1x16xf32> to vector<16x16xf32>
    %636 = arith.addf %634, %635 : vector<16x16xf32>
    %637 = arith.addf %636, %347 : vector<16x16xf32>
    %638 = tpu.concatenate %347, %637 in 1 : vector<16x16xf32>, vector<16x16xf32> -> vector<16x32xf32>
    %c0_253 = arith.constant 0 : index
    %c0_254 = arith.constant 0 : index
    %c0_255 = arith.constant 0 : index
    %639 = vector.load %arg29[%c0_253, %c0_254, %c0_255] : memref<1x16x32xf32, #tpu.memory_space<vmem>>, vector<1x16x32xf32>
    %640 = vector.shape_cast %639 : vector<1x16x32xf32> to vector<16x32xf32>
    %641 = vector.shape_cast %638 : vector<16x32xf32> to vector<1x16x32xf32>
    tpu.vector_store %arg29[%c0_253, %c0_254, %c0_255], %641 {strides = array<i32>} : memref<1x16x32xf32, #tpu.memory_space<vmem>>, vector<1x16x32xf32>,
    return
  }
  func.func @transform_0(%arg0: i32) -> (i32, i32, i32) {
    %c0_i32 = arith.constant 0 : i32
    %c0_i32_0 = arith.constant 0 : i32
    %c0_i32_1 = arith.constant 0 : i32
    return %arg0, %c0_i32, %c0_i32_0 : i32, i32, i32
  }
  func.func @transform_1(%arg0: i32) -> (i32, i32, i32) {
    %c0_i32 = arith.constant 0 : i32
    %c0_i32_0 = arith.constant 0 : i32
    %c0_i32_1 = arith.constant 0 : i32
    return %arg0, %c0_i32, %c0_i32_0 : i32, i32, i32
  }
  func.func @transform_2(%arg0: i32) -> (i32, i32, i32) {
    %c0_i32 = arith.constant 0 : i32
    %c0_i32_0 = arith.constant 0 : i32
    %c0_i32_1 = arith.constant 0 : i32
    return %arg0, %c0_i32, %c0_i32_0 : i32, i32, i32
  }
  func.func @transform_3(%arg0: i32) -> (i32, i32) {
    %c0_i32 = arith.constant 0 : i32
    %c0_i32_0 = arith.constant 0 : i32
    %c0_i32_1 = arith.constant 0 : i32
    return %c0_i32, %c0_i32_0 : i32, i32
  }
  func.func @transform_4(%arg0: i32) -> (i32, i32, i32) {
    %c0_i32 = arith.constant 0 : i32
    %c0_i32_0 = arith.constant 0 : i32
    %c0_i32_1 = arith.constant 0 : i32
    %c0_i32_2 = arith.constant 0 : i32
    return %c0_i32, %c0_i32_0, %c0_i32_1 : i32, i32, i32
  }
  func.func @transform_5(%arg0: i32) -> (i32, i32, i32) {
    %c0_i32 = arith.constant 0 : i32
    %c0_i32_0 = arith.constant 0 : i32
    %c0_i32_1 = arith.constant 0 : i32
    %c0_i32_2 = arith.constant 0 : i32
    return %c0_i32, %c0_i32_0, %c0_i32_1 : i32, i32, i32
  }
  func.func @transform_6(%arg0: i32) -> (i32, i32, i32) {
    %c0_i32 = arith.constant 0 : i32
    %c0_i32_0 = arith.constant 0 : i32
    %c0_i32_1 = arith.constant 0 : i32
    %c0_i32_2 = arith.constant 0 : i32
    return %c0_i32, %c0_i32_0, %c0_i32_1 : i32, i32, i32
  }
  func.func @transform_7(%arg0: i32) -> (i32, i32, i32) {
    %c0_i32 = arith.constant 0 : i32
    %c0_i32_0 = arith.constant 0 : i32
    %c0_i32_1 = arith.constant 0 : i32
    %c0_i32_2 = arith.constant 0 : i32
    return %c0_i32, %c0_i32_0, %c0_i32_1 : i32, i32, i32
  }
  func.func @transform_8(%arg0: i32) -> (i32, i32, i32) {
    %c0_i32 = arith.constant 0 : i32
    %c0_i32_0 = arith.constant 0 : i32
    %c0_i32_1 = arith.constant 0 : i32
    %c0_i32_2 = arith.constant 0 : i32
    return %c0_i32, %c0_i32_0, %c0_i32_1 : i32, i32, i32
  }
  func.func @transform_9(%arg0: i32) -> (i32, i32, i32) {
    %c0_i32 = arith.constant 0 : i32
    %c0_i32_0 = arith.constant 0 : i32
    %c0_i32_1 = arith.constant 0 : i32
    %c0_i32_2 = arith.constant 0 : i32
    return %c0_i32, %c0_i32_0, %c0_i32_1 : i32, i32, i32
  }
  func.func @transform_10(%arg0: i32) -> (i32, i32, i32, i32) {
    %c0_i32 = arith.constant 0 : i32
    %c0_i32_0 = arith.constant 0 : i32
    %c0_i32_1 = arith.constant 0 : i32
    %c0_i32_2 = arith.constant 0 : i32
    %c0_i32_3 = arith.constant 0 : i32
    return %c0_i32, %c0_i32_0, %c0_i32_1, %c0_i32_2 : i32, i32, i32, i32
  }
  func.func @transform_11(%arg0: i32) -> (i32, i32, i32) {
    %c0_i32 = arith.constant 0 : i32
    %c0_i32_0 = arith.constant 0 : i32
    %c0_i32_1 = arith.constant 0 : i32
    %c0_i32_2 = arith.constant 0 : i32
    return %c0_i32, %c0_i32_0, %c0_i32_1 : i32, i32, i32
  }
  func.func @transform_12(%arg0: i32) -> (i32, i32, i32) {
    %c0_i32 = arith.constant 0 : i32
    %c0_i32_0 = arith.constant 0 : i32
    %c0_i32_1 = arith.constant 0 : i32
    %c0_i32_2 = arith.constant 0 : i32
    return %c0_i32, %c0_i32_0, %c0_i32_1 : i32, i32, i32
  }
  func.func @transform_13(%arg0: i32) -> (i32, i32, i32) {
    %c0_i32 = arith.constant 0 : i32
    %c0_i32_0 = arith.constant 0 : i32
    %c0_i32_1 = arith.constant 0 : i32
    %c0_i32_2 = arith.constant 0 : i32
    return %c0_i32, %c0_i32_0, %c0_i32_1 : i32, i32, i32
  }
  func.func @transform_14(%arg0: i32) -> (i32, i32, i32) {
    %c0_i32 = arith.constant 0 : i32
    %c0_i32_0 = arith.constant 0 : i32
    %c0_i32_1 = arith.constant 0 : i32
    %c0_i32_2 = arith.constant 0 : i32
    return %c0_i32, %c0_i32_0, %c0_i32_1 : i32, i32, i32
  }
  func.func @transform_15(%arg0: i32) -> (i32, i32, i32) {
    %c0_i32 = arith.constant 0 : i32
    %c0_i32_0 = arith.constant 0 : i32
    %c0_i32_1 = arith.constant 0 : i32
    %c0_i32_2 = arith.constant 0 : i32
    return %c0_i32, %c0_i32_0, %c0_i32_1 : i32, i32, i32
  }
  func.func @transform_16(%arg0: i32) -> (i32, i32) {
    %c0_i32 = arith.constant 0 : i32
    %c0_i32_0 = arith.constant 0 : i32
    %c0_i32_1 = arith.constant 0 : i32
    return %c0_i32, %c0_i32_0 : i32, i32
  }
  func.func @transform_17(%arg0: i32) -> (i32, i32) {
    %c0_i32 = arith.constant 0 : i32
    %c0_i32_0 = arith.constant 0 : i32
    %c0_i32_1 = arith.constant 0 : i32
    return %c0_i32, %c0_i32_0 : i32, i32
  }
  func.func @transform_18(%arg0: i32) -> (i32, i32, i32) {
    %c0_i32 = arith.constant 0 : i32
    %c0_i32_0 = arith.constant 0 : i32
    %c0_i32_1 = arith.constant 0 : i32
    %c0_i32_2 = arith.constant 0 : i32
    return %c0_i32, %c0_i32_0, %c0_i32_1 : i32, i32, i32
  }
  func.func @transform_19(%arg0: i32) -> (i32, i32) {
    %c0_i32 = arith.constant 0 : i32
    %c0_i32_0 = arith.constant 0 : i32
    %c0_i32_1 = arith.constant 0 : i32
    return %c0_i32, %c0_i32_0 : i32, i32
  }
  func.func @transform_20(%arg0: i32) -> (i32, i32, i32) {
    %c0_i32 = arith.constant 0 : i32
    %c0_i32_0 = arith.constant 0 : i32
    %c0_i32_1 = arith.constant 0 : i32
    %c0_i32_2 = arith.constant 0 : i32
    return %c0_i32, %c0_i32_0, %c0_i32_1 : i32, i32, i32
  }
  func.func @transform_21(%arg0: i32) -> (i32, i32) {
    %c0_i32 = arith.constant 0 : i32
    %c0_i32_0 = arith.constant 0 : i32
    %c0_i32_1 = arith.constant 0 : i32
    return %c0_i32, %c0_i32_0 : i32, i32
  }
  func.func @transform_22(%arg0: i32) -> (i32, i32, i32) {
    %c0_i32 = arith.constant 0 : i32
    %c0_i32_0 = arith.constant 0 : i32
    %c0_i32_1 = arith.constant 0 : i32
    %c0_i32_2 = arith.constant 0 : i32
    return %c0_i32, %c0_i32_0, %c0_i32_1 : i32, i32, i32
  }
  func.func @transform_23(%arg0: i32) -> (i32, i32) {
    %c0_i32 = arith.constant 0 : i32
    %c0_i32_0 = arith.constant 0 : i32
    %c0_i32_1 = arith.constant 0 : i32
    return %c0_i32, %c0_i32_0 : i32, i32
  }
  func.func @transform_24(%arg0: i32) -> (i32, i32, i32) {
    %c0_i32 = arith.constant 0 : i32
    %c0_i32_0 = arith.constant 0 : i32
    %c0_i32_1 = arith.constant 0 : i32
    %c0_i32_2 = arith.constant 0 : i32
    return %c0_i32, %c0_i32_0, %c0_i32_1 : i32, i32, i32
  }
  func.func @transform_25(%arg0: i32) -> (i32, i32) {
    %c0_i32 = arith.constant 0 : i32
    %c0_i32_0 = arith.constant 0 : i32
    %c0_i32_1 = arith.constant 0 : i32
    return %c0_i32, %c0_i32_0 : i32, i32
  }
  func.func @transform_26(%arg0: i32) -> (i32, i32, i32) {
    %c0_i32 = arith.constant 0 : i32
    %c0_i32_0 = arith.constant 0 : i32
    %c0_i32_1 = arith.constant 0 : i32
    %c0_i32_2 = arith.constant 0 : i32
    return %c0_i32, %c0_i32_0, %c0_i32_1 : i32, i32, i32
  }
  func.func @transform_27(%arg0: i32) -> (i32, i32) {
    %c0_i32 = arith.constant 0 : i32
    %c0_i32_0 = arith.constant 0 : i32
    %c0_i32_1 = arith.constant 0 : i32
    return %c0_i32, %c0_i32_0 : i32, i32
  }
  func.func @transform_28(%arg0: i32) -> (i32, i32, i32) {
    %c0_i32 = arith.constant 0 : i32
    %c0_i32_0 = arith.constant 0 : i32
    %c0_i32_1 = arith.constant 0 : i32
    return %arg0, %c0_i32, %c0_i32_0 : i32, i32, i32
  }
}

</mosaic_0001>

<bundles_post_ra>
// kernel: custom-call.2
= control target key start
LH: loop header
LB: loop body
LE: loop exit
PB: predicated region body
PF: predicated region fallthrough
CT: control target
= control target key end

     0   :  { %s6_s0 = inlined_call_operand.vmem [shape: u32[2,8], index: 0, kind: output, shape index: {}]  }

// kernel: ne.4
= control target key start
LH: loop header
LB: loop body
LE: loop exit
PB: predicated region body
PF: predicated region fallthrough
CT: control target
= control target key end

     0   :  { %v16_v2 = vmov 0   ;;  %s41_s0 = inlined_call_operand.vmem [shape: f32[2,8], index: 0, kind: input, shape index: {}, may-alias: {0,1}]   ;;  %s42_s1 = inlined_call_operand.vmem [shape: f32[2,8], index: 1, kind: input, shape index: {}, may-alias: {0,1}]   ;;  %s43_s2 = inlined_call_operand.vmem [shape: pred[2,8], index: 2, kind: output, shape index: {}]  }
   0x1   :  { %v3_v0 = vld [vmem:[%s41_s0] sm:$0x3] }
   0x2   :  { %v4_v1 = vld [vmem:[%s42_s1] sm:$0x3] }
   0x3   :  { %vm7_vm0 = vcmp.ne.f32.partialorder %v3_v0, %v4_v1 }
   0x4   :  { %v8_v3 = vsel %vm7_vm0, 1, %v16_v2 }
   0x5   :  { %v10_v4 = vpack.c.b16 0, %v8_v3 }
   0x7   :  { %v11_v5 = vpack.c.b8 0, %v10_v4 }
   0x9   :  { %14 = vst [vmem:[%s43_s2] sm:$0x1] %v11_v5 }

// kernel: squeeze.16
= control target key start
LH: loop header
LB: loop body
LE: loop exit
PB: predicated region body
PF: predicated region fallthrough
CT: control target
= control target key end

     0   :  { %vm7_vm0 = vcmask 64512   ;;  %s39_s0 = inlined_call_operand.vmem [shape: f32[16], index: 0, kind: input, shape index: {}]   ;;  %s40_s1 = inlined_call_operand.vmem [shape: f32[2,8], index: 1, kind: output, shape index: {}]  }
   0x1   :  { %v4_v0 = vld [vmem:[%s39_s0] sm:$0x1]  ;;  %s22_s0 = smov 120  }
   0x2   :  { %5 = vst [vmem:[#allocation1] sm:$0x1] %v4_v0 }
   0x9   :  { %v9_v1 = vld [vmem:[#allocation1] sm:$0x1]  }
   0xa   :  { %v6_v2 = vld [vmem:[#allocation1] sm:$0x1]   ;;  %10 = vrot.lane.b32.xlu0 %v9_v1, %s22_s0 }
   0xb   :  { %8 = vst.msk [vmem:[#allocation0] sm:$0x1] %vm7_vm0, %v6_v2  }
  0x7c   :  { %v11_v3 = vpop.permute.xlu0 %10  }
  0x7d   :  { %14 = vst.msk [vmem:[#allocation0 + $0x1] sm:$0x1] %vm7_vm0, %v11_v3  }
  0x84   :  { %v17_v4 = vld [vmem:[#allocation0] sm:$0x3] }
  0x85   :  { %20 = vst [vmem:[%s40_s1] sm:$0x3] %v17_v4 }

// kernel: fastspeech2_forward.4
= control target key start
LH: loop header
LB: loop body
LE: loop exit
PB: predicated region body
PF: predicated region fallthrough
CT: control target
= control target key end

     0   :  { %s2131_s18 = smov 0   ;;  %s2456_s0 = inlined_call_operand.vmem [shape: f32[2,8,32], index: 0, kind: input, shape index: {}]   ;;  %s2457_s1 = inlined_call_operand.vmem [shape: f32[2,8,1], index: 1, kind: input, shape index: {}]   ;;  %s2458_s2 = inlined_call_operand.vmem [shape: f32[2,8,32], index: 2, kind: input, shape index: {}]   ;;  %s2459_s3 = inlined_call_operand.vmem [shape: f32[2,8,32], index: 3, kind: input, shape index: {}]   ;;  %s2460_s4 = inlined_call_operand.vmem [shape: bf16[3,3,32,32], index: 4, kind: input, shape index: {}]   ;;  %s2461_s5 = inlined_call_operand.vmem [shape: f32[3,1,32], index: 5, kind: input, shape index: {}]   ;;  %s2462_s6 = inlined_call_operand.vmem [shape: f32[3,1,32], index: 6, kind: input, shape index: {}]   ;;  %s2463_s7 = inlined_call_operand.vmem [shape: f32[3,1,32], index: 7, kind: input, shape index: {}]   ;;  %s2464_s8 = inlined_call_operand.vmem [shape: bf16[3,3,32,32], index: 8, kind: input, shape index: {}]   ;;  %s2465_s9 = inlined_call_operand.vmem [shape: f32[3,1,32], index: 9, kind: input, shape index: {}]   ;;  %s2466_s10 = inlined_call_operand.vmem [shape: f32[3,1,32], index: 10, kind: input, shape index: {}]   ;;  %s2467_s11 = inlined_call_operand.vmem [shape: f32[3,1,32], index: 11, kind: input, shape index: {}]   ;;  %s2468_s12 = inlined_call_operand.vmem [shape: bf16[3,32,1], index: 12, kind: input, shape index: {}]   ;;  %s2469_s13 = inlined_call_operand.vmem [shape: f32[3,1,1], index: 13, kind: input, shape index: {}]   ;;  %s2470_s14 = inlined_call_operand.vmem [shape: f32[2,8,3], index: 14, kind: output, shape index: {0}]   ;;  %s2471_s15 = inlined_call_operand.vmem [shape: f32[2,8,32], index: 15, kind: output, shape index: {1}]  }
   0x1 LB: > { %s1680_s19 = sadd.s32 4294967295, %s2046_s18   ;;  %p1684_p0 = scmp.ge.s32.totalorder %s2046_s18, 1  ;;  %s2046_s18 = sphi %s2131_s18, %s26_s18  }
   0x2   : > { %p466_p1 = scmp.lt.s32.totalorder %s2046_s18, 3 }
   0x4   : > { %p467_p2 = pnand %p1684_p0, %p466_p1 }
   0x5   : > { %p528_p3 = scmp.lt.s32.totalorder (!%p467_p2), %s1680_s19, 1 }
   0x6   : > { %470 = sbr.rel (%p467_p2) target bundleno = 1944 (0x798), region = 76 }
   0xb   : > { %v1955_v0 = vld [vmem:[%s2460_s4 + $0x18] sm:$0xff]  ;;  %v1953_v1 = vld [vmem:[%s2460_s4 + $0x8] sm:$0xff]  ;;  %v568_v3 = vlaneseq  ;;  %v1954_v4 = vld [vmem:[%s2460_s4 + $0x10] sm:$0xff]  ;;  %s2473_s19 = smov (!%p528_p3, %s1680_s19), 1  ;;  %vm589_vm0 = vcmask 261120   ;;  %v2048_v32 = vmov 32.0  }
   0xc   : > { %v1957_v2 = vld [vmem:[%s2460_s4 + $0x28] sm:$0xff]  ;;  %v1952_v5 = vld [vmem:[%s2460_s4] sm:$0xff]  ;;  %599 = vmatpush.bf16.msra.mxu0 %v1955_v0  ;;  %627 = vmatpush.bf16.msra.mxu1 %v1953_v1  ;;  %s2159_s17 = sshll.u32 %s2473_s19, 3  ;;  %2026 = vrcp.f32 %v2048_v32  ;;  %v1961_v44 = vld [vmem:[%s2464_s8 + $0x18] sm:$0xff] }
   0xd   : > { %v1956_v6 = vld [vmem:[%s2460_s4 + $0x20] sm:$0xff]  ;;  %v2157_v7 = vshrl.u32 %v568_v3, 7  ;;  %661 = vmatpush.bf16.msra.mxu2 %v1957_v2  ;;  %s531_s22 = scalar_lea.vmem %s2456_s0, %s2159_s17  ;;  %s539_s25 = scalar_lea.vmem %s2458_s2, %s2159_s17  ;;  %v1959_v45 = vld [vmem:[%s2464_s8 + $0x8] sm:$0xff]  ;;  %751 = vmatpush.bf16.msra.mxu3 %v1961_v44  ;;  %v1960_v47 = vld [vmem:[%s2464_s8 + $0x10] sm:$0xff] }
   0xe   : > { %s543_s19 = scalar_lea.vmem %s2459_s3, %s2159_s17  ;;  %v553_v8 = vld [vmem:[%s531_s22] sm:$0xff]  ;;  %s551_s30 = scalar_lea.vmem %s2471_s15, %s2159_s17  ;;  %v1963_v46 = vld [vmem:[%s2464_s8 + $0x28] sm:$0xff]  ;;  %v1967_v53 = vld [vmem:[%s2460_s4 + $0x38] sm:$0xff] }
   0xf   : > { %v1209_v9 = vld [vmem:[%s539_s25] sm:$0xff]  ;;  %vm571_vm1 = vcmp.ge.s32.totalorder %v2157_v7, 1  ;;  %vm635_vm2 = vcmp.lt.s32.totalorder %v2157_v7, 7  ;;  %v2175_v10 = vpack.c.bf16 %v553_v8, %v553_v8  ;;  %v570_v13 = vrot.slane %v553_v8, 7  ;;  %v1969_v50 = vld [vmem:[%s2460_s4 + $0x48] sm:$0xff]  ;;  %v1971_v55 = vld [vmem:[%s2460_s4 + $0x58] sm:$0xff]  ;;  %s535_s29 = scalar_lea.vmem %s2457_s1, %s2159_s17  ;;  %s547_s23 = scalar_lea.vmem %s2470_s14, %s2159_s17 }
  0x10   : > { %600 = vmatpush.bf16.msra.mxu0 %v1954_v4  ;;  %628 = vmatpush.bf16.msra.mxu1 %v1952_v5  ;;  %v2177_v11 = vadd.f32 %v1209_v9, %v553_v8  ;;  %v1543_v12 = vld [vmem:[%s543_s19] sm:$0xff]  ;;  %v634_v14 = vrot.slane %v553_v8, 1  ;;  %v1966_v57 = vld [vmem:[%s2460_s4 + $0x30] sm:$0xff] }
  0x11   : > { %662 = vmatpush.bf16.msra.mxu2 %v1956_v6  ;;  %v574_v16 = vsel %vm571_vm1, %v570_v13, 0.0  ;;  %v2005_v24 = vld [vmem:[%s2461_s5] ss:$0 sm:$0xff]  ;;  %752 = vmatpush.bf16.msra.mxu3 %v1960_v47  ;;  %v1970_v60 = vld [vmem:[%s2460_s4 + $0x50] sm:$0xff]  ;;  %v2009_v32 = vld [vmem:[%s2461_s5 + $0x1] ss:$0 sm:$0xff] }
  0x12   : > { %v1544_v15 = vadd.f32 %v1543_v12, %v2177_v11  ;;  %v638_v17 = vsel %vm635_vm2, %v634_v14, 0.0  ;;  %v2190_v18 = vpack.c.bf16 %v574_v16, %v574_v16  ;;  %v2027_v33 = vpop.eup %2026  ;;  %v1958_v48 = vld [vmem:[%s2464_s8] sm:$0xff] }
  0x13   : > { %1699 = vmatmul.msk.bf16.vlgmr.msra.gmra.mxu0 %vm589_vm0, %v2175_v10  ;;  %v2192_v19 = vpack.c.bf16 %v638_v17, %v638_v17  ;;  %v680_v34 = vmul.f32 32.0, %v2027_v33  ;;  %vm684_vm3 = vweird.f32 %v2027_v33  ;;  %v1962_v49 = vld [vmem:[%s2464_s8 + $0x20] sm:$0xff] }
  0x14   : > { %1545 = vst.msk [vmem:[%s551_s30] sm:$0xff] %vm589_vm0, %v1544_v15  ;;  %1708 = vmatmul.msk.bf16.vlgmr.msra.gmra.mxu1 %vm589_vm0, %v2190_v18  ;;  %779 = vmatpush.bf16.msrb.mxu0 %v1959_v45  ;;  %v1968_v54 = vld [vmem:[%s2460_s4 + $0x40] sm:$0xff]  ;;  %s2049_s30 = smov 1  }
  0x15   : > { %1717 = vmatmul.msk.bf16.vlgmr.msra.gmra.mxu2 %vm589_vm0, %v2192_v19  ;;  %v681_v35 = vsub.f32 1.0, %v680_v34  ;;  %810 = vmatpush.bf16.msrb.mxu1 %v1963_v46  ;;  %v2006_v1 = vld [vmem:[%s2462_s6] ss:$0 sm:$0xff] }
  0x16   : > { %926 = vmatpush.bf16.msrb.mxu3 %v1969_v50  ;;  %v2007_v4 = vld [vmem:[%s2463_s7] ss:$0 sm:$0xff] }
  0x17   : > { %v682_v36 = vmul.f32 %v2027_v33, %v681_v35 }
  0x18   : > { %780 = vmatpush.bf16.msrb.mxu0 %v1958_v48 }
  0x19   : > { %v683_v37 = vadd.f32 %v2027_v33, %v682_v36  ;;  %811 = vmatpush.bf16.msrb.mxu1 %v1962_v49 }
  0x1a   : > { %927 = vmatpush.bf16.msrb.mxu3 %v1968_v54 }
  0x1b   : > { %v2203_v38 = vsel %vm684_vm3, %v2027_v33, %v683_v37 }
  0x1c   : > { %951 = vmatpush.bf16.msra.mxu0 %v1967_v53 }
  0x1d   : > { %976 = vmatpush.bf16.msra.mxu1 %v1971_v55 }
  0x20   : > { %952 = vmatpush.bf16.msra.mxu0 %v1966_v57  ;;  %v1973_v57 = vld [vmem:[%s2464_s8 + $0x38] sm:$0xff] }
  0x21   : > { %977 = vmatpush.bf16.msra.mxu1 %v1970_v60 }
  0x90   : > { %v602_v20 = vpop.f32.mrf.mxu0 }
  0x91   : > { %v630_v21 = vpop.f32.mrf.mxu1 }
  0x92   : > { %v631_v22 = vadd.f32 %v630_v21, %v602_v20 }
  0x98   : > { %v604_v23 = vpop.f32.mrf.mxu0  ;;  %v664_v25 = vpop.f32.mrf.mxu2 }
  0x99   : > { %v668_v26 = vadd.f32 %v664_v25, %v631_v22  ;;  %v632_v27 = vpop.f32.mrf.mxu1  ;;  %v2008_v23 = vld [vmem:[%s2465_s9] ss:$0 sm:$0xff] }
  0x9b   : > { %v672_v28 = vadd.f32 %v2005_v24, %v668_v26 }
  0x9d   : > { %v673_v29 = vmax.f32 %v672_v28, 0.0 }
  0x9f   : > { %v676_v30 = vsel %vm589_vm0, %v673_v29, 0.0 }
  0xa0   : > { %v666_v31 = vpop.f32.mrf.mxu2  ;;  %677 = vadd.xlane.f32.xlu0 %v676_v30 }
 0x113   : > { %v678_v39 = vpop.xlane.xlu0 %677 }
 0x114   : > { %v686_v40 = vmul.f32 %v2203_v38, %v678_v39 }
 0x116   : > { %v687_v41 = vsub.f32 %v673_v29, %v686_v40 }
 0x118   : > { %v688_v42 = vmul.f32 %v687_v41, %v687_v41 }
 0x11a   : > { %v689_v43 = vsel %vm589_vm0, %v688_v42, 0.0 }
 0x11b   : > { %690 = vadd.xlane.f32.xlu0 %v689_v43 }
 0x18e   : > { %v691_v51 = vpop.xlane.xlu0 %690 }
 0x18f   : > { %v692_v52 = vmul.f32 %v691_v51, %v2203_v38  ;;  %v1965_v51 = vld [vmem:[%s2468_s12 + $0x8] sm:$0xff] }
 0x190   : > { %885 = vmatpush.bf16.msrb.mxu2 %v1965_v51 }
 0x191   : > { %v693_v56 = vadd.f32 1e-05, %v692_v52  ;;  %v1964_v52 = vld [vmem:[%s2468_s12] sm:$0xff] }
 0x193   : > { %2028 = vrsqrt.f32 %v693_v56  ;;  %vm700_vm5 = vweird.f32 %v693_v56 }
 0x194   : > { %886 = vmatpush.bf16.msrb.mxu2 %v1964_v52 }
 0x199   : > { %v2029_v58 = vpop.eup %2028 }
 0x19a   : > { %v695_v59 = vmul.f32 %v2029_v58, %v693_v56  ;;  %vm701_vm4 = vweird.f32 %v2029_v58  ;;  %v1975_v56 = vld [vmem:[%s2464_s8 + $0x48] sm:$0xff] }
 0x19b   : > { %vm702_vm6 = vmor %vm700_vm5, %vm701_vm4  ;;  %1063 = vmatpush.bf16.msra.mxu2 %v1975_v56 }
 0x19c   : > { %v696_v61 = vmul.f32 %v2029_v58, %v695_v59  ;;  %v1974_v59 = vld [vmem:[%s2464_s8 + $0x40] sm:$0xff] }
 0x19e   : > { %v697_v62 = vmul.f32 0.5, %v696_v61  ;;  %v1972_v61 = vld [vmem:[%s2464_s8 + $0x30] sm:$0xff] }
 0x19f   : > { %1064 = vmatpush.bf16.msra.mxu2 %v1974_v59 }
 0x1a0   : > { %v698_v63 = vsub.f32 1.5, %v697_v62 }
 0x1a2   : > { %v699_v0 = vmul.f32 %v2029_v58, %v698_v63  ;;  %v1976_v63 = vld [vmem:[%s2464_s8 + $0x50] sm:$0xff] }
 0x1a4   : > { %v703_v2 = vsel %vm702_vm6, %v2029_v58, %v699_v0  ;;  %v1977_v58 = vld [vmem:[%s2464_s8 + $0x58] sm:$0xff] }
 0x1a5   : > { %v704_v3 = vmul.f32 %v703_v2, %v687_v41 }
 0x1a7   : > { %v708_v5 = vmul.f32 %v2006_v1, %v704_v3 }
 0x1a9   : > { %v712_v6 = vadd.f32 %v2007_v4, %v708_v5  ;;  %v1981_v5 = vld [vmem:[%s2460_s4 + $0x68] sm:$0xff] }
 0x1ab   : > { %v729_v8 = vpack.c.bf16 %v712_v6, %v712_v6  ;;  %v726_v9 = vrot.slane %v712_v6, 7  ;;  %v786_v12 = vrot.slane %v712_v6, 1 }
 0x1ad   : > { %1726 = vmatmul.msk.bf16.vlgmr.msra.gmra.mxu3 %vm589_vm0, %v729_v8  ;;  %v727_v13 = vsel %vm571_vm1, %v726_v9, 0.0  ;;  %v787_v14 = vsel %vm635_vm2, %v786_v12, 0.0  ;;  %v1985_v8 = vld [vmem:[%s2460_s4 + $0x88] sm:$0xff]  ;;  %v1980_v12 = vld [vmem:[%s2460_s4 + $0x60] sm:$0xff] }
 0x1ae   : > { %v728_v15 = vpack.c.bf16 %v727_v13, %v727_v13  ;;  %v788_v16 = vpack.c.bf16 %v787_v14, %v787_v14  ;;  %1091 = vmatpush.bf16.msra.mxu3 %v1973_v57  ;;  %v2012_v13 = vld [vmem:[%s2466_s10] ss:$0 sm:$0xff] }
 0x1b0   : > { %1735 = vmatmul.msk.bf16.vlgmr.msrb.gmra.mxu0 %vm589_vm0, %v728_v15  ;;  %1744 = vmatmul.msk.bf16.vlgmr.msrb.gmra.mxu1 %vm589_vm0, %v788_v16  ;;  %v2013_v16 = vld [vmem:[%s2467_s11] ss:$0 sm:$0xff] }
 0x1b1   : > { %1122 = vmatpush.bf16.msrb.mxu0 %v1977_v58 }
 0x1b2   : > { %1092 = vmatpush.bf16.msra.mxu3 %v1972_v61 }
 0x1b5   : > { %1123 = vmatpush.bf16.msrb.mxu0 %v1976_v63 }
 0x1bd   : > { %1775 = vmatmul.msk.bf16.vlgmr.msrb.gmra.mxu3 %vm589_vm0, %v2175_v10 }
 0x1be   : > { %1279 = vmatpush.bf16.msrb.mxu3 %v1981_v5 }
 0x1c0   : > { %1784 = vmatmul.msk.bf16.vlgmr.msra.gmra.mxu0 %vm589_vm0, %v2190_v18  ;;  %1793 = vmatmul.msk.bf16.vlgmr.msra.gmra.mxu1 %vm589_vm0, %v2192_v19 }
 0x1c1   : > { %1310 = vmatpush.bf16.msra.mxu0 %v1985_v8 }
 0x1c2   : > { %1280 = vmatpush.bf16.msrb.mxu3 %v1980_v12 }
 0x22d   : > { %v782_v17 = vpop.f32.mrf.mxu0  ;;  %v813_v20 = vpop.f32.mrf.mxu1 }
 0x230   : > { %v754_v21 = vpop.f32.mrf.mxu3 }
 0x231   : > { %v783_v22 = vadd.f32 %v782_v17, %v754_v21 }
 0x233   : > { %v817_v24 = vadd.f32 %v813_v20, %v783_v22 }
 0x235   : > { %v784_v25 = vpop.f32.mrf.mxu0  ;;  %v815_v26 = vpop.f32.mrf.mxu1  ;;  %v821_v27 = vadd.f32 %v2008_v23, %v817_v24  ;;  %v1983_v23 = vld [vmem:[%s2460_s4 + $0x78] sm:$0xff] }
 0x236   : > { %v1984_v25 = vld [vmem:[%s2460_s4 + $0x80] sm:$0xff] }
 0x237   : > { %v822_v28 = vmax.f32 %v821_v27, 0.0  ;;  %1311 = vmatpush.bf16.msra.mxu0 %v1984_v25  ;;  %v1979_v25 = vld [vmem:[%s2468_s12 + $0x18] sm:$0xff] }
 0x238   : > { %v756_v10 = vpop.f32.mrf.mxu3  ;;  %1201 = vmatpush.bf16.msrb.mxu1 %v1979_v25 }
 0x239   : > { %v825_v29 = vsel %vm589_vm0, %v822_v28, 0.0 }
 0x23a   : > { %826 = vadd.xlane.f32.xlu1 %v825_v29 }
 0x23d   : > { %v954_v18 = vpop.f32.mrf.mxu0  ;;  %v979_v30 = vpop.f32.mrf.mxu1 }
 0x240   : > { %v929_v19 = vpop.f32.mrf.mxu3 }
 0x241   : > { %v955_v31 = vadd.f32 %v954_v18, %v929_v19  ;;  %v2010_v18 = vld [vmem:[%s2462_s6 + $0x1] ss:$0 sm:$0xff] }
 0x242   : > { %v2011_v19 = vld [vmem:[%s2463_s7 + $0x1] ss:$0 sm:$0xff] }
 0x243   : > { %v983_v33 = vadd.f32 %v979_v30, %v955_v31 }
 0x245   : > { %v956_v34 = vpop.f32.mrf.mxu0  ;;  %v981_v35 = vpop.f32.mrf.mxu1  ;;  %v987_v36 = vadd.f32 %v2009_v32, %v983_v33 }
 0x247   : > { %v988_v37 = vmax.f32 %v987_v36, 0.0 }
 0x248   : > { %v931_v39 = vpop.f32.mrf.mxu3 }
 0x249   : > { %v993_v40 = vsel %vm589_vm0, %v988_v37, 0.0 }
 0x24a   : > { %994 = vadd.xlane.f32.xlu1 %v993_v40 }
 0x2ad   : > { %v827_v41 = vpop.xlane.xlu1 %826 }
 0x2ae   : > { %v828_v42 = vmul.f32 %v827_v41, %v2203_v38 }
 0x2b0   : > { %v829_v43 = vsub.f32 %v822_v28, %v828_v42  ;;  %v1982_v28 = vld [vmem:[%s2460_s4 + $0x70] sm:$0xff]  ;;  %v1226_v42 = vrot.slane %v2177_v11, 7 }
 0x2b2   : > { %v830_v44 = vmul.f32 %v829_v43, %v829_v43 }
 0x2b4   : > { %v831_v45 = vsel %vm589_vm0, %v830_v44, 0.0  ;;  %v1229_v44 = vpack.c.bf16 %v2177_v11, %v2177_v11 }
 0x2b5   : > { %832 = vadd.xlane.f32.xlu2 %v831_v45  ;;  %v1227_v45 = vsel %vm571_vm1, %v1226_v42, 0.0 }
 0x2bd   : > { %v995_v46 = vpop.xlane.xlu1 %994 }
 0x2be   : > { %v996_v47 = vmul.f32 %v995_v46, %v2203_v38 }
 0x2c0   : > { %v2274_v48 = vsub.f32 %v988_v37, %v996_v47  ;;  %v1228_v47 = vpack.c.bf16 %v1227_v45, %v1227_v45 }
 0x2c2   : > { %v998_v49 = vmul.f32 %v2274_v48, %v2274_v48 }
 0x2c4   : > { %v999_v50 = vsel %vm589_vm0, %v998_v49, 0.0 }
 0x2c5   : > { %1000 = vadd.xlane.f32.xlu2 %v999_v50 }
 0x328   : > { %v833_v53 = vpop.xlane.xlu2 %832 }
 0x329   : > { %v834_v54 = vmul.f32 %v833_v53, %v2203_v38 }
 0x32b   : > { %v835_v55 = vadd.f32 1e-05, %v834_v54  ;;  %v2015_v54 = vld [vmem:[%s2465_s9 + $0x1] ss:$0 sm:$0xff] }
 0x32d   : > { %2030 = vrsqrt.f32 %v835_v55  ;;  %vm842_vm8 = vweird.f32 %v835_v55 }
 0x333   : > { %v2031_v60 = vpop.eup %2030 }
 0x334   : > { %v837_v62 = vmul.f32 %v2031_v60, %v835_v55  ;;  %vm843_vm7 = vweird.f32 %v2031_v60 }
 0x335   : > { %vm844_vm9 = vmor %vm842_vm8, %vm843_vm7  ;;  %vm1554_vm7 = vcmask 7168   ;;  %vm1558_vm8 = vcmask 23552  }
 0x336   : > { %v838_v0 = vmul.f32 %v2031_v60, %v837_v62 }
 0x338   : > { %v839_v1 = vmul.f32 0.5, %v838_v0  ;;  %v1001_v2 = vpop.xlane.xlu2 %1000 }
 0x339   : > { %v1002_v3 = vmul.f32 %v1001_v2, %v2203_v38  ;;  %v2016_v2 = vld [vmem:[%s2461_s5 + $0x2] ss:$0 sm:$0xff] }
 0x33a   : > { %v840_v4 = vsub.f32 1.5, %v839_v1 }
 0x33b   : > { %v1003_v6 = vadd.f32 1e-05, %v1002_v3 }
 0x33c   : > { %v841_v9 = vmul.f32 %v2031_v60, %v840_v4 }
 0x33d   : > { %2032 = vrsqrt.f32 %v1003_v6  ;;  %vm1010_vm11 = vweird.f32 %v1003_v6 }
 0x33e   : > { %v845_v14 = vsel %vm844_vm9, %v2031_v60, %v841_v9 }
 0x33f   : > { %v846_v15 = vmul.f32 %v845_v14, %v829_v43  ;;  %v1286_v43 = vrot.slane %v2177_v11, 1 }
 0x341   : > { %v850_v17 = vmul.f32 %v2012_v13, %v846_v15  ;;  %v1287_v46 = vsel %vm635_vm2, %v1286_v43, 0.0  ;;  %v2017_v43 = vld [vmem:[%s2466_s10 + $0x1] ss:$0 sm:$0xff] }
 0x343   : > { %v2033_v20 = vpop.eup %2032  ;;  %v854_v21 = vadd.f32 %v2013_v16, %v850_v17 }
 0x344   : > { %v1005_v22 = vmul.f32 %v2033_v20, %v1003_v6  ;;  %vm1011_vm10 = vweird.f32 %v2033_v20 }
 0x345   : > { %v859_v24 = vpack.c.bf16 %v854_v21, %v854_v21  ;;  %vm1012_vm12 = vmor %vm1010_vm11, %vm1011_vm10 }
 0x346   : > { %v1006_v26 = vmul.f32 %v2033_v20, %v1005_v22 }
 0x347   : > { %1753 = vmatmul.msk.bf16.vlgmr.msrb.gmra.mxu2 %vm589_vm0, %v859_v24 }
 0x348   : > { %v1007_v27 = vmul.f32 0.5, %v1006_v26  ;;  %1251 = vmatpush.bf16.msrb.mxu2 %v1983_v23  ;;  %v1978_v26 = vld [vmem:[%s2468_s12 + $0x10] sm:$0xff] }
 0x349   : > { %1202 = vmatpush.bf16.msrb.mxu1 %v1978_v26 }
 0x34a   : > { %v1008_v10 = vsub.f32 1.5, %v1007_v27 }
 0x34c   : > { %v1009_v29 = vmul.f32 %v2033_v20, %v1008_v10  ;;  %1252 = vmatpush.bf16.msrb.mxu2 %v1982_v28 }
 0x34e   : > { %v1013_v30 = vsel %vm1012_vm12, %v2033_v20, %v1009_v29  ;;  %v1989_v29 = vld [vmem:[%s2464_s8 + $0x78] sm:$0xff] }
 0x34f   : > { %v1014_v31 = vmul.f32 %v1013_v30, %v2274_v48  ;;  %v1288_v48 = vpack.c.bf16 %v1287_v46, %v1287_v46  ;;  %1397 = vmatpush.bf16.msra.mxu1 %v1989_v29  ;;  %v1991_v30 = vld [vmem:[%s2464_s8 + $0x88] sm:$0xff]  ;;  %v2020_v46 = vld [vmem:[%s2467_s11 + $0x1] ss:$0 sm:$0xff] }
 0x351   : > { %v1018_v32 = vmul.f32 %v2010_v18, %v1014_v31  ;;  %v1987_v18 = vld [vmem:[%s2464_s8 + $0x68] sm:$0xff] }
 0x353   : > { %v1022_v33 = vadd.f32 %v2011_v19, %v1018_v32  ;;  %v1988_v19 = vld [vmem:[%s2464_s8 + $0x70] sm:$0xff]  ;;  %v1986_v32 = vld [vmem:[%s2464_s8 + $0x60] sm:$0xff] }
 0x354   : > { %1398 = vmatpush.bf16.msra.mxu1 %v1988_v19  ;;  %v1992_v19 = vld [vmem:[%s2468_s12 + $0x20] sm:$0xff] }
 0x355   : > { %v1041_v34 = vpack.c.bf16 %v1022_v33, %v1022_v33  ;;  %v1038_v35 = vrot.slane %v1022_v33, 7  ;;  %v1098_v36 = vrot.slane %v1022_v33, 1  ;;  %v1990_v33 = vld [vmem:[%s2464_s8 + $0x80] sm:$0xff] }
 0x357   : > { %1817 = vmatmul.msk.bf16.vlgmr.msra.gmra.mxu2 %vm589_vm0, %v1041_v34  ;;  %v1039_v37 = vsel %vm571_vm1, %v1038_v35, 0.0  ;;  %v1099_v39 = vsel %vm635_vm2, %v1098_v36, 0.0 }
 0x358   : > { %v1040_v40 = vpack.c.bf16 %v1039_v37, %v1039_v37  ;;  %v1100_v41 = vpack.c.bf16 %v1099_v39, %v1099_v39  ;;  %1425 = vmatpush.bf16.msra.mxu2 %v1987_v18 }
 0x35a   : > { %1826 = vmatmul.msk.bf16.vlgmr.msra.gmra.mxu3 %vm589_vm0, %v1040_v40  ;;  %1835 = vmatmul.msk.bf16.vlgmr.msrb.gmra.mxu0 %vm589_vm0, %v1100_v41 }
 0x35b   : > { %1456 = vmatpush.bf16.msra.mxu3 %v1991_v30  ;;  %v1993_v30 = vld [vmem:[%s2468_s12 + $0x28] sm:$0xff] }
 0x35c   : > { %1426 = vmatpush.bf16.msra.mxu2 %v1986_v32  ;;  %1535 = vmatpush.bf16.msrb.mxu0 %v1993_v30 }
 0x35f   : > { %1457 = vmatpush.bf16.msra.mxu3 %v1990_v33 }
 0x360   : > { %1536 = vmatpush.bf16.msrb.mxu0 %v1992_v19 }
 0x367   : > { %1873 = vmatmul.msk.bf16.vlgmr.msrb.gmra.mxu2 %vm589_vm0, %v1229_v44 }
 0x36a   : > { %1882 = vmatmul.msk.bf16.vlgmr.msrb.gmra.mxu3 %vm589_vm0, %v1228_v47  ;;  %1891 = vmatmul.msk.bf16.vlgmr.msra.gmra.mxu0 %vm589_vm0, %v1288_v48 }
 0x3ca   : > { %v2355_v49 = vpop.f32.mrf.mxu2 }
 0x3d2   : > { %v890_v50 = vpop.f32.mrf.mxu2 }
 0x3d7   : > { %v1125_v51 = vpop.f32.mrf.mxu0 }
 0x3da   : > { %v1066_v52 = vpop.f32.mrf.mxu2 }
 0x3dd   : > { %v1094_v11 = vpop.f32.mrf.mxu3 }
 0x3de   : > { %v1095_v53 = vadd.f32 %v1094_v11, %v1066_v52 }
 0x3df   : > { %v1127_v55 = vpop.f32.mrf.mxu0 }
 0x3e0   : > { %v1129_v56 = vadd.f32 %v1125_v51, %v1095_v53 }
 0x3e2   : > { %v1068_v57 = vpop.f32.mrf.mxu2  ;;  %v1133_v58 = vadd.f32 %v2015_v54, %v1129_v56  ;;  %v2018_v56 = vld [vmem:[%s2462_s6 + $0x2] ss:$0 sm:$0xff] }
 0x3e4   : > { %v1134_v59 = vmax.f32 %v1133_v58, 0.0  ;;  %v2019_v58 = vld [vmem:[%s2463_s7 + $0x2] ss:$0 sm:$0xff] }
 0x3e5   : > { %v1096_v60 = vpop.f32.mrf.mxu3 }
 0x3e6   : > { %v1139_v61 = vsel %vm589_vm0, %v1134_v59, 0.0 }
 0x3e7   : > { %v1313_v62 = vpop.f32.mrf.mxu0  ;;  %1140 = vadd.xlane.f32.xlu0 %v1139_v61 }
 0x3ea   : > { %v1254_v63 = vpop.f32.mrf.mxu2 }
 0x3ed   : > { %v1282_v0 = vpop.f32.mrf.mxu3 }
 0x3ee   : > { %v1283_v1 = vadd.f32 %v1282_v0, %v1254_v63 }
 0x3ef   : > { %v1315_v3 = vpop.f32.mrf.mxu0 }
 0x3f0   : > { %v1317_v4 = vadd.f32 %v1313_v62, %v1283_v1 }
 0x3f2   : > { %v1256_v5 = vpop.f32.mrf.mxu2  ;;  %v1321_v6 = vadd.f32 %v2016_v2, %v1317_v4 }
 0x3f3   : > { %v2021_v5 = vld [vmem:[%s2469_s13 + $0x1] ss:$0 sm:$0xff] }
 0x3f4   : > { %v1322_v8 = vmax.f32 %v1321_v6, 0.0 }
 0x3f5   : > { %v1284_v9 = vpop.f32.mrf.mxu3 }
 0x3f6   : > { %v1327_v12 = vsel %vm589_vm0, %v1322_v8, 0.0  ;;  %v554_v9 = vld [vmem:[%s535_s29] sm:$0xff] }
 0x3f7   : > { %1328 = vadd.xlane.f32.xlu1 %v1327_v12 }
 0x45a   : > { %v1141_v13 = vpop.xlane.xlu0 %1140 }
 0x45b   : > { %v1142_v14 = vmul.f32 %v1141_v13, %v2203_v38 }
 0x45d   : > { %v1143_v15 = vsub.f32 %v1134_v59, %v1142_v14 }
 0x45f   : > { %v1144_v16 = vmul.f32 %v1143_v15, %v1143_v15 }
 0x461   : > { %v1145_v17 = vsel %vm589_vm0, %v1144_v16, 0.0 }
 0x462   : > { %1146 = vadd.xlane.f32.xlu2 %v1145_v17 }
 0x46a   : > { %v1329_v20 = vpop.xlane.xlu1 %1328 }
 0x46b   : > { %v1330_v21 = vmul.f32 %v1329_v20, %v2203_v38  ;;  %v2022_v20 = vld [vmem:[%s2465_s9 + $0x2] ss:$0 sm:$0xff] }
 0x46d   : > { %v1331_v22 = vsub.f32 %v1322_v8, %v1330_v21 }
 0x46f   : > { %v1332_v23 = vmul.f32 %v1331_v22, %v1331_v22 }
 0x471   : > { %v1333_v24 = vsel %vm589_vm0, %v1332_v23, 0.0 }
 0x472   : > { %1334 = vadd.xlane.f32.xlu0 %v1333_v24 }
 0x4d5   : > { %v1147_v27 = vpop.xlane.xlu2 %1146 }
 0x4d6   : > { %v1148_v28 = vmul.f32 %v1147_v27, %v2203_v38 }
 0x4d8   : > { %v1149_v10 = vadd.f32 1e-05, %v1148_v28 }
 0x4da   : > { %2034 = vrsqrt.f32 %v1149_v10  ;;  %vm1156_vm14 = vweird.f32 %v1149_v10 }
 0x4e0   : > { %v2035_v31 = vpop.eup %2034 }
 0x4e1   : > { %v1151_v34 = vmul.f32 %v2035_v31, %v1149_v10  ;;  %vm1157_vm13 = vweird.f32 %v2035_v31 }
 0x4e2   : > { %vm1158_vm15 = vmor %vm1156_vm14, %vm1157_vm13 }
 0x4e3   : > { %v1152_v35 = vmul.f32 %v2035_v31, %v1151_v34 }
 0x4e5   : > { %v1153_v36 = vmul.f32 0.5, %v1152_v35  ;;  %v1335_v37 = vpop.xlane.xlu0 %1334 }
 0x4e6   : > { %v1336_v39 = vmul.f32 %v1335_v37, %v2203_v38 }
 0x4e7   : > { %v1154_v40 = vsub.f32 1.5, %v1153_v36 }
 0x4e8   : > { %v1337_v41 = vadd.f32 1e-05, %v1336_v39 }
 0x4e9   : > { %v1155_v42 = vmul.f32 %v2035_v31, %v1154_v40 }
 0x4ea   : > { %2036 = vrsqrt.f32 %v1337_v41  ;;  %vm1344_vm4 = vweird.f32 %v1337_v41 }
 0x4eb   : > { %v1159_v44 = vsel %vm1158_vm15, %v2035_v31, %v1155_v42 }
 0x4ec   : > { %v1160_v45 = vmul.f32 %v1159_v44, %v1143_v15 }
 0x4ee   : > { %v1164_v47 = vmul.f32 %v2017_v43, %v1160_v45 }
 0x4f0   : > { %v2037_v48 = vpop.eup %2036  ;;  %v1168_v50 = vadd.f32 %v2020_v46, %v1164_v47  ;;  %v2025_v47 = vld [vmem:[%s2469_s13 + $0x2] ss:$0 sm:$0xff] }
 0x4f1   : > { %v1339_v51 = vmul.f32 %v2037_v48, %v1337_v41  ;;  %vm1345_vm3 = vweird.f32 %v2037_v48  ;;  %v2023_v41 = vld [vmem:[%s2466_s10 + $0x2] ss:$0 sm:$0xff] }
 0x4f2   : > { %v1174_v52 = vpack.c.bf16 %v1168_v50, %v1168_v50  ;;  %vm1346_vm5 = vmor %vm1344_vm4, %vm1345_vm3 }
 0x4f3   : > { %v1340_v11 = vmul.f32 %v2037_v48, %v1339_v51 }
 0x4f4   : > { %1851 = vmatmul.msk.bf16.vlgmr.msrb.gmra.mxu1 %vm589_vm0, %v1174_v52 }
 0x4f5   : > { %v1341_v53 = vmul.f32 0.5, %v1340_v11  ;;  %v2014_v11 = vld [vmem:[%s2469_s13] ss:$0 sm:$0xff] }
 0x4f7   : > { %v1342_v54 = vsub.f32 1.5, %v1341_v53  ;;  %v889_v53 = vadd.f32 %v2014_v11, %v2355_v49 }
 0x4f9   : > { %v1343_v55 = vmul.f32 %v2037_v48, %v1342_v54 }
 0x4fb   : > { %v1347_v57 = vsel %vm1346_vm5, %v2037_v48, %v1343_v55  ;;  %v892_v55 = vmul.f32 %v889_v53, %v554_v9 }
 0x4fc   : > { %v1348_v59 = vmul.f32 %v1347_v57, %v1331_v22 }
 0x4fe   : > { %v1352_v60 = vmul.f32 %v2018_v56, %v1348_v59 }
 0x500   : > { %v1356_v61 = vadd.f32 %v2019_v58, %v1352_v60 }
 0x502   : > { %v1375_v62 = vpack.c.bf16 %v1356_v61, %v1356_v61  ;;  %v1372_v63 = vrot.slane %v1356_v61, 7  ;;  %v1432_v0 = vrot.slane %v1356_v61, 1 }
 0x504   : > { %1915 = vmatmul.msk.bf16.vlgmr.msra.gmra.mxu1 %vm589_vm0, %v1375_v62  ;;  %v1373_v1 = vsel %vm571_vm1, %v1372_v63, 0.0  ;;  %v1433_v2 = vsel %vm635_vm2, %v1432_v0, 0.0 }
 0x505   : > { %v1374_v3 = vpack.c.bf16 %v1373_v1, %v1373_v1  ;;  %v1434_v4 = vpack.c.bf16 %v1433_v2, %v1433_v2 }
 0x507   : > { %1924 = vmatmul.msk.bf16.vlgmr.msra.gmra.mxu2 %vm589_vm0, %v1374_v3  ;;  %1933 = vmatmul.msk.bf16.vlgmr.msra.gmra.mxu3 %vm589_vm0, %v1434_v4 }
 0x571   : > { %v1204_v6 = vpop.f32.mrf.mxu1 }
 0x572   : > { %v1205_v8 = vadd.f32 %v2021_v5, %v1204_v6 }
 0x574   : > { %v1208_v12 = vmul.f32 %v1205_v8, %v554_v9 }
 0x576   : > { %1547 = vrot.lane.b32.xlu0 %v1208_v12, %s2049_s30  ;;  %s2050_s30 = smov 2  }
 0x579   : > { %v1206_v7 = vpop.f32.mrf.mxu1 }
 0x581   : > { %v1400_v13 = vpop.f32.mrf.mxu1 }
 0x589   : > { %v1402_v14 = vpop.f32.mrf.mxu1 }
 0x58a   : > { %v1428_v15 = vpop.f32.mrf.mxu2  ;;  %v1459_v16 = vpop.f32.mrf.mxu3 }
 0x58b   : > { %v1429_v17 = vadd.f32 %v1428_v15, %v1400_v13 }
 0x58d   : > { %v1463_v21 = vadd.f32 %v1459_v16, %v1429_v17 }
 0x58f   : > { %v1467_v22 = vadd.f32 %v2022_v20, %v1463_v21 }
 0x591   : > { %v1468_v23 = vmax.f32 %v1467_v22, 0.0 }
 0x592   : > { %v1430_v24 = vpop.f32.mrf.mxu2  ;;  %v1461_v25 = vpop.f32.mrf.mxu3 }
 0x593   : > { %v1473_v26 = vsel %vm589_vm0, %v1468_v23, 0.0 }
 0x594   : > { %1474 = vadd.xlane.f32.xlu1 %v1473_v26 }
 0x5e8   : > { %v1548_v54 = vpop.permute.xlu0 %1547 }
 0x5e9   : > { %v1555_v56 = vsel %vm1554_vm7, %v892_v55, %v1548_v54 }
 0x607   : > { %v1475_v27 = vpop.xlane.xlu1 %1474 }
 0x608   : > { %v1476_v28 = vmul.f32 %v1475_v27, %v2203_v38 }
 0x60a   : > { %v1477_v10 = vsub.f32 %v1468_v23, %v1476_v28 }
 0x60c   : > { %v1478_v29 = vmul.f32 %v1477_v10, %v1477_v10 }
 0x60e   : > { %v1479_v18 = vsel %vm589_vm0, %v1478_v29, 0.0 }
 0x60f   : > { %1480 = vadd.xlane.f32.xlu2 %v1479_v18 }
 0x682   : > { %v1481_v31 = vpop.xlane.xlu2 %1480 }
 0x683   : > { %v1482_v32 = vmul.f32 %v1481_v31, %v2203_v38  ;;  %v2024_v38 = vld [vmem:[%s2467_s11 + $0x2] ss:$0 sm:$0xff] }
 0x685   : > { %v1483_v33 = vadd.f32 1e-05, %v1482_v32 }
 0x687   : > { %2038 = vrsqrt.f32 %v1483_v33  ;;  %vm1490_vm2 = vweird.f32 %v1483_v33 }
 0x68d   : > { %v2039_v34 = vpop.eup %2038 }
 0x68e   : > { %v1485_v35 = vmul.f32 %v2039_v34, %v1483_v33  ;;  %vm1491_vm1 = vweird.f32 %v2039_v34 }
 0x68f   : > { %vm1492_vm6 = vmor %vm1490_vm2, %vm1491_vm1 }
 0x690   : > { %v1486_v36 = vmul.f32 %v2039_v34, %v1485_v35 }
 0x692   : > { %v1487_v37 = vmul.f32 0.5, %v1486_v36 }
 0x694   : > { %v1488_v39 = vsub.f32 1.5, %v1487_v37 }
 0x696   : > { %v1489_v40 = vmul.f32 %v2039_v34, %v1488_v39 }
 0x698   : > { %v1493_v42 = vsel %vm1492_vm6, %v2039_v34, %v1489_v40 }
 0x699   : > { %v1494_v43 = vmul.f32 %v1493_v42, %v1477_v10 }
 0x69b   : > { %v1498_v44 = vmul.f32 %v2023_v41, %v1494_v43 }
 0x69d   : > { %v1502_v45 = vadd.f32 %v2024_v38, %v1498_v44 }
 0x69f   : > { %v1508_v46 = vpack.c.bf16 %v1502_v45, %v1502_v45 }
 0x6a1   : > { %1949 = vmatmul.msk.bf16.vlgmr.msrb.gmra.mxu0 %vm589_vm0, %v1508_v46  ;;  %vm1556_vm0 = vcmask 15360  }
 0x71e   : > { %v1538_v48 = vpop.f32.mrf.mxu0 }
 0x71f   : > { %v1539_v50 = vadd.f32 %v2025_v47, %v1538_v48 }
 0x721   : > { %v1542_v51 = vmul.f32 %v1539_v50, %v554_v9 }
 0x723   : > { %1551 = vrot.lane.b32.xlu1 %v1542_v51, %s2050_s30 }
 0x726   : > { %v1540_v52 = vpop.f32.mrf.mxu0 }
 0x795   : > { %v1552_v57 = vpop.permute.xlu1 %1551 }
 0x796   : > { %v1557_v58 = vsel %vm1556_vm0, %v1555_v56, %v1552_v57 }
 0x797   : > { %1559 = vst.msk [vmem:[%s547_s23] sm:$0xff] %vm1558_vm8, %v1557_v58 }
 0x798 PF: > { %s26_s18 = sadd.s32 1, %s2046_s18  }
 0x799   : > { %p23_p4 = scmp.ge.s32.totalorder %s26_s18, 4  }
 0x79b   :  { %25 = sbr.rel (!%p23_p4) target bundleno = 1 (0x1), region = 147 }

// kernel: fastspeech2_forward.3
= control target key start
LH: loop header
LB: loop body
LE: loop exit
PB: predicated region body
PF: predicated region fallthrough
CT: control target
= control target key end

     0   :  { %s1901_s21 = smov 0   ;;  %s2177_s0 = inlined_call_operand.vmem [shape: f32[2,8,32], index: 0, kind: input, shape index: {}]   ;;  %s2178_s1 = inlined_call_operand.vmem [shape: f32[2,1,8], index: 1, kind: input, shape index: {}]   ;;  %s2179_s2 = inlined_call_operand.vmem [shape: f32[2,8,1], index: 2, kind: input, shape index: {}]   ;;  %s2180_s3 = inlined_call_operand.vmem [shape: f32[8,32], index: 3, kind: input, shape index: {}]   ;;  %s2181_s4 = inlined_call_operand.vmem [shape: bf16[2,32,96], index: 4, kind: input, shape index: {}]   ;;  %s2182_s5 = inlined_call_operand.vmem [shape: f32[2,1,96], index: 5, kind: input, shape index: {}]   ;;  %s2183_s6 = inlined_call_operand.vmem [shape: bf16[2,32,32], index: 6, kind: input, shape index: {}]   ;;  %s2184_s7 = inlined_call_operand.vmem [shape: f32[2,1,32], index: 7, kind: input, shape index: {}]   ;;  %s2185_s8 = inlined_call_operand.vmem [shape: f32[2,1,32], index: 8, kind: input, shape index: {}]   ;;  %s2186_s9 = inlined_call_operand.vmem [shape: f32[2,1,32], index: 9, kind: input, shape index: {}]   ;;  %s2187_s10 = inlined_call_operand.vmem [shape: bf16[2,3,32,64], index: 10, kind: input, shape index: {}]   ;;  %s2188_s11 = inlined_call_operand.vmem [shape: f32[2,1,64], index: 11, kind: input, shape index: {}]   ;;  %s2189_s12 = inlined_call_operand.vmem [shape: bf16[2,64,32], index: 12, kind: input, shape index: {}]   ;;  %s2190_s13 = inlined_call_operand.vmem [shape: f32[2,1,32], index: 13, kind: input, shape index: {}]   ;;  %s2191_s14 = inlined_call_operand.vmem [shape: f32[2,1,32], index: 14, kind: input, shape index: {}]   ;;  %s2192_s15 = inlined_call_operand.vmem [shape: f32[2,1,32], index: 15, kind: input, shape index: {}]   ;;  %s2193_s16 = inlined_call_operand.vmem [shape: f32[2,8,32], index: 16, kind: output, shape index: {}]  }
   0x1   :  { %2195 = sst [smem:[#allocation2_spill]] %s2177_s0 }
   0x2 LB: > { %s1538_s22 = sadd.s32 4294967295, %s1808_s21   ;;  %p1542_p0 = scmp.ge.s32.totalorder %s1808_s21, 1  ;;  %s1808_s21 = sphi %s1901_s21, %s26_s21  }
   0x3   : > { %p478_p1 = scmp.lt.s32.totalorder %s1808_s21, 3 }
   0x5   : > { %p479_p2 = pnand %p1542_p0, %p478_p1 }
   0x6   : > { %p533_p3 = scmp.lt.s32.totalorder (!%p479_p2), %s1538_s22, 1  ;;  %s2196_s17 = sld [smem:[#allocation2_spill]] (!%p479_p2) }
   0x7   : > { %482 = sbr.rel (%p479_p2) target bundleno = 3891 (0xf33), region = 84  ;;  %s1810_s23 = smov (!%p479_p2), 112  }
   0x8   : > { %s1811_s24 = smov (!%p479_p2), 96   ;;  %s1812_s25 = smov (!%p479_p2), 64  }
   0x9   : > { %s2194_s0 = smov (!%p479_p2), 16  }
   0xc   : > { %v1717_v0 = vld [vmem:[%s2181_s4 + $0x8] sm:$0xff]  ;;  %v1716_v1 = vld [vmem:[%s2181_s4] sm:$0xff]  ;;  %s2201_s22 = smov (!%p533_p3, %s1538_s22), 1  ;;  %vm606_vm0 = vcmask 261120   ;;  %vm634_vm1 = vcmask 130048   ;;  %vm716_vm2 = vcmask 1043456  }
   0xd   : > { %616 = vmatpush.bf16.msra.mxu0 %v1717_v0  ;;  %s1918_s27 = sshll.u32 %s2201_s22, 3  ;;  %v550_v2 = vld [vmem:[%s2180_s3] sm:$0xff]  ;;  %v1813_v21 = vmov 0   ;;  %s539_s29 = scalar_lea.vmem %s2178_s1, %s2201_s22  ;;  %vm686_vm5 = vcmask 64512   ;;  %v1719_v60 = vld [vmem:[%s2183_s6 + $0x8] sm:$0xff]  ;;  %vm968_vm12 = vcmask 523264  }
   0xe   : > { %s536_s18 = scalar_lea.vmem %s2196_s17, %s1918_s27  ;;  %v1760_v6 = vld [vmem:[%s2182_s5] ss:$0 sm:$0xff]  ;;  %1758 = vset.pattern.permute.xlu1 %v1813_v21  ;;  %1759 = vset.pattern.permute.xlu0 %v1813_v21 }
   0xf   : > { %v549_v3 = vld [vmem:[%s536_s18] sm:$0xff] }
  0x10   : > { %v1927_v4 = vadd.f32 %v550_v2, %v549_v3  ;;  %v552_v26 = vld [vmem:[%s539_s29] sm:$0x1]  ;;  %s543_s29 = scalar_lea.vmem %s2179_s2, %s1918_s27 }
  0x11   : > { %617 = vmatpush.bf16.msra.mxu0 %v1716_v1  ;;  %vm680_vm3 = vcmp.gt.f32.partialorder %v552_v26, 0.5  ;;  %v1718_v63 = vld [vmem:[%s2183_s6] sm:$0xff] }
  0x12   : > { %v590_v5 = vpack.c.bf16 %v1927_v4, %v1927_v4  ;;  %v681_v27 = vsel %vm680_vm3, 1, %v1813_v21  ;;  %v1761_v3 = vld [vmem:[%s2184_s7] ss:$0 sm:$0xff] }
  0x13   : > { %v682_v28 = vperm.slane %v681_v27, 0  ;;  %v1720_v26 = vld [vmem:[%s2187_s10] sm:$0xff] }
  0x14   : > { %1554 = vmatmul.msk.bf16.vlgmr.msra.gmra.mxu0 %vm606_vm0, %v590_v5  ;;  %v1724_v27 = vld [vmem:[%s2187_s10 + $0x20] sm:$0xff] }
  0x15   : > { %vm1950_vm4 = vcmp.eq.s32.totalorder %v682_v28, 1  ;;  %784 = vmatpush.bf16.msrb.mxu0 %v1719_v60 }
  0x19   : > { %785 = vmatpush.bf16.msrb.mxu0 %v1718_v63 }
  0x91   : > { %v619_v7 = vpop.f32.mrf.mxu0 }
  0x92   : > { %v620_v8 = vadd.f32 %v1760_v6, %v619_v7 }
  0x94   : > { %v627_v9 = vpack.c.bf16 %v620_v8, %v620_v8  ;;  %624 = vrot.lane.b32.xlu0 %v620_v8, %s1810_s23 }
  0x96   : > { %v630_v10 = vunpack.c.l.b16 %v627_v9 }
  0x98   : > { %v631_v12 = vpack.c.b16 %v630_v10, %v630_v10  ;;  %v1815_v10 = vmov 32.0  }
  0x99   : > { %v621_v11 = vpop.f32.mrf.mxu0 }
  0x9a   : > { %v553_v11 = vld [vmem:[%s543_s29] sm:$0xff] }
  0x9c   : > { %632 = vrot.lane.b32.xlu0 %v631_v12, %s1811_s24 }
  0xa4   : > { %711 = vrot.lane.b32.xlu0 %v631_v12, %s1812_s25 }
 0x106   : > { %v625_v13 = vpop.permute.xlu0 %624 }
 0x107   : > { %v628_v14 = vpack.c.bf16 %v625_v13, %v625_v13 }
 0x109   : > { %v655_v15 = vunpack.c.l.b16 %v628_v14 }
 0x10b   : > { %v656_v16 = vpack.c.b16 %v655_v15, %v655_v15 }
 0x10d   : > { %657 = vrot.lane.b32.xlu1 %v656_v16, %s1811_s24  ;;  %733 = vrot.lane.b32.xlu0 %v656_v16, %s1812_s25 }
 0x10e   : > { %v633_v17 = vpop.permute.xlu0 %632 }
 0x10f   : > { %v639_v18 = vsel %vm634_vm1, %v633_v17, 0 }
 0x110   : > { %648 = vmatpush.bf16.xpose.msra.mxu1 %v639_v18 }
 0x116   : > { %v712_v19 = vpop.permute.xlu0 %711 }
 0x117   : > { %1555 = vmatmul.msk.bf16.vlgmr.msra.gmra.mxu1 %vm634_vm1, %v627_v9  ;;  %v718_v20 = vsel %vm716_vm2, %v712_v19, 0 }
 0x118   : > { %727 = vmatpush.bf16.msra.mxu3 %v718_v20 }
 0x17f   : > { %v658_v22 = vpop.permute.xlu1 %657  ;;  %v734_v23 = vpop.permute.xlu0 %733 }
 0x180   : > { %v663_v24 = vsel %vm634_vm1, %v658_v22, 0  ;;  %v739_v25 = vsel %vm716_vm2, %v734_v23, 0  ;;  %v1723_v22 = vld [vmem:[%s2187_s10 + $0x18] sm:$0xff]  ;;  %v1721_v23 = vld [vmem:[%s2187_s10 + $0x8] sm:$0xff] }
 0x181   : > { %672 = vmatpush.bf16.xpose.msra.mxu2 %v663_v24  ;;  %748 = vmatpush.bf16.msrb.mxu3 %v739_v25  ;;  %v1725_v24 = vld [vmem:[%s2187_s10 + $0x28] sm:$0xff]  ;;  %v1722_v25 = vld [vmem:[%s2187_s10 + $0x10] sm:$0xff] }
 0x182   : > { %865 = vmatpush.bf16.msrb.mxu1 %v1723_v22 }
 0x186   : > { %866 = vmatpush.bf16.msrb.mxu1 %v1722_v25 }
 0x188   : > { %1556 = vmatmul.msk.bf16.vlgmr.msra.gmra.mxu2 %vm634_vm1, %v628_v14 }
 0x189   : > { %893 = vmatpush.bf16.msrb.mxu2 %v1721_v23 }
 0x18d   : > { %894 = vmatpush.bf16.msrb.mxu2 %v1720_v26 }
 0x194   : > { %v650_v29 = vpop.f32.mrf.mxu1 }
 0x195   : > { %v678_v31 = vmul.f32 0.25, %v650_v29 }
 0x197   : > { %v684_v32 = vsel %vm1950_vm4, -1e+09, %v678_v31 }
 0x198   : > { %v687_v33 = vsel %vm686_vm5, %v684_v32, -inf }
 0x199   : > { %688 = vmax.xlane.f32.xlu1 %v687_v33 }
 0x19c   : > { %v652_v34 = vpop.f32.mrf.mxu1 }
 0x1b2   : > { %831 = vperm.xlu1 %1758, %v553_v11  }
 0x20b   : > { %v674_v35 = vpop.f32.mrf.mxu2 }
 0x20c   : > { %v679_v36 = vmul.f32 0.25, %v674_v35  ;;  %v689_v37 = vpop.xlane.xlu1 %688 }
 0x20d   : > { %v693_v38 = vsub.f32 %v684_v32, %v689_v37 }
 0x20e   : > { %v685_v39 = vsel %vm1950_vm4, -1e+09, %v679_v36 }
 0x20f   : > { %v695_v40 = vmul.f32 1.442695, %v693_v38  ;;  %v690_v41 = vsel %vm686_vm5, %v685_v39, -inf  ;;  %v1762_v38 = vld [vmem:[%s2185_s8] ss:$0 sm:$0xff] }
 0x210   : > { %691 = vmax.xlane.f32.xlu2 %v690_v41 }
 0x211   : > { %1776 = vpow2.f32 %v695_v40  ;;  %v835_v40 = vlaneseq }
 0x213   : > { %v676_v42 = vpop.f32.mrf.mxu2 }
 0x214   : > { %v1763_v42 = vld [vmem:[%s2186_s9] ss:$0 sm:$0xff] }
 0x217   : > { %v1777_v43 = vpop.eup %1776 }
 0x218   : > { %v699_v44 = vsel %vm686_vm5, %v1777_v43, 0.0 }
 0x219   : > { %700 = vadd.xlane.f32.xlu2 %v699_v44 }
 0x224   : > { %v2011_v44 = vpop.permute.xlu1 %831 }
 0x283   : > { %v692_v45 = vpop.xlane.xlu2 %691 }
 0x284   : > { %v694_v46 = vsub.f32 %v685_v39, %v692_v45  ;;  %v2013_v45 = vshrl.u32 %v835_v40, 7 }
 0x286   : > { %v697_v47 = vmul.f32 1.442695, %v694_v46  ;;  %vm838_vm10 = vcmp.ge.s32.totalorder %v2013_v45, 1  ;;  %vm901_vm11 = vcmp.lt.s32.totalorder %v2013_v45, 7  ;;  %v1740_v45 = vld [vmem:[%s2189_s12 + $0x20] sm:$0xff] }
 0x288   : > { %1778 = vpow2.f32 %v697_v47 }
 0x28c   : > { %v701_v48 = vpop.xlane.xlu2 %700 }
 0x28d   : > { %1780 = vrcp.f32 %v701_v48 }
 0x28e   : > { %v1779_v49 = vpop.eup %1778 }
 0x28f   : > { %v702_v50 = vsel %vm686_vm5, %v1779_v49, 0.0 }
 0x290   : > { %703 = vadd.xlane.f32.xlu2 %v702_v50 }
 0x293   : > { %v1781_v51 = vpop.eup %1780 }
 0x294   : > { %v707_v52 = vmul.f32 %v1781_v51, %v1777_v43 }
 0x296   : > { %v709_v53 = vpack.c.bf16 %v707_v52, %v707_v52 }
 0x298   : > { %1557 = vmatmul.msk.bf16.vlgmr.msra.gmra.mxu3 %vm686_vm5, %v709_v53 }
 0x299   : > { %927 = vmatpush.bf16.msra.mxu3 %v1725_v24 }
 0x29d   : > { %928 = vmatpush.bf16.msra.mxu3 %v1724_v27 }
 0x303   : > { %v704_v54 = vpop.xlane.xlu2 %703 }
 0x304   : > { %1782 = vrcp.f32 %v704_v54 }
 0x305   : > { %1784 = vrcp.f32 %v1815_v10 }
 0x30a   : > { %v1783_v55 = vpop.eup %1782 }
 0x30b   : > { %v708_v56 = vmul.f32 %v1783_v55, %v1779_v49  ;;  %v1785_v12 = vpop.eup %1784  ;;  %v1729_v55 = vld [vmem:[%s2189_s12 + $0x18] sm:$0xff] }
 0x30c   : > { %v796_v13 = vmul.f32 32.0, %v1785_v12  ;;  %vm800_vm6 = vweird.f32 %v1785_v12  ;;  %976 = vmatpush.bf16.msra.mxu0 %v1729_v55 }
 0x30d   : > { %v710_v57 = vpack.c.bf16 %v708_v56, %v708_v56  ;;  %v1728_v56 = vld [vmem:[%s2189_s12 + $0x10] sm:$0xff] }
 0x30e   : > { %v797_v14 = vsub.f32 1.0, %v796_v13 }
 0x30f   : > { %1558 = vmatmul.msk.bf16.vlgmr.msrb.gmra.mxu3 %vm686_vm5, %v710_v57  ;;  %v1727_v57 = vld [vmem:[%s2189_s12 + $0x8] sm:$0xff] }
 0x310   : > { %v798_v15 = vmul.f32 %v1785_v12, %v797_v14  ;;  %977 = vmatpush.bf16.msra.mxu0 %v1728_v56 }
 0x312   : > { %v799_v16 = vadd.f32 %v1785_v12, %v798_v15 }
 0x314   : > { %v1982_v17 = vsel %vm800_vm6, %v1785_v12, %v799_v16  ;;  %978 = vmatpush.bf16.msra.mxu0 %v1727_v57 }
 0x31b   : > { %v729_v58 = vpop.f32.mrf.mxu3 }
 0x323   : > { %v731_v59 = vpop.f32.mrf.mxu3 }
 0x392   : > { %v750_v61 = vpop.f32.mrf.mxu3 }
 0x393   : > { %755 = vrot.lane.b32.xlu2 %v750_v61, %s2194_s0 }
 0x39a   : > { %v752_v62 = vpop.f32.mrf.mxu3 }
 0x3ed   : > { %v756_v0 = vpop.permute.xlu2 %755 }
 0x3ee   : > { %v758_v1 = vsel %vm634_vm1, %v729_v58, %v756_v0  ;;  %v1726_v58 = vld [vmem:[%s2189_s12] sm:$0xff] }
 0x3ef   : > { %v759_v2 = vpack.c.bf16 %v758_v1, %v758_v1  ;;  %979 = vmatpush.bf16.msra.mxu0 %v1726_v58  ;;  %v1764_v0 = vld [vmem:[%s2188_s11] ss:$0 sm:$0xff] }
 0x3f1   : > { %1567 = vmatmul.msk.bf16.vlgmr.msrb.gmra.mxu0 %vm606_vm0, %v759_v2 }
 0x46e   : > { %v787_v5 = vpop.f32.mrf.mxu0 }
 0x46f   : > { %v788_v6 = vadd.f32 %v1761_v3, %v787_v5 }
 0x471   : > { %v791_v7 = vadd.f32 %v788_v6, %v1927_v4 }
 0x473   : > { %v792_v8 = vsel %vm606_vm0, %v791_v7, 0.0 }
 0x474   : > { %793 = vadd.xlane.f32.xlu0 %v792_v8  ;;  %v1765_v8 = vld [vmem:[%s2190_s13] ss:$0 sm:$0xff] }
 0x476   : > { %v789_v9 = vpop.f32.mrf.mxu0 }
 0x4e7   : > { %v794_v4 = vpop.xlane.xlu0 %793 }
 0x4e8   : > { %v802_v18 = vmul.f32 %v1982_v17, %v794_v4 }
 0x4ea   : > { %v803_v19 = vsub.f32 %v791_v7, %v802_v18 }
 0x4ec   : > { %v804_v20 = vmul.f32 %v803_v19, %v803_v19 }
 0x4ee   : > { %v805_v21 = vsel %vm606_vm0, %v804_v20, 0.0  ;;  %v1730_v20 = vld [vmem:[%s2181_s4 + $0x10] sm:$0xff] }
 0x4ef   : > { %806 = vadd.xlane.f32.xlu2 %v805_v21 }
 0x562   : > { %v807_v28 = vpop.xlane.xlu2 %806 }
 0x563   : > { %v808_v29 = vmul.f32 %v807_v28, %v1982_v17 }
 0x565   : > { %v809_v31 = vadd.f32 1e-05, %v808_v29 }
 0x567   : > { %1786 = vrsqrt.f32 %v809_v31  ;;  %vm816_vm8 = vweird.f32 %v809_v31 }
 0x56d   : > { %v1787_v32 = vpop.eup %1786 }
 0x56e   : > { %v811_v33 = vmul.f32 %v1787_v32, %v809_v31  ;;  %vm817_vm7 = vweird.f32 %v1787_v32  ;;  %v1766_v31 = vld [vmem:[%s2191_s14] ss:$0 sm:$0xff] }
 0x56f   : > { %vm818_vm9 = vmor %vm816_vm8, %vm817_vm7 }
 0x570   : > { %v812_v34 = vmul.f32 %v1787_v32, %v811_v33  ;;  %v1767_v33 = vld [vmem:[%s2192_s15] ss:$0 sm:$0xff] }
 0x572   : > { %v813_v35 = vmul.f32 0.5, %v812_v34 }
 0x574   : > { %v814_v36 = vsub.f32 1.5, %v813_v35 }
 0x576   : > { %v815_v37 = vmul.f32 %v1787_v32, %v814_v36 }
 0x578   : > { %v819_v39 = vsel %vm818_vm9, %v1787_v32, %v815_v37 }
 0x579   : > { %v820_v41 = vmul.f32 %v819_v39, %v803_v19  ;;  %v1731_v19 = vld [vmem:[%s2181_s4 + $0x18] sm:$0xff]  ;;  %v1768_v39 = vld [vmem:[%s2182_s5 + $0x1] ss:$0 sm:$0xff] }
 0x57a   : > { %1090 = vmatpush.bf16.msra.mxu1 %v1731_v19 }
 0x57b   : > { %v824_v43 = vmul.f32 %v1762_v38, %v820_v41 }
 0x57d   : > { %v828_v46 = vadd.f32 %v1763_v42, %v824_v43 }
 0x57e   : > { %1091 = vmatpush.bf16.msra.mxu1 %v1730_v20 }
 0x57f   : > { %v834_v47 = vmul.f32 %v2011_v44, %v828_v46 }
 0x581   : > { %v900_v48 = vrot.slane %v834_v47, 1  ;;  %v843_v49 = vpack.c.bf16 %v834_v47, %v834_v47  ;;  %v837_v50 = vrot.slane %v834_v47, 7 }
 0x583   : > { %1576 = vmatmul.msk.bf16.vlgmr.msrb.gmra.mxu1 %vm606_vm0, %v843_v49  ;;  %v841_v51 = vsel %vm838_vm10, %v837_v50, 0.0  ;;  %v904_v52 = vsel %vm901_vm11, %v900_v48, 0.0 }
 0x584   : > { %v842_v53 = vpack.c.bf16 %v841_v51, %v841_v51  ;;  %v905_v54 = vpack.c.bf16 %v904_v52, %v904_v52 }
 0x586   : > { %1585 = vmatmul.msk.bf16.vlgmr.msrb.gmra.mxu2 %vm606_vm0, %v842_v53  ;;  %1594 = vmatmul.msk.bf16.vlgmr.msra.gmra.mxu3 %vm606_vm0, %v905_v54 }
 0x600   : > { %v868_v59 = vpop.f32.mrf.mxu1 }
 0x608   : > { %v870_v60 = vpop.f32.mrf.mxu1 }
 0x609   : > { %v896_v61 = vpop.f32.mrf.mxu2  ;;  %v930_v62 = vpop.f32.mrf.mxu3 }
 0x60a   : > { %v897_v63 = vadd.f32 %v896_v61, %v868_v59 }
 0x60c   : > { %v934_v1 = vadd.f32 %v930_v62, %v897_v63 }
 0x60e   : > { %v938_v2 = vadd.f32 %v1764_v0, %v934_v1 }
 0x610   : > { %v939_v3 = vmax.f32 %v938_v2, 0.0 }
 0x611   : > { %v898_v5 = vpop.f32.mrf.mxu2  ;;  %v932_v6 = vpop.f32.mrf.mxu3 }
 0x612   : > { %v940_v7 = vpack.c.bf16 %v939_v3, %v939_v3 }
 0x614   : > { %1611 = vmatmul.msk.bf16.vlgmr.msra.gmra.mxu0 %vm968_vm12, %v940_v7 }
 0x691   : > { %v981_v9 = vpop.f32.mrf.mxu0 }
 0x692   : > { %v982_v10 = vadd.f32 %v1765_v8, %v981_v9 }
 0x694   : > { %v985_v11 = vadd.f32 %v982_v10, %v834_v47 }
 0x696   : > { %v986_v12 = vsel %vm606_vm0, %v985_v11, 0.0 }
 0x697   : > { %987 = vadd.xlane.f32.xlu0 %v986_v12 }
 0x699   : > { %v983_v13 = vpop.f32.mrf.mxu0 }
 0x70a   : > { %v988_v14 = vpop.xlane.xlu0 %987 }
 0x70b   : > { %v989_v15 = vmul.f32 %v988_v14, %v1982_v17 }
 0x70d   : > { %v990_v16 = vsub.f32 %v985_v11, %v989_v15 }
 0x70f   : > { %v991_v4 = vmul.f32 %v990_v16, %v990_v16 }
 0x711   : > { %v992_v18 = vsel %vm606_vm0, %v991_v4, 0.0 }
 0x712   : > { %993 = vadd.xlane.f32.xlu1 %v992_v18 }
 0x785   : > { %v994_v21 = vpop.xlane.xlu1 %993 }
 0x786   : > { %v995_v22 = vmul.f32 %v994_v21, %v1982_v17 }
 0x788   : > { %v996_v23 = vadd.f32 1e-05, %v995_v22 }
 0x78a   : > { %1788 = vrsqrt.f32 %v996_v23  ;;  %vm1003_vm14 = vweird.f32 %v996_v23 }
 0x790   : > { %v1789_v24 = vpop.eup %1788 }
 0x791   : > { %v998_v25 = vmul.f32 %v1789_v24, %v996_v23  ;;  %vm1004_vm13 = vweird.f32 %v1789_v24 }
 0x792   : > { %vm1005_vm15 = vmor %vm1003_vm14, %vm1004_vm13 }
 0x793   : > { %v999_v26 = vmul.f32 %v1789_v24, %v998_v25 }
 0x795   : > { %v1000_v27 = vmul.f32 0.5, %v999_v26  ;;  %v1733_v26 = vld [vmem:[%s2183_s6 + $0x18] sm:$0xff] }
 0x797   : > { %v1001_v28 = vsub.f32 1.5, %v1000_v27 }
 0x799   : > { %v1002_v29 = vmul.f32 %v1789_v24, %v1001_v28 }
 0x79b   : > { %v1006_v32 = vsel %vm1005_vm15, %v1789_v24, %v1002_v29  ;;  %v1732_v29 = vld [vmem:[%s2183_s6 + $0x10] sm:$0xff] }
 0x79c   : > { %v1007_v34 = vmul.f32 %v1006_v32, %v990_v16 }
 0x79e   : > { %v1011_v35 = vmul.f32 %v1766_v31, %v1007_v34  ;;  %v1769_v34 = vld [vmem:[%s2184_s7 + $0x1] ss:$0 sm:$0xff] }
 0x7a0   : > { %v1015_v36 = vadd.f32 %v1767_v33, %v1011_v35 }
 0x7a2   : > { %v2061_v37 = vmul.f32 %v1015_v36, %v2011_v44 }
 0x7a4   : > { %v1065_v38 = vpack.c.bf16 %v2061_v37, %v2061_v37 }
 0x7a6   : > { %1656 = vmatmul.msk.bf16.vlgmr.msra.gmra.mxu1 %vm606_vm0, %v1065_v38 }
 0x823   : > { %v1093_v40 = vpop.f32.mrf.mxu1 }
 0x824   : > { %v1094_v41 = vadd.f32 %v1768_v39, %v1093_v40 }
 0x826   : > { %v1101_v42 = vpack.c.bf16 %v1094_v41, %v1094_v41  ;;  %1098 = vrot.lane.b32.xlu0 %v1094_v41, %s1810_s23  ;;  %s2199_s23 = smov 16  }
 0x828   : > { %v1104_v43 = vunpack.c.l.b16 %v1101_v42 }
 0x82a   : > { %v1105_v47 = vpack.c.b16 %v1104_v43, %v1104_v43 }
 0x82b   : > { %v1095_v46 = vpop.f32.mrf.mxu1 }
 0x82e   : > { %1106 = vrot.lane.b32.xlu0 %v1105_v47, %s1811_s24 }
 0x898   : > { %v1099_v48 = vpop.permute.xlu0 %1098 }
 0x899   : > { %v1102_v49 = vpack.c.bf16 %v1099_v48, %v1099_v48  ;;  %v1737_v48 = vld [vmem:[%s2187_s10 + $0x48] sm:$0xff] }
 0x89b   : > { %v1128_v50 = vunpack.c.l.b16 %v1102_v49 }
 0x89d   : > { %v1129_v51 = vpack.c.b16 %v1128_v50, %v1128_v50  ;;  %v1736_v50 = vld [vmem:[%s2187_s10 + $0x40] sm:$0xff] }
 0x89f   : > { %1130 = vrot.lane.b32.xlu2 %v1129_v51, %s1811_s24 }
 0x8a0   : > { %v1107_v52 = vpop.permute.xlu0 %1106 }
 0x8a1   : > { %v1112_v53 = vsel %vm634_vm1, %v1107_v52, 0  ;;  %v1738_v52 = vld [vmem:[%s2187_s10 + $0x50] sm:$0xff] }
 0x8a2   : > { %1121 = vmatpush.bf16.xpose.msra.mxu2 %v1112_v53 }
 0x8a9   : > { %1657 = vmatmul.msk.bf16.vlgmr.msra.gmra.mxu2 %vm634_vm1, %v1101_v42 }
 0x8aa   : > { %1251 = vmatpush.bf16.msrb.mxu2 %v1733_v26 }
 0x8ae   : > { %1252 = vmatpush.bf16.msrb.mxu2 %v1732_v29 }
 0x8f9   : > { %v1131_v54 = vpop.permute.xlu2 %1130 }
 0x8fa   : > { %v1136_v55 = vsel %vm634_vm1, %v1131_v54, 0 }
 0x8fb   : > { %1145 = vmatpush.bf16.xpose.msrb.mxu3 %v1136_v55 }
 0x902   : > { %1658 = vmatmul.msk.bf16.vlgmr.msrb.gmra.mxu3 %vm634_vm1, %v1102_v49  ;;  %v1739_v49 = vld [vmem:[%s2187_s10 + $0x58] sm:$0xff] }
 0x903   : > { %1315 = vmatpush.bf16.msra.mxu3 %v1737_v48 }
 0x907   : > { %1316 = vmatpush.bf16.msra.mxu3 %v1736_v50  ;;  %v1774_v50 = vld [vmem:[%s2191_s14 + $0x1] ss:$0 sm:$0xff] }
 0x92c   : > { %v1123_v56 = vpop.f32.mrf.mxu2 }
 0x92d   : > { %v1151_v57 = vmul.f32 0.25, %v1123_v56  ;;  %v1743_v56 = vld [vmem:[%s2189_s12 + $0x38] sm:$0xff] }
 0x92e   : > { %1422 = vmatpush.bf16.msra.mxu2 %v1743_v56 }
 0x92f   : > { %v1153_v58 = vsel %vm1950_vm4, -1e+09, %v1151_v57 }
 0x930   : > { %v1155_v59 = vsel %vm686_vm5, %v1153_v58, -inf }
 0x931   : > { %1156 = vmax.xlane.f32.xlu2 %v1155_v59 }
 0x934   : > { %v1125_v60 = vpop.f32.mrf.mxu2 }
 0x985   : > { %v1147_v61 = vpop.f32.mrf.mxu3 }
 0x986   : > { %v1152_v62 = vmul.f32 0.25, %v1147_v61 }
 0x988   : > { %v1154_v63 = vsel %vm1950_vm4, -1e+09, %v1152_v62 }
 0x989   : > { %v1158_v0 = vsel %vm686_vm5, %v1154_v63, -inf }
 0x98a   : > { %1159 = vmax.xlane.f32.xlu0 %v1158_v0 }
 0x98d   : > { %v1149_v1 = vpop.f32.mrf.mxu3 }
 0x98e   : > { %v1771_v1 = vld [vmem:[%s2186_s9 + $0x1] ss:$0 sm:$0xff] }
 0x99e   : > { %1179 = vrot.lane.b32.xlu0 %v1105_v47, %s1812_s25 }
 0x9a4   : > { %v1157_v30 = vpop.xlane.xlu2 %1156 }
 0x9a5   : > { %v1161_v10 = vsub.f32 %v1153_v58, %v1157_v30 }
 0x9a7   : > { %v1163_v11 = vmul.f32 1.442695, %v1161_v10 }
 0x9fd   : > { %v1160_v2 = vpop.xlane.xlu0 %1159 }
 0x9fe   : > { %v1162_v3 = vsub.f32 %v1154_v63, %v1160_v2  ;;  %v1770_v63 = vld [vmem:[%s2185_s8 + $0x1] ss:$0 sm:$0xff] }
 0xa00   : > { %v1165_v5 = vmul.f32 1.442695, %v1162_v3 }
 0xa02   : > { %1790 = vpow2.f32 %v1165_v5 }
 0xa03   : > { %1792 = vpow2.f32 %v1163_v11 }
 0xa08   : > { %v1791_v6 = vpop.eup %1790 }
 0xa09   : > { %v1170_v7 = vsel %vm686_vm5, %v1791_v6, 0.0  ;;  %v1793_v12 = vpop.eup %1792 }
 0xa0a   : > { %1171 = vadd.xlane.f32.xlu1 %v1170_v7  ;;  %v1167_v13 = vsel %vm686_vm5, %v1793_v12, 0.0 }
 0xa10   : > { %v1180_v8 = vpop.permute.xlu0 %1179 }
 0xa11   : > { %v1185_v9 = vsel %vm716_vm2, %v1180_v8, 0 }
 0xa12   : > { %1194 = vmatpush.bf16.msrb.mxu0 %v1185_v9 }
 0xa23   : > { %1200 = vrot.lane.b32.xlu1 %v1129_v51, %s1812_s25  ;;  %v1734_v51 = vld [vmem:[%s2187_s10 + $0x30] sm:$0xff]  ;;  %s547_s25 = scalar_lea.vmem %s2193_s16, %s1918_s27 }
 0xa4d   : > { %1168 = vadd.xlane.f32.xlu1 %v1167_v13  ;;  %v1742_v13 = vld [vmem:[%s2189_s12 + $0x30] sm:$0xff] }
 0xa4e   : > { %1423 = vmatpush.bf16.msra.mxu2 %v1742_v13 }
 0xa7d   : > { %v1172_v14 = vpop.xlane.xlu1 %1171 }
 0xa7e   : > { %1794 = vrcp.f32 %v1172_v14  ;;  %v1741_v14 = vld [vmem:[%s2189_s12 + $0x28] sm:$0xff] }
 0xa7f   : > { %1424 = vmatpush.bf16.msra.mxu2 %v1741_v14 }
 0xa83   : > { %1425 = vmatpush.bf16.msra.mxu2 %v1740_v45 }
 0xa84   : > { %v1795_v15 = vpop.eup %1794 }
 0xa85   : > { %v1176_v16 = vmul.f32 %v1795_v15, %v1791_v6 }
 0xa87   : > { %v1178_v19 = vpack.c.bf16 %v1176_v16, %v1176_v16 }
 0xa95   : > { %v1201_v4 = vpop.permute.xlu1 %1200 }
 0xa96   : > { %v1206_v18 = vsel %vm716_vm2, %v1201_v4, 0 }
 0xa97   : > { %1215 = vmatpush.bf16.msrb.mxu1 %v1206_v18 }
 0xa9a   : > { %1660 = vmatmul.msk.bf16.vlgmr.msrb.gmra.mxu1 %vm686_vm5, %v1178_v19  ;;  %v1772_v19 = vld [vmem:[%s2188_s11 + $0x1] ss:$0 sm:$0xff] }
 0xa9b   : > { %1374 = vmatpush.bf16.msra.mxu1 %v1739_v49 }
 0xa9f   : > { %1375 = vmatpush.bf16.msra.mxu1 %v1738_v52 }
 0xac0   : > { %v1169_v20 = vpop.xlane.xlu1 %1168 }
 0xac1   : > { %1796 = vrcp.f32 %v1169_v20 }
 0xac7   : > { %v1797_v21 = vpop.eup %1796 }
 0xac8   : > { %v1175_v22 = vmul.f32 %v1797_v21, %v1793_v12 }
 0xaca   : > { %v1177_v23 = vpack.c.bf16 %v1175_v22, %v1175_v22 }
 0xacc   : > { %1659 = vmatmul.msk.bf16.vlgmr.msrb.gmra.mxu0 %vm686_vm5, %v1177_v23 }
 0xb17   : > { %v1217_v24 = vpop.f32.mrf.mxu1 }
 0xb18   : > { %1222 = vrot.lane.b32.xlu2 %v1217_v24, %s2199_s23 }
 0xb1f   : > { %v1219_v25 = vpop.f32.mrf.mxu1 }
 0xb49   : > { %v1196_v27 = vpop.f32.mrf.mxu0 }
 0xb51   : > { %v1198_v28 = vpop.f32.mrf.mxu0 }
 0xb72   : > { %v1223_v31 = vpop.permute.xlu2 %1222 }
 0xb73   : > { %v1225_v32 = vsel %vm634_vm1, %v1196_v27, %v1223_v31  ;;  %v1773_v27 = vld [vmem:[%s2190_s13 + $0x1] ss:$0 sm:$0xff] }
 0xb74   : > { %v1226_v33 = vpack.c.bf16 %v1225_v32, %v1225_v32 }
 0xb76   : > { %1669 = vmatmul.msk.bf16.vlgmr.msrb.gmra.mxu2 %vm606_vm0, %v1226_v33 }
 0xbf9   : > { %v1254_v35 = vpop.f32.mrf.mxu2 }
 0xbfa   : > { %v1255_v36 = vadd.f32 %v1769_v34, %v1254_v35 }
 0xbfc   : > { %v1258_v38 = vadd.f32 %v1255_v36, %v2061_v37  ;;  %v1735_v37 = vld [vmem:[%s2187_s10 + $0x38] sm:$0xff] }
 0xbfd   : > { %1343 = vmatpush.bf16.msra.mxu0 %v1735_v37 }
 0xbfe   : > { %v1259_v39 = vsel %vm606_vm0, %v1258_v38, 0.0 }
 0xbff   : > { %1260 = vadd.xlane.f32.xlu0 %v1259_v39 }
 0xc01   : > { %v1256_v40 = vpop.f32.mrf.mxu2  ;;  %1344 = vmatpush.bf16.msra.mxu0 %v1734_v51 }
 0xc72   : > { %v1261_v41 = vpop.xlane.xlu0 %1260 }
 0xc73   : > { %v1262_v42 = vmul.f32 %v1261_v41, %v1982_v17 }
 0xc75   : > { %v1263_v43 = vsub.f32 %v1258_v38, %v1262_v42 }
 0xc77   : > { %v1264_v46 = vmul.f32 %v1263_v43, %v1263_v43 }
 0xc79   : > { %v1265_v47 = vsel %vm606_vm0, %v1264_v46, 0.0 }
 0xc7a   : > { %1266 = vadd.xlane.f32.xlu2 %v1265_v47 }
 0xced   : > { %v1267_v53 = vpop.xlane.xlu2 %1266 }
 0xcee   : > { %v1268_v54 = vmul.f32 %v1267_v53, %v1982_v17 }
 0xcf0   : > { %v1269_v55 = vadd.f32 1e-05, %v1268_v54 }
 0xcf2   : > { %1798 = vrsqrt.f32 %v1269_v55  ;;  %vm1276_vm2 = vweird.f32 %v1269_v55 }
 0xcf8   : > { %v1799_v57 = vpop.eup %1798 }
 0xcf9   : > { %v1271_v58 = vmul.f32 %v1799_v57, %v1269_v55  ;;  %vm1277_vm1 = vweird.f32 %v1799_v57 }
 0xcfa   : > { %vm1278_vm3 = vmor %vm1276_vm2, %vm1277_vm1 }
 0xcfb   : > { %v1272_v59 = vmul.f32 %v1799_v57, %v1271_v58 }
 0xcfd   : > { %v1273_v60 = vmul.f32 0.5, %v1272_v59 }
 0xcff   : > { %v1274_v61 = vsub.f32 1.5, %v1273_v60 }
 0xd01   : > { %v1275_v62 = vmul.f32 %v1799_v57, %v1274_v61 }
 0xd03   : > { %v1279_v0 = vsel %vm1278_vm3, %v1799_v57, %v1275_v62 }
 0xd04   : > { %v1280_v2 = vmul.f32 %v1279_v0, %v1263_v43 }
 0xd06   : > { %v1284_v3 = vmul.f32 %v1770_v63, %v1280_v2 }
 0xd08   : > { %v1288_v5 = vadd.f32 %v1771_v1, %v1284_v3 }
 0xd0a   : > { %v1289_v6 = vmul.f32 %v1288_v5, %v2011_v44 }
 0xd0c   : > { %v1293_v7 = vpack.c.bf16 %v1289_v6, %v1289_v6  ;;  %v1290_v8 = vrot.slane %v1289_v6, 7  ;;  %v1350_v9 = vrot.slane %v1289_v6, 1 }
 0xd0e   : > { %1678 = vmatmul.msk.bf16.vlgmr.msra.gmra.mxu3 %vm606_vm0, %v1293_v7  ;;  %v1291_v30 = vsel %vm838_vm10, %v1290_v8, 0.0  ;;  %v1351_v10 = vsel %vm901_vm11, %v1350_v9, 0.0 }
 0xd0f   : > { %v1292_v11 = vpack.c.bf16 %v1291_v30, %v1291_v30  ;;  %v1352_v12 = vpack.c.bf16 %v1351_v10, %v1351_v10 }
 0xd11   : > { %1687 = vmatmul.msk.bf16.vlgmr.msra.gmra.mxu0 %vm606_vm0, %v1292_v11  ;;  %1696 = vmatmul.msk.bf16.vlgmr.msra.gmra.mxu1 %vm606_vm0, %v1352_v12 }
 0xd8e   : > { %v1346_v15 = vpop.f32.mrf.mxu0  ;;  %v1377_v16 = vpop.f32.mrf.mxu1 }
 0xd91   : > { %v1318_v4 = vpop.f32.mrf.mxu3 }
 0xd92   : > { %v1347_v18 = vadd.f32 %v1346_v15, %v1318_v4 }
 0xd94   : > { %v1381_v20 = vadd.f32 %v1377_v16, %v1347_v18 }
 0xd96   : > { %v1385_v21 = vadd.f32 %v1772_v19, %v1381_v20  ;;  %v1348_v22 = vpop.f32.mrf.mxu0  ;;  %v1379_v23 = vpop.f32.mrf.mxu1 }
 0xd98   : > { %v1386_v24 = vmax.f32 %v1385_v21, 0.0 }
 0xd99   : > { %v1320_v25 = vpop.f32.mrf.mxu3 }
 0xd9a   : > { %v1387_v26 = vpack.c.bf16 %v1386_v24, %v1386_v24 }
 0xd9c   : > { %1713 = vmatmul.msk.bf16.vlgmr.msra.gmra.mxu2 %vm968_vm12, %v1387_v26 }
 0xe1f   : > { %v1427_v28 = vpop.f32.mrf.mxu2 }
 0xe20   : > { %v1428_v29 = vadd.f32 %v1773_v27, %v1427_v28 }
 0xe22   : > { %v1431_v31 = vadd.f32 %v1428_v29, %v1289_v6 }
 0xe24   : > { %v1432_v32 = vsel %vm606_vm0, %v1431_v31, 0.0 }
 0xe25   : > { %1433 = vadd.xlane.f32.xlu1 %v1432_v32 }
 0xe27   : > { %v1429_v33 = vpop.f32.mrf.mxu2 }
 0xe98   : > { %v1434_v34 = vpop.xlane.xlu1 %1433 }
 0xe99   : > { %v1435_v35 = vmul.f32 %v1434_v34, %v1982_v17 }
 0xe9b   : > { %v1436_v36 = vsub.f32 %v1431_v31, %v1435_v35 }
 0xe9d   : > { %v1437_v38 = vmul.f32 %v1436_v36, %v1436_v36 }
 0xe9f   : > { %v1438_v39 = vsel %vm606_vm0, %v1437_v38, 0.0 }
 0xea0   : > { %1439 = vadd.xlane.f32.xlu1 %v1438_v39 }
 0xf13   : > { %v1440_v40 = vpop.xlane.xlu1 %1439 }
 0xf14   : > { %v1441_v41 = vmul.f32 %v1440_v40, %v1982_v17  ;;  %v1775_v17 = vld [vmem:[%s2192_s15 + $0x1] ss:$0 sm:$0xff] }
 0xf16   : > { %v1442_v42 = vadd.f32 1e-05, %v1441_v41 }
 0xf18   : > { %1800 = vrsqrt.f32 %v1442_v42  ;;  %vm1449_vm5 = vweird.f32 %v1442_v42 }
 0xf1e   : > { %v1801_v43 = vpop.eup %1800 }
 0xf1f   : > { %v1444_v46 = vmul.f32 %v1801_v43, %v1442_v42  ;;  %vm1450_vm4 = vweird.f32 %v1801_v43 }
 0xf20   : > { %vm1451_vm6 = vmor %vm1449_vm5, %vm1450_vm4 }
 0xf21   : > { %v1445_v47 = vmul.f32 %v1801_v43, %v1444_v46 }
 0xf23   : > { %v1446_v48 = vmul.f32 0.5, %v1445_v47 }
 0xf25   : > { %v1447_v37 = vsub.f32 1.5, %v1446_v48 }
 0xf27   : > { %v1448_v49 = vmul.f32 %v1801_v43, %v1447_v37 }
 0xf29   : > { %v1452_v51 = vsel %vm1451_vm6, %v1801_v43, %v1448_v49 }
 0xf2a   : > { %v1453_v52 = vmul.f32 %v1452_v51, %v1436_v36 }
 0xf2c   : > { %v1457_v53 = vmul.f32 %v1774_v50, %v1453_v52 }
 0xf2e   : > { %v1461_v54 = vadd.f32 %v1775_v17, %v1457_v53 }
 0xf30   : > { %v1462_v55 = vmul.f32 %v1461_v54, %v2011_v44 }
 0xf32   : > { %1463 = vst.msk [vmem:[%s547_s25] sm:$0xff] %vm606_vm0, %v1462_v55 }
 0xf33 PF: > { %s26_s21 = sadd.s32 1, %s1808_s21  }
 0xf34   : > { %p23_p4 = scmp.ge.s32.totalorder %s26_s21, 4  }
 0xf36   :  { %25 = sbr.rel (!%p23_p4) target bundleno = 2 (0x2), region = 132 }

// kernel: fastspeech2_forward.5
= control target key start
LH: loop header
LB: loop body
LE: loop exit
PB: predicated region body
PF: predicated region fallthrough
CT: control target
= control target key end

     0   :  { %s4626_s0 = inlined_call_operand.vmem [shape: f32[2,16,32], index: 0, kind: input, shape index: {}]   ;;  %s4627_s1 = inlined_call_operand.vmem [shape: f32[2,1,16], index: 1, kind: input, shape index: {}]   ;;  %s4628_s2 = inlined_call_operand.vmem [shape: f32[2,16,1], index: 2, kind: input, shape index: {}]   ;;  %s4629_s3 = inlined_call_operand.vmem [shape: f32[16,32], index: 3, kind: input, shape index: {}]   ;;  %s4630_s4 = inlined_call_operand.vmem [shape: bf16[2,32,96], index: 4, kind: input, shape index: {}]   ;;  %s4631_s5 = inlined_call_operand.vmem [shape: f32[2,1,96], index: 5, kind: input, shape index: {}]   ;;  %s4632_s6 = inlined_call_operand.vmem [shape: bf16[2,32,32], index: 6, kind: input, shape index: {}]   ;;  %s4633_s7 = inlined_call_operand.vmem [shape: f32[2,1,32], index: 7, kind: input, shape index: {}]   ;;  %s4634_s8 = inlined_call_operand.vmem [shape: f32[2,1,32], index: 8, kind: input, shape index: {}]   ;;  %s4635_s9 = inlined_call_operand.vmem [shape: f32[2,1,32], index: 9, kind: input, shape index: {}]   ;;  %s4636_s10 = inlined_call_operand.vmem [shape: bf16[2,3,32,64], index: 10, kind: input, shape index: {}]   ;;  %s4637_s11 = inlined_call_operand.vmem [shape: f32[2,1,64], index: 11, kind: input, shape index: {}]   ;;  %s4638_s12 = inlined_call_operand.vmem [shape: bf16[2,64,32], index: 12, kind: input, shape index: {}]   ;;  %s4639_s13 = inlined_call_operand.vmem [shape: f32[2,1,32], index: 13, kind: input, shape index: {}]   ;;  %s4640_s14 = inlined_call_operand.vmem [shape: f32[2,1,32], index: 14, kind: input, shape index: {}]   ;;  %s4641_s15 = inlined_call_operand.vmem [shape: f32[2,1,32], index: 15, kind: input, shape index: {}]   ;;  %s4642_s16 = inlined_call_operand.vmem [shape: bf16[32,16], index: 16, kind: input, shape index: {}]   ;;  %s4643_s17 = inlined_call_operand.vmem [shape: f32[1,16], index: 17, kind: input, shape index: {}]   ;;  %s4644_s18 = inlined_call_operand.vmem [shape: bf16[5,16,32], index: 18, kind: input, shape index: {}]   ;;  %s4645_s19 = inlined_call_operand.vmem [shape: f32[1,32], index: 19, kind: input, shape index: {}]   ;;  %s4646_s20 = inlined_call_operand.vmem [shape: bf16[5,32,32], index: 20, kind: input, shape index: {}]   ;;  %s4647_s21 = inlined_call_operand.vmem [shape: f32[1,32], index: 21, kind: input, shape index: {}]   ;;  %s4648_s22 = inlined_call_operand.vmem [shape: bf16[5,32,32], index: 22, kind: input, shape index: {}]   ;;  %s4649_s23 = inlined_call_operand.vmem [shape: f32[1,32], index: 23, kind: input, shape index: {}]   ;;  %s4650_s24 = inlined_call_operand.vmem [shape: bf16[5,32,32], index: 24, kind: input, shape index: {}]   ;;  %s4651_s25 = inlined_call_operand.vmem [shape: f32[1,32], index: 25, kind: input, shape index: {}]   ;;  %s4652_s26 = inlined_call_operand.vmem [shape: bf16[5,32,16], index: 26, kind: input, shape index: {}]   ;;  %s4653_s27 = inlined_call_operand.vmem [shape: f32[1,16], index: 27, kind: input, shape index: {}]   ;;  %s4654_s28 = inlined_call_operand.vmem [shape: f32[2,16,32], index: 28, kind: output, shape index: {}]  }
   0x1   :  { %4679 = sst [smem:[#allocation4_spill]] %s4626_s0 }
   0x2   :  { %4680 = sst [smem:[#allocation5_spill]] %s4627_s1 }
   0x3   :  { %4681 = sst [smem:[#allocation6_spill]] %s4628_s2 }
   0x4   :  { %4682 = sst [smem:[#allocation7_spill]] %s4629_s3 }
   0x5   :  { %4683 = sst [smem:[#allocation8_spill]] %s4630_s4 }
   0x6   :  { %4684 = sst [smem:[#allocation9_spill]] %s4631_s5 }
   0x7   :  { %4685 = sst [smem:[#allocation10_spill]] %s4632_s6 }
   0x8   :  { %4686 = sst [smem:[#allocation11_spill]] %s4633_s7 }
   0x9   :  { %4687 = sst [smem:[#allocation12_spill]] %s4634_s8  ;;  %s3951_s8 = smov 0  }
   0xa   :  { %4688 = sst [smem:[#allocation13_spill]] %s4635_s9 }
   0xb   :  { %4689 = sst [smem:[#allocation14_spill]] %s4636_s10 }
   0xc   :  { %4690 = sst [smem:[#allocation15_spill]] %s4637_s11 }
   0xd   :  { %4691 = sst [smem:[#allocation16_spill]] %s4638_s12 }
   0xe   :  { %4692 = sst [smem:[#allocation17_spill]] %s4654_s28 }
   0xf LB: > { %4693 = sst [smem:[#allocation2_spill]] %s3798_s8  ;;  %s3195_s5 = sadd.s32 4294967295, %s3798_s8   ;;  %s3798_s8 = sphi %s3951_s8, %s38_s8  }
  0x10   : > { %p3199_p0 = scmp.ge.s32.totalorder %s3798_s8, 1  ;;  %p780_p1 = scmp.lt.s32.totalorder %s3798_s8, 3 }
  0x12   : > { %p781_p2 = pnand %p3199_p0, %p780_p1 }
  0x14   : > { %784 = sbr.rel (%p781_p2) target bundleno = 5190 (0x1446), region = 132 }
  0x19   : > { %s4694_s3 = sld [smem:[#allocation8_spill]]  ;;  %p862_p3 = scmp.lt.s32.totalorder %s3195_s5, 1  ;;  %v3800_v2 = vmov 0   ;;  %vm942_vm1 = vcmask 261120   ;;  %vm979_vm2 = vcmask 130048   ;;  %vm1411_vm15 = vcmask 523264  }
  0x1a   : > { %3693 = vset.pattern.permute.xlu0 %v3800_v2  ;;  %3692 = vset.pattern.permute.xlu2 %v3800_v2  ;;  %s4695_s29 = sld [smem:[#allocation7_spill]]  ;;  %s4670_s7 = smov 96  }
  0x1b   : > { %s4720_s5 = smov (!%p862_p3, %s3195_s5), 1  ;;  %s4697_s1 = sld [smem:[#allocation5_spill]] }
  0x1c   : > { %s3968_s2 = sshll.u32 %s4720_s5, 4  ;;  %s4698_s8 = sld [smem:[#allocation4_spill]] }
  0x1d   : > { %4696 = sst [smem:[#allocation3_spill]] %s3968_s2  ;;  %s4668_s12 = smov 64  }
  0x1e   : > { %s4703_s9 = sld [smem:[#allocation10_spill]]  ;;  %s4666_s30 = smov 16  }
  0x1f   : > { %v3594_v0 = vld [vmem:[%s4694_s3 + $0x8] sm:$0xff]  ;;  %v3593_v1 = vld [vmem:[%s4694_s3] sm:$0xff]  ;;  %s4706_s10 = sld [smem:[#allocation6_spill]]  ;;  %s4712_s0 = smov 112  }
  0x20   : > { %952 = vmatpush.bf16.msra.mxu0 %v3594_v0  ;;  %v883_v3 = vld [vmem:[%s4695_s29] sm:$0xff]  ;;  %v884_v4 = vld [vmem:[%s4695_s29 + $0x8] sm:$0xff]  ;;  %s4710_s6 = sld [smem:[#allocation16_spill]]  ;;  %s4714_s29 = smov 64  }
  0x21   : > { %s869_s4 = scalar_lea.vmem %s4697_s1, %s4720_s5 }
  0x22   : > { %s866_s28 = scalar_lea.vmem %s4698_s8, %s3968_s2  ;;  %v887_v5 = vld [vmem:[%s869_s4] sm:$0x1]  ;;  %s4699_s8 = sld [smem:[#allocation9_spill]] }
  0x23   : > { %v881_v6 = vld [vmem:[%s866_s28] sm:$0xff]  ;;  %v882_v7 = vld [vmem:[%s866_s28 + $0x8] sm:$0xff]  ;;  %vm1031_vm0 = vcmp.gt.f32.partialorder %v887_v5, 0.5  ;;  %s4672_s28 = smov 112   ;;  %s4707_s4 = sld [smem:[#allocation14_spill]] }
  0x24   : > { %953 = vmatpush.bf16.msra.mxu0 %v3593_v1  ;;  %v3980_v8 = vadd.f32 %v883_v3, %v881_v6  ;;  %v3982_v9 = vadd.f32 %v884_v4, %v882_v7  ;;  %v1032_v10 = vsel %vm1031_vm0, 1, %v3800_v2 }
  0x25   : > { %v1033_v35 = vperm.slane %v1032_v10, 0  ;;  %s874_s5 = scalar_lea.vmem %s4706_s10, %s3968_s2 }
  0x26   : > { %v926_v11 = vpack.c.bf16 %v3982_v9, %v3980_v8 }
  0x27   : > { %vm3997_vm3 = vcmp.eq.s32.totalorder %v1033_v35, 1  ;;  %v3596_v35 = vld [vmem:[%s4703_s9 + $0x8] sm:$0xff] }
  0x28   : > { %3214 = vmatmul.msk.bf16.vlgmr.msra.gmra.mxu0 %vm942_vm1, %v926_v11  ;;  %s4700_s11 = smov %s4699_s8  ;;  %v3704_v13 = vld [vmem:[%s4699_s8] ss:$0 sm:$0xff]  ;;  %s4704_s8 = sld [smem:[#allocation11_spill]] }
  0x29   : > { %1172 = vmatpush.bf16.msrb.mxu0 %v3596_v35 }
  0x2e   : > { %s4705_s1 = smov %s4704_s8 }
  0xa5   : > { %v955_v12 = vpop.f32.mrf.mxu0 }
  0xa6   : > { %v956_v15 = vadd.f32 %v3704_v13, %v955_v12 }
  0xa8   : > { %v968_v19 = vpack.c.bf16 %v956_v15, %v956_v15 }
  0xaa   : > { %v974_v21 = vunpack.c.l.b16 %v968_v19 }
  0xad   : > { %v957_v14 = vpop.f32.mrf.mxu0 }
  0xae   : > { %v958_v16 = vadd.f32 %v3704_v13, %v957_v14 }
  0xb0   : > { %v969_v17 = vpack.c.bf16 %v958_v16, %v958_v16  ;;  %v3682_v18 = vpack.i.bf16 %v958_v16, %v956_v15 }
  0xb2   : > { %3683 = vrot.lane.b32.xlu0 %v3682_v18, %s4672_s28  ;;  %v975_v20 = vunpack.c.l.b16 %v969_v17  ;;  %s4711_s28 = sld [smem:[#allocation15_spill]] }
  0xb4   : > { %v976_v22 = vpack.c.b16 %v975_v20, %v974_v21 }
  0xba   : > { %977 = vrot.lane.b32.xlu0 %v976_v22, %s4670_s7 }
 0x124   : > { %v3684_v23 = vpop.permute.xlu0 %3683 }
 0x125   : > { %v3686_v24 = vunpack.i.h.bf16 %v3684_v23  ;;  %v3685_v25 = vunpack.i.l.bf16 %v3684_v23 }
 0x127   : > { %v971_v26 = vpack.c.bf16 %v3686_v24, %v3686_v24  ;;  %v970_v27 = vpack.c.bf16 %v3685_v25, %v3685_v25 }
 0x129   : > { %v1003_v28 = vunpack.c.l.b16 %v971_v26  ;;  %v1002_v29 = vunpack.c.l.b16 %v970_v27 }
 0x12b   : > { %v1004_v30 = vpack.c.b16 %v1003_v28, %v1002_v29 }
 0x12c   : > { %v978_v31 = vpop.permute.xlu0 %977 }
 0x12d   : > { %1005 = vrot.lane.b32.xlu1 %v1004_v30, %s4670_s7  ;;  %v984_v32 = vsel %vm979_vm2, %v978_v31, 0 }
 0x12e   : > { %993 = vmatpush.bf16.xpose.msra.mxu1 %v984_v32 }
 0x135   : > { %3215 = vmatmul.msk.bf16.vlgmr.msra.gmra.mxu1 %vm979_vm2, %v976_v22 }
 0x19f   : > { %v1006_v33 = vpop.permute.xlu1 %1005 }
 0x1a0   : > { %v1011_v34 = vsel %vm979_vm2, %v1006_v33, 0 }
 0x1a1   : > { %1020 = vmatpush.bf16.xpose.msra.mxu2 %v1011_v34 }
 0x1a8   : > { %3216 = vmatmul.msk.bf16.vlgmr.msra.gmra.mxu2 %vm979_vm2, %v1004_v30 }
 0x1b2   : > { %v995_v37 = vpop.f32.mrf.mxu1 }
 0x1b3   : > { %v1027_v38 = vmul.f32 0.25, %v995_v37 }
 0x1b5   : > { %v1035_v39 = vsel %vm3997_vm3, -1e+09, %v1027_v38 }
 0x1b6   : > { %v1039_v40 = vsel %vm979_vm2, %v1035_v39, -inf }
 0x1b7   : > { %1040 = vmax.xlane.f32.xlu1 %v1039_v40 }
 0x1ba   : > { %v997_v41 = vpop.f32.mrf.mxu1 }
 0x1bb   : > { %v1028_v42 = vmul.f32 0.25, %v997_v41 }
 0x1bd   : > { %v1036_v43 = vsel %vm3997_vm3, -1e+09, %v1028_v42  ;;  %v3595_v42 = vld [vmem:[%s4703_s9] sm:$0xff] }
 0x1be   : > { %v1042_v44 = vsel %vm979_vm2, %v1036_v43, -inf  ;;  %1173 = vmatpush.bf16.msrb.mxu0 %v3595_v42  ;;  %v1255_v42 = vlaneseq }
 0x1bf   : > { %1043 = vmax.xlane.f32.xlu2 %v1042_v44 }
 0x22a   : > { %v1041_v45 = vpop.xlane.xlu1 %1040 }
 0x22b   : > { %v1051_v46 = vsub.f32 %v1035_v39, %v1041_v45  ;;  %v1022_v47 = vpop.f32.mrf.mxu2 }
 0x22c   : > { %v1029_v48 = vmul.f32 0.25, %v1022_v47 }
 0x22d   : > { %v1055_v49 = vmul.f32 1.442695, %v1051_v46 }
 0x22e   : > { %v1037_v50 = vsel %vm3997_vm3, -1e+09, %v1029_v48 }
 0x22f   : > { %3726 = vpow2.f32 %v1055_v49  ;;  %v1045_v51 = vsel %vm979_vm2, %v1037_v50, -inf  ;;  %v3705_v49 = vld [vmem:[%s4704_s8] ss:$0 sm:$0xff]  ;;  %s4713_s8 = smov 96  }
 0x230   : > { %1046 = vmax.xlane.f32.xlu2 %v1045_v51 }
 0x232   : > { %v1044_v52 = vpop.xlane.xlu2 %1043 }
 0x233   : > { %v1052_v53 = vsub.f32 %v1036_v43, %v1044_v52  ;;  %v1024_v54 = vpop.f32.mrf.mxu2 }
 0x234   : > { %v1030_v55 = vmul.f32 0.25, %v1024_v54 }
 0x235   : > { %v3727_v56 = vpop.eup %3726  ;;  %v1057_v57 = vmul.f32 1.442695, %v1052_v53 }
 0x236   : > { %v1038_v58 = vsel %vm3997_vm3, -1e+09, %v1030_v55  ;;  %v1063_v59 = vsel %vm979_vm2, %v3727_v56, 0.0 }
 0x237   : > { %3728 = vpow2.f32 %v1057_v57  ;;  %v1048_v60 = vsel %vm979_vm2, %v1038_v58, -inf }
 0x238   : > { %1049 = vmax.xlane.f32.xlu0 %v1048_v60  ;;  %1064 = vadd.xlane.f32.xlu2 %v1063_v59 }
 0x23d   : > { %v3729_v61 = vpop.eup %3728 }
 0x23e   : > { %v1066_v62 = vsel %vm979_vm2, %v3729_v61, 0.0 }
 0x240   : > { %1067 = vadd.xlane.f32.xlu2 %v1066_v62 }
 0x24c   : > { %1117 = vrot.lane.b32.xlu0 %v1004_v30, %s4668_s12 }
 0x258   : > { %1092 = vrot.lane.b32.xlu2 %v976_v22, %s4668_s12  ;;  %s4708_s12 = sld [smem:[#allocation12_spill]] }
 0x25e   : > { %v3706_v35 = vld [vmem:[%s4708_s12] ss:$0 sm:$0xff] }
 0x2a3   : > { %v1047_v63 = vpop.xlane.xlu2 %1046 }
 0x2a4   : > { %v1053_v0 = vsub.f32 %v1037_v50, %v1047_v63 }
 0x2a6   : > { %v1059_v1 = vmul.f32 1.442695, %v1053_v0 }
 0x2a8   : > { %3730 = vpow2.f32 %v1059_v1 }
 0x2ab   : > { %v1065_v2 = vpop.xlane.xlu2 %1064  ;;  %v1050_v3 = vpop.xlane.xlu0 %1049 }
 0x2ac   : > { %v1054_v4 = vsub.f32 %v1038_v58, %v1050_v3  ;;  %3732 = vrcp.f32 %v1065_v2  ;;  %v3805_v58 = vmov 32.0  }
 0x2ae   : > { %v3731_v5 = vpop.eup %3730  ;;  %v1061_v6 = vmul.f32 1.442695, %v1054_v4 }
 0x2af   : > { %v1069_v7 = vsel %vm979_vm2, %v3731_v5, 0.0 }
 0x2b0   : > { %3734 = vpow2.f32 %v1061_v6  ;;  %1070 = vadd.xlane.f32.xlu1 %v1069_v7 }
 0x2b2   : > { %v3733_v11 = vpop.eup %3732 }
 0x2b3   : > { %v1068_v10 = vpop.xlane.xlu2 %1067  ;;  %v1079_v14 = vmul.f32 %v3733_v11, %v3727_v56 }
 0x2b4   : > { %3736 = vrcp.f32 %v1068_v10 }
 0x2b5   : > { %v1083_v18 = vpack.c.bf16 %v1079_v14, %v1079_v14 }
 0x2b6   : > { %v3735_v12 = vpop.eup %3734 }
 0x2b7   : > { %v1072_v13 = vsel %vm979_vm2, %v3735_v12, 0.0  ;;  %v1089_v21 = vunpack.c.l.b16 %v1083_v18  ;;  %v3598_v18 = vld [vmem:[%s4707_s4 + $0x8] sm:$0xff] }
 0x2b8   : > { %1073 = vadd.xlane.f32.xlu2 %v1072_v13  ;;  %v3600_v13 = vld [vmem:[%s4707_s4 + $0x18] sm:$0xff]  ;;  %1323 = vmatpush.bf16.msrb.mxu2 %v3598_v18 }
 0x2b9   : > { %1294 = vmatpush.bf16.msrb.mxu1 %v3600_v13 }
 0x2ba   : > { %v3737_v15 = vpop.eup %3736 }
 0x2bb   : > { %v1093_v16 = vpop.permute.xlu2 %1092  ;;  %v1080_v17 = vmul.f32 %v3737_v15, %v3729_v61  ;;  %v889_v61 = vld [vmem:[%s874_s5 + $0x8] sm:$0xff] }
 0x2bc   : > { %1105 = vmatpush.bf16.msra.mxu3 %v1093_v16 }
 0x2bd   : > { %v1084_v19 = vpack.c.bf16 %v1080_v17, %v1080_v17  ;;  %v3599_v17 = vld [vmem:[%s4707_s4 + $0x10] sm:$0xff] }
 0x2be   : > { %v1118_v20 = vpop.permute.xlu0 %1117  ;;  %1295 = vmatpush.bf16.msrb.mxu1 %v3599_v17 }
 0x2bf   : > { %v1090_v22 = vunpack.c.l.b16 %v1084_v19  ;;  %v3602_v19 = vld [vmem:[%s4707_s4 + $0x28] sm:$0xff] }
 0x2c0   : > { %1130 = vmatpush.bf16.msrb.mxu3 %v1118_v20 }
 0x2c1   : > { %v1091_v23 = vpack.c.b16 %v1090_v22, %v1089_v21  ;;  %v3597_v21 = vld [vmem:[%s4707_s4] sm:$0xff] }
 0x2c2   : > { %v3601_v22 = vld [vmem:[%s4707_s4 + $0x20] sm:$0xff]  ;;  %1324 = vmatpush.bf16.msrb.mxu2 %v3597_v21 }
 0x2c3   : > { %3217 = vmatmul.msk.bf16.vlgmr.msra.gmra.mxu3 %vm979_vm2, %v1091_v23 }
 0x2c4   : > { %1366 = vmatpush.bf16.msra.mxu3 %v3602_v19 }
 0x2c8   : > { %1367 = vmatpush.bf16.msra.mxu3 %v3601_v22 }
 0x323   : > { %v1071_v24 = vpop.xlane.xlu1 %1070 }
 0x324   : > { %3738 = vrcp.f32 %v1071_v24 }
 0x32a   : > { %v3739_v26 = vpop.eup %3738 }
 0x32b   : > { %v1074_v25 = vpop.xlane.xlu2 %1073  ;;  %v1081_v27 = vmul.f32 %v3739_v26, %v3731_v5 }
 0x32c   : > { %3740 = vrcp.f32 %v1074_v25 }
 0x32d   : > { %v1085_v29 = vpack.c.bf16 %v1081_v27, %v1081_v27  ;;  %3742 = vrcp.f32 %v3805_v58 }
 0x32f   : > { %v1114_v32 = vunpack.c.l.b16 %v1085_v29 }
 0x332   : > { %v3741_v28 = vpop.eup %3740 }
 0x333   : > { %v1082_v30 = vmul.f32 %v3741_v28, %v3735_v12  ;;  %v3743_v59 = vpop.eup %3742  ;;  %v888_v12 = vld [vmem:[%s874_s5] sm:$0xff]  ;;  %s4709_s5 = sld [smem:[#allocation13_spill]] }
 0x334   : > { %v1189_v60 = vmul.f32 32.0, %v3743_v59  ;;  %vm1193_vm4 = vweird.f32 %v3743_v59 }
 0x335   : > { %v1086_v31 = vpack.c.bf16 %v1082_v30, %v1082_v30 }
 0x337   : > { %v1115_v33 = vunpack.c.l.b16 %v1086_v31 }
 0x339   : > { %v1116_v34 = vpack.c.b16 %v1115_v33, %v1114_v32 }
 0x33b   : > { %3218 = vmatmul.msk.bf16.vlgmr.msrb.gmra.mxu3 %vm979_vm2, %v1116_v34 }
 0x346   : > { %v1107_v37 = vpop.f32.mrf.mxu3 }
 0x34e   : > { %v1109_v38 = vpop.f32.mrf.mxu3 }
 0x3be   : > { %v1132_v39 = vpop.f32.mrf.mxu3 }
 0x3c6   : > { %v1134_v40 = vpop.f32.mrf.mxu3 }
 0x3c7   : > { %v3687_v41 = vpack.i.bf16 %v1134_v40, %v1132_v39 }
 0x3c9   : > { %3688 = vrot.lane.b32.xlu1 %v3687_v41, %s4666_s30  ;;  %v3707_v41 = vld [vmem:[%s4709_s5] ss:$0 sm:$0xff]  ;;  %s4715_s30 = smov 16  }
 0x43b   : > { %v3689_v43 = vpop.permute.xlu1 %3688 }
 0x43c   : > { %v3691_v44 = vunpack.i.h.bf16 %v3689_v43  ;;  %v3690_v45 = vunpack.i.l.bf16 %v3689_v43 }
 0x43e   : > { %v1146_v46 = vsel %vm979_vm2, %v1109_v38, %v3691_v44  ;;  %v1145_v47 = vsel %vm979_vm2, %v1107_v37, %v3690_v45 }
 0x43f   : > { %v1147_v48 = vpack.c.bf16 %v1146_v46, %v1145_v47  ;;  %v4074_v46 = vshrl.u32 %v1255_v42, 7 }
 0x441   : > { %3227 = vmatmul.msk.bf16.vlgmr.msrb.gmra.mxu0 %vm942_vm1, %v1147_v48  ;;  %vm1260_vm11 = vcmp.lt.s32.totalorder %v4074_v46, 1  ;;  %vm1263_vm12 = vcmp.ge.s32.totalorder %v4074_v46, 1  ;;  %vm1333_vm13 = vcmp.lt.s32.totalorder %v4074_v46, 7 }
 0x4be   : > { %v1175_v50 = vpop.f32.mrf.mxu0 }
 0x4bf   : > { %v1176_v51 = vadd.f32 %v3705_v49, %v1175_v50 }
 0x4c1   : > { %v1180_v52 = vadd.f32 %v1176_v51, %v3980_v8  ;;  %v1190_v8 = vsub.f32 1.0, %v1189_v60 }
 0x4c3   : > { %v1182_v53 = vsel %vm942_vm1, %v1180_v52, 0.0  ;;  %v1191_v62 = vmul.f32 %v3743_v59, %v1190_v8 }
 0x4c4   : > { %1183 = vadd.xlane.f32.xlu0 %v1182_v53 }
 0x4c5   : > { %v1192_v63 = vadd.f32 %v3743_v59, %v1191_v62 }
 0x4c6   : > { %v1177_v54 = vpop.f32.mrf.mxu0 }
 0x4c7   : > { %v1178_v55 = vadd.f32 %v3705_v49, %v1177_v54  ;;  %v4042_v0 = vsel %vm1193_vm4, %v3743_v59, %v1192_v63 }
 0x4c9   : > { %v1181_v56 = vadd.f32 %v1178_v55, %v3982_v9 }
 0x4cb   : > { %v1185_v57 = vsel %vm942_vm1, %v1181_v56, 0.0 }
 0x4cc   : > { %1186 = vadd.xlane.f32.xlu1 %v1185_v57 }
 0x4d8   : > { %1250 = vperm.xlu0 %3693, %v889_v61  }
 0x537   : > { %v1184_v9 = vpop.xlane.xlu0 %1183 }
 0x538   : > { %v1195_v1 = vmul.f32 %v4042_v0, %v1184_v9 }
 0x53a   : > { %v1197_v2 = vsub.f32 %v1180_v52, %v1195_v1  ;;  %v4082_v52 = vadd.s32 8, %v4074_v46 }
 0x53c   : > { %v1199_v3 = vmul.f32 %v1197_v2, %v1197_v2  ;;  %vm1337_vm14 = vcmp.lt.s32.totalorder %v4082_v52, 15 }
 0x53e   : > { %v1201_v4 = vsel %vm942_vm1, %v1199_v3, 0.0  ;;  %v3606_v3 = vld [vmem:[%s4710_s6 + $0x18] sm:$0xff] }
 0x53f   : > { %v1187_v5 = vpop.xlane.xlu1 %1186  ;;  %1202 = vadd.xlane.f32.xlu2 %v1201_v4  ;;  %1419 = vmatpush.bf16.msra.mxu0 %v3606_v3  ;;  %v3605_v4 = vld [vmem:[%s4710_s6 + $0x10] sm:$0xff]  ;;  %v3710_v3 = vld [vmem:[%s4640_s14] ss:$0 sm:$0xff] }
 0x540   : > { %v1196_v6 = vmul.f32 %v4042_v0, %v1187_v5  ;;  %v3604_v5 = vld [vmem:[%s4710_s6 + $0x8] sm:$0xff] }
 0x542   : > { %v1198_v7 = vsub.f32 %v1181_v56, %v1196_v6  ;;  %v3603_v6 = vld [vmem:[%s4710_s6] sm:$0xff] }
 0x543   : > { %1420 = vmatpush.bf16.msra.mxu0 %v3605_v4 }
 0x544   : > { %v1200_v10 = vmul.f32 %v1198_v7, %v1198_v7 }
 0x546   : > { %v1204_v11 = vsel %vm942_vm1, %v1200_v10, 0.0 }
 0x547   : > { %1205 = vadd.xlane.f32.xlu2 %v1204_v11  ;;  %1421 = vmatpush.bf16.msra.mxu0 %v3604_v5 }
 0x54a   : > { %v4079_v51 = vpop.permute.xlu0 %1250 }
 0x54b   : > { %1422 = vmatpush.bf16.msra.mxu0 %v3603_v6 }
 0x55f   : > { %1245 = vperm.xlu2 %3692, %v888_v12  }
 0x5b2   : > { %v1203_v14 = vpop.xlane.xlu2 %1202 }
 0x5b3   : > { %v1207_v15 = vmul.f32 %v1203_v14, %v4042_v0  ;;  %v3708_v14 = vld [vmem:[%s4711_s28] ss:$0 sm:$0xff] }
 0x5b5   : > { %v1209_v16 = vadd.f32 1e-05, %v1207_v15 }
 0x5b7   : > { %3744 = vrsqrt.f32 %v1209_v16  ;;  %vm1217_vm6 = vweird.f32 %v1209_v16 }
 0x5ba   : > { %v1206_v20 = vpop.xlane.xlu2 %1205 }
 0x5bb   : > { %v1208_v23 = vmul.f32 %v1206_v20, %v4042_v0 }
 0x5bd   : > { %v3745_v24 = vpop.eup %3744  ;;  %v1210_v25 = vadd.f32 1e-05, %v1208_v23 }
 0x5be   : > { %v1212_v26 = vmul.f32 %v3745_v24, %v1209_v16  ;;  %vm1218_vm5 = vweird.f32 %v3745_v24 }
 0x5bf   : > { %3746 = vrsqrt.f32 %v1210_v25  ;;  %vm1219_vm7 = vmor %vm1217_vm6, %vm1218_vm5  ;;  %vm1227_vm9 = vweird.f32 %v1210_v25 }
 0x5c0   : > { %v1213_v27 = vmul.f32 %v3745_v24, %v1212_v26 }
 0x5c2   : > { %v1214_v28 = vmul.f32 0.5, %v1213_v27  ;;  %v4076_v48 = vpop.permute.xlu2 %1245 }
 0x5c4   : > { %v1215_v29 = vsub.f32 1.5, %v1214_v28 }
 0x5c5   : > { %v3747_v30 = vpop.eup %3746 }
 0x5c6   : > { %v1216_v31 = vmul.f32 %v3745_v24, %v1215_v29  ;;  %v1222_v32 = vmul.f32 %v3747_v30, %v1210_v25  ;;  %vm1228_vm8 = vweird.f32 %v3747_v30  ;;  %v3709_v25 = vld [vmem:[%s4639_s13] ss:$0 sm:$0xff] }
 0x5c7   : > { %vm1229_vm10 = vmor %vm1227_vm9, %vm1228_vm8 }
 0x5c8   : > { %v1220_v33 = vsel %vm1219_vm7, %v3745_v24, %v1216_v31  ;;  %v1223_v34 = vmul.f32 %v3747_v30, %v1222_v32 }
 0x5c9   : > { %v1231_v37 = vmul.f32 %v1220_v33, %v1197_v2 }
 0x5ca   : > { %v1224_v38 = vmul.f32 0.5, %v1223_v34 }
 0x5cb   : > { %v1236_v40 = vmul.f32 %v3706_v35, %v1231_v37 }
 0x5cc   : > { %v1225_v39 = vsub.f32 1.5, %v1224_v38 }
 0x5cd   : > { %v1241_v45 = vadd.f32 %v3707_v41, %v1236_v40 }
 0x5ce   : > { %v1226_v43 = vmul.f32 %v3747_v30, %v1225_v39 }
 0x5cf   : > { %v1253_v50 = vmul.f32 %v4076_v48, %v1241_v45 }
 0x5d0   : > { %v1230_v44 = vsel %vm1229_vm10, %v3747_v30, %v1226_v43 }
 0x5d1   : > { %v1232_v47 = vmul.f32 %v1230_v44, %v1198_v7  ;;  %v1331_v55 = vrot.slane %v1253_v50, 1  ;;  %v1258_v58 = vrot.slane %v1253_v50, 7 }
 0x5d3   : > { %v1237_v49 = vmul.f32 %v3706_v35, %v1232_v47  ;;  %v3608_v47 = vld [vmem:[%s4694_s3 + $0x18] sm:$0xff] }
 0x5d4   : > { %1560 = vmatpush.bf16.msra.mxu1 %v3608_v47 }
 0x5d5   : > { %v1242_v53 = vadd.f32 %v3707_v41, %v1237_v49 }
 0x5d7   : > { %v1254_v54 = vmul.f32 %v4079_v51, %v1242_v53  ;;  %v3607_v53 = vld [vmem:[%s4694_s3 + $0x10] sm:$0xff] }
 0x5d8   : > { %1561 = vmatpush.bf16.msra.mxu1 %v3607_v53 }
 0x5d9   : > { %v1332_v56 = vrot.slane %v1254_v54, 1  ;;  %v1272_v57 = vpack.c.bf16 %v1254_v54, %v1253_v50  ;;  %v1259_v59 = vrot.slane %v1254_v54, 7 }
 0x5db   : > { %3236 = vmatmul.msk.bf16.vlgmr.msrb.gmra.mxu1 %vm942_vm1, %v1272_v57  ;;  %v1261_v60 = vsel %vm1260_vm11, %v1258_v58, %v1259_v59  ;;  %v1262_v61 = vsel %vm1260_vm11, %v1259_v59, %v1258_v58  ;;  %v1334_v8 = vsel %vm1333_vm13, %v1331_v55, %v1332_v56  ;;  %v1335_v62 = vsel %vm1333_vm13, %v1332_v56, %v1331_v55 }
 0x5dc   : > { %v1269_v63 = vsel %vm1263_vm12, %v1262_v61, 0.0  ;;  %v1343_v9 = vsel %vm1337_vm14, %v1335_v62, 0.0 }
 0x5dd   : > { %v1271_v1 = vpack.c.bf16 %v1261_v60, %v1269_v63  ;;  %v1344_v2 = vpack.c.bf16 %v1343_v9, %v1334_v8 }
 0x5df   : > { %3245 = vmatmul.msk.bf16.vlgmr.msrb.gmra.mxu2 %vm942_vm1, %v1271_v1  ;;  %3254 = vmatmul.msk.bf16.vlgmr.msra.gmra.mxu3 %vm942_vm1, %v1344_v2 }
 0x658   : > { %v1297_v7 = vpop.f32.mrf.mxu1 }
 0x660   : > { %v1299_v15 = vpop.f32.mrf.mxu1 }
 0x662   : > { %v1326_v10 = vpop.f32.mrf.mxu2  ;;  %v1369_v11 = vpop.f32.mrf.mxu3 }
 0x663   : > { %v1327_v12 = vadd.f32 %v1326_v10, %v1297_v7  ;;  %v3711_v7 = vld [vmem:[%s4641_s15] ss:$0 sm:$0xff] }
 0x665   : > { %v1374_v13 = vadd.f32 %v1369_v11, %v1327_v12 }
 0x667   : > { %v1379_v19 = vadd.f32 %v3708_v14, %v1374_v13 }
 0x669   : > { %v1381_v22 = vmax.f32 %v1379_v19, 0.0 }
 0x66a   : > { %v1328_v16 = vpop.f32.mrf.mxu2  ;;  %v1371_v18 = vpop.f32.mrf.mxu3 }
 0x66b   : > { %v1329_v17 = vadd.f32 %v1328_v16, %v1299_v15 }
 0x66d   : > { %v1375_v20 = vadd.f32 %v1371_v18, %v1329_v17 }
 0x66f   : > { %v1380_v21 = vadd.f32 %v3708_v14, %v1375_v20  ;;  %v3712_v20 = vld [vmem:[%s4700_s11 + $0x1] ss:$0 sm:$0xff] }
 0x671   : > { %v1382_v23 = vmax.f32 %v1380_v21, 0.0 }
 0x673   : > { %v1383_v24 = vpack.c.bf16 %v1382_v23, %v1381_v22 }
 0x675   : > { %3271 = vmatmul.msk.bf16.vlgmr.msra.gmra.mxu0 %vm1411_vm15, %v1383_v24 }
 0x6f2   : > { %v1424_v26 = vpop.f32.mrf.mxu0 }
 0x6f3   : > { %v1425_v27 = vadd.f32 %v3709_v25, %v1424_v26 }
 0x6f5   : > { %v1429_v28 = vadd.f32 %v1425_v27, %v1253_v50 }
 0x6f7   : > { %v1431_v29 = vsel %vm942_vm1, %v1429_v28, 0.0 }
 0x6f8   : > { %1432 = vadd.xlane.f32.xlu1 %v1431_v29 }
 0x6fa   : > { %v1426_v30 = vpop.f32.mrf.mxu0 }
 0x6fb   : > { %v1427_v31 = vadd.f32 %v3709_v25, %v1426_v30 }
 0x6fd   : > { %v1430_v32 = vadd.f32 %v1427_v31, %v1254_v54 }
 0x6ff   : > { %v1434_v33 = vsel %vm942_vm1, %v1430_v32, 0.0 }
 0x700   : > { %1435 = vadd.xlane.f32.xlu1 %v1434_v33 }
 0x76b   : > { %v1433_v34 = vpop.xlane.xlu1 %1432 }
 0x76c   : > { %v1437_v35 = vmul.f32 %v1433_v34, %v4042_v0 }
 0x76e   : > { %v1439_v37 = vsub.f32 %v1429_v28, %v1437_v35 }
 0x770   : > { %v1441_v38 = vmul.f32 %v1439_v37, %v1439_v37 }
 0x772   : > { %v1443_v39 = vsel %vm942_vm1, %v1441_v38, 0.0 }
 0x773   : > { %1444 = vadd.xlane.f32.xlu2 %v1443_v39  ;;  %v1436_v40 = vpop.xlane.xlu1 %1435 }
 0x774   : > { %v1438_v41 = vmul.f32 %v1436_v40, %v4042_v0 }
 0x776   : > { %v1440_v42 = vsub.f32 %v1430_v32, %v1438_v41 }
 0x778   : > { %v1442_v43 = vmul.f32 %v1440_v42, %v1440_v42 }
 0x77a   : > { %v1446_v44 = vsel %vm942_vm1, %v1442_v43, 0.0 }
 0x77b   : > { %1447 = vadd.xlane.f32.xlu1 %v1446_v44 }
 0x7e6   : > { %v1445_v45 = vpop.xlane.xlu2 %1444 }
 0x7e7   : > { %v1449_v49 = vmul.f32 %v1445_v45, %v4042_v0 }
 0x7e9   : > { %v1451_v50 = vadd.f32 1e-05, %v1449_v49 }
 0x7eb   : > { %3748 = vrsqrt.f32 %v1451_v50  ;;  %vm1459_vm4 = vweird.f32 %v1451_v50 }
 0x7ee   : > { %v1448_v54 = vpop.xlane.xlu1 %1447 }
 0x7ef   : > { %v1450_v55 = vmul.f32 %v1448_v54, %v4042_v0 }
 0x7f1   : > { %v3749_v56 = vpop.eup %3748  ;;  %v1452_v57 = vadd.f32 1e-05, %v1450_v55 }
 0x7f2   : > { %v1454_v58 = vmul.f32 %v3749_v56, %v1451_v50  ;;  %vm1460_vm0 = vweird.f32 %v3749_v56 }
 0x7f3   : > { %3750 = vrsqrt.f32 %v1452_v57  ;;  %vm1461_vm5 = vmor %vm1459_vm4, %vm1460_vm0  ;;  %vm1469_vm7 = vweird.f32 %v1452_v57 }
 0x7f4   : > { %v1455_v59 = vmul.f32 %v3749_v56, %v1454_v58 }
 0x7f6   : > { %v1456_v60 = vmul.f32 0.5, %v1455_v59 }
 0x7f8   : > { %v1457_v61 = vsub.f32 1.5, %v1456_v60 }
 0x7f9   : > { %v3751_v8 = vpop.eup %3750 }
 0x7fa   : > { %v1458_v62 = vmul.f32 %v3749_v56, %v1457_v61  ;;  %v1464_v63 = vmul.f32 %v3751_v8, %v1452_v57  ;;  %vm1470_vm6 = vweird.f32 %v3751_v8 }
 0x7fb   : > { %vm1471_vm8 = vmor %vm1469_vm7, %vm1470_vm6 }
 0x7fc   : > { %v1462_v9 = vsel %vm1461_vm5, %v3749_v56, %v1458_v62  ;;  %v1465_v1 = vmul.f32 %v3751_v8, %v1464_v63 }
 0x7fd   : > { %v1473_v4 = vmul.f32 %v1462_v9, %v1439_v37 }
 0x7fe   : > { %v1466_v2 = vmul.f32 0.5, %v1465_v1 }
 0x7ff   : > { %v1478_v10 = vmul.f32 %v3710_v3, %v1473_v4 }
 0x800   : > { %v1467_v5 = vsub.f32 1.5, %v1466_v2 }
 0x801   : > { %v1483_v13 = vadd.f32 %v3711_v7, %v1478_v10 }
 0x802   : > { %v1468_v6 = vmul.f32 %v3751_v8, %v1467_v5 }
 0x803   : > { %v4144_v16 = vmul.f32 %v1483_v13, %v4076_v48 }
 0x804   : > { %v1472_v11 = vsel %vm1471_vm8, %v3751_v8, %v1468_v6 }
 0x805   : > { %v1474_v12 = vmul.f32 %v1472_v11, %v1440_v42 }
 0x807   : > { %v1479_v14 = vmul.f32 %v3710_v3, %v1474_v12 }
 0x809   : > { %v1484_v15 = vadd.f32 %v3711_v7, %v1479_v14 }
 0x80b   : > { %v4147_v17 = vmul.f32 %v1484_v15, %v4079_v51 }
 0x80d   : > { %v1535_v18 = vpack.c.bf16 %v4147_v17, %v4144_v16 }
 0x80f   : > { %3316 = vmatmul.msk.bf16.vlgmr.msra.gmra.mxu1 %vm942_vm1, %v1535_v18 }
 0x88c   : > { %v1563_v19 = vpop.f32.mrf.mxu1 }
 0x88d   : > { %v1564_v21 = vadd.f32 %v3712_v20, %v1563_v19 }
 0x88f   : > { %v1576_v23 = vpack.c.bf16 %v1564_v21, %v1564_v21 }
 0x891   : > { %v1582_v27 = vunpack.c.l.b16 %v1576_v23 }
 0x894   : > { %v1565_v22 = vpop.f32.mrf.mxu1 }
 0x895   : > { %v1566_v24 = vadd.f32 %v3712_v20, %v1565_v22 }
 0x897   : > { %v1577_v25 = vpack.c.bf16 %v1566_v24, %v1566_v24  ;;  %v3694_v26 = vpack.i.bf16 %v1566_v24, %v1564_v21 }
 0x899   : > { %v1583_v28 = vunpack.c.l.b16 %v1577_v25  ;;  %3695 = vrot.lane.b32.xlu1 %v3694_v26, %s4712_s0 }
 0x89b   : > { %v4156_v29 = vpack.c.b16 %v1583_v28, %v1582_v27 }
 0x90b   : > { %v3696_v30 = vpop.permute.xlu1 %3695 }
 0x90c   : > { %v3698_v31 = vunpack.i.h.bf16 %v3696_v30  ;;  %v3697_v32 = vunpack.i.l.bf16 %v3696_v30 }
 0x90e   : > { %v1579_v33 = vpack.c.bf16 %v3698_v31, %v3698_v31  ;;  %v1578_v34 = vpack.c.bf16 %v3697_v32, %v3697_v32 }
 0x910   : > { %v1610_v35 = vunpack.c.l.b16 %v1579_v33  ;;  %v1609_v37 = vunpack.c.l.b16 %v1578_v34 }
 0x912   : > { %v1611_v38 = vpack.c.b16 %v1610_v35, %v1609_v37 }
 0x914   : > { %1612 = vrot.lane.b32.xlu0 %v1611_v38, %s4713_s8 }
 0x91c   : > { %1585 = vrot.lane.b32.xlu0 %v4156_v29, %s4713_s8 }
 0x986   : > { %v1613_v39 = vpop.permute.xlu0 %1612 }
 0x987   : > { %v1618_v40 = vsel %vm979_vm2, %v1613_v39, 0 }
 0x988   : > { %1627 = vmatpush.bf16.xpose.msrb.mxu3 %v1618_v40 }
 0x98e   : > { %v1586_v41 = vpop.permute.xlu0 %1585 }
 0x98f   : > { %v1591_v42 = vsel %vm979_vm2, %v1586_v41, 0  ;;  %3318 = vmatmul.msk.bf16.vlgmr.msrb.gmra.mxu3 %vm979_vm2, %v1611_v38 }
 0x990   : > { %1600 = vmatpush.bf16.xpose.msra.mxu2 %v1591_v42 }
 0x997   : > { %3317 = vmatmul.msk.bf16.vlgmr.msra.gmra.mxu2 %vm979_vm2, %v4156_v29 }
 0xa12   : > { %v1629_v43 = vpop.f32.mrf.mxu3 }
 0xa13   : > { %v1636_v44 = vmul.f32 0.25, %v1629_v43 }
 0xa15   : > { %v1640_v45 = vsel %vm3997_vm3, -1e+09, %v1636_v44 }
 0xa16   : > { %v1648_v47 = vsel %vm979_vm2, %v1640_v45, -inf }
 0xa17   : > { %1649 = vmax.xlane.f32.xlu1 %v1648_v47  ;;  %v3610_v47 = vld [vmem:[%s4703_s9 + $0x18] sm:$0xff] }
 0xa18   : > { %1775 = vmatpush.bf16.msrb.mxu2 %v3610_v47 }
 0xa1a   : > { %v1602_v49 = vpop.f32.mrf.mxu2  ;;  %v1631_v50 = vpop.f32.mrf.mxu3 }
 0xa1b   : > { %v1634_v53 = vmul.f32 0.25, %v1602_v49  ;;  %v1637_v54 = vmul.f32 0.25, %v1631_v50 }
 0xa1d   : > { %v1641_v55 = vsel %vm3997_vm3, -1e+09, %v1637_v54  ;;  %v1638_v56 = vsel %vm3997_vm3, -1e+09, %v1634_v53  ;;  %v3609_v54 = vld [vmem:[%s4703_s9 + $0x10] sm:$0xff]  ;;  %s4717_s9 = sld [smem:[#allocation17_spill]] }
 0xa1e   : > { %v1651_v57 = vsel %vm979_vm2, %v1641_v55, -inf  ;;  %v1642_v58 = vsel %vm979_vm2, %v1638_v56, -inf  ;;  %1776 = vmatpush.bf16.msrb.mxu2 %v3609_v54 }
 0xa1f   : > { %1652 = vmax.xlane.f32.xlu0 %v1651_v57  ;;  %1643 = vmax.xlane.f32.xlu2 %v1642_v58 }
 0xa22   : > { %v1604_v59 = vpop.f32.mrf.mxu2 }
 0xa23   : > { %v1635_v60 = vmul.f32 0.25, %v1604_v59 }
 0xa25   : > { %v1639_v61 = vsel %vm3997_vm3, -1e+09, %v1635_v60 }
 0xa26   : > { %v1645_v8 = vsel %vm979_vm2, %v1639_v61, -inf }
 0xa27   : > { %1646 = vmax.xlane.f32.xlu2 %v1645_v8 }
 0xa8a   : > { %v1650_v62 = vpop.xlane.xlu1 %1649 }
 0xa8b   : > { %v1656_v63 = vsub.f32 %v1640_v45, %v1650_v62  ;;  %v3713_v62 = vld [vmem:[%s4705_s1 + $0x1] ss:$0 sm:$0xff] }
 0xa8d   : > { %v1662_v9 = vmul.f32 1.442695, %v1656_v63 }
 0xa8f   : > { %3752 = vpow2.f32 %v1662_v9 }
 0xa92   : > { %v1644_v1 = vpop.xlane.xlu2 %1643  ;;  %v1653_v2 = vpop.xlane.xlu0 %1652 }
 0xa93   : > { %v1654_v3 = vsub.f32 %v1638_v56, %v1644_v1  ;;  %v1657_v4 = vsub.f32 %v1641_v55, %v1653_v2 }
 0xa95   : > { %v3753_v5 = vpop.eup %3752  ;;  %v1658_v6 = vmul.f32 1.442695, %v1654_v3  ;;  %v1664_v7 = vmul.f32 1.442695, %v1657_v4 }
 0xa96   : > { %v1672_v10 = vsel %vm979_vm2, %v3753_v5, 0.0 }
 0xa97   : > { %3754 = vpow2.f32 %v1658_v6  ;;  %1673 = vadd.xlane.f32.xlu2 %v1672_v10 }
 0xa98   : > { %3756 = vpow2.f32 %v1664_v7 }
 0xa9a   : > { %v1647_v36 = vpop.xlane.xlu2 %1646 }
 0xa9b   : > { %v1655_v11 = vsub.f32 %v1639_v61, %v1647_v36 }
 0xa9d   : > { %v3755_v12 = vpop.eup %3754  ;;  %v1660_v13 = vmul.f32 1.442695, %v1655_v11 }
 0xa9e   : > { %v3757_v14 = vpop.eup %3756  ;;  %v1666_v15 = vsel %vm979_vm2, %v3755_v12, 0.0 }
 0xa9f   : > { %3758 = vpow2.f32 %v1660_v13  ;;  %1667 = vadd.xlane.f32.xlu1 %v1666_v15  ;;  %v1675_v18 = vsel %vm979_vm2, %v3757_v14, 0.0 }
 0xaa0   : > { %1676 = vadd.xlane.f32.xlu2 %v1675_v18 }
 0xaa5   : > { %v3759_v19 = vpop.eup %3758 }
 0xaa6   : > { %v1669_v20 = vsel %vm979_vm2, %v3759_v19, 0.0 }
 0xaa7   : > { %1670 = vadd.xlane.f32.xlu0 %v1669_v20 }
 0xab8   : > { %1720 = vrot.lane.b32.xlu2 %v1611_v38, %s4714_s29  ;;  %1695 = vrot.lane.b32.xlu1 %v4156_v29, %s4714_s29 }
 0xb0a   : > { %v1674_v21 = vpop.xlane.xlu2 %1673 }
 0xb0b   : > { %3760 = vrcp.f32 %v1674_v21 }
 0xb11   : > { %v3761_v23 = vpop.eup %3760 }
 0xb12   : > { %v1668_v24 = vpop.xlane.xlu1 %1667  ;;  %v1684_v25 = vmul.f32 %v3761_v23, %v3753_v5  ;;  %v3612_v23 = vld [vmem:[%s4707_s4 + $0x38] sm:$0xff] }
 0xb13   : > { %v1677_v22 = vpop.xlane.xlu2 %1676 }
 0xb14   : > { %3762 = vrcp.f32 %v1677_v22  ;;  %v1688_v28 = vpack.c.bf16 %v1684_v25, %v1684_v25  ;;  %v3613_v22 = vld [vmem:[%s4707_s4 + $0x40] sm:$0xff] }
 0xb15   : > { %3764 = vrcp.f32 %v1668_v24  ;;  %v3616_v24 = vld [vmem:[%s4707_s4 + $0x58] sm:$0xff] }
 0xb16   : > { %v1717_v34 = vunpack.c.l.b16 %v1688_v28 }
 0xb1a   : > { %v3763_v26 = vpop.eup %3762  ;;  %v1671_v27 = vpop.xlane.xlu0 %1670 }
 0xb1b   : > { %v1685_v30 = vmul.f32 %v3763_v26, %v3757_v14  ;;  %v1721_v31 = vpop.permute.xlu2 %1720  ;;  %3766 = vrcp.f32 %v1671_v27  ;;  %v3765_v33 = vpop.eup %3764  ;;  %v3611_v26 = vld [vmem:[%s4707_s4 + $0x30] sm:$0xff] }
 0xb1c   : > { %1733 = vmatpush.bf16.msrb.mxu1 %v1721_v31  ;;  %v1682_v38 = vmul.f32 %v3765_v33, %v3755_v12  ;;  %v3615_v27 = vld [vmem:[%s4707_s4 + $0x50] sm:$0xff] }
 0xb1d   : > { %v1689_v32 = vpack.c.bf16 %v1685_v30, %v1685_v30 }
 0xb1e   : > { %v1686_v41 = vpack.c.bf16 %v1682_v38, %v1682_v38 }
 0xb1f   : > { %v1718_v35 = vunpack.c.l.b16 %v1689_v32 }
 0xb20   : > { %v1692_v43 = vunpack.c.l.b16 %v1686_v41  ;;  %1935 = vmatpush.bf16.msra.mxu1 %v3616_v24 }
 0xb21   : > { %v3767_v29 = vpop.eup %3766  ;;  %v1719_v37 = vpack.c.b16 %v1718_v35, %v1717_v34 }
 0xb22   : > { %v1683_v39 = vmul.f32 %v3767_v29, %v3759_v19  ;;  %v3614_v19 = vld [vmem:[%s4707_s4 + $0x48] sm:$0xff]  ;;  %s4716_s4 = sld [smem:[#allocation3_spill]] }
 0xb23   : > { %3320 = vmatmul.msk.bf16.vlgmr.msrb.gmra.mxu1 %vm979_vm2, %v1719_v37  ;;  %1870 = vmatpush.bf16.msra.mxu3 %v3614_v19 }
 0xb24   : > { %v1687_v40 = vpack.c.bf16 %v1683_v39, %v1683_v39  ;;  %1936 = vmatpush.bf16.msra.mxu1 %v3615_v27  ;;  %v3714_v39 = vld [vmem:[%s4708_s12 + $0x1] ss:$0 sm:$0xff] }
 0xb26   : > { %v1693_v42 = vunpack.c.l.b16 %v1687_v40 }
 0xb27   : > { %1871 = vmatpush.bf16.msra.mxu3 %v3613_v22 }
 0xb28   : > { %v1694_v45 = vpack.c.b16 %v1693_v42, %v1692_v43  ;;  %s879_s1 = scalar_lea.vmem %s4717_s9, %s4716_s4 }
 0xb2a   : > { %v1696_v44 = vpop.permute.xlu1 %1695 }
 0xb2b   : > { %1708 = vmatpush.bf16.msrb.mxu0 %v1696_v44  ;;  %v3715_v44 = vld [vmem:[%s4709_s5 + $0x1] ss:$0 sm:$0xff] }
 0xb2e   : > { %3319 = vmatmul.msk.bf16.vlgmr.msrb.gmra.mxu0 %vm979_vm2, %v1694_v45 }
 0xb2f   : > { %1899 = vmatpush.bf16.msra.mxu0 %v3612_v23 }
 0xb33   : > { %1900 = vmatpush.bf16.msra.mxu0 %v3611_v26 }
 0xba0   : > { %v1735_v49 = vpop.f32.mrf.mxu1 }
 0xba8   : > { %v1737_v50 = vpop.f32.mrf.mxu1 }
 0xba9   : > { %v3699_v53 = vpack.i.bf16 %v1737_v50, %v1735_v49 }
 0xbab   : > { %3700 = vrot.lane.b32.xlu0 %v3699_v53, %s4715_s30  ;;  %v1710_v55 = vpop.f32.mrf.mxu0 }
 0xbb3   : > { %v1712_v59 = vpop.f32.mrf.mxu0 }
 0xc1d   : > { %v3701_v56 = vpop.permute.xlu0 %3700 }
 0xc1e   : > { %v3703_v57 = vunpack.i.h.bf16 %v3701_v56  ;;  %v3702_v58 = vunpack.i.l.bf16 %v3701_v56 }
 0xc20   : > { %v1749_v60 = vsel %vm979_vm2, %v1712_v59, %v3703_v57  ;;  %v1748_v61 = vsel %vm979_vm2, %v1710_v55, %v3702_v58 }
 0xc21   : > { %v1750_v8 = vpack.c.bf16 %v1749_v60, %v1748_v61 }
 0xc23   : > { %3329 = vmatmul.msk.bf16.vlgmr.msrb.gmra.mxu2 %vm942_vm1, %v1750_v8 }
 0xca6   : > { %v1778_v63 = vpop.f32.mrf.mxu2 }
 0xca7   : > { %v1779_v9 = vadd.f32 %v3713_v62, %v1778_v63 }
 0xca9   : > { %v1783_v1 = vadd.f32 %v1779_v9, %v4144_v16 }
 0xcab   : > { %v1785_v2 = vsel %vm942_vm1, %v1783_v1, 0.0 }
 0xcac   : > { %1786 = vadd.xlane.f32.xlu2 %v1785_v2 }
 0xcae   : > { %v1780_v3 = vpop.f32.mrf.mxu2 }
 0xcaf   : > { %v1781_v4 = vadd.f32 %v3713_v62, %v1780_v3 }
 0xcb1   : > { %v1784_v5 = vadd.f32 %v1781_v4, %v4147_v17 }
 0xcb3   : > { %v1788_v6 = vsel %vm942_vm1, %v1784_v5, 0.0 }
 0xcb4   : > { %1789 = vadd.xlane.f32.xlu0 %v1788_v6 }
 0xd1f   : > { %v1787_v7 = vpop.xlane.xlu2 %1786 }
 0xd20   : > { %v1791_v10 = vmul.f32 %v1787_v7, %v4042_v0  ;;  %v3620_v7 = vld [vmem:[%s4710_s6 + $0x38] sm:$0xff] }
 0xd21   : > { %1987 = vmatpush.bf16.msra.mxu2 %v3620_v7 }
 0xd22   : > { %v1793_v36 = vsub.f32 %v1783_v1, %v1791_v10  ;;  %v3619_v10 = vld [vmem:[%s4710_s6 + $0x30] sm:$0xff] }
 0xd24   : > { %v1795_v11 = vmul.f32 %v1793_v36, %v1793_v36 }
 0xd25   : > { %1988 = vmatpush.bf16.msra.mxu2 %v3619_v10 }
 0xd26   : > { %v1797_v12 = vsel %vm942_vm1, %v1795_v11, 0.0  ;;  %v3617_v11 = vld [vmem:[%s4710_s6 + $0x20] sm:$0xff] }
 0xd27   : > { %v1790_v13 = vpop.xlane.xlu0 %1789  ;;  %1798 = vadd.xlane.f32.xlu1 %v1797_v12 }
 0xd28   : > { %v1792_v16 = vmul.f32 %v1790_v13, %v4042_v0 }
 0xd2a   : > { %v1794_v14 = vsub.f32 %v1784_v5, %v1792_v16 }
 0xd2c   : > { %v1796_v15 = vmul.f32 %v1794_v14, %v1794_v14 }
 0xd2e   : > { %v1800_v18 = vsel %vm942_vm1, %v1796_v15, 0.0 }
 0xd2f   : > { %1801 = vadd.xlane.f32.xlu2 %v1800_v18  ;;  %v3716_v18 = vld [vmem:[%s4711_s28 + $0x1] ss:$0 sm:$0xff] }
 0xd9a   : > { %v1799_v17 = vpop.xlane.xlu1 %1798 }
 0xd9b   : > { %v1803_v20 = vmul.f32 %v1799_v17, %v4042_v0 }
 0xd9d   : > { %v1805_v21 = vadd.f32 1e-05, %v1803_v20 }
 0xd9f   : > { %3768 = vrsqrt.f32 %v1805_v21  ;;  %vm1813_vm9 = vweird.f32 %v1805_v21 }
 0xda2   : > { %v1802_v25 = vpop.xlane.xlu2 %1801 }
 0xda3   : > { %v1804_v28 = vmul.f32 %v1802_v25, %v4042_v0 }
 0xda5   : > { %v3769_v30 = vpop.eup %3768  ;;  %v1806_v31 = vadd.f32 1e-05, %v1804_v28  ;;  %v3717_v28 = vld [vmem:[%s4639_s13 + $0x1] ss:$0 sm:$0xff] }
 0xda6   : > { %v1808_v32 = vmul.f32 %v3769_v30, %v1805_v21  ;;  %vm1814_vm3 = vweird.f32 %v3769_v30 }
 0xda7   : > { %3770 = vrsqrt.f32 %v1806_v31  ;;  %vm1815_vm10 = vmor %vm1813_vm9, %vm1814_vm3  ;;  %vm1823_vm4 = vweird.f32 %v1806_v31 }
 0xda8   : > { %v1809_v33 = vmul.f32 %v3769_v30, %v1808_v32 }
 0xdaa   : > { %v1810_v34 = vmul.f32 0.5, %v1809_v33 }
 0xdac   : > { %v1811_v35 = vsub.f32 1.5, %v1810_v34 }
 0xdad   : > { %v3771_v29 = vpop.eup %3770 }
 0xdae   : > { %v1812_v37 = vmul.f32 %v3769_v30, %v1811_v35  ;;  %v1818_v38 = vmul.f32 %v3771_v29, %v1806_v31  ;;  %vm1824_vm0 = vweird.f32 %v3771_v29 }
 0xdaf   : > { %vm1825_vm5 = vmor %vm1823_vm4, %vm1824_vm0  ;;  %vm2109_vm0 = vcmp.ge.s32.totalorder %v4074_v46, 2  ;;  %vm2231_vm4 = vcmp.lt.s32.totalorder %v4074_v46, 6 }
 0xdb0   : > { %v1816_v40 = vsel %vm1815_vm10, %v3769_v30, %v1812_v37  ;;  %v1819_v41 = vmul.f32 %v3771_v29, %v1818_v38  ;;  %vm2106_vm10 = vcmp.lt.s32.totalorder %v4074_v46, 2  ;;  %v3725_v46 = vld [vmem:[%s4653_s27] ss:$0 sm:$0xff] }
 0xdb1   : > { %v1827_v42 = vmul.f32 %v1816_v40, %v1793_v36  ;;  %v3618_v36 = vld [vmem:[%s4710_s6 + $0x28] sm:$0xff] }
 0xdb2   : > { %v1820_v43 = vmul.f32 0.5, %v1819_v41  ;;  %1989 = vmatpush.bf16.msra.mxu2 %v3618_v36  ;;  %v3719_v36 = vld [vmem:[%s4641_s15 + $0x1] ss:$0 sm:$0xff] }
 0xdb3   : > { %v1832_v45 = vmul.f32 %v3714_v39, %v1827_v42 }
 0xdb4   : > { %v1821_v47 = vsub.f32 1.5, %v1820_v43 }
 0xdb5   : > { %v1837_v50 = vadd.f32 %v3715_v44, %v1832_v45 }
 0xdb6   : > { %v1822_v49 = vmul.f32 %v3771_v29, %v1821_v47  ;;  %1990 = vmatpush.bf16.msra.mxu2 %v3617_v11 }
 0xdb7   : > { %v1839_v56 = vmul.f32 %v1837_v50, %v4076_v48 }
 0xdb8   : > { %v1826_v53 = vsel %vm1825_vm5, %v3771_v29, %v1822_v49  ;;  %vm2235_vm5 = vcmp.lt.s32.totalorder %v4082_v52, 14 }
 0xdb9   : > { %v1828_v54 = vmul.f32 %v1826_v53, %v1794_v14  ;;  %v1841_v59 = vrot.slane %v1839_v56, 7  ;;  %v1907_v8 = vrot.slane %v1839_v56, 1  ;;  %v3622_v53 = vld [vmem:[%s4642_s16 + $0x8] sm:$0xff] }
 0xdba   : > { %2085 = vmatpush.bf16.msrb.mxu3 %v3622_v53 }
 0xdbb   : > { %v1833_v55 = vmul.f32 %v3714_v39, %v1828_v54 }
 0xdbd   : > { %v1838_v57 = vadd.f32 %v3715_v44, %v1833_v55 }
 0xdbf   : > { %v1840_v58 = vmul.f32 %v1838_v57, %v4079_v51 }
 0xdc1   : > { %v1848_v60 = vpack.c.bf16 %v1840_v58, %v1839_v56  ;;  %v1842_v61 = vrot.slane %v1840_v58, 7  ;;  %v1908_v62 = vrot.slane %v1840_v58, 1 }
 0xdc3   : > { %3338 = vmatmul.msk.bf16.vlgmr.msra.gmra.mxu3 %vm942_vm1, %v1848_v60  ;;  %v1843_v63 = vsel %vm1260_vm11, %v1841_v59, %v1842_v61  ;;  %v1844_v9 = vsel %vm1260_vm11, %v1842_v61, %v1841_v59  ;;  %v1909_v1 = vsel %vm1333_vm13, %v1907_v8, %v1908_v62  ;;  %v1910_v2 = vsel %vm1333_vm13, %v1908_v62, %v1907_v8 }
 0xdc4   : > { %v1845_v3 = vsel %vm1263_vm12, %v1844_v9, 0.0  ;;  %v1912_v4 = vsel %vm1337_vm14, %v1910_v2, 0.0 }
 0xdc5   : > { %v1847_v5 = vpack.c.bf16 %v1843_v63, %v1845_v3  ;;  %v1913_v6 = vpack.c.bf16 %v1912_v4, %v1909_v1 }
 0xdc7   : > { %3347 = vmatmul.msk.bf16.vlgmr.msra.gmra.mxu0 %vm942_vm1, %v1847_v5  ;;  %3356 = vmatmul.msk.bf16.vlgmr.msra.gmra.mxu1 %vm942_vm1, %v1913_v6 }
 0xe44   : > { %v1902_v12 = vpop.f32.mrf.mxu0  ;;  %v1938_v13 = vpop.f32.mrf.mxu1 }
 0xe46   : > { %v1873_v16 = vpop.f32.mrf.mxu3 }
 0xe47   : > { %v1903_v14 = vadd.f32 %v1902_v12, %v1873_v16 }
 0xe49   : > { %v1943_v15 = vadd.f32 %v1938_v13, %v1903_v14 }
 0xe4b   : > { %v1948_v22 = vadd.f32 %v3716_v18, %v1943_v15 }
 0xe4c   : > { %v1904_v17 = vpop.f32.mrf.mxu0  ;;  %v1940_v21 = vpop.f32.mrf.mxu1 }
 0xe4d   : > { %v1950_v25 = vmax.f32 %v1948_v22, 0.0  ;;  %v3623_v22 = vld [vmem:[%s4644_s18] sm:$0xff] }
 0xe4e   : > { %v1875_v19 = vpop.f32.mrf.mxu3  ;;  %2164 = vmatpush.bf16.msrb.mxu1 %v3623_v22 }
 0xe4f   : > { %v1905_v20 = vadd.f32 %v1904_v17, %v1875_v19 }
 0xe51   : > { %v1944_v23 = vadd.f32 %v1940_v21, %v1905_v20  ;;  %v3625_v20 = vld [vmem:[%s4644_s18 + $0x10] sm:$0xff]  ;;  %v3624_v21 = vld [vmem:[%s4644_s18 + $0x8] sm:$0xff] }
 0xe52   : > { %2188 = vmatpush.bf16.msrb.mxu2 %v3625_v20  ;;  %2141 = vmatpush.bf16.msrb.mxu0 %v3624_v21 }
 0xe53   : > { %v1949_v24 = vadd.f32 %v3716_v18, %v1944_v23 }
 0xe55   : > { %v1951_v26 = vmax.f32 %v1949_v24, 0.0  ;;  %v3720_v24 = vld [vmem:[%s4643_s17] ss:$0 sm:$0xff] }
 0xe57   : > { %v1952_v27 = vpack.c.bf16 %v1951_v26, %v1950_v25 }
 0xe59   : > { %3373 = vmatmul.msk.bf16.vlgmr.msra.gmra.mxu2 %vm1411_vm15, %v1952_v27 }
 0xedc   : > { %v1992_v30 = vpop.f32.mrf.mxu2 }
 0xedd   : > { %v1993_v31 = vadd.f32 %v3717_v28, %v1992_v30 }
 0xedf   : > { %v1997_v32 = vadd.f32 %v1993_v31, %v1839_v56  ;;  %v3621_v56 = vld [vmem:[%s4642_s16] sm:$0xff] }
 0xee0   : > { %2086 = vmatpush.bf16.msrb.mxu3 %v3621_v56 }
 0xee1   : > { %v1999_v33 = vsel %vm942_vm1, %v1997_v32, 0.0 }
 0xee2   : > { %2000 = vadd.xlane.f32.xlu2 %v1999_v33 }
 0xee4   : > { %v1994_v34 = vpop.f32.mrf.mxu2 }
 0xee5   : > { %v1995_v35 = vadd.f32 %v3717_v28, %v1994_v34 }
 0xee7   : > { %v1998_v29 = vadd.f32 %v1995_v35, %v1840_v58 }
 0xee9   : > { %v2002_v37 = vsel %vm942_vm1, %v1998_v29, 0.0 }
 0xeea   : > { %2003 = vadd.xlane.f32.xlu0 %v2002_v37 }
 0xf55   : > { %v2001_v38 = vpop.xlane.xlu2 %2000 }
 0xf56   : > { %v2005_v39 = vmul.f32 %v2001_v38, %v4042_v0 }
 0xf58   : > { %v2007_v40 = vsub.f32 %v1997_v32, %v2005_v39 }
 0xf5a   : > { %v2009_v41 = vmul.f32 %v2007_v40, %v2007_v40 }
 0xf5c   : > { %v2011_v42 = vsel %vm942_vm1, %v2009_v41, 0.0 }
 0xf5d   : > { %v2004_v43 = vpop.xlane.xlu0 %2003  ;;  %2012 = vadd.xlane.f32.xlu1 %v2011_v42 }
 0xf5e   : > { %v2006_v44 = vmul.f32 %v2004_v43, %v4042_v0 }
 0xf60   : > { %v2008_v45 = vsub.f32 %v1998_v29, %v2006_v44 }
 0xf62   : > { %v2010_v47 = vmul.f32 %v2008_v45, %v2008_v45 }
 0xf64   : > { %v2014_v49 = vsel %vm942_vm1, %v2010_v47, 0.0 }
 0xf65   : > { %2015 = vadd.xlane.f32.xlu2 %v2014_v49 }
 0xfd0   : > { %v2013_v50 = vpop.xlane.xlu1 %2012 }
 0xfd1   : > { %v2017_v54 = vmul.f32 %v2013_v50, %v4042_v0 }
 0xfd3   : > { %v2019_v55 = vadd.f32 1e-05, %v2017_v54 }
 0xfd5   : > { %3772 = vrsqrt.f32 %v2019_v55  ;;  %vm2027_vm6 = vweird.f32 %v2019_v55 }
 0xfd8   : > { %v2016_v57 = vpop.xlane.xlu2 %2015 }
 0xfd9   : > { %v2018_v58 = vmul.f32 %v2016_v57, %v4042_v0  ;;  %v3718_v0 = vld [vmem:[%s4640_s14 + $0x1] ss:$0 sm:$0xff] }
 0xfdb   : > { %v3773_v59 = vpop.eup %3772  ;;  %v2020_v60 = vadd.f32 1e-05, %v2018_v58  ;;  %v3633_v58 = vld [vmem:[%s4646_s20 + $0x28] sm:$0xff] }
 0xfdc   : > { %v2022_v61 = vmul.f32 %v3773_v59, %v2019_v55  ;;  %vm2028_vm15 = vweird.f32 %v3773_v59 }
 0xfdd   : > { %3774 = vrsqrt.f32 %v2020_v60  ;;  %vm2029_vm7 = vmor %vm2027_vm6, %vm2028_vm15  ;;  %vm2037_vm3 = vweird.f32 %v2020_v60 }
 0xfde   : > { %v2023_v8 = vmul.f32 %v3773_v59, %v2022_v61  ;;  %v3635_v61 = vld [vmem:[%s4646_s20 + $0x38] sm:$0xff] }
 0xfe0   : > { %v2024_v62 = vmul.f32 0.5, %v2023_v8  ;;  %v3632_v8 = vld [vmem:[%s4646_s20 + $0x20] sm:$0xff] }
 0xfe2   : > { %v2025_v63 = vsub.f32 1.5, %v2024_v62 }
 0xfe3   : > { %v3775_v9 = vpop.eup %3774 }
 0xfe4   : > { %v2026_v1 = vmul.f32 %v3773_v59, %v2025_v63  ;;  %v2032_v2 = vmul.f32 %v3775_v9, %v2020_v60  ;;  %vm2038_vm8 = vweird.f32 %v3775_v9  ;;  %v3629_v60 = vld [vmem:[%s4646_s20 + $0x8] sm:$0xff] }
 0xfe5   : > { %vm2039_vm9 = vmor %vm2037_vm3, %vm2038_vm8  ;;  %2360 = vmatpush.bf16.msra.mxu2 %v3629_v60  ;;  %v3642_v60 = vld [vmem:[%s4648_s22 + $0x20] sm:$0xff] }
 0xfe6   : > { %v2030_v3 = vsel %vm2029_vm7, %v3773_v59, %v2026_v1  ;;  %v2033_v4 = vmul.f32 %v3775_v9, %v2032_v2  ;;  %v3631_v59 = vld [vmem:[%s4646_s20 + $0x18] sm:$0xff]  ;;  %v3628_v1 = vld [vmem:[%s4646_s20] sm:$0xff]  ;;  %v3634_v2 = vld [vmem:[%s4646_s20 + $0x30] sm:$0xff] }
 0xfe7   : > { %v2041_v6 = vmul.f32 %v2030_v3, %v2007_v40  ;;  %2331 = vmatpush.bf16.msra.mxu1 %v3631_v59  ;;  %v3645_v59 = vld [vmem:[%s4648_s22 + $0x38] sm:$0xff] }
 0xfe8   : > { %v2034_v5 = vmul.f32 0.5, %v2033_v4 }
 0xfe9   : > { %v2046_v11 = vmul.f32 %v3718_v0, %v2041_v6  ;;  %2361 = vmatpush.bf16.msra.mxu2 %v3628_v1  ;;  %v3637_v6 = vld [vmem:[%s4646_s20 + $0x48] sm:$0xff] }
 0xfea   : > { %v2035_v7 = vsub.f32 1.5, %v2034_v5 }
 0xfeb   : > { %v2051_v16 = vadd.f32 %v3719_v36, %v2046_v11 }
 0xfec   : > { %v2036_v10 = vmul.f32 %v3775_v9, %v2035_v7  ;;  %v3636_v7 = vld [vmem:[%s4646_s20 + $0x40] sm:$0xff] }
 0xfed   : > { %v2053_v18 = vmul.f32 %v2051_v16, %v4076_v48  ;;  %v3626_v48 = vld [vmem:[%s4644_s18 + $0x18] sm:$0xff] }
 0xfee   : > { %v2040_v12 = vsel %vm2039_vm9, %v3775_v9, %v2036_v10  ;;  %2220 = vmatpush.bf16.msra.mxu3 %v3626_v48  ;;  %v3630_v9 = vld [vmem:[%s4646_s20 + $0x10] sm:$0xff] }
 0xfef   : > { %v2042_v13 = vmul.f32 %v2040_v12, %v2008_v45  ;;  %2332 = vmatpush.bf16.msra.mxu1 %v3630_v9  ;;  %v3644_v9 = vld [vmem:[%s4648_s22 + $0x30] sm:$0xff] }
 0xff1   : > { %v2047_v14 = vmul.f32 %v3718_v0, %v2042_v13 }
 0xff3   : > { %v2052_v15 = vadd.f32 %v3719_v36, %v2047_v14 }
 0xff5   : > { %v2054_v17 = vmul.f32 %v2052_v15, %v4079_v51  ;;  %v3627_v51 = vld [vmem:[%s4644_s18 + $0x20] sm:$0xff] }
 0xff6   : > { %2259 = vmatpush.bf16.msra.mxu0 %v3627_v51  ;;  %v3721_v15 = vld [vmem:[%s4645_s19] ss:$0 sm:$0xff] }
 0xff7   : > { %v2059_v19 = vpack.c.bf16 %v2054_v17, %v2053_v18 }
 0xff9   : > { %3382 = vmatmul.msk.bf16.vlgmr.msrb.gmra.mxu3 %vm942_vm1, %v2059_v19 }
 0xffa   : > { %2390 = vmatpush.bf16.msrb.mxu3 %v3633_v58  ;;  %v3639_v58 = vld [vmem:[%s4648_s22 + $0x8] sm:$0xff] }
 0xffe   : > { %2391 = vmatpush.bf16.msrb.mxu3 %v3632_v8 }
0x107c   : > { %v2088_v23 = vpop.f32.mrf.mxu3 }
0x107d   : > { %v4311_v25 = vadd.f32 %v3720_v24, %v2088_v23 }
0x107f   : > { %v2118_v28 = vrot.slane %v4311_v25, 7  ;;  %v2104_v30 = vrot.slane %v4311_v25, 6  ;;  %v2197_v35 = vrot.slane %v4311_v25, 1  ;;  %v2229_v53 = vrot.slane %v4311_v25, 2 }
0x1084   : > { %v2090_v26 = vpop.f32.mrf.mxu3 }
0x1085   : > { %v4313_v27 = vadd.f32 %v3720_v24, %v2090_v26 }
0x1087   : > { %v2171_v31 = vpack.c.bf16 %v4313_v27, %v4311_v25  ;;  %v2119_v32 = vrot.slane %v4313_v27, 7  ;;  %v2105_v33 = vrot.slane %v4313_v27, 6  ;;  %v2198_v34 = vrot.slane %v4313_v27, 1 }
0x1088   : > { %v2230_v50 = vrot.slane %v4313_v27, 2 }
0x1089   : > { %3397 = vmatmul.msk.bf16.vlgmr.msrb.gmra.mxu2 %vm979_vm2, %v2171_v31  ;;  %v2120_v29 = vsel %vm1260_vm11, %v2118_v28, %v2119_v32  ;;  %v2121_v37 = vsel %vm1260_vm11, %v2119_v32, %v2118_v28  ;;  %v2107_v38 = vsel %vm2106_vm10, %v2104_v30, %v2105_v33  ;;  %v2108_v39 = vsel %vm2106_vm10, %v2105_v33, %v2104_v30 }
0x108a   : > { %v2122_v40 = vsel %vm1263_vm12, %v2121_v37, 0.0  ;;  %v2115_v41 = vsel %vm2109_vm0, %v2108_v39, 0.0  ;;  %v2199_v42 = vsel %vm1333_vm13, %v2197_v35, %v2198_v34  ;;  %v2200_v43 = vsel %vm1333_vm13, %v2198_v34, %v2197_v35 }
0x108b   : > { %v2124_v44 = vpack.c.bf16 %v2120_v29, %v2122_v40  ;;  %v2117_v45 = vpack.c.bf16 %v2107_v38, %v2115_v41  ;;  %v2202_v47 = vsel %vm1337_vm14, %v2200_v43, 0.0  ;;  %v2233_v54 = vsel %vm2231_vm4, %v2230_v50, %v2229_v53 }
0x108c   : > { %v2203_v49 = vpack.c.bf16 %v2202_v47, %v2199_v42  ;;  %v2232_v55 = vsel %vm2231_vm4, %v2229_v53, %v2230_v50  ;;  %v2241_v56 = vsel %vm2235_vm5, %v2233_v54, 0.0 }
0x108d   : > { %3387 = vmatmul.msk.bf16.vlgmr.msrb.gmra.mxu0 %vm979_vm2, %v2124_v44  ;;  %3392 = vmatmul.msk.bf16.vlgmr.msrb.gmra.mxu1 %vm979_vm2, %v2117_v45  ;;  %v2242_v57 = vpack.c.bf16 %v2241_v56, %v2232_v55  ;;  %v3643_v56 = vld [vmem:[%s4648_s22 + $0x28] sm:$0xff] }
0x108e   : > { %3402 = vmatmul.msk.bf16.vlgmr.msra.gmra.mxu3 %vm979_vm2, %v2203_v49  ;;  %2428 = vmatpush.bf16.msrb.mxu0 %v3635_v61 }
0x108f   : > { %2466 = vmatpush.bf16.msrb.mxu1 %v3637_v6  ;;  %2568 = vmatpush.bf16.msra.mxu3 %v3639_v58  ;;  %v3646_v6 = vld [vmem:[%s4648_s22 + $0x40] sm:$0xff] }
0x1090   : > { %v3652_v58 = vld [vmem:[%s4650_s24 + $0x20] sm:$0xff] }
0x1092   : > { %2429 = vmatpush.bf16.msrb.mxu0 %v3634_v2 }
0x1093   : > { %2467 = vmatpush.bf16.msrb.mxu1 %v3636_v7 }
0x109d   : > { %3407 = vmatmul.msk.bf16.vlgmr.msra.gmra.mxu0 %vm979_vm2, %v2242_v57  ;;  %v3641_v57 = vld [vmem:[%s4648_s22 + $0x18] sm:$0xff] }
0x109e   : > { %2598 = vmatpush.bf16.msra.mxu0 %v3643_v56  ;;  %2539 = vmatpush.bf16.msrb.mxu2 %v3641_v57  ;;  %v3649_v56 = vld [vmem:[%s4650_s24 + $0x8] sm:$0xff]  ;;  %v3655_v57 = vld [vmem:[%s4650_s24 + $0x38] sm:$0xff] }
0x10a2   : > { %2599 = vmatpush.bf16.msra.mxu0 %v3642_v60 }
0x110a   : > { %v2143_v62 = vpop.f32.mrf.mxu0  ;;  %v2166_v63 = vpop.f32.mrf.mxu1 }
0x110b   : > { %v2167_v5 = vadd.f32 %v2166_v63, %v2143_v62  ;;  %v3640_v62 = vld [vmem:[%s4648_s22 + $0x10] sm:$0xff]  ;;  %v3638_v63 = vld [vmem:[%s4648_s22] sm:$0xff] }
0x110c   : > { %v2190_v3 = vpop.f32.mrf.mxu2  ;;  %2540 = vmatpush.bf16.msrb.mxu2 %v3640_v62  ;;  %2569 = vmatpush.bf16.msra.mxu3 %v3638_v63  ;;  %v3654_v62 = vld [vmem:[%s4650_s24 + $0x30] sm:$0xff] }
0x110d   : > { %v2195_v10 = vadd.f32 %v2190_v3, %v2167_v5 }
0x1111   : > { %v2222_v0 = vpop.f32.mrf.mxu3 }
0x1112   : > { %v2145_v4 = vpop.f32.mrf.mxu0  ;;  %v2168_v36 = vpop.f32.mrf.mxu1  ;;  %v2227_v11 = vadd.f32 %v2222_v0, %v2195_v10 }
0x1113   : > { %v2169_v13 = vadd.f32 %v2168_v36, %v2145_v4  ;;  %v3647_v4 = vld [vmem:[%s4648_s22 + $0x48] sm:$0xff] }
0x1114   : > { %v2192_v16 = vpop.f32.mrf.mxu2 }
0x1115   : > { %v2196_v17 = vadd.f32 %v2192_v16, %v2169_v13  ;;  %v3722_v16 = vld [vmem:[%s4647_s21] ss:$0 sm:$0xff] }
0x1119   : > { %v2224_v18 = vpop.f32.mrf.mxu3 }
0x111a   : > { %v2261_v12 = vpop.f32.mrf.mxu0  ;;  %v2228_v20 = vadd.f32 %v2224_v18, %v2196_v17 }
0x111b   : > { %v2266_v14 = vadd.f32 %v2261_v12, %v2227_v11 }
0x111d   : > { %v2271_v19 = vadd.f32 %v3721_v15, %v2266_v14 }
0x111f   : > { %3776 = vtanh.f32 %v2271_v19 }
0x1122   : > { %v2263_v21 = vpop.f32.mrf.mxu0 }
0x1123   : > { %v2267_v22 = vadd.f32 %v2263_v21, %v2228_v20 }
0x1125   : > { %v2272_v48 = vadd.f32 %v3721_v15, %v2267_v22  ;;  %v3777_v51 = vpop.eup %3776 }
0x1126   : > { %v2303_v24 = vrot.slane %v3777_v51, 7  ;;  %v2296_v26 = vrot.slane %v3777_v51, 6  ;;  %v2400_v33 = vrot.slane %v3777_v51, 1  ;;  %v2438_v49 = vrot.slane %v3777_v51, 2 }
0x1127   : > { %3778 = vtanh.f32 %v2272_v48 }
0x112d   : > { %v3779_v23 = vpop.eup %3778 }
0x112e   : > { %v2368_v28 = vpack.c.bf16 %v3779_v23, %v3777_v51  ;;  %v2304_v30 = vrot.slane %v3779_v23, 7  ;;  %v2297_v31 = vrot.slane %v3779_v23, 6  ;;  %v2401_v32 = vrot.slane %v3779_v23, 1 }
0x112f   : > { %v2439_v47 = vrot.slane %v3779_v23, 2 }
0x1130   : > { %3434 = vmatmul.msk.bf16.vlgmr.msrb.gmra.mxu3 %vm942_vm1, %v2368_v28  ;;  %v2305_v34 = vsel %vm1260_vm11, %v2303_v24, %v2304_v30  ;;  %v2306_v35 = vsel %vm1260_vm11, %v2304_v30, %v2303_v24  ;;  %v2298_v29 = vsel %vm2106_vm10, %v2296_v26, %v2297_v31  ;;  %v2299_v37 = vsel %vm2106_vm10, %v2297_v31, %v2296_v26 }
0x1131   : > { %v2307_v38 = vsel %vm1263_vm12, %v2306_v35, 0.0  ;;  %v2300_v39 = vsel %vm2109_vm0, %v2299_v37, 0.0  ;;  %v2402_v40 = vsel %vm1333_vm13, %v2400_v33, %v2401_v32  ;;  %v2403_v41 = vsel %vm1333_vm13, %v2401_v32, %v2400_v33 }
0x1132   : > { %v2309_v42 = vpack.c.bf16 %v2305_v34, %v2307_v38  ;;  %v2302_v43 = vpack.c.bf16 %v2298_v29, %v2300_v39  ;;  %v2405_v44 = vsel %vm1337_vm14, %v2403_v41, 0.0  ;;  %v2441_v50 = vsel %vm2231_vm4, %v2439_v47, %v2438_v49 }
0x1133   : > { %v2406_v45 = vpack.c.bf16 %v2405_v44, %v2402_v40  ;;  %v2440_v53 = vsel %vm2231_vm4, %v2438_v49, %v2439_v47  ;;  %v2443_v54 = vsel %vm2235_vm5, %v2441_v50, 0.0 }
0x1134   : > { %3416 = vmatmul.msk.bf16.vlgmr.msra.gmra.mxu1 %vm942_vm1, %v2309_v42  ;;  %3425 = vmatmul.msk.bf16.vlgmr.msra.gmra.mxu2 %vm942_vm1, %v2302_v43  ;;  %v2444_v55 = vpack.c.bf16 %v2443_v54, %v2440_v53  ;;  %v3653_v54 = vld [vmem:[%s4650_s24 + $0x28] sm:$0xff] }
0x1135   : > { %3443 = vmatmul.msk.bf16.vlgmr.msrb.gmra.mxu0 %vm942_vm1, %v2406_v45  ;;  %2636 = vmatpush.bf16.msra.mxu1 %v3645_v59 }
0x1136   : > { %2674 = vmatpush.bf16.msra.mxu2 %v3647_v4  ;;  %2776 = vmatpush.bf16.msrb.mxu0 %v3649_v56  ;;  %v3662_v56 = vld [vmem:[%s4652_s26 + $0x20] sm:$0xff] }
0x1139   : > { %2637 = vmatpush.bf16.msra.mxu1 %v3644_v9 }
0x113a   : > { %2675 = vmatpush.bf16.msra.mxu2 %v3646_v6 }
0x1144   : > { %3452 = vmatmul.msk.bf16.vlgmr.msrb.gmra.mxu1 %vm942_vm1, %v2444_v55  ;;  %v3651_v55 = vld [vmem:[%s4650_s24 + $0x18] sm:$0xff] }
0x1145   : > { %2806 = vmatpush.bf16.msrb.mxu1 %v3653_v54  ;;  %2747 = vmatpush.bf16.msrb.mxu3 %v3651_v55  ;;  %v3659_v54 = vld [vmem:[%s4652_s26 + $0x8] sm:$0xff]  ;;  %v3665_v55 = vld [vmem:[%s4652_s26 + $0x38] sm:$0xff] }
0x1149   : > { %2807 = vmatpush.bf16.msrb.mxu1 %v3652_v58 }
0x11b1   : > { %v2334_v61 = vpop.f32.mrf.mxu1 }
0x11b2   : > { %v2431_v5 = vpop.f32.mrf.mxu0 }
0x11b3   : > { %v2393_v1 = vpop.f32.mrf.mxu3 }
0x11b7   : > { %v2363_v8 = vpop.f32.mrf.mxu2 }
0x11b8   : > { %v2364_v2 = vadd.f32 %v2363_v8, %v2334_v61  ;;  %v3650_v61 = vld [vmem:[%s4650_s24 + $0x10] sm:$0xff]  ;;  %v3648_v8 = vld [vmem:[%s4650_s24] sm:$0xff] }
0x11b9   : > { %v2336_v3 = vpop.f32.mrf.mxu1  ;;  %2748 = vmatpush.bf16.msrb.mxu3 %v3650_v61  ;;  %2777 = vmatpush.bf16.msrb.mxu0 %v3648_v8  ;;  %v3664_v61 = vld [vmem:[%s4652_s26 + $0x30] sm:$0xff] }
0x11ba   : > { %v2398_v0 = vadd.f32 %v2393_v1, %v2364_v2  ;;  %v2433_v15 = vpop.f32.mrf.mxu0  ;;  %v3657_v2 = vld [vmem:[%s4650_s24 + $0x48] sm:$0xff] }
0x11bb   : > { %v2395_v12 = vpop.f32.mrf.mxu3 }
0x11bc   : > { %v2436_v36 = vadd.f32 %v2431_v5, %v2398_v0  ;;  %v3656_v0 = vld [vmem:[%s4650_s24 + $0x40] sm:$0xff] }
0x11bf   : > { %v2365_v7 = vpop.f32.mrf.mxu2 }
0x11c0   : > { %v2366_v10 = vadd.f32 %v2365_v7, %v2336_v3 }
0x11c1   : > { %v2469_v11 = vpop.f32.mrf.mxu1 }
0x11c2   : > { %v2474_v13 = vadd.f32 %v2469_v11, %v2436_v36  ;;  %v2399_v14 = vadd.f32 %v2395_v12, %v2366_v10  ;;  %v3723_v12 = vld [vmem:[%s4649_s23] ss:$0 sm:$0xff] }
0x11c4   : > { %v2479_v18 = vadd.f32 %v3722_v16, %v2474_v13  ;;  %v2437_v17 = vadd.f32 %v2433_v15, %v2399_v14 }
0x11c6   : > { %3780 = vtanh.f32 %v2479_v18 }
0x11c9   : > { %v2471_v19 = vpop.f32.mrf.mxu1 }
0x11ca   : > { %v2475_v20 = vadd.f32 %v2471_v19, %v2437_v17 }
0x11cc   : > { %v2480_v21 = vadd.f32 %v3722_v16, %v2475_v20  ;;  %v3781_v22 = vpop.eup %3780 }
0x11cd   : > { %v2511_v51 = vrot.slane %v3781_v22, 7  ;;  %v2504_v23 = vrot.slane %v3781_v22, 6  ;;  %v2608_v31 = vrot.slane %v3781_v22, 1  ;;  %v2646_v45 = vrot.slane %v3781_v22, 2 }
0x11ce   : > { %3782 = vtanh.f32 %v2480_v21 }
0x11d4   : > { %v3783_v48 = vpop.eup %3782 }
0x11d5   : > { %v2576_v24 = vpack.c.bf16 %v3783_v48, %v3781_v22  ;;  %v2512_v26 = vrot.slane %v3783_v48, 7  ;;  %v2505_v28 = vrot.slane %v3783_v48, 6  ;;  %v2609_v30 = vrot.slane %v3783_v48, 1 }
0x11d6   : > { %v2647_v44 = vrot.slane %v3783_v48, 2 }
0x11d7   : > { %3479 = vmatmul.msk.bf16.vlgmr.msra.gmra.mxu0 %vm942_vm1, %v2576_v24  ;;  %v2513_v32 = vsel %vm1260_vm11, %v2511_v51, %v2512_v26  ;;  %v2514_v33 = vsel %vm1260_vm11, %v2512_v26, %v2511_v51  ;;  %v2506_v34 = vsel %vm2106_vm10, %v2504_v23, %v2505_v28  ;;  %v2507_v35 = vsel %vm2106_vm10, %v2505_v28, %v2504_v23 }
0x11d8   : > { %v2515_v29 = vsel %vm1263_vm12, %v2514_v33, 0.0  ;;  %v2508_v37 = vsel %vm2109_vm0, %v2507_v35, 0.0  ;;  %v2610_v38 = vsel %vm1333_vm13, %v2608_v31, %v2609_v30  ;;  %v2611_v39 = vsel %vm1333_vm13, %v2609_v30, %v2608_v31 }
0x11d9   : > { %v2517_v40 = vpack.c.bf16 %v2513_v32, %v2515_v29  ;;  %v2510_v41 = vpack.c.bf16 %v2506_v34, %v2508_v37  ;;  %v2613_v42 = vsel %vm1337_vm14, %v2611_v39, 0.0  ;;  %v2649_v47 = vsel %vm2231_vm4, %v2647_v44, %v2646_v45 }
0x11da   : > { %v2614_v43 = vpack.c.bf16 %v2613_v42, %v2610_v38  ;;  %v2648_v49 = vsel %vm2231_vm4, %v2646_v45, %v2647_v44  ;;  %v2651_v50 = vsel %vm2235_vm5, %v2649_v47, 0.0 }
0x11db   : > { %3461 = vmatmul.msk.bf16.vlgmr.msrb.gmra.mxu2 %vm942_vm1, %v2517_v40  ;;  %3470 = vmatmul.msk.bf16.vlgmr.msra.gmra.mxu3 %vm942_vm1, %v2510_v41  ;;  %v2652_v53 = vpack.c.bf16 %v2651_v50, %v2648_v49  ;;  %v3663_v50 = vld [vmem:[%s4652_s26 + $0x28] sm:$0xff] }
0x11dc   : > { %3488 = vmatmul.msk.bf16.vlgmr.msra.gmra.mxu1 %vm942_vm1, %v2614_v43  ;;  %2844 = vmatpush.bf16.msrb.mxu2 %v3655_v57 }
0x11dd   : > { %2882 = vmatpush.bf16.msra.mxu3 %v3657_v2  ;;  %2984 = vmatpush.bf16.msra.mxu1 %v3659_v54 }
0x11e0   : > { %2845 = vmatpush.bf16.msrb.mxu2 %v3654_v62 }
0x11e1   : > { %2883 = vmatpush.bf16.msra.mxu3 %v3656_v0 }
0x11eb   : > { %3497 = vmatmul.msk.bf16.vlgmr.msra.gmra.mxu2 %vm942_vm1, %v2652_v53  ;;  %v3661_v53 = vld [vmem:[%s4652_s26 + $0x18] sm:$0xff] }
0x11ec   : > { %3014 = vmatpush.bf16.msra.mxu2 %v3663_v50  ;;  %2955 = vmatpush.bf16.msra.mxu0 %v3661_v53 }
0x11f0   : > { %3015 = vmatpush.bf16.msra.mxu2 %v3662_v56 }
0x1254   : > { %v2601_v63 = vpop.f32.mrf.mxu0 }
0x1259   : > { %v2639_v3 = vpop.f32.mrf.mxu1 }
0x125c   : > { %v2603_v36 = vpop.f32.mrf.mxu0 }
0x125e   : > { %v2542_v59 = vpop.f32.mrf.mxu2  ;;  %v2571_v60 = vpop.f32.mrf.mxu3 }
0x125f   : > { %v2572_v9 = vadd.f32 %v2571_v60, %v2542_v59  ;;  %v3660_v59 = vld [vmem:[%s4652_s26 + $0x10] sm:$0xff]  ;;  %v3658_v60 = vld [vmem:[%s4652_s26] sm:$0xff] }
0x1260   : > { %2956 = vmatpush.bf16.msra.mxu0 %v3660_v59  ;;  %2985 = vmatpush.bf16.msra.mxu1 %v3658_v60 }
0x1261   : > { %v2606_v4 = vadd.f32 %v2601_v63, %v2572_v9  ;;  %v2641_v16 = vpop.f32.mrf.mxu1  ;;  %v3667_v9 = vld [vmem:[%s4652_s26 + $0x48] sm:$0xff] }
0x1263   : > { %v2644_v7 = vadd.f32 %v2639_v3, %v2606_v4  ;;  %v3666_v3 = vld [vmem:[%s4652_s26 + $0x40] sm:$0xff] }
0x1266   : > { %v2544_v1 = vpop.f32.mrf.mxu2  ;;  %v2573_v5 = vpop.f32.mrf.mxu3 }
0x1267   : > { %v2574_v6 = vadd.f32 %v2573_v5, %v2544_v1 }
0x1269   : > { %v2607_v13 = vadd.f32 %v2603_v36, %v2574_v6  ;;  %v3724_v36 = vld [vmem:[%s4651_s25] ss:$0 sm:$0xff] }
0x126b   : > { %v2645_v15 = vadd.f32 %v2641_v16, %v2607_v13 }
0x126e   : > { %v2677_v10 = vpop.f32.mrf.mxu2 }
0x126f   : > { %v2682_v11 = vadd.f32 %v2677_v10, %v2644_v7 }
0x1271   : > { %v2687_v14 = vadd.f32 %v3723_v12, %v2682_v11 }
0x1273   : > { %3784 = vtanh.f32 %v2687_v14 }
0x1276   : > { %v2679_v18 = vpop.f32.mrf.mxu2 }
0x1277   : > { %v2683_v17 = vadd.f32 %v2679_v18, %v2645_v15 }
0x1279   : > { %v2688_v19 = vadd.f32 %v3723_v12, %v2683_v17  ;;  %v3785_v20 = vpop.eup %3784 }
0x127a   : > { %v2719_v22 = vrot.slane %v3785_v20, 7  ;;  %v2712_v48 = vrot.slane %v3785_v20, 6  ;;  %v2816_v28 = vrot.slane %v3785_v20, 1  ;;  %v2854_v43 = vrot.slane %v3785_v20, 2 }
0x127b   : > { %3786 = vtanh.f32 %v2688_v19 }
0x1281   : > { %v3787_v21 = vpop.eup %3786 }
0x1282   : > { %v2784_v51 = vpack.c.bf16 %v3787_v21, %v3785_v20  ;;  %v2720_v23 = vrot.slane %v3787_v21, 7  ;;  %v2713_v24 = vrot.slane %v3787_v21, 6  ;;  %v2817_v26 = vrot.slane %v3787_v21, 1 }
0x1283   : > { %v2855_v42 = vrot.slane %v3787_v21, 2 }
0x1284   : > { %3524 = vmatmul.msk.bf16.vlgmr.msrb.gmra.mxu1 %vm942_vm1, %v2784_v51  ;;  %v2721_v30 = vsel %vm1260_vm11, %v2719_v22, %v2720_v23  ;;  %v2722_v31 = vsel %vm1260_vm11, %v2720_v23, %v2719_v22  ;;  %v2714_v32 = vsel %vm2106_vm10, %v2712_v48, %v2713_v24  ;;  %v2715_v33 = vsel %vm2106_vm10, %v2713_v24, %v2712_v48 }
0x1285   : > { %v2723_v34 = vsel %vm1263_vm12, %v2722_v31, 0.0  ;;  %v2716_v35 = vsel %vm2109_vm0, %v2715_v33, 0.0  ;;  %v2818_v29 = vsel %vm1333_vm13, %v2816_v28, %v2817_v26  ;;  %v2819_v37 = vsel %vm1333_vm13, %v2817_v26, %v2816_v28 }
0x1286   : > { %v2725_v38 = vpack.c.bf16 %v2721_v30, %v2723_v34  ;;  %v2718_v39 = vpack.c.bf16 %v2714_v32, %v2716_v35  ;;  %v2821_v40 = vsel %vm1337_vm14, %v2819_v37, 0.0  ;;  %v2857_v44 = vsel %vm2231_vm4, %v2855_v42, %v2854_v43 }
0x1287   : > { %v2822_v41 = vpack.c.bf16 %v2821_v40, %v2818_v29  ;;  %v2856_v45 = vsel %vm2231_vm4, %v2854_v43, %v2855_v42  ;;  %v2859_v47 = vsel %vm2235_vm5, %v2857_v44, 0.0 }
0x1288   : > { %3506 = vmatmul.msk.bf16.vlgmr.msrb.gmra.mxu3 %vm942_vm1, %v2725_v38  ;;  %3515 = vmatmul.msk.bf16.vlgmr.msrb.gmra.mxu0 %vm942_vm1, %v2718_v39  ;;  %v2860_v49 = vpack.c.bf16 %v2859_v47, %v2856_v45 }
0x1289   : > { %3533 = vmatmul.msk.bf16.vlgmr.msrb.gmra.mxu2 %vm942_vm1, %v2822_v41  ;;  %3052 = vmatpush.bf16.msrb.mxu3 %v3665_v55 }
0x128a   : > { %3090 = vmatpush.bf16.msrb.mxu0 %v3667_v9 }
0x128d   : > { %3053 = vmatpush.bf16.msrb.mxu3 %v3664_v61 }
0x128e   : > { %3091 = vmatpush.bf16.msrb.mxu0 %v3666_v3 }
0x1298   : > { %3542 = vmatmul.msk.bf16.vlgmr.msra.gmra.mxu3 %vm942_vm1, %v2860_v49 }
0x1301   : > { %v2809_v8 = vpop.f32.mrf.mxu1 }
0x1305   : > { %v2779_v58 = vpop.f32.mrf.mxu0 }
0x1309   : > { %v2811_v7 = vpop.f32.mrf.mxu1 }
0x130b   : > { %v2750_v57 = vpop.f32.mrf.mxu3 }
0x130c   : > { %v2780_v62 = vadd.f32 %v2779_v58, %v2750_v57  ;;  %v2847_v2 = vpop.f32.mrf.mxu2 }
0x130d   : > { %v2781_v4 = vpop.f32.mrf.mxu0 }
0x130e   : > { %v2814_v1 = vadd.f32 %v2809_v8, %v2780_v62 }
0x1310   : > { %v2852_v0 = vadd.f32 %v2847_v2, %v2814_v1 }
0x1313   : > { %v2752_v63 = vpop.f32.mrf.mxu3 }
0x1314   : > { %v2782_v5 = vadd.f32 %v2781_v4, %v2752_v63  ;;  %v2849_v12 = vpop.f32.mrf.mxu2 }
0x1316   : > { %v2815_v11 = vadd.f32 %v2811_v7, %v2782_v5 }
0x1318   : > { %v2853_v16 = vadd.f32 %v2849_v12, %v2815_v11 }
0x131b   : > { %v2885_v6 = vpop.f32.mrf.mxu3 }
0x131c   : > { %v2890_v10 = vadd.f32 %v2885_v6, %v2852_v0 }
0x131e   : > { %v2895_v13 = vadd.f32 %v3724_v36, %v2890_v10 }
0x1320   : > { %3788 = vtanh.f32 %v2895_v13 }
0x1323   : > { %v2887_v14 = vpop.f32.mrf.mxu3 }
0x1324   : > { %v2891_v15 = vadd.f32 %v2887_v14, %v2853_v16 }
0x1326   : > { %v2896_v18 = vadd.f32 %v3724_v36, %v2891_v15  ;;  %v3789_v17 = vpop.eup %3788 }
0x1327   : > { %v2927_v20 = vrot.slane %v3789_v17, 7  ;;  %v2920_v21 = vrot.slane %v3789_v17, 6  ;;  %v3024_v24 = vrot.slane %v3789_v17, 1  ;;  %v3062_v41 = vrot.slane %v3789_v17, 2 }
0x1328   : > { %3790 = vtanh.f32 %v2896_v18 }
0x132e   : > { %v3791_v19 = vpop.eup %3790 }
0x132f   : > { %v2992_v22 = vpack.c.bf16 %v3791_v19, %v3789_v17  ;;  %v2928_v48 = vrot.slane %v3791_v19, 7  ;;  %v2921_v51 = vrot.slane %v3791_v19, 6  ;;  %v3025_v23 = vrot.slane %v3791_v19, 1 }
0x1330   : > { %v3063_v40 = vrot.slane %v3791_v19, 2 }
0x1331   : > { %3569 = vmatmul.msk.bf16.vlgmr.msra.gmra.mxu2 %vm942_vm1, %v2992_v22  ;;  %v2929_v26 = vsel %vm1260_vm11, %v2927_v20, %v2928_v48  ;;  %v2930_v28 = vsel %vm1260_vm11, %v2928_v48, %v2927_v20  ;;  %v2922_v30 = vsel %vm2106_vm10, %v2920_v21, %v2921_v51  ;;  %v2923_v31 = vsel %vm2106_vm10, %v2921_v51, %v2920_v21 }
0x1332   : > { %v2931_v32 = vsel %vm1263_vm12, %v2930_v28, 0.0  ;;  %v2924_v33 = vsel %vm2109_vm0, %v2923_v31, 0.0  ;;  %v3026_v34 = vsel %vm1333_vm13, %v3024_v24, %v3025_v23  ;;  %v3027_v35 = vsel %vm1333_vm13, %v3025_v23, %v3024_v24 }
0x1333   : > { %v2933_v29 = vpack.c.bf16 %v2929_v26, %v2931_v32  ;;  %v2926_v37 = vpack.c.bf16 %v2922_v30, %v2924_v33  ;;  %v3029_v38 = vsel %vm1337_vm14, %v3027_v35, 0.0  ;;  %v3065_v42 = vsel %vm2231_vm4, %v3063_v40, %v3062_v41 }
0x1334   : > { %v3030_v39 = vpack.c.bf16 %v3029_v38, %v3026_v34  ;;  %v3064_v43 = vsel %vm2231_vm4, %v3062_v41, %v3063_v40  ;;  %v3067_v44 = vsel %vm2235_vm5, %v3065_v42, 0.0 }
0x1335   : > { %3551 = vmatmul.msk.bf16.vlgmr.msra.gmra.mxu0 %vm942_vm1, %v2933_v29  ;;  %3560 = vmatmul.msk.bf16.vlgmr.msra.gmra.mxu1 %vm942_vm1, %v2926_v37  ;;  %v3068_v45 = vpack.c.bf16 %v3067_v44, %v3064_v43 }
0x1336   : > { %3578 = vmatmul.msk.bf16.vlgmr.msrb.gmra.mxu3 %vm942_vm1, %v3030_v39 }
0x1345   : > { %3587 = vmatmul.msk.bf16.vlgmr.msrb.gmra.mxu0 %vm942_vm1, %v3068_v45 }
0x13b2   : > { %v2958_v47 = vpop.f32.mrf.mxu0  ;;  %v2987_v49 = vpop.f32.mrf.mxu1 }
0x13b3   : > { %v2988_v54 = vadd.f32 %v2987_v49, %v2958_v47 }
0x13b4   : > { %v3017_v50 = vpop.f32.mrf.mxu2 }
0x13b5   : > { %v3022_v56 = vadd.f32 %v3017_v50, %v2988_v54 }
0x13b9   : > { %v3055_v55 = vpop.f32.mrf.mxu3 }
0x13ba   : > { %v2960_v53 = vpop.f32.mrf.mxu0  ;;  %v2989_v57 = vpop.f32.mrf.mxu1  ;;  %v3060_v58 = vadd.f32 %v3055_v55, %v3022_v56 }
0x13bb   : > { %v2990_v52 = vadd.f32 %v2989_v57, %v2960_v53 }
0x13bc   : > { %v3019_v61 = vpop.f32.mrf.mxu2 }
0x13bd   : > { %v3023_v63 = vadd.f32 %v3019_v61, %v2990_v52 }
0x13c1   : > { %v3057_v62 = vpop.f32.mrf.mxu3 }
0x13c2   : > { %v3093_v59 = vpop.f32.mrf.mxu0  ;;  %v3061_v1 = vadd.f32 %v3057_v62, %v3023_v63 }
0x13c3   : > { %v3098_v60 = vadd.f32 %v3093_v59, %v3060_v58 }
0x13c5   : > { %v3103_v8 = vadd.f32 %v3725_v46, %v3098_v60 }
0x13c7   : > { %v3105_v9 = vadd.f32 %v3103_v8, %v4311_v25 }
0x13c9   : > { %3109 = vrot.lane.b32.xlu0 %v3105_v9, %s4715_s30 }
0x13ca   : > { %v3095_v2 = vpop.f32.mrf.mxu0 }
0x13cb   : > { %v3099_v3 = vadd.f32 %v3095_v2, %v3061_v1 }
0x13cd   : > { %v3104_v4 = vadd.f32 %v3725_v46, %v3099_v3 }
0x13cf   : > { %v3106_v5 = vadd.f32 %v3104_v4, %v4313_v27 }
0x13d1   : > { %3111 = vrot.lane.b32.xlu1 %v3106_v5, %s4715_s30 }
0x143b   : > { %v3110_v0 = vpop.permute.xlu0 %3109 }
0x143c   : > { %v3115_v6 = vsel %vm979_vm2, %v4311_v25, %v3110_v0 }
0x143d   : > { %3117 = vst.msk [vmem:[%s879_s1] sm:$0xff] %vm942_vm1, %v3115_v6 }
0x1443   : > { %v3112_v7 = vpop.permute.xlu1 %3111 }
0x1444   : > { %v3116_v10 = vsel %vm979_vm2, %v4313_v27, %v3112_v7 }
0x1445   : > { %3118 = vst.msk [vmem:[%s879_s1 + $0x8] sm:$0xff] %vm942_vm1, %v3116_v10 }
0x1446 PF: > { %s4718_s0 = sld [smem:[#allocation2_spill]] }
0x144c   : > { %s38_s8 = sadd.s32 1, %s4718_s0  }
0x144d   : > { %p35_p4 = scmp.ge.s32.totalorder %s38_s8, 4  }
0x144f   :  { %37 = sbr.rel (!%p35_p4) target bundleno = 15 (0xf), region = 180 }

</bundles_post_ra>
